<compile_context>
chip_gen: v7x
topology: tpu7x:2x2x1
jax: 0.10.0
libtpu: 0.0.40
codegen_flags: <defaults>
</compile_context>

<pallas_src>
import jax
import jax.numpy as jnp
from jax.experimental import pallas as pl
from jax.experimental.pallas import tpu as pltpu


LANE = 128  # TPU lane width; channels are padded to a multiple of this.


def _round_up(x, m):
    return ((x + m - 1) // m) * m


# ---------------------------------------------------------------------------
# In-kernel helper: 3x3 SAME conv (as one im2col matmul) + bias + ReLU.
# ---------------------------------------------------------------------------
def _conv3x3_bias_relu(pad_ref, x, w_flat, bias, H, W):
    """pad_ref: VMEM scratch (NB, H+2, W+2, C) used for the zero halo.
    x:       (NB, H, W, C) activations (C is the lane-dense padded channel dim).
    w_flat:  (9*C, Co) weights in (dy, dx, cin) row order, BN scale pre-folded.
    bias:    (1, Co) folded conv-bias + BN shift.
    Returns (NB*H*W, Co) float32."""
    NB, _, _, C = x.shape

    # Zero only the 1-pixel halo ring (NOT the whole buffer), then the interior.
    pad_ref[:, 0:1, :, :] = jnp.zeros((NB, 1, W + 2, C), jnp.float32)
    pad_ref[:, H + 1:H + 2, :, :] = jnp.zeros((NB, 1, W + 2, C), jnp.float32)
    pad_ref[:, :, 0:1, :] = jnp.zeros((NB, H + 2, 1, C), jnp.float32)
    pad_ref[:, :, W + 1:W + 2, :] = jnp.zeros((NB, H + 2, 1, C), jnp.float32)
    pad_ref[:, 1:H + 1, 1:W + 1, :] = x

    # im2col: 9 shifted slabs concatenated along the lane-dense channel axis,
    # then a single MXU matmul with K = 9*C.
    cols = []
    for dy in range(3):
        for dx in range(3):
            cols.append(
                pad_ref[:, dy:dy + H, dx:dx + W, :].reshape(NB * H * W, C))
    patches = jnp.concatenate(cols, axis=-1)                  # (NB*H*W, 9*C)
    acc = jnp.dot(patches, w_flat, preferred_element_type=jnp.float32)
    return jnp.maximum(acc + bias, 0.0)                       # bias+ReLU only


# ---------------------------------------------------------------------------
# Fused DoubleConv kernel: (conv3x3 -> BN -> ReLU) * 2 on a batch block.
# ---------------------------------------------------------------------------
def double_conv_kernel(x_ref, w1_ref, b1_ref, w2_ref, b2_ref, o_ref,
                       pad0_ref, pad1_ref):
    NB, H, W, _ = x_ref.shape
    Co = w2_ref.shape[1]
    h1 = _conv3x3_bias_relu(pad0_ref, x_ref[...], w1_ref[...], b1_ref[...], H, W)
    h2 = _conv3x3_bias_relu(pad1_ref, h1.reshape(NB, H, W, -1),
                            w2_ref[...], b2_ref[...], H, W)
    o_ref[...] = h2.reshape(NB, H, W, Co).astype(o_ref.dtype)


def double_conv_pallas(x_nhwc, kparams, *, batch_block=None):
    """x_nhwc: (N, H, W, Cin_real).  Returns (N, H, W, Cout_real) float32."""
    w1f, b1v, w2f, b2v, cout_real = kparams
    N, H, W, cin = x_nhwc.shape
    Cp = w1f.shape[0] // 9      # padded input channels
    Cm = w1f.shape[1]           # padded mid channels
    Co = w2f.shape[1]           # padded output channels
    assert cin <= Cp

    # Lane-dense activations: zero-pad channels up to the padded lane width.
    if cin < Cp:
        x_nhwc = jnp.pad(x_nhwc, ((0, 0), (0, 0), (0, 0), (0, Cp - cin)))

    NB = N if batch_block is None else batch_block
    assert N % NB == 0
    grid = (N // NB,)

    y = pl.pallas_call(
        double_conv_kernel,
        out_shape=jax.ShapeDtypeStruct((N, H, W, Co), jnp.float32),
        grid=grid,
        in_specs=[
            pl.BlockSpec((NB, H, W, Cp), lambda n: (n, 0, 0, 0)),
            pl.BlockSpec((9 * Cp, Cm), lambda n: (0, 0)),
            pl.BlockSpec((1, Cm), lambda n: (0, 0)),
            pl.BlockSpec((9 * Cm, Co), lambda n: (0, 0)),
            pl.BlockSpec((1, Co), lambda n: (0, 0)),
        ],
        out_specs=pl.BlockSpec((NB, H, W, Co), lambda n: (n, 0, 0, 0)),
        scratch_shapes=[
            pltpu.VMEM((NB, H + 2, W + 2, Cp), jnp.float32),   # conv1 halo
            pltpu.VMEM((NB, H + 2, W + 2, Cm), jnp.float32),   # conv2 halo
        ],
        compiler_params=pltpu.CompilerParams(
            dimension_semantics=("parallel",),        # batch blocks independent
            vmem_limit_bytes=32 * 1024 * 1024),
    )(x_nhwc, w1f, b1v, w2f, b2v)

    return y[..., :cout_real]                          # drop channel padding


# ---------------------------------------------------------------------------
# Bilinear upsample (scale_factor=2, align_corners=True) as interpolation
# matrices — exact match of torch.nn.Upsample semantics.
# ---------------------------------------------------------------------------
def bilinear_upsample_matrix(n_in, n_out):
    if n_in == 1:
        return jnp.ones((n_out, 1), jnp.float32)
    src = jnp.arange(n_out, dtype=jnp.float32) * (n_in - 1) / (n_out - 1)
    j0 = jnp.clip(jnp.floor(src).astype(jnp.int32), 0, n_in - 2)
    frac = src - j0.astype(jnp.float32)
    r = jnp.arange(n_out)
    M = jnp.zeros((n_out, n_in), jnp.float32)
    M = M.at[r, j0].add(1.0 - frac)
    M = M.at[r, j0 + 1].add(frac)
    return M


def up_forward(x1_nchw, x2_nchw, kparams):
    """Up.forward(x1, x2) with bilinear=True.  Inputs/outputs are NCHW."""
    _, _, H1, W1 = x1_nchw.shape
    Mh = bilinear_upsample_matrix(H1, 2 * H1)
    Mw = bilinear_upsample_matrix(W1, 2 * W1)
    # Emit NHWC directly; concat on the last (channel) axis — no NCHW concat
    # followed by a full-tensor transpose.
    x1_up_nhwc = jnp.einsum('oh,nchw,pw->nopc', Mh, x1_nchw, Mw)
    x2_nhwc = jnp.transpose(x2_nchw, (0, 2, 3, 1))
    x_nhwc = jnp.concatenate([x2_nhwc, x1_up_nhwc], axis=-1)
    y_nhwc = double_conv_pallas(x_nhwc, kparams)
    return jnp.transpose(y_nhwc, (0, 3, 1, 2))          # back to NCHW API


# ---------------------------------------------------------------------------
# Parameter construction (Conv2d weight+bias, BN gamma/beta/running stats),
# plus folding into lane-padded kernel parameters.
# ---------------------------------------------------------------------------
def make_double_conv_params(key, in_ch, out_ch, eps=1e-5):
    """Raw (un-padded) params: (w1, s1, b1, w2, s2, b2) with w in HWIO and
    s/b the BN-folded per-channel scale / bias (conv bias included in b)."""
    ks = jax.random.split(key, 12)

    def conv_bn(kw, kb, kg, kbe, km, kv, cin, cout):
        w = 0.1 * jax.random.normal(kw, (3, 3, cin, cout), jnp.float32)  # HWIO
        cb = 0.1 * jax.random.normal(kb, (cout,), jnp.float32)
        gamma = 1.0 + 0.1 * jax.random.normal(kg, (cout,), jnp.float32)
        beta = 0.1 * jax.random.normal(kbe, (cout,), jnp.float32)
        mean = 0.1 * jax.random.normal(km, (cout,), jnp.float32)
        var = jax.random.uniform(kv, (cout,), jnp.float32, 0.5, 1.5)
        scale = gamma / jnp.sqrt(var + eps)
        bias = (cb - mean) * scale + beta
        return w, scale, bias

    w1, s1, b1 = conv_bn(*ks[0:6], in_ch, out_ch)
    w2, s2, b2 = conv_bn(*ks[6:12], out_ch, out_ch)
    return (w1, s1, b1, w2, s2, b2)


def fold_params_for_kernel(raw, lane=LANE):
    """Fold BN scale into the conv weights, zero-pad all channel axes to the
    lane width, and flatten weights to (9*Cin_pad, Cout_pad) im2col layout."""
    w1, s1, b1, w2, s2, b2 = raw
    cin, cmid = w1.shape[2], w1.shape[3]
    cout = w2.shape[3]
    Cp = _round_up(cin, lane)
    Cm = _round_up(cmid, lane)
    Co = _round_up(cout, lane)

    w1s = w1 * s1.reshape(1, 1, 1, cmid)            # fold BN scale into weights
    w2s = w2 * s2.reshape(1, 1, 1, cout)

    w1p = jnp.zeros((3, 3, Cp, Cm), jnp.float32).at[:, :, :cin, :cmid].set(w1s)
    w2p = jnp.zeros((3, 3, Cm, Co), jnp.float32).at[:, :, :cmid, :cout].set(w2s)
    b1p = jnp.zeros((1, Cm), jnp.float32).at[:, :cmid].set(b1.reshape(1, cmid))
    b2p = jnp.zeros((1, Co), jnp.float32).at[:, :cout].set(b2.reshape(1, cout))

    return (w1p.reshape(9 * Cp, Cm), b1p, w2p.reshape(9 * Cm, Co), b2p, cout)


# Pure-JAX reference of the DoubleConv part (for correctness checking).
def ref_double_conv(x_nhwc, w1, s1, b1, w2, s2, b2):
    dn = ('NHWC', 'HWIO', 'NHWC')
    y = jax.lax.conv_general_dilated(x_nhwc, w1, (1, 1), 'SAME',
                                     dimension_numbers=dn)
    y = jnp.maximum(y * s1.reshape(1, 1, 1, -1) + b1.reshape(1, 1, 1, -1), 0.0)
    y = jax.lax.conv_general_dilated(y, w2, (1, 1), 'SAME',
                                     dimension_numbers=dn)
    y = jnp.maximum(y * s2.reshape(1, 1, 1, -1) + b2.reshape(1, 1, 1, -1), 0.0)
    return y


if __name__ == "__main__":
    key = jax.random.PRNGKey(0)
    k1, k2, kp = jax.random.split(key, 3)

    # Up(in_channels=8, out_channels=4, bilinear=True)
    in_channels, out_channels = 8, 4
    N, H, W = 2, 16, 16
    # x1: low-res feature map (gets upsampled 2x), x2: skip connection.
    x1 = jax.random.normal(k1, (N, in_channels // 2, H // 2, W // 2), jnp.float32)
    x2 = jax.random.normal(k2, (N, in_channels // 2, H, W), jnp.float32)

    raw_params = make_double_conv_params(kp, in_channels, out_channels)
    kparams = fold_params_for_kernel(raw_params)

    y = up_forward(x1, x2, kparams)
    jax.block_until_ready(y)
    assert y.shape == (N, out_channels, H, W), y.shape

    # Verify the Pallas DoubleConv against a pure-JAX reference on the same
    # upsampled + concatenated input.
    Mh = bilinear_upsample_matrix(H // 2, H)
    Mw = bilinear_upsample_matrix(W // 2, W)
    x1_up = jnp.einsum('oh,nchw,pw->ncop', Mh, x1, Mw)
    x_cat = jnp.concatenate([x2, x1_up], axis=1)
    x_nhwc = jnp.transpose(x_cat, (0, 2, 3, 1))
    y_ref = jnp.transpose(ref_double_conv(x_nhwc, *raw_params), (0, 3, 1, 2))

    err = float(jnp.max(jnp.abs(y - y_ref)))
    assert jnp.allclose(y, y_ref, atol=1e-4, rtol=1e-4), err

    print("KERNEL_OK")
</pallas_src>

<mosaic_0001>
module attributes {stable_mosaic.version = 11 : i64} {
  func.func @double_conv_kernel(%arg0: i32, %arg1: memref<2x16x16x128xf32, #tpu.memory_space<vmem>>, %arg2: memref<1152x128xf32, #tpu.memory_space<vmem>>, %arg3: memref<1x128xf32, #tpu.memory_space<vmem>>, %arg4: memref<1152x128xf32, #tpu.memory_space<vmem>>, %arg5: memref<1x128xf32, #tpu.memory_space<vmem>>, %arg6: memref<2x16x16x128xf32, #tpu.memory_space<vmem>>, %arg7: memref<2x18x18x128xf32, #tpu.memory_space<vmem>>, %arg8: memref<2x18x18x128xf32, #tpu.memory_space<vmem>>) attributes {dimension_semantics = [#tpu.dimension_semantics<parallel>], iteration_bounds = array<i64: 1>, scalar_prefetch = 0 : i64, scratch_operands = 2 : i64, tpu.core_type = #tpu.core_type<tc>, window_params = [{transform_indices = @transform_0, window_bounds = array<i64: 2, 16, 16, 128>}, {pipeline_mode = #tpu.pipeline_mode<synchronous>, transform_indices = @transform_1, window_bounds = array<i64: 1152, 128>}, {pipeline_mode = #tpu.pipeline_mode<synchronous>, transform_indices = @transform_2, window_bounds = array<i64: 1, 128>}, {pipeline_mode = #tpu.pipeline_mode<synchronous>, transform_indices = @transform_3, window_bounds = array<i64: 1152, 128>}, {pipeline_mode = #tpu.pipeline_mode<synchronous>, transform_indices = @transform_4, window_bounds = array<i64: 1, 128>}, {transform_indices = @transform_5, window_bounds = array<i64: 2, 16, 16, 128>}]} {
    %c0 = arith.constant 0 : index
    %c0_0 = arith.constant 0 : index
    %c0_1 = arith.constant 0 : index
    %c0_2 = arith.constant 0 : index
    %0 = vector.load %arg1[%c0, %c0_0, %c0_1, %c0_2] : memref<2x16x16x128xf32, #tpu.memory_space<vmem>>, vector<2x16x16x128xf32>
    %c0_3 = arith.constant 0 : index
    %c0_4 = arith.constant 0 : index
    %1 = vector.load %arg2[%c0_3, %c0_4] : memref<1152x128xf32, #tpu.memory_space<vmem>>, vector<1152x128xf32>
    %c0_5 = arith.constant 0 : index
    %c0_6 = arith.constant 0 : index
    %2 = vector.load %arg3[%c0_5, %c0_6] : memref<1x128xf32, #tpu.memory_space<vmem>>, vector<1x128xf32>
    %cst = arith.constant 0.000000e+00 : f32
    %3 = vector.broadcast %cst : f32 to vector<2x1x18x128xf32>
    %c0_7 = arith.constant 0 : index
    %c0_8 = arith.constant 0 : index
    %c0_9 = arith.constant 0 : index
    %c0_10 = arith.constant 0 : index
    %4 = vector.load %arg7[%c0_7, %c0_8, %c0_9, %c0_10] : memref<2x18x18x128xf32, #tpu.memory_space<vmem>>, vector<2x1x18x128xf32>
    tpu.vector_store %arg7[%c0_7, %c0_8, %c0_9, %c0_10], %3 {strides = array<i32>} : memref<2x18x18x128xf32, #tpu.memory_space<vmem>>, vector<2x1x18x128xf32>,
    %cst_11 = arith.constant 0.000000e+00 : f32
    %5 = vector.broadcast %cst_11 : f32 to vector<2x1x18x128xf32>
    %c0_12 = arith.constant 0 : index
    %c17 = arith.constant 17 : index
    %c0_13 = arith.constant 0 : index
    %c0_14 = arith.constant 0 : index
    %6 = vector.load %arg7[%c0_12, %c17, %c0_13, %c0_14] : memref<2x18x18x128xf32, #tpu.memory_space<vmem>>, vector<2x1x18x128xf32>
    tpu.vector_store %arg7[%c0_12, %c17, %c0_13, %c0_14], %5 {strides = array<i32>} : memref<2x18x18x128xf32, #tpu.memory_space<vmem>>, vector<2x1x18x128xf32>,
    %cst_15 = arith.constant 0.000000e+00 : f32
    %7 = vector.broadcast %cst_15 : f32 to vector<2x18x1x128xf32>
    %c0_16 = arith.constant 0 : index
    %c0_17 = arith.constant 0 : index
    %c0_18 = arith.constant 0 : index
    %c0_19 = arith.constant 0 : index
    %8 = vector.load %arg7[%c0_16, %c0_17, %c0_18, %c0_19] : memref<2x18x18x128xf32, #tpu.memory_space<vmem>>, vector<2x18x1x128xf32>
    tpu.vector_store %arg7[%c0_16, %c0_17, %c0_18, %c0_19], %7 {strides = array<i32>} : memref<2x18x18x128xf32, #tpu.memory_space<vmem>>, vector<2x18x1x128xf32>,
    %cst_20 = arith.constant 0.000000e+00 : f32
    %9 = vector.broadcast %cst_20 : f32 to vector<2x18x1x128xf32>
    %c0_21 = arith.constant 0 : index
    %c0_22 = arith.constant 0 : index
    %c17_23 = arith.constant 17 : index
    %c0_24 = arith.constant 0 : index
    %10 = vector.load %arg7[%c0_21, %c0_22, %c17_23, %c0_24] : memref<2x18x18x128xf32, #tpu.memory_space<vmem>>, vector<2x18x1x128xf32>
    tpu.vector_store %arg7[%c0_21, %c0_22, %c17_23, %c0_24], %9 {strides = array<i32>} : memref<2x18x18x128xf32, #tpu.memory_space<vmem>>, vector<2x18x1x128xf32>,
    %c0_25 = arith.constant 0 : index
    %c1 = arith.constant 1 : index
    %c1_26 = arith.constant 1 : index
    %c0_27 = arith.constant 0 : index
    %11 = vector.load %arg7[%c0_25, %c1, %c1_26, %c0_27] : memref<2x18x18x128xf32, #tpu.memory_space<vmem>>, vector<2x16x16x128xf32>
    tpu.vector_store %arg7[%c0_25, %c1, %c1_26, %c0_27], %0 {strides = array<i32>} : memref<2x18x18x128xf32, #tpu.memory_space<vmem>>, vector<2x16x16x128xf32>,
    %c0_28 = arith.constant 0 : index
    %c0_29 = arith.constant 0 : index
    %c0_30 = arith.constant 0 : index
    %c0_31 = arith.constant 0 : index
    %12 = vector.load %arg7[%c0_28, %c0_29, %c0_30, %c0_31] : memref<2x18x18x128xf32, #tpu.memory_space<vmem>>, vector<2x16x16x128xf32>
    %13 = vector.shape_cast %12 : vector<2x16x16x128xf32> to vector<512x128xf32>
    %c0_32 = arith.constant 0 : index
    %c0_33 = arith.constant 0 : index
    %c1_34 = arith.constant 1 : index
    %c0_35 = arith.constant 0 : index
    %14 = vector.load %arg7[%c0_32, %c0_33, %c1_34, %c0_35] : memref<2x18x18x128xf32, #tpu.memory_space<vmem>>, vector<2x16x16x128xf32>
    %15 = vector.shape_cast %14 : vector<2x16x16x128xf32> to vector<512x128xf32>
    %c0_36 = arith.constant 0 : index
    %c0_37 = arith.constant 0 : index
    %c2 = arith.constant 2 : index
    %c0_38 = arith.constant 0 : index
    %16 = vector.load %arg7[%c0_36, %c0_37, %c2, %c0_38] : memref<2x18x18x128xf32, #tpu.memory_space<vmem>>, vector<2x16x16x128xf32>
    %17 = vector.shape_cast %16 : vector<2x16x16x128xf32> to vector<512x128xf32>
    %c0_39 = arith.constant 0 : index
    %c1_40 = arith.constant 1 : index
    %c0_41 = arith.constant 0 : index
    %c0_42 = arith.constant 0 : index
    %18 = vector.load %arg7[%c0_39, %c1_40, %c0_41, %c0_42] : memref<2x18x18x128xf32, #tpu.memory_space<vmem>>, vector<2x16x16x128xf32>
    %19 = vector.shape_cast %18 : vector<2x16x16x128xf32> to vector<512x128xf32>
    %c0_43 = arith.constant 0 : index
    %c1_44 = arith.constant 1 : index
    %c1_45 = arith.constant 1 : index
    %c0_46 = arith.constant 0 : index
    %20 = vector.load %arg7[%c0_43, %c1_44, %c1_45, %c0_46] : memref<2x18x18x128xf32, #tpu.memory_space<vmem>>, vector<2x16x16x128xf32>
    %21 = vector.shape_cast %20 : vector<2x16x16x128xf32> to vector<512x128xf32>
    %c0_47 = arith.constant 0 : index
    %c1_48 = arith.constant 1 : index
    %c2_49 = arith.constant 2 : index
    %c0_50 = arith.constant 0 : index
    %22 = vector.load %arg7[%c0_47, %c1_48, %c2_49, %c0_50] : memref<2x18x18x128xf32, #tpu.memory_space<vmem>>, vector<2x16x16x128xf32>
    %23 = vector.shape_cast %22 : vector<2x16x16x128xf32> to vector<512x128xf32>
    %c0_51 = arith.constant 0 : index
    %c2_52 = arith.constant 2 : index
    %c0_53 = arith.constant 0 : index
    %c0_54 = arith.constant 0 : index
    %24 = vector.load %arg7[%c0_51, %c2_52, %c0_53, %c0_54] : memref<2x18x18x128xf32, #tpu.memory_space<vmem>>, vector<2x16x16x128xf32>
    %25 = vector.shape_cast %24 : vector<2x16x16x128xf32> to vector<512x128xf32>
    %c0_55 = arith.constant 0 : index
    %c2_56 = arith.constant 2 : index
    %c1_57 = arith.constant 1 : index
    %c0_58 = arith.constant 0 : index
    %26 = vector.load %arg7[%c0_55, %c2_56, %c1_57, %c0_58] : memref<2x18x18x128xf32, #tpu.memory_space<vmem>>, vector<2x16x16x128xf32>
    %27 = vector.shape_cast %26 : vector<2x16x16x128xf32> to vector<512x128xf32>
    %c0_59 = arith.constant 0 : index
    %c2_60 = arith.constant 2 : index
    %c2_61 = arith.constant 2 : index
    %c0_62 = arith.constant 0 : index
    %28 = vector.load %arg7[%c0_59, %c2_60, %c2_61, %c0_62] : memref<2x18x18x128xf32, #tpu.memory_space<vmem>>, vector<2x16x16x128xf32>
    %29 = vector.shape_cast %28 : vector<2x16x16x128xf32> to vector<512x128xf32>
    %30 = tpu.concatenate %13, %15, %17, %19, %21, %23, %25, %27, %29 in 1 : vector<512x128xf32>, vector<512x128xf32>, vector<512x128xf32>, vector<512x128xf32>, vector<512x128xf32>, vector<512x128xf32>, vector<512x128xf32>, vector<512x128xf32>, vector<512x128xf32> -> vector<512x1152xf32>
    %cst_63 = arith.constant dense<0.000000e+00> : vector<512x128xf32>
    %31 = tpu.matmul %30, %1, %cst_63 {dimension_numbers = #tpu.dot_dimension_numbers<[1], [0], [0], [1], [0, 0, 1, 1], [], []>} : vector<512x1152xf32>, vector<1152x128xf32>, vector<512x128xf32> -> vector<512x128xf32>
    %32 = vector.broadcast %2 : vector<1x128xf32> to vector<512x128xf32>
    %33 = arith.addf %31, %32 : vector<512x128xf32>
    %cst_64 = arith.constant 0.000000e+00 : f32
    %34 = vector.broadcast %cst_64 : f32 to vector<512x128xf32>
    %35 = arith.maximumf %33, %34 : vector<512x128xf32>
    %36 = vector.shape_cast %35 : vector<512x128xf32> to vector<2x16x16x128xf32>
    %c0_65 = arith.constant 0 : index
    %c0_66 = arith.constant 0 : index
    %37 = vector.load %arg4[%c0_65, %c0_66] : memref<1152x128xf32, #tpu.memory_space<vmem>>, vector<1152x128xf32>
    %c0_67 = arith.constant 0 : index
    %c0_68 = arith.constant 0 : index
    %38 = vector.load %arg5[%c0_67, %c0_68] : memref<1x128xf32, #tpu.memory_space<vmem>>, vector<1x128xf32>
    %cst_69 = arith.constant 0.000000e+00 : f32
    %39 = vector.broadcast %cst_69 : f32 to vector<2x1x18x128xf32>
    %c0_70 = arith.constant 0 : index
    %c0_71 = arith.constant 0 : index
    %c0_72 = arith.constant 0 : index
    %c0_73 = arith.constant 0 : index
    %40 = vector.load %arg8[%c0_70, %c0_71, %c0_72, %c0_73] : memref<2x18x18x128xf32, #tpu.memory_space<vmem>>, vector<2x1x18x128xf32>
    tpu.vector_store %arg8[%c0_70, %c0_71, %c0_72, %c0_73], %39 {strides = array<i32>} : memref<2x18x18x128xf32, #tpu.memory_space<vmem>>, vector<2x1x18x128xf32>,
    %cst_74 = arith.constant 0.000000e+00 : f32
    %41 = vector.broadcast %cst_74 : f32 to vector<2x1x18x128xf32>
    %c0_75 = arith.constant 0 : index
    %c17_76 = arith.constant 17 : index
    %c0_77 = arith.constant 0 : index
    %c0_78 = arith.constant 0 : index
    %42 = vector.load %arg8[%c0_75, %c17_76, %c0_77, %c0_78] : memref<2x18x18x128xf32, #tpu.memory_space<vmem>>, vector<2x1x18x128xf32>
    tpu.vector_store %arg8[%c0_75, %c17_76, %c0_77, %c0_78], %41 {strides = array<i32>} : memref<2x18x18x128xf32, #tpu.memory_space<vmem>>, vector<2x1x18x128xf32>,
    %cst_79 = arith.constant 0.000000e+00 : f32
    %43 = vector.broadcast %cst_79 : f32 to vector<2x18x1x128xf32>
    %c0_80 = arith.constant 0 : index
    %c0_81 = arith.constant 0 : index
    %c0_82 = arith.constant 0 : index
    %c0_83 = arith.constant 0 : index
    %44 = vector.load %arg8[%c0_80, %c0_81, %c0_82, %c0_83] : memref<2x18x18x128xf32, #tpu.memory_space<vmem>>, vector<2x18x1x128xf32>
    tpu.vector_store %arg8[%c0_80, %c0_81, %c0_82, %c0_83], %43 {strides = array<i32>} : memref<2x18x18x128xf32, #tpu.memory_space<vmem>>, vector<2x18x1x128xf32>,
    %cst_84 = arith.constant 0.000000e+00 : f32
    %45 = vector.broadcast %cst_84 : f32 to vector<2x18x1x128xf32>
    %c0_85 = arith.constant 0 : index
    %c0_86 = arith.constant 0 : index
    %c17_87 = arith.constant 17 : index
    %c0_88 = arith.constant 0 : index
    %46 = vector.load %arg8[%c0_85, %c0_86, %c17_87, %c0_88] : memref<2x18x18x128xf32, #tpu.memory_space<vmem>>, vector<2x18x1x128xf32>
    tpu.vector_store %arg8[%c0_85, %c0_86, %c17_87, %c0_88], %45 {strides = array<i32>} : memref<2x18x18x128xf32, #tpu.memory_space<vmem>>, vector<2x18x1x128xf32>,
    %c0_89 = arith.constant 0 : index
    %c1_90 = arith.constant 1 : index
    %c1_91 = arith.constant 1 : index
    %c0_92 = arith.constant 0 : index
    %47 = vector.load %arg8[%c0_89, %c1_90, %c1_91, %c0_92] : memref<2x18x18x128xf32, #tpu.memory_space<vmem>>, vector<2x16x16x128xf32>
    tpu.vector_store %arg8[%c0_89, %c1_90, %c1_91, %c0_92], %36 {strides = array<i32>} : memref<2x18x18x128xf32, #tpu.memory_space<vmem>>, vector<2x16x16x128xf32>,
    %c0_93 = arith.constant 0 : index
    %c0_94 = arith.constant 0 : index
    %c0_95 = arith.constant 0 : index
    %c0_96 = arith.constant 0 : index
    %48 = vector.load %arg8[%c0_93, %c0_94, %c0_95, %c0_96] : memref<2x18x18x128xf32, #tpu.memory_space<vmem>>, vector<2x16x16x128xf32>
    %49 = vector.shape_cast %48 : vector<2x16x16x128xf32> to vector<512x128xf32>
    %c0_97 = arith.constant 0 : index
    %c0_98 = arith.constant 0 : index
    %c1_99 = arith.constant 1 : index
    %c0_100 = arith.constant 0 : index
    %50 = vector.load %arg8[%c0_97, %c0_98, %c1_99, %c0_100] : memref<2x18x18x128xf32, #tpu.memory_space<vmem>>, vector<2x16x16x128xf32>
    %51 = vector.shape_cast %50 : vector<2x16x16x128xf32> to vector<512x128xf32>
    %c0_101 = arith.constant 0 : index
    %c0_102 = arith.constant 0 : index
    %c2_103 = arith.constant 2 : index
    %c0_104 = arith.constant 0 : index
    %52 = vector.load %arg8[%c0_101, %c0_102, %c2_103, %c0_104] : memref<2x18x18x128xf32, #tpu.memory_space<vmem>>, vector<2x16x16x128xf32>
    %53 = vector.shape_cast %52 : vector<2x16x16x128xf32> to vector<512x128xf32>
    %c0_105 = arith.constant 0 : index
    %c1_106 = arith.constant 1 : index
    %c0_107 = arith.constant 0 : index
    %c0_108 = arith.constant 0 : index
    %54 = vector.load %arg8[%c0_105, %c1_106, %c0_107, %c0_108] : memref<2x18x18x128xf32, #tpu.memory_space<vmem>>, vector<2x16x16x128xf32>
    %55 = vector.shape_cast %54 : vector<2x16x16x128xf32> to vector<512x128xf32>
    %c0_109 = arith.constant 0 : index
    %c1_110 = arith.constant 1 : index
    %c1_111 = arith.constant 1 : index
    %c0_112 = arith.constant 0 : index
    %56 = vector.load %arg8[%c0_109, %c1_110, %c1_111, %c0_112] : memref<2x18x18x128xf32, #tpu.memory_space<vmem>>, vector<2x16x16x128xf32>
    %57 = vector.shape_cast %56 : vector<2x16x16x128xf32> to vector<512x128xf32>
    %c0_113 = arith.constant 0 : index
    %c1_114 = arith.constant 1 : index
    %c2_115 = arith.constant 2 : index
    %c0_116 = arith.constant 0 : index
    %58 = vector.load %arg8[%c0_113, %c1_114, %c2_115, %c0_116] : memref<2x18x18x128xf32, #tpu.memory_space<vmem>>, vector<2x16x16x128xf32>
    %59 = vector.shape_cast %58 : vector<2x16x16x128xf32> to vector<512x128xf32>
    %c0_117 = arith.constant 0 : index
    %c2_118 = arith.constant 2 : index
    %c0_119 = arith.constant 0 : index
    %c0_120 = arith.constant 0 : index
    %60 = vector.load %arg8[%c0_117, %c2_118, %c0_119, %c0_120] : memref<2x18x18x128xf32, #tpu.memory_space<vmem>>, vector<2x16x16x128xf32>
    %61 = vector.shape_cast %60 : vector<2x16x16x128xf32> to vector<512x128xf32>
    %c0_121 = arith.constant 0 : index
    %c2_122 = arith.constant 2 : index
    %c1_123 = arith.constant 1 : index
    %c0_124 = arith.constant 0 : index
    %62 = vector.load %arg8[%c0_121, %c2_122, %c1_123, %c0_124] : memref<2x18x18x128xf32, #tpu.memory_space<vmem>>, vector<2x16x16x128xf32>
    %63 = vector.shape_cast %62 : vector<2x16x16x128xf32> to vector<512x128xf32>
    %c0_125 = arith.constant 0 : index
    %c2_126 = arith.constant 2 : index
    %c2_127 = arith.constant 2 : index
    %c0_128 = arith.constant 0 : index
    %64 = vector.load %arg8[%c0_125, %c2_126, %c2_127, %c0_128] : memref<2x18x18x128xf32, #tpu.memory_space<vmem>>, vector<2x16x16x128xf32>
    %65 = vector.shape_cast %64 : vector<2x16x16x128xf32> to vector<512x128xf32>
    %66 = tpu.concatenate %49, %51, %53, %55, %57, %59, %61, %63, %65 in 1 : vector<512x128xf32>, vector<512x128xf32>, vector<512x128xf32>, vector<512x128xf32>, vector<512x128xf32>, vector<512x128xf32>, vector<512x128xf32>, vector<512x128xf32>, vector<512x128xf32> -> vector<512x1152xf32>
    %cst_129 = arith.constant dense<0.000000e+00> : vector<512x128xf32>
    %67 = tpu.matmul %66, %37, %cst_129 {dimension_numbers = #tpu.dot_dimension_numbers<[1], [0], [0], [1], [0, 0, 1, 1], [], []>} : vector<512x1152xf32>, vector<1152x128xf32>, vector<512x128xf32> -> vector<512x128xf32>
    %68 = vector.broadcast %38 : vector<1x128xf32> to vector<512x128xf32>
    %69 = arith.addf %67, %68 : vector<512x128xf32>
    %cst_130 = arith.constant 0.000000e+00 : f32
    %70 = vector.broadcast %cst_130 : f32 to vector<512x128xf32>
    %71 = arith.maximumf %69, %70 : vector<512x128xf32>
    %72 = vector.shape_cast %71 : vector<512x128xf32> to vector<2x16x16x128xf32>
    %c0_131 = arith.constant 0 : index
    %c0_132 = arith.constant 0 : index
    %c0_133 = arith.constant 0 : index
    %c0_134 = arith.constant 0 : index
    %73 = vector.load %arg6[%c0_131, %c0_132, %c0_133, %c0_134] : memref<2x16x16x128xf32, #tpu.memory_space<vmem>>, vector<2x16x16x128xf32>
    tpu.vector_store %arg6[%c0_131, %c0_132, %c0_133, %c0_134], %72 {strides = array<i32>} : memref<2x16x16x128xf32, #tpu.memory_space<vmem>>, vector<2x16x16x128xf32>,
    return
  }
  func.func @transform_0(%arg0: i32) -> (i32, i32, i32, i32) {
    %c0_i32 = arith.constant 0 : i32
    %c0_i32_0 = arith.constant 0 : i32
    %c0_i32_1 = arith.constant 0 : i32
    %c0_i32_2 = arith.constant 0 : i32
    return %arg0, %c0_i32, %c0_i32_0, %c0_i32_1 : i32, i32, i32, i32
  }
  func.func @transform_1(%arg0: i32) -> (i32, i32) {
    %c0_i32 = arith.constant 0 : i32
    %c0_i32_0 = arith.constant 0 : i32
    %c0_i32_1 = arith.constant 0 : i32
    return %c0_i32, %c0_i32_0 : i32, i32
  }
  func.func @transform_2(%arg0: i32) -> (i32, i32) {
    %c0_i32 = arith.constant 0 : i32
    %c0_i32_0 = arith.constant 0 : i32
    %c0_i32_1 = arith.constant 0 : i32
    return %c0_i32, %c0_i32_0 : i32, i32
  }
  func.func @transform_3(%arg0: i32) -> (i32, i32) {
    %c0_i32 = arith.constant 0 : i32
    %c0_i32_0 = arith.constant 0 : i32
    %c0_i32_1 = arith.constant 0 : i32
    return %c0_i32, %c0_i32_0 : i32, i32
  }
  func.func @transform_4(%arg0: i32) -> (i32, i32) {
    %c0_i32 = arith.constant 0 : i32
    %c0_i32_0 = arith.constant 0 : i32
    %c0_i32_1 = arith.constant 0 : i32
    return %c0_i32, %c0_i32_0 : i32, i32
  }
  func.func @transform_5(%arg0: i32) -> (i32, i32, i32, i32) {
    %c0_i32 = arith.constant 0 : i32
    %c0_i32_0 = arith.constant 0 : i32
    %c0_i32_1 = arith.constant 0 : i32
    %c0_i32_2 = arith.constant 0 : i32
    return %arg0, %c0_i32, %c0_i32_0, %c0_i32_1 : i32, i32, i32, i32
  }
}

</mosaic_0001>

<bundles_post_ra>
// kernel: tpu_custom_call.1
= control target key start
LH: loop header
LB: loop body
LE: loop exit
PB: predicated region body
PF: predicated region fallthrough
CT: control target
= control target key end

     0   :  { %10 = vsyncpa [#allocation5], 0  ;;  %s10305_s0 = inlined_call_operand.hbm [shape: f32[2,16,16,128], index: 0, kind: input, shape index: {}]   ;;  %s10306_s1 = inlined_call_operand.hbm [shape: f32[1152,128], index: 1, kind: input, shape index: {}]   ;;  %s10307_s2 = inlined_call_operand.vmem [shape: f32[1,128], index: 2, kind: input, shape index: {}]   ;;  %s10308_s3 = inlined_call_operand.hbm [shape: f32[1152,128], index: 3, kind: input, shape index: {}]   ;;  %s10309_s4 = inlined_call_operand.vmem [shape: f32[1,128], index: 4, kind: input, shape index: {}]   ;;  %s10310_s5 = inlined_call_operand.hbm [shape: f32[2,16,16,128], index: 5, kind: output, shape index: {}]  }
   0x1   :  { %11 = vsyncpa [#allocation8], 0 }
   0x2   :  { %12 = vsyncpa [#allocation6], 0  ;;  %s7827_s18 = smov [#allocation7]   ;;  %s7828_s20 = smov [#allocation4]  }
   0x3   :  { %s30_s19 = sshll.u32 %s7827_s18, 4  ;;  %s18_s21 = sshll.u32 %s7828_s20, 4  ;;  %s31_s19 = int_to_ptr.vmem [resolvable:$true] %s30_s19  ;;  %s7865_s21 = int_to_ptr.vmem [resolvable:$true] %s18_s21 }
   0x4   :  { %s7733_s24 = scalar_lea.hbm %s10306_s1, 18432 }
   0x5   :  { %p7734_p0 = scmp.ne.s32.totalorder %s10306_s1, %s7733_s24  ;;  %p7737_p1 = scmp.lt.u32.totalorder %s7733_s24, %s10306_s1 }
   0x7   :  { %p7739_p2 = pnand %p7737_p1, %p7734_p0 }
   0x9   :  { %7742 = shalt.err (!%p7739_p2)
}
   0xa   :  { %s7743_s29 = scalar_lea.vmem %s31_s19, 18432  ;;  %p7748_p4 = scmp.lt.s32.totalorder %s31_s19, %s31_s19 }
   0xb   :  { %p7744_p3 = scmp.ne.s32.totalorder %s31_s19, %s7743_s29  ;;  %p7749_p5 = scmp.lt.s32.totalorder %s7743_s29, %s7743_s29 }
   0xd   :  { %p7750_p6 = por %p7749_p5, %p7748_p4 }
   0xf   :  { %p7751_p7 = pnand %p7750_p6, %p7744_p3 }
  0x11   :  { %7754 = shalt.err (!%p7751_p7)
}
  0x12   :  { %s7829_s30 = smov 128   ;;  %s7830_s6 = smov 8  }
  0x13   :  { %36 = dma.hbm_to_vmem [thread:$0]  %s10306_s1, 18432, %s31_s19, [#allocation8], %s7829_s30, %s7829_s30, %s7830_s6  }
  0x14   :  { %s7755_s11 = scalar_lea.hbm %s10305_s0, 8192 }
  0x15   :  { %p7756_p8 = scmp.ne.s32.totalorder %s10305_s0, %s7755_s11  ;;  %p7759_p9 = scmp.lt.u32.totalorder %s7755_s11, %s10305_s0 }
  0x17   :  { %p7761_p10 = pnand %p7759_p9, %p7756_p8 }
  0x19   :  { %7764 = shalt.err (!%p7761_p10)
}
  0x1a   :  { %s7765_s16 = scalar_lea.vmem %s7865_s21, 8192  ;;  %p7770_p12 = scmp.lt.s32.totalorder %s7865_s21, %s7865_s21 }
  0x1b   :  { %p7766_p11 = scmp.ne.s32.totalorder %s7865_s21, %s7765_s16  ;;  %p7771_p13 = scmp.lt.s32.totalorder %s7765_s16, %s7765_s16 }
  0x1d   :  { %p7772_p0 = por %p7771_p13, %p7770_p12 }
  0x1f   :  { %p7773_p1 = pnand %p7772_p0, %p7766_p11 }
  0x21   :  { %7776 = shalt.err (!%p7773_p1)
}
  0x22   :  { %24 = dma.hbm_to_vmem [thread:$0]  %s10305_s0, 8192, %s7865_s21, [#allocation5], %s7829_s30, %s7829_s30, %s7830_s6  }
  0x23   :  { %s7831_s18 = smov [#allocation9]   ;;  %s7777_s23 = scalar_lea.hbm %s10308_s3, 18432 }
  0x24   :  { %s44_s19 = sshll.u32 %s7831_s18, 4  ;;  %p7778_p2 = scmp.ne.s32.totalorder %s10308_s3, %s7777_s23  ;;  %s45_s19 = int_to_ptr.vmem [resolvable:$true] %s44_s19 }
  0x25   :  { %p7781_p3 = scmp.lt.u32.totalorder %s7777_s23, %s10308_s3 }
  0x27   :  { %p7783_p4 = pnand %p7781_p3, %p7778_p2 }
  0x29   :  { %7786 = shalt.err (!%p7783_p4)
}
  0x2a   :  { %s7787_s28 = scalar_lea.vmem %s45_s19, 18432  ;;  %p7792_p6 = scmp.lt.s32.totalorder %s45_s19, %s45_s19 }
  0x2b   :  { %p7788_p5 = scmp.ne.s32.totalorder %s45_s19, %s7787_s28  ;;  %p7793_p7 = scmp.lt.s32.totalorder %s7787_s28, %s7787_s28 }
  0x2d   :  { %p7794_p8 = por %p7793_p7, %p7792_p6 }
  0x2f   :  { %p7795_p9 = pnand %p7794_p8, %p7788_p5 }
  0x31   :  { %7798 = shalt.err (!%p7795_p9)
}
  0x32   :  { %50 = dma.hbm_to_vmem [thread:$0]  %s10308_s3, 18432, %s45_s19, [#allocation8], %s7829_s30, %s7829_s30, %s7830_s6  }
  0x33   :  { %7821 = dma.done.wait [#allocation5], 8192  }
  0x34   :  { %7822 = vsyncadd [#allocation5], 4294959104 }
  0x35   :  { %7823 = dma.done.wait [#allocation8], 36864  }
  0x36   :  { %7824 = vsyncadd [#allocation8], 4294930432  ;;  %v10311_v0 = vmov 0.0|0.0   ;;  %v7833_v1 = vmov 0.0   ;;  %v126_v2 = vld [vmem:[#allocation7] sm:$0xff]  ;;  %v127_v3 = vld [vmem:[#allocation7 + $0x8] sm:$0xff] }
  0x37   :  { %6360 = vmatprep.subr.bf16.mxu0 %v10311_v0  ;;  %271 = vst [vmem:[#allocation2] sm:$0xff] %v7833_v1  ;;  %272 = vst [vmem:[#allocation2 + $0x8] sm:$0xff] %v7833_v1  ;;  %v128_v4 = vld [vmem:[#allocation7 + $0x10] sm:$0xff]  ;;  %v6361_v5 = vpack.c.bf16 %v127_v3, %v126_v2  ;;  %v129_v6 = vld [vmem:[#allocation7 + $0x18] sm:$0xff] }
  0x38   :  { %273 = vst [vmem:[#allocation2 + $0x10] sm:$0x3] %v7833_v1  ;;  %274 = vst [vmem:[#allocation2 + $0x1b0] sm:$0xff] %v7833_v1  ;;  %v6364_v7 = vpack.c.bf16 %v129_v6, %v128_v4  ;;  %v130_v8 = vld [vmem:[#allocation7 + $0x20] sm:$0xff]  ;;  %v131_v9 = vld [vmem:[#allocation7 + $0x28] sm:$0xff] }
  0x39   :  { %275 = vst [vmem:[#allocation2 + $0x1b8] sm:$0xff] %v7833_v1  ;;  %276 = vst [vmem:[#allocation2 + $0x1c0] sm:$0x3] %v7833_v1  ;;  %6362 = vmatpush1.bf16.msra.mxu0 %v6361_v5  ;;  %v6367_v10 = vpack.c.bf16 %v131_v9, %v130_v8  ;;  %v132_v11 = vld [vmem:[#allocation7 + $0x30] sm:$0xff]  ;;  %v133_v12 = vld [vmem:[#allocation7 + $0x38] sm:$0xff] }
  0x3a   :  { %278 = vst [vmem:[#allocation2 + $0x198] sm:$0xff] %v7833_v1  ;;  %279 = vst [vmem:[#allocation2 + $0x1a0] sm:$0xff] %v7833_v1  ;;  %6363 = vmatprep.subr.bf16.mxu0 %v10311_v0  ;;  %v6370_v14 = vpack.c.bf16 %v133_v12, %v132_v11  ;;  %v134_v15 = vld [vmem:[#allocation7 + $0x40] sm:$0xff]  ;;  %v135_v16 = vld [vmem:[#allocation7 + $0x48] sm:$0xff] }
  0x3b   :  { %280 = vst [vmem:[#allocation2 + $0x1a8] sm:$0x3] %v7833_v1  ;;  %281 = vst [vmem:[#allocation2 + $0x348] sm:$0xff] %v7833_v1  ;;  %v8089_v17 = vld [vmem:[#allocation4] sm:$0xff]  ;;  %v8091_v18 = vld [vmem:[#allocation4 + $0x8] sm:$0xff]  ;;  %v6373_v23 = vpack.c.bf16 %v135_v16, %v134_v15 }
  0x3c   :  { %282 = vst [vmem:[#allocation2 + $0x350] sm:$0xff] %v7833_v1  ;;  %283 = vst [vmem:[#allocation2 + $0x358] sm:$0x3] %v7833_v1  ;;  %v8095_v19 = vld [vmem:[#allocation4 + $0x10] sm:$0xff]  ;;  %v8098_v20 = vld [vmem:[#allocation4 + $0x18] sm:$0xff] }
  0x3d   :  { %285 = vst [vmem:[#allocation2 + $0x18] sm:$0x1] %v7833_v1  ;;  %286 = vst [vmem:[#allocation2 + $0x30] sm:$0x1] %v7833_v1  ;;  %6365 = vmatpush1.bf16.msra.mxu0 %v6364_v7  ;;  %v8100_v21 = vld [vmem:[#allocation4 + $0x20] sm:$0xff]  ;;  %v8102_v22 = vld [vmem:[#allocation4 + $0x28] sm:$0xff] }
  0x3e   :  { %287 = vst [vmem:[#allocation2 + $0x48] sm:$0x1] %v7833_v1  ;;  %288 = vst [vmem:[#allocation2 + $0x60] sm:$0x1] %v7833_v1  ;;  %6366 = vmatprep.subr.bf16.mxu0 %v10311_v0  ;;  %v485_v13 = vld [vmem:[#allocation2 + $0x1] sm:$0xff]  ;;  %v136_v24 = vld [vmem:[#allocation7 + $0x50] sm:$0xff] }
  0x3f   :  { %289 = vst [vmem:[#allocation2 + $0x78] sm:$0x1] %v7833_v1  ;;  %290 = vst [vmem:[#allocation2 + $0x90] sm:$0x1] %v7833_v1  ;;  %1068 = vmatprep.mubr.f32.mxu0 %v485_v13  ;;  %v137_v25 = vld [vmem:[#allocation7 + $0x58] sm:$0xff]  ;;  %v8107_v26 = vld [vmem:[#allocation4 + $0x30] sm:$0xff] }
  0x40   :  { %291 = vst [vmem:[#allocation2 + $0xa8] sm:$0x1] %v7833_v1  ;;  %292 = vst [vmem:[#allocation2 + $0xc0] sm:$0x1] %v7833_v1  ;;  %v8111_v27 = vld [vmem:[#allocation4 + $0x38] sm:$0xff]  ;;  %v8113_v28 = vld [vmem:[#allocation4 + $0x40] sm:$0xff]  ;;  %v6376_v34 = vpack.c.bf16 %v137_v25, %v136_v24 }
  0x41   :  { %293 = vst [vmem:[#allocation2 + $0xd8] sm:$0x1] %v7833_v1  ;;  %294 = vst [vmem:[#allocation2 + $0xf0] sm:$0x1] %v7833_v1  ;;  %6368 = vmatpush1.bf16.msra.mxu0 %v6367_v10  ;;  %v8115_v29 = vld [vmem:[#allocation4 + $0x48] sm:$0xff]  ;;  %v8120_v30 = vld [vmem:[#allocation4 + $0x50] sm:$0xff] }
  0x42   :  { %295 = vst [vmem:[#allocation2 + $0x108] sm:$0x1] %v7833_v1  ;;  %296 = vst [vmem:[#allocation2 + $0x120] sm:$0x1] %v7833_v1  ;;  %6369 = vmatprep.subr.bf16.mxu0 %v10311_v0  ;;  %v8123_v31 = vld [vmem:[#allocation4 + $0x58] sm:$0xff]  ;;  %v8125_v32 = vld [vmem:[#allocation4 + $0x60] sm:$0xff] }
  0x43   :  { %297 = vst [vmem:[#allocation2 + $0x138] sm:$0x1] %v7833_v1  ;;  %298 = vst [vmem:[#allocation2 + $0x150] sm:$0x1] %v7833_v1  ;;  %v8127_v33 = vld [vmem:[#allocation4 + $0x68] sm:$0xff]  ;;  %v8132_v35 = vld [vmem:[#allocation4 + $0x70] sm:$0xff] }
  0x44   :  { %299 = vst [vmem:[#allocation2 + $0x168] sm:$0x1] %v7833_v1  ;;  %300 = vst [vmem:[#allocation2 + $0x180] sm:$0x1] %v7833_v1  ;;  %v138_v36 = vld [vmem:[#allocation7 + $0x60] sm:$0xff]  ;;  %v139_v37 = vld [vmem:[#allocation7 + $0x68] sm:$0xff] }
  0x45   :  { %303 = vst [vmem:[#allocation2 + $0x1c8] sm:$0x1] %v7833_v1  ;;  %304 = vst [vmem:[#allocation2 + $0x1e0] sm:$0x1] %v7833_v1  ;;  %6371 = vmatpush1.bf16.msra.mxu0 %v6370_v14  ;;  %v8136_v38 = vld [vmem:[#allocation4 + $0x78] sm:$0xff]  ;;  %v8139_v39 = vld [vmem:[#allocation4 + $0x80] sm:$0xff]  ;;  %v6379_v41 = vpack.c.bf16 %v139_v37, %v138_v36 }
  0x46   :  { %305 = vst [vmem:[#allocation2 + $0x1f8] sm:$0x1] %v7833_v1  ;;  %306 = vst [vmem:[#allocation2 + $0x210] sm:$0x1] %v7833_v1  ;;  %6372 = vmatprep.subr.bf16.mxu0 %v10311_v0  ;;  %v8141_v40 = vld [vmem:[#allocation4 + $0x88] sm:$0xff]  ;;  %v8145_v42 = vld [vmem:[#allocation4 + $0x90] sm:$0xff] }
  0x47   :  { %307 = vst [vmem:[#allocation2 + $0x228] sm:$0x1] %v7833_v1  ;;  %308 = vst [vmem:[#allocation2 + $0x240] sm:$0x1] %v7833_v1  ;;  %v140_v43 = vld [vmem:[#allocation7 + $0x70] sm:$0xff]  ;;  %v141_v44 = vld [vmem:[#allocation7 + $0x78] sm:$0xff] }
  0x48   :  { %309 = vst [vmem:[#allocation2 + $0x258] sm:$0x1] %v7833_v1  ;;  %310 = vst [vmem:[#allocation2 + $0x270] sm:$0x1] %v7833_v1  ;;  %v8149_v45 = vld [vmem:[#allocation4 + $0x98] sm:$0xff]  ;;  %v6382_v46 = vpack.c.bf16 %v141_v44, %v140_v43  ;;  %v8152_v47 = vld [vmem:[#allocation4 + $0xa0] sm:$0xff] }
  0x49   :  { %311 = vst [vmem:[#allocation2 + $0x288] sm:$0x1] %v7833_v1  ;;  %312 = vst [vmem:[#allocation2 + $0x2a0] sm:$0x1] %v7833_v1  ;;  %6374 = vmatpush1.bf16.msra.mxu0 %v6373_v23  ;;  %v8154_v48 = vld [vmem:[#allocation4 + $0xa8] sm:$0xff]  ;;  %v142_v49 = vld [vmem:[#allocation7 + $0x80] sm:$0xff] }
  0x4a   :  { %313 = vst [vmem:[#allocation2 + $0x2b8] sm:$0x1] %v7833_v1  ;;  %314 = vst [vmem:[#allocation2 + $0x2d0] sm:$0x1] %v7833_v1  ;;  %6375 = vmatprep.subr.bf16.mxu0 %v10311_v0  ;;  %v143_v50 = vld [vmem:[#allocation7 + $0x88] sm:$0xff]  ;;  %v8159_v51 = vld [vmem:[#allocation4 + $0xb0] sm:$0xff] }
  0x4b   :  { %315 = vst [vmem:[#allocation2 + $0x2e8] sm:$0x1] %v7833_v1  ;;  %316 = vst [vmem:[#allocation2 + $0x300] sm:$0x1] %v7833_v1  ;;  %v8162_v52 = vld [vmem:[#allocation4 + $0xb8] sm:$0xff]  ;;  %v6385_v53 = vpack.c.bf16 %v143_v50, %v142_v49  ;;  %v144_v54 = vld [vmem:[#allocation7 + $0x90] sm:$0xff] }
  0x4c   :  { %317 = vst [vmem:[#allocation2 + $0x318] sm:$0x1] %v7833_v1  ;;  %318 = vst [vmem:[#allocation2 + $0x330] sm:$0x1] %v7833_v1  ;;  %v145_v55 = vld [vmem:[#allocation7 + $0x98] sm:$0xff]  ;;  %v8166_v56 = vld [vmem:[#allocation4 + $0xc0] sm:$0xff] }
  0x4d   :  { %321 = vst [vmem:[#allocation2 + $0x29] sm:$0x1] %v7833_v1  ;;  %322 = vst [vmem:[#allocation2 + $0x41] sm:$0x1] %v7833_v1  ;;  %6377 = vmatpush1.bf16.msra.mxu0 %v6376_v34  ;;  %v6388_v57 = vpack.c.bf16 %v145_v55, %v144_v54  ;;  %v146_v58 = vld [vmem:[#allocation7 + $0xa0] sm:$0xff]  ;;  %v147_v59 = vld [vmem:[#allocation7 + $0xa8] sm:$0xff] }
  0x4e   :  { %323 = vst [vmem:[#allocation2 + $0x59] sm:$0x1] %v7833_v1  ;;  %324 = vst [vmem:[#allocation2 + $0x71] sm:$0x1] %v7833_v1  ;;  %6378 = vmatprep.subr.bf16.mxu0 %v10311_v0  ;;  %v8170_v60 = vld [vmem:[#allocation4 + $0xc8] sm:$0xff]  ;;  %v6391_v61 = vpack.c.bf16 %v147_v59, %v146_v58  ;;  %v148_v62 = vld [vmem:[#allocation7 + $0xb0] sm:$0xff] }
  0x4f   :  { %325 = vst [vmem:[#allocation2 + $0x89] sm:$0x1] %v7833_v1  ;;  %326 = vst [vmem:[#allocation2 + $0xa1] sm:$0x1] %v7833_v1  ;;  %v149_v63 = vld [vmem:[#allocation7 + $0xb8] sm:$0xff]  ;;  %v8174_v2 = vld [vmem:[#allocation4 + $0xd0] sm:$0xff] }
  0x50   :  { %327 = vst [vmem:[#allocation2 + $0xb9] sm:$0x1] %v7833_v1  ;;  %328 = vst [vmem:[#allocation2 + $0xd1] sm:$0x1] %v7833_v1  ;;  %v6394_v3 = vpack.c.bf16 %v149_v63, %v148_v62  ;;  %v150_v4 = vld [vmem:[#allocation7 + $0xc0] sm:$0xff]  ;;  %v151_v5 = vld [vmem:[#allocation7 + $0xc8] sm:$0xff] }
  0x51   :  { %329 = vst [vmem:[#allocation2 + $0xe9] sm:$0x1] %v7833_v1  ;;  %330 = vst [vmem:[#allocation2 + $0x101] sm:$0x1] %v7833_v1  ;;  %6380 = vmatpush1.bf16.msra.mxu0 %v6379_v41  ;;  %v8178_v6 = vld [vmem:[#allocation4 + $0xd8] sm:$0xff]  ;;  %v6397_v7 = vpack.c.bf16 %v151_v5, %v150_v4  ;;  %v152_v8 = vld [vmem:[#allocation7 + $0xd0] sm:$0xff] }
  0x52   :  { %331 = vst [vmem:[#allocation2 + $0x119] sm:$0x1] %v7833_v1  ;;  %332 = vst [vmem:[#allocation2 + $0x131] sm:$0x1] %v7833_v1  ;;  %6381 = vmatprep.subr.bf16.mxu0 %v10311_v0  ;;  %v153_v9 = vld [vmem:[#allocation7 + $0xd8] sm:$0xff]  ;;  %v8182_v10 = vld [vmem:[#allocation4 + $0xe0] sm:$0xff] }
  0x53   :  { %333 = vst [vmem:[#allocation2 + $0x149] sm:$0x1] %v7833_v1  ;;  %334 = vst [vmem:[#allocation2 + $0x161] sm:$0x1] %v7833_v1  ;;  %v6400_v11 = vpack.c.bf16 %v153_v9, %v152_v8  ;;  %v154_v12 = vld [vmem:[#allocation7 + $0xe0] sm:$0xff]  ;;  %v155_v13 = vld [vmem:[#allocation7 + $0xe8] sm:$0xff] }
  0x54   :  { %335 = vst [vmem:[#allocation2 + $0x179] sm:$0x1] %v7833_v1  ;;  %336 = vst [vmem:[#allocation2 + $0x191] sm:$0x1] %v7833_v1  ;;  %v8186_v14 = vld [vmem:[#allocation4 + $0xe8] sm:$0xff]  ;;  %v6403_v15 = vpack.c.bf16 %v155_v13, %v154_v12  ;;  %v156_v16 = vld [vmem:[#allocation7 + $0xf0] sm:$0xff] }
  0x55   :  { %339 = vst [vmem:[#allocation2 + $0x1d9] sm:$0x1] %v7833_v1  ;;  %340 = vst [vmem:[#allocation2 + $0x1f1] sm:$0x1] %v7833_v1  ;;  %6383 = vmatpush1.bf16.msra.mxu0 %v6382_v46  ;;  %v157_v23 = vld [vmem:[#allocation7 + $0xf8] sm:$0xff]  ;;  %v158_v25 = vld [vmem:[#allocation7 + $0x100] sm:$0xff] }
  0x56   :  { %341 = vst [vmem:[#allocation2 + $0x209] sm:$0x1] %v7833_v1  ;;  %342 = vst [vmem:[#allocation2 + $0x221] sm:$0x1] %v7833_v1  ;;  %6384 = vmatprep.subr.bf16.mxu0 %v10311_v0  ;;  %v6406_v24 = vpack.c.bf16 %v157_v23, %v156_v16  ;;  %v159_v34 = vld [vmem:[#allocation7 + $0x108] sm:$0xff]  ;;  %v160_v43 = vld [vmem:[#allocation7 + $0x110] sm:$0xff] }
  0x57   :  { %343 = vst [vmem:[#allocation2 + $0x239] sm:$0x1] %v7833_v1  ;;  %344 = vst [vmem:[#allocation2 + $0x251] sm:$0x1] %v7833_v1  ;;  %v6409_v37 = vpack.c.bf16 %v159_v34, %v158_v25  ;;  %v486_v41 = vld [vmem:[#allocation2 + $0x9] sm:$0xff]  ;;  %v161_v44 = vld [vmem:[#allocation7 + $0x118] sm:$0xff] }
  0x58   :  { %345 = vst [vmem:[#allocation2 + $0x269] sm:$0x1] %v7833_v1  ;;  %346 = vst [vmem:[#allocation2 + $0x281] sm:$0x1] %v7833_v1  ;;  %v8192_v46 = vld [vmem:[#allocation4 + $0x100] sm:$0xff]  ;;  %v6412_v49 = vpack.c.bf16 %v161_v44, %v160_v43  ;;  %v8196_v54 = vld [vmem:[#allocation4 + $0x108] sm:$0xff] }
  0x59   :  { %347 = vst [vmem:[#allocation2 + $0x299] sm:$0x1] %v7833_v1  ;;  %348 = vst [vmem:[#allocation2 + $0x2b1] sm:$0x1] %v7833_v1  ;;  %6386 = vmatpush1.bf16.msra.mxu0 %v6385_v53  ;;  %v162_v50 = vld [vmem:[#allocation7 + $0x120] sm:$0xff]  ;;  %v163_v53 = vld [vmem:[#allocation7 + $0x128] sm:$0xff] }
  0x5a   :  { %349 = vst [vmem:[#allocation2 + $0x2c9] sm:$0x1] %v7833_v1  ;;  %350 = vst [vmem:[#allocation2 + $0x2e1] sm:$0x1] %v7833_v1  ;;  %6387 = vmatprep.subr.bf16.mxu0 %v10311_v0  ;;  %v164_v58 = vld [vmem:[#allocation7 + $0x130] sm:$0xff]  ;;  %v165_v59 = vld [vmem:[#allocation7 + $0x138] sm:$0xff] }
  0x5b   :  { %351 = vst [vmem:[#allocation2 + $0x2f9] sm:$0x1] %v7833_v1  ;;  %352 = vst [vmem:[#allocation2 + $0x311] sm:$0x1] %v7833_v1  ;;  %v166_v62 = vld [vmem:[#allocation7 + $0x140] sm:$0xff]  ;;  %v167_v63 = vld [vmem:[#allocation7 + $0x148] sm:$0xff] }
  0x5c   :  { %353 = vst [vmem:[#allocation2 + $0x329] sm:$0x1] %v7833_v1  ;;  %354 = vst [vmem:[#allocation2 + $0x341] sm:$0x1] %v7833_v1  ;;  %v168_v5 = vld [vmem:[#allocation7 + $0x150] sm:$0xff]  ;;  %v8220_v8 = vld [vmem:[#allocation4 + $0x120] sm:$0xff] }
  0x5d   :  { %3138 = vst [vmem:[#allocation3] sm:$0xff] %v7833_v1  ;;  %3139 = vst [vmem:[#allocation3 + $0x8] sm:$0xff] %v7833_v1  ;;  %6389 = vmatpush1.bf16.msra.mxu0 %v6388_v57  ;;  %v6415_v57 = vpack.c.bf16 %v163_v53, %v162_v50  ;;  %v171_v12 = vld [vmem:[#allocation7 + $0x168] sm:$0xff]  ;;  %v172_v16 = vld [vmem:[#allocation7 + $0x170] sm:$0xff] }
  0x5e   :  { %3140 = vst [vmem:[#allocation3 + $0x10] sm:$0x3] %v7833_v1  ;;  %3141 = vst [vmem:[#allocation3 + $0x1b0] sm:$0xff] %v7833_v1  ;;  %6390 = vmatprep.subr.bf16.mxu0 %v10311_v0  ;;  %v8228_v13 = vld [vmem:[#allocation4 + $0x128] sm:$0xff]  ;;  %v173_v23 = vld [vmem:[#allocation7 + $0x178] sm:$0xff] }
  0x5f   :  { %3142 = vst [vmem:[#allocation3 + $0x1b8] sm:$0xff] %v7833_v1  ;;  %3143 = vst [vmem:[#allocation3 + $0x1c0] sm:$0x3] %v7833_v1  ;;  %v174_v34 = vld [vmem:[#allocation7 + $0x180] sm:$0xff]  ;;  %v176_v43 = vld [vmem:[#allocation7 + $0x190] sm:$0xff] }
  0x60   :  { %3145 = vst [vmem:[#allocation3 + $0x198] sm:$0xff] %v7833_v1  ;;  %3146 = vst [vmem:[#allocation3 + $0x1a0] sm:$0xff] %v7833_v1  ;;  %v177_v44 = vld [vmem:[#allocation7 + $0x198] sm:$0xff]  ;;  %v178_v53 = vld [vmem:[#allocation7 + $0x1a0] sm:$0xff] }
  0x61   :  { %3147 = vst [vmem:[#allocation3 + $0x1a8] sm:$0x3] %v7833_v1  ;;  %3148 = vst [vmem:[#allocation3 + $0x348] sm:$0xff] %v7833_v1  ;;  %6392 = vmatpush1.bf16.msra.mxu0 %v6391_v61  ;;  %v8204_v61 = vld [vmem:[#allocation4 + $0x110] sm:$0xff] }
  0x62   :  { %3149 = vst [vmem:[#allocation3 + $0x350] sm:$0xff] %v7833_v1  ;;  %3150 = vst [vmem:[#allocation3 + $0x358] sm:$0x3] %v7833_v1  ;;  %6393 = vmatprep.subr.bf16.mxu0 %v10311_v0 }
  0x63   :  { %3152 = vst [vmem:[#allocation3 + $0x18] sm:$0x1] %v7833_v1  ;;  %3153 = vst [vmem:[#allocation3 + $0x30] sm:$0x1] %v7833_v1 }
  0x64   :  { %3154 = vst [vmem:[#allocation3 + $0x48] sm:$0x1] %v7833_v1  ;;  %3155 = vst [vmem:[#allocation3 + $0x60] sm:$0x1] %v7833_v1 }
  0x65   :  { %3156 = vst [vmem:[#allocation3 + $0x78] sm:$0x1] %v7833_v1  ;;  %3157 = vst [vmem:[#allocation3 + $0x90] sm:$0x1] %v7833_v1  ;;  %6395 = vmatpush1.bf16.msra.mxu0 %v6394_v3  ;;  %v8212_v3 = vld [vmem:[#allocation4 + $0x118] sm:$0xff] }
  0x66   :  { %3158 = vst [vmem:[#allocation3 + $0xa8] sm:$0x1] %v7833_v1  ;;  %3159 = vst [vmem:[#allocation3 + $0xc0] sm:$0x1] %v7833_v1  ;;  %6396 = vmatprep.subr.bf16.mxu0 %v10311_v0 }
  0x67   :  { %3160 = vst [vmem:[#allocation3 + $0xd8] sm:$0x1] %v7833_v1  ;;  %3161 = vst [vmem:[#allocation3 + $0xf0] sm:$0x1] %v7833_v1 }
  0x68   :  { %3162 = vst [vmem:[#allocation3 + $0x108] sm:$0x1] %v7833_v1  ;;  %3163 = vst [vmem:[#allocation3 + $0x120] sm:$0x1] %v7833_v1 }
  0x69   :  { %3164 = vst [vmem:[#allocation3 + $0x138] sm:$0x1] %v7833_v1  ;;  %3165 = vst [vmem:[#allocation3 + $0x150] sm:$0x1] %v7833_v1  ;;  %6398 = vmatpush1.bf16.msra.mxu0 %v6397_v7  ;;  %v169_v7 = vld [vmem:[#allocation7 + $0x158] sm:$0xff] }
  0x6a   :  { %3166 = vst [vmem:[#allocation3 + $0x168] sm:$0x1] %v7833_v1  ;;  %3167 = vst [vmem:[#allocation3 + $0x180] sm:$0x1] %v7833_v1  ;;  %6399 = vmatprep.subr.bf16.mxu0 %v10311_v0 }
  0x6b   :  { %3170 = vst [vmem:[#allocation3 + $0x1c8] sm:$0x1] %v7833_v1  ;;  %3171 = vst [vmem:[#allocation3 + $0x1e0] sm:$0x1] %v7833_v1 }
  0x6c   :  { %3172 = vst [vmem:[#allocation3 + $0x1f8] sm:$0x1] %v7833_v1  ;;  %3173 = vst [vmem:[#allocation3 + $0x210] sm:$0x1] %v7833_v1 }
  0x6d   :  { %3174 = vst [vmem:[#allocation3 + $0x228] sm:$0x1] %v7833_v1  ;;  %3175 = vst [vmem:[#allocation3 + $0x240] sm:$0x1] %v7833_v1  ;;  %6401 = vmatpush1.bf16.msra.mxu0 %v6400_v11  ;;  %v170_v11 = vld [vmem:[#allocation7 + $0x160] sm:$0xff] }
  0x6e   :  { %3176 = vst [vmem:[#allocation3 + $0x258] sm:$0x1] %v7833_v1  ;;  %3177 = vst [vmem:[#allocation3 + $0x270] sm:$0x1] %v7833_v1  ;;  %6402 = vmatprep.subr.bf16.mxu0 %v10311_v0 }
  0x6f   :  { %3178 = vst [vmem:[#allocation3 + $0x288] sm:$0x1] %v7833_v1  ;;  %3179 = vst [vmem:[#allocation3 + $0x2a0] sm:$0x1] %v7833_v1 }
  0x70   :  { %3180 = vst [vmem:[#allocation3 + $0x2b8] sm:$0x1] %v7833_v1  ;;  %3181 = vst [vmem:[#allocation3 + $0x2d0] sm:$0x1] %v7833_v1 }
  0x71   :  { %3182 = vst [vmem:[#allocation3 + $0x2e8] sm:$0x1] %v7833_v1  ;;  %3183 = vst [vmem:[#allocation3 + $0x300] sm:$0x1] %v7833_v1  ;;  %6404 = vmatpush1.bf16.msra.mxu0 %v6403_v15 }
  0x72   :  { %3184 = vst [vmem:[#allocation3 + $0x318] sm:$0x1] %v7833_v1  ;;  %3185 = vst [vmem:[#allocation3 + $0x330] sm:$0x1] %v7833_v1  ;;  %6405 = vmatprep.subr.bf16.mxu0 %v10311_v0 }
  0x73   :  { %3188 = vst [vmem:[#allocation3 + $0x29] sm:$0x1] %v7833_v1  ;;  %3189 = vst [vmem:[#allocation3 + $0x41] sm:$0x1] %v7833_v1 }
  0x74   :  { %3190 = vst [vmem:[#allocation3 + $0x59] sm:$0x1] %v7833_v1  ;;  %3191 = vst [vmem:[#allocation3 + $0x71] sm:$0x1] %v7833_v1 }
  0x75   :  { %3192 = vst [vmem:[#allocation3 + $0x89] sm:$0x1] %v7833_v1  ;;  %3193 = vst [vmem:[#allocation3 + $0xa1] sm:$0x1] %v7833_v1  ;;  %6407 = vmatpush1.bf16.msra.mxu0 %v6406_v24  ;;  %v8236_v24 = vld [vmem:[#allocation4 + $0x130] sm:$0xff] }
  0x76   :  { %3194 = vst [vmem:[#allocation3 + $0xb9] sm:$0x1] %v7833_v1  ;;  %3195 = vst [vmem:[#allocation3 + $0xd1] sm:$0x1] %v7833_v1  ;;  %6408 = vmatprep.subr.bf16.mxu0 %v10311_v0 }
  0x77   :  { %3196 = vst [vmem:[#allocation3 + $0xe9] sm:$0x1] %v7833_v1  ;;  %3197 = vst [vmem:[#allocation3 + $0x101] sm:$0x1] %v7833_v1 }
  0x78   :  { %3198 = vst [vmem:[#allocation3 + $0x119] sm:$0x1] %v7833_v1  ;;  %3199 = vst [vmem:[#allocation3 + $0x131] sm:$0x1] %v7833_v1 }
  0x79   :  { %3200 = vst [vmem:[#allocation3 + $0x149] sm:$0x1] %v7833_v1  ;;  %3201 = vst [vmem:[#allocation3 + $0x161] sm:$0x1] %v7833_v1 }
  0x7a   :  { %3202 = vst [vmem:[#allocation3 + $0x179] sm:$0x1] %v7833_v1  ;;  %3203 = vst [vmem:[#allocation3 + $0x191] sm:$0x1] %v7833_v1 }
  0x7b   :  { %3206 = vst [vmem:[#allocation3 + $0x1d9] sm:$0x1] %v7833_v1  ;;  %3207 = vst [vmem:[#allocation3 + $0x1f1] sm:$0x1] %v7833_v1 }
  0x7c   :  { %3208 = vst [vmem:[#allocation3 + $0x209] sm:$0x1] %v7833_v1  ;;  %3209 = vst [vmem:[#allocation3 + $0x221] sm:$0x1] %v7833_v1 }
  0x7d   :  { %3210 = vst [vmem:[#allocation3 + $0x239] sm:$0x1] %v7833_v1  ;;  %3211 = vst [vmem:[#allocation3 + $0x251] sm:$0x1] %v7833_v1 }
  0x7e   :  { %3212 = vst [vmem:[#allocation3 + $0x269] sm:$0x1] %v7833_v1  ;;  %3213 = vst [vmem:[#allocation3 + $0x281] sm:$0x1] %v7833_v1 }
  0x7f   :  { %3214 = vst [vmem:[#allocation3 + $0x299] sm:$0x1] %v7833_v1  ;;  %3215 = vst [vmem:[#allocation3 + $0x2b1] sm:$0x1] %v7833_v1 }
  0x80   :  { %3216 = vst [vmem:[#allocation3 + $0x2c9] sm:$0x1] %v7833_v1  ;;  %3217 = vst [vmem:[#allocation3 + $0x2e1] sm:$0x1] %v7833_v1 }
  0x81   :  { %3218 = vst [vmem:[#allocation3 + $0x2f9] sm:$0x1] %v7833_v1  ;;  %3219 = vst [vmem:[#allocation3 + $0x311] sm:$0x1] %v7833_v1 }
  0x82   :  { %3220 = vst [vmem:[#allocation3 + $0x329] sm:$0x1] %v7833_v1  ;;  %3221 = vst [vmem:[#allocation3 + $0x341] sm:$0x1] %v7833_v1 }
  0x83   :  { %284 = vst [vmem:[#allocation2] sm:$0x1] %v7833_v1  ;;  %301 = vst [vmem:[#allocation2 + $0x198] sm:$0x1] %v7833_v1 }
  0x84   :  { %302 = vst [vmem:[#allocation2 + $0x1b0] sm:$0x1] %v7833_v1  ;;  %319 = vst [vmem:[#allocation2 + $0x348] sm:$0x1] %v7833_v1 }
  0x85   :  { %320 = vst [vmem:[#allocation2 + $0x11] sm:$0x1] %v7833_v1  ;;  %337 = vst [vmem:[#allocation2 + $0x1a9] sm:$0x1] %v7833_v1 }
  0x86   :  { %338 = vst [vmem:[#allocation2 + $0x1c1] sm:$0x1] %v7833_v1  ;;  %355 = vst [vmem:[#allocation2 + $0x359] sm:$0x1] %v7833_v1 }
  0x87   :  { %3151 = vst [vmem:[#allocation3] sm:$0x1] %v7833_v1  ;;  %3168 = vst [vmem:[#allocation3 + $0x198] sm:$0x1] %v7833_v1 }
  0x88   :  { %3169 = vst [vmem:[#allocation3 + $0x1b0] sm:$0x1] %v7833_v1  ;;  %3186 = vst [vmem:[#allocation3 + $0x348] sm:$0x1] %v7833_v1 }
  0x89   :  { %3187 = vst [vmem:[#allocation3 + $0x11] sm:$0x1] %v7833_v1  ;;  %3204 = vst [vmem:[#allocation3 + $0x1a9] sm:$0x1] %v7833_v1 }
  0x8a   :  { %3205 = vst [vmem:[#allocation3 + $0x1c1] sm:$0x1] %v7833_v1  ;;  %3222 = vst [vmem:[#allocation3 + $0x359] sm:$0x1] %v7833_v1  ;;  %v421_v36 = vld [vmem:[#allocation2] sm:$0xff] }
  0x8b   :  { %357 = vst [vmem:[#allocation2 + $0x19] sm:$0xff] %v8089_v17  ;;  %358 = vst [vmem:[#allocation2 + $0x21] sm:$0xff] %v8091_v18  ;;  %1069 = vmatmul.mubr.f32.vlgmr.msra.gmra.mrb[0].mxu0 %v421_v36  ;;  %v175_v36 = vld [vmem:[#allocation7 + $0x188] sm:$0xff] }
  0x8c   :  { %359 = vst [vmem:[#allocation2 + $0x31] sm:$0xff] %v8095_v19  ;;  %360 = vst [vmem:[#allocation2 + $0x39] sm:$0xff] %v8098_v20  ;;  %6410 = vmatpush1.bf16.msra.mxu0 %v6409_v37  ;;  %1073 = vmatprep.mubr.f32.mxu0 %v486_v41  ;;  %v8244_v37 = vld [vmem:[#allocation4 + $0x138] sm:$0xff] }
  0x8d   :  { %361 = vst [vmem:[#allocation2 + $0x49] sm:$0xff] %v8100_v21  ;;  %362 = vst [vmem:[#allocation2 + $0x51] sm:$0xff] %v8102_v22  ;;  %6411 = vmatprep.subr.bf16.mxu0 %v10311_v0 }
  0x8e   :  { %363 = vst [vmem:[#allocation2 + $0x61] sm:$0xff] %v8107_v26  ;;  %364 = vst [vmem:[#allocation2 + $0x69] sm:$0xff] %v8111_v27 }
  0x8f   :  { %365 = vst [vmem:[#allocation2 + $0x79] sm:$0xff] %v8113_v28  ;;  %366 = vst [vmem:[#allocation2 + $0x81] sm:$0xff] %v8115_v29  ;;  %1074 = vmatmul.mubr.f32.gmra.mrb[2].mxu0 %v7833_v1 }
  0x90   :  { %367 = vst [vmem:[#allocation2 + $0x91] sm:$0xff] %v8120_v30  ;;  %368 = vst [vmem:[#allocation2 + $0x99] sm:$0xff] %v8123_v31  ;;  %1078 = vmatprep.mubr.f32.mxu0 %v8089_v17  ;;  %6413 = vmatpush1.bf16.msra.mxu0 %v6412_v49  ;;  %v6418_v17 = vpack.c.bf16 %v165_v59, %v164_v58  ;;  %v8252_v49 = vld [vmem:[#allocation4 + $0x140] sm:$0xff]  ;;  %v8260_v58 = vld [vmem:[#allocation4 + $0x148] sm:$0xff] }
  0x91   :  { %369 = vst [vmem:[#allocation2 + $0xa9] sm:$0xff] %v8125_v32  ;;  %370 = vst [vmem:[#allocation2 + $0xb1] sm:$0xff] %v8127_v33  ;;  %6414 = vmatprep.subr.bf16.mxu0 %v10311_v0 }
  0x92   :  { %371 = vst [vmem:[#allocation2 + $0xc1] sm:$0xff] %v8132_v35  ;;  %372 = vst [vmem:[#allocation2 + $0xc9] sm:$0xff] %v8136_v38  ;;  %v8201_v55 = vld [vmem:[#allocation2 + $0x18] sm:$0xff]  ;;  %v8209_v1 = vld [vmem:[#allocation2 + $0x20] sm:$0xff] }
  0x93   :  { %373 = vst [vmem:[#allocation2 + $0xd9] sm:$0xff] %v8139_v39  ;;  %374 = vst [vmem:[#allocation2 + $0xe1] sm:$0xff] %v8141_v40  ;;  %1079 = vmatmul.mubr.f32.gmra.mrb[4].mxu0 %v8201_v55  ;;  %v8217_v4 = vld [vmem:[#allocation2 + $0x30] sm:$0xff]  ;;  %v8225_v9 = vld [vmem:[#allocation2 + $0x38] sm:$0xff] }
  0x94   :  { %375 = vst [vmem:[#allocation2 + $0xf1] sm:$0xff] %v8145_v42  ;;  %376 = vst [vmem:[#allocation2 + $0xf9] sm:$0xff] %v8149_v45  ;;  %1083 = vmatprep.mubr.f32.mxu0 %v8091_v18  ;;  %6416 = vmatpush1.bf16.msra.mxu0 %v6415_v57  ;;  %v6421_v18 = vpack.c.bf16 %v167_v63, %v166_v62  ;;  %v8233_v15 = vld [vmem:[#allocation2 + $0x48] sm:$0xff]  ;;  %v8241_v25 = vld [vmem:[#allocation2 + $0x50] sm:$0xff] }
  0x95   :  { %377 = vst [vmem:[#allocation2 + $0x109] sm:$0xff] %v8152_v47  ;;  %378 = vst [vmem:[#allocation2 + $0x111] sm:$0xff] %v8154_v48  ;;  %6417 = vmatprep.subr.bf16.mxu0 %v10311_v0  ;;  %v8249_v41 = vld [vmem:[#allocation2 + $0x60] sm:$0xff]  ;;  %v8257_v50 = vld [vmem:[#allocation2 + $0x68] sm:$0xff] }
  0x96   :  { %379 = vst [vmem:[#allocation2 + $0x121] sm:$0xff] %v8159_v51  ;;  %380 = vst [vmem:[#allocation2 + $0x129] sm:$0xff] %v8162_v52  ;;  %v179_v57 = vld [vmem:[#allocation7 + $0x1a8] sm:$0xff]  ;;  %v8265_v59 = vld [vmem:[#allocation2 + $0x78] sm:$0xff] }
  0x97   :  { %381 = vst [vmem:[#allocation2 + $0x139] sm:$0xff] %v8166_v56  ;;  %382 = vst [vmem:[#allocation2 + $0x141] sm:$0xff] %v8170_v60  ;;  %1084 = vmatmul.mubr.f32.gmra.mrb[6].mxu0 %v8209_v1  ;;  %v8273_v62 = vld [vmem:[#allocation2 + $0x80] sm:$0xff]  ;;  %v8281_v63 = vld [vmem:[#allocation2 + $0x90] sm:$0xff] }
  0x98   :  { %383 = vst [vmem:[#allocation2 + $0x151] sm:$0xff] %v8174_v2  ;;  %384 = vst [vmem:[#allocation2 + $0x159] sm:$0xff] %v8178_v6  ;;  %1088 = vmatprep.mubr.f32.mxu0 %v8095_v19  ;;  %6419 = vmatpush1.bf16.msra.mxu0 %v6418_v17  ;;  %v6424_v19 = vpack.c.bf16 %v169_v7, %v168_v5  ;;  %v8268_v17 = vld [vmem:[#allocation4 + $0x150] sm:$0xff]  ;;  %v181_v5 = vld [vmem:[#allocation7 + $0x1b8] sm:$0xff] }
  0x99   :  { %385 = vst [vmem:[#allocation2 + $0x169] sm:$0xff] %v8182_v10  ;;  %386 = vst [vmem:[#allocation2 + $0x171] sm:$0xff] %v8186_v14  ;;  %6420 = vmatprep.subr.bf16.mxu0 %v10311_v0  ;;  %v8288_v7 = vld [vmem:[#allocation2 + $0x98] sm:$0xff] }
  0x9a   :  { %389 = vst [vmem:[#allocation2 + $0x1c9] sm:$0xff] %v8192_v46  ;;  %390 = vst [vmem:[#allocation2 + $0x1d1] sm:$0xff] %v8196_v54 }
  0x9b   :  { %391 = vst [vmem:[#allocation2 + $0x1e1] sm:$0xff] %v8204_v61  ;;  %392 = vst [vmem:[#allocation2 + $0x1e9] sm:$0xff] %v8212_v3  ;;  %1089 = vmatmul.mubr.f32.gmra.mrb[8].mxu0 %v8217_v4 }
  0x9c   :  { %393 = vst [vmem:[#allocation2 + $0x1f9] sm:$0xff] %v8220_v8  ;;  %1093 = vmatprep.mubr.f32.mxu0 %v8098_v20  ;;  %6422 = vmatpush1.bf16.msra.mxu0 %v6421_v18  ;;  %394 = vst [vmem:[#allocation2 + $0x201] sm:$0xff] %v8228_v13  ;;  %v6427_v20 = vpack.c.bf16 %v171_v12, %v170_v11  ;;  %v8283_v18 = vld [vmem:[#allocation4 + $0x160] sm:$0xff]  ;;  %v8290_v11 = vld [vmem:[#allocation4 + $0x168] sm:$0xff] }
  0x9d   :  { %6423 = vmatprep.subr.bf16.mxu0 %v10311_v0  ;;  %395 = vst [vmem:[#allocation2 + $0x211] sm:$0xff] %v8236_v24  ;;  %396 = vst [vmem:[#allocation2 + $0x219] sm:$0xff] %v8244_v37  ;;  %v8298_v12 = vld [vmem:[#allocation4 + $0x170] sm:$0xff] }
  0x9e   :  { %397 = vst [vmem:[#allocation2 + $0x229] sm:$0xff] %v8252_v49  ;;  %398 = vst [vmem:[#allocation2 + $0x231] sm:$0xff] %v8260_v58 }
  0x9f   :  { %1094 = vmatmul.mubr.f32.gmra.mrb[10].mxu0 %v8225_v9  ;;  %399 = vst [vmem:[#allocation2 + $0x241] sm:$0xff] %v8268_v17  ;;  %401 = vst [vmem:[#allocation2 + $0x259] sm:$0xff] %v8283_v18 }
  0xa0   :  { %1098 = vmatprep.mubr.f32.mxu0 %v8100_v21  ;;  %6425 = vmatpush1.bf16.msra.mxu0 %v6424_v19  ;;  %v6430_v21 = vpack.c.bf16 %v173_v23, %v172_v16  ;;  %402 = vst [vmem:[#allocation2 + $0x261] sm:$0xff] %v8290_v11  ;;  %403 = vst [vmem:[#allocation2 + $0x271] sm:$0xff] %v8298_v12  ;;  %v8312_v16 = vld [vmem:[#allocation4 + $0x180] sm:$0xff] }
  0xa1   :  { %6426 = vmatprep.subr.bf16.mxu0 %v10311_v0  ;;  %v182_v23 = vld [vmem:[#allocation7 + $0x1c0] sm:$0xff]  ;;  %405 = vst [vmem:[#allocation2 + $0x289] sm:$0xff] %v8312_v16 }
  0xa3   :  { %1099 = vmatmul.mubr.f32.gmra.mrb[12].mxu0 %v8233_v15 }
  0xa4   :  { %1103 = vmatprep.mubr.f32.mxu0 %v8102_v22  ;;  %6428 = vmatpush1.bf16.msra.mxu0 %v6427_v20  ;;  %v6433_v22 = vpack.c.bf16 %v175_v36, %v174_v34  ;;  %v8305_v20 = vld [vmem:[#allocation4 + $0x178] sm:$0xff]  ;;  %v8319_v36 = vld [vmem:[#allocation4 + $0x188] sm:$0xff] }
  0xa5   :  { %6429 = vmatprep.subr.bf16.mxu0 %v10311_v0  ;;  %404 = vst [vmem:[#allocation2 + $0x279] sm:$0xff] %v8305_v20  ;;  %406 = vst [vmem:[#allocation2 + $0x291] sm:$0xff] %v8319_v36 }
  0xa7   :  { %1104 = vmatmul.mubr.f32.gmra.mrb[14].mxu0 %v8241_v25 }
  0xa8   :  { %1108 = vmatprep.mubr.f32.mxu0 %v8107_v26  ;;  %6431 = vmatpush1.bf16.msra.mxu0 %v6430_v21  ;;  %v6436_v26 = vpack.c.bf16 %v177_v44, %v176_v43  ;;  %v183_v21 = vld [vmem:[#allocation7 + $0x1c8] sm:$0xff]  ;;  %v8334_v43 = vld [vmem:[#allocation4 + $0x198] sm:$0xff]  ;;  %v8341_v44 = vld [vmem:[#allocation4 + $0x1a0] sm:$0xff] }
  0xa9   :  { %6432 = vmatprep.subr.bf16.mxu0 %v10311_v0  ;;  %v6445_v34 = vpack.c.bf16 %v183_v21, %v182_v23  ;;  %408 = vst [vmem:[#allocation2 + $0x2a9] sm:$0xff] %v8334_v43  ;;  %409 = vst [vmem:[#allocation2 + $0x2b9] sm:$0xff] %v8341_v44  ;;  %v186_v23 = vld [vmem:[#allocation7 + $0x1e0] sm:$0xff]  ;;  %v187_v21 = vld [vmem:[#allocation7 + $0x1e8] sm:$0xff] }
  0xab   :  { %1109 = vmatmul.mubr.f32.gmra.mrb[16].mxu0 %v8249_v41 }
  0xac   :  { %1113 = vmatprep.mubr.f32.mxu0 %v8111_v27  ;;  %6434 = vmatpush1.bf16.msra.mxu0 %v6433_v22  ;;  %v6439_v27 = vpack.c.bf16 %v179_v57, %v178_v53  ;;  %v8327_v22 = vld [vmem:[#allocation4 + $0x190] sm:$0xff]  ;;  %v185_v53 = vld [vmem:[#allocation7 + $0x1d8] sm:$0xff] }
  0xad   :  { %6435 = vmatprep.subr.bf16.mxu0 %v10311_v0  ;;  %407 = vst [vmem:[#allocation2 + $0x2a1] sm:$0xff] %v8327_v22 }
  0xaf   :  { %1114 = vmatmul.mubr.f32.gmra.mrb[18].mxu0 %v8257_v50 }
  0xb0   :  { %1118 = vmatprep.mubr.f32.mxu0 %v8113_v28  ;;  %6437 = vmatpush1.bf16.msra.mxu0 %v6436_v26  ;;  %v8276_v28 = vld [vmem:[#allocation4 + $0x158] sm:$0xff]  ;;  %v184_v26 = vld [vmem:[#allocation7 + $0x1d0] sm:$0xff] }
  0xb1   :  { %6438 = vmatprep.subr.bf16.mxu0 %v10311_v0  ;;  %400 = vst [vmem:[#allocation2 + $0x249] sm:$0xff] %v8276_v28  ;;  %v6448_v57 = vpack.c.bf16 %v185_v53, %v184_v26  ;;  %v8377_v26 = vld [vmem:[#allocation4 + $0x1c8] sm:$0xff]  ;;  %v8385_v53 = vld [vmem:[#allocation4 + $0x1d0] sm:$0xff] }
  0xb2   :  { %414 = vst [vmem:[#allocation2 + $0x2f1] sm:$0xff] %v8377_v26  ;;  %415 = vst [vmem:[#allocation2 + $0x301] sm:$0xff] %v8385_v53 }
  0xb3   :  { %1119 = vmatmul.mubr.f32.gmra.mrb[20].mxu0 %v8265_v59 }
  0xb4   :  { %1123 = vmatprep.mubr.f32.mxu0 %v8115_v29  ;;  %6440 = vmatpush1.bf16.msra.mxu0 %v6439_v27  ;;  %v180_v29 = vld [vmem:[#allocation7 + $0x1b0] sm:$0xff]  ;;  %v8348_v27 = vld [vmem:[#allocation4 + $0x1a8] sm:$0xff] }
  0xb5   :  { %6441 = vmatprep.subr.bf16.mxu0 %v10311_v0  ;;  %v6442_v19 = vpack.c.bf16 %v181_v5, %v180_v29  ;;  %410 = vst [vmem:[#allocation2 + $0x2c1] sm:$0xff] %v8348_v27  ;;  %v8356_v29 = vld [vmem:[#allocation4 + $0x1b0] sm:$0xff]  ;;  %v8363_v5 = vld [vmem:[#allocation4 + $0x1b8] sm:$0xff] }
  0xb6   :  { %411 = vst [vmem:[#allocation2 + $0x2d1] sm:$0xff] %v8356_v29  ;;  %412 = vst [vmem:[#allocation2 + $0x2d9] sm:$0xff] %v8363_v5 }
  0xb7   :  { %1124 = vmatmul.mubr.f32.gmra.mrb[22].mxu0 %v8273_v62 }
  0xb8   :  { %1128 = vmatprep.mubr.f32.mxu0 %v8120_v30  ;;  %6443 = vmatpush1.bf16.msra.mxu0 %v6442_v19  ;;  %v8296_v30 = vld [vmem:[#allocation2 + $0xa8] sm:$0xff]  ;;  %v8370_v19 = vld [vmem:[#allocation4 + $0x1c0] sm:$0xff] }
  0xb9   :  { %6444 = vmatprep.subr.bf16.mxu0 %v10311_v0  ;;  %413 = vst [vmem:[#allocation2 + $0x2e9] sm:$0xff] %v8370_v19 }
  0xbb   :  { %1129 = vmatmul.mubr.f32.gmra.mrb[24].mxu0 %v8281_v63 }
  0xbc   :  { %1133 = vmatprep.mubr.f32.mxu0 %v8123_v31  ;;  %v8303_v31 = vld [vmem:[#allocation2 + $0xb0] sm:$0xff]  ;;  %6446 = vmatpush1.bf16.msra.mxu0 %v6445_v34  ;;  %v6451_v34 = vpack.c.bf16 %v187_v21, %v186_v23  ;;  %v8399_v23 = vld [vmem:[#allocation4 + $0x1e0] sm:$0xff] }
  0xbd   :  { %6447 = vmatprep.subr.bf16.mxu0 %v10311_v0  ;;  %v188_v21 = vld [vmem:[#allocation7 + $0x1f0] sm:$0xff]  ;;  %417 = vst [vmem:[#allocation2 + $0x319] sm:$0xff] %v8399_v23 }
  0xbf   :  { %1134 = vmatmul.mubr.f32.gmra.mrb[26].mxu0 %v8288_v7 }
  0xc0   :  { %1138 = vmatprep.mubr.f32.mxu0 %v8125_v32  ;;  %v8310_v32 = vld [vmem:[#allocation2 + $0xc0] sm:$0xff]  ;;  %6449 = vmatpush1.bf16.msra.mxu0 %v6448_v57  ;;  %v8392_v57 = vld [vmem:[#allocation4 + $0x1d8] sm:$0xff] }
  0xc1   :  { %6450 = vmatprep.subr.bf16.mxu0 %v10311_v0  ;;  %416 = vst [vmem:[#allocation2 + $0x309] sm:$0xff] %v8392_v57 }
  0xc3   :  { %1139 = vmatmul.mubr.f32.gmra.mrb[28].mxu0 %v8296_v30 }
  0xc4   :  { %1143 = vmatprep.mubr.f32.mxu0 %v8127_v33  ;;  %v8317_v33 = vld [vmem:[#allocation2 + $0xc8] sm:$0xff]  ;;  %6452 = vmatpush1.bf16.msra.mxu0 %v6451_v34  ;;  %v189_v34 = vld [vmem:[#allocation7 + $0x1f8] sm:$0xff] }
  0xc5   :  { %6453 = vmatprep.subr.bf16.mxu0 %v10311_v0  ;;  %v6454_v0 = vpack.c.bf16 %v189_v34, %v188_v21  ;;  %v517_v21 = vld [vmem:[#allocation2 + $0x1b1] sm:$0xff]  ;;  %v518_v34 = vld [vmem:[#allocation2 + $0x1b9] sm:$0xff] }
  0xc7   :  { %1144 = vmatmul.mubr.f32.gmra.mrb[30].mxu0 %v8303_v31 }
  0xc8   :  { %1148 = vmatprep.mubr.f32.mxu0 %v8132_v35  ;;  %v8325_v35 = vld [vmem:[#allocation2 + $0xd8] sm:$0xff]  ;;  %6455 = vmatpush1.bf16.msra.mxu0 %v6454_v0  ;;  %v453_v0 = vld [vmem:[#allocation2 + $0x1b0] sm:$0xff] }
  0xcb   :  { %1149 = vmatmul.mubr.f32.gmra.mrb[32].mxu0 %v8310_v32 }
  0xcc   :  { %1153 = vmatprep.mubr.f32.mxu0 %v8136_v38  ;;  %v8332_v38 = vld [vmem:[#allocation2 + $0xe0] sm:$0xff] }
  0xcf   :  { %1154 = vmatmul.mubr.f32.gmra.mrb[34].mxu0 %v8317_v33 }
  0xd0   :  { %1158 = vmatprep.mubr.f32.mxu0 %v8139_v39  ;;  %v8339_v39 = vld [vmem:[#allocation2 + $0xf0] sm:$0xff] }
  0xd3   :  { %1159 = vmatmul.mubr.f32.gmra.mrb[36].mxu0 %v8325_v35 }
  0xd4   :  { %1163 = vmatprep.mubr.f32.mxu0 %v8141_v40  ;;  %v8346_v40 = vld [vmem:[#allocation2 + $0xf8] sm:$0xff] }
  0xd7   :  { %1164 = vmatmul.mubr.f32.gmra.mrb[38].mxu0 %v8332_v38 }
  0xd8   :  { %1168 = vmatprep.mubr.f32.mxu0 %v8145_v42  ;;  %v8354_v42 = vld [vmem:[#allocation2 + $0x108] sm:$0xff] }
  0xdb   :  { %1169 = vmatmul.mubr.f32.gmra.mrb[40].mxu0 %v8339_v39 }
  0xdc   :  { %1173 = vmatprep.mubr.f32.mxu0 %v8149_v45  ;;  %v8361_v45 = vld [vmem:[#allocation2 + $0x110] sm:$0xff] }
  0xdf   :  { %1174 = vmatmul.mubr.f32.gmra.mrb[42].mxu0 %v8346_v40 }
  0xe0   :  { %1178 = vmatprep.mubr.f32.mxu0 %v8152_v47  ;;  %v8368_v47 = vld [vmem:[#allocation2 + $0x120] sm:$0xff] }
  0xe3   :  { %1179 = vmatmul.mubr.f32.gmra.mrb[44].mxu0 %v8354_v42 }
  0xe4   :  { %1183 = vmatprep.mubr.f32.mxu0 %v8154_v48  ;;  %v8375_v48 = vld [vmem:[#allocation2 + $0x128] sm:$0xff] }
  0xe7   :  { %1184 = vmatmul.mubr.f32.gmra.mrb[46].mxu0 %v8361_v45 }
  0xe8   :  { %1188 = vmatprep.mubr.f32.mxu0 %v8159_v51  ;;  %v8383_v51 = vld [vmem:[#allocation2 + $0x138] sm:$0xff] }
  0xeb   :  { %1189 = vmatmul.mubr.f32.gmra.mrb[48].mxu0 %v8368_v47 }
  0xec   :  { %1193 = vmatprep.mubr.f32.mxu0 %v8162_v52  ;;  %v8390_v52 = vld [vmem:[#allocation2 + $0x140] sm:$0xff] }
  0xed   :  { %10370 = vst [vmem:[#allocation14_spill] sm:$0xff] %v8390_v52 }
  0xef   :  { %1194 = vmatmul.mubr.f32.gmra.mrb[50].mxu0 %v8375_v48 }
  0xf0   :  { %1198 = vmatprep.mubr.f32.mxu0 %v8166_v56  ;;  %v8397_v56 = vld [vmem:[#allocation2 + $0x150] sm:$0xff] }
  0xf1   :  { %10371 = vst [vmem:[#allocation15_spill] sm:$0xff] %v8397_v56 }
  0xf3   :  { %1199 = vmatmul.mubr.f32.gmra.mrb[52].mxu0 %v8383_v51 }
  0xf4   :  { %1203 = vmatprep.mubr.f32.mxu0 %v8170_v60  ;;  %v8404_v60 = vld [vmem:[#allocation2 + $0x158] sm:$0xff] }
  0xf5   :  { %10372 = vst [vmem:[#allocation16_spill] sm:$0xff] %v8404_v60 }
  0xf7   :  { %1204 = vmatmul.mubr.f32.gmra.mrb[54].mxu0 %v8390_v52  ;;  %v8406_v52 = vld [vmem:[#allocation4 + $0x1e8] sm:$0xff] }
  0xf8   :  { %1208 = vmatprep.mubr.f32.mxu0 %v8174_v2  ;;  %418 = vst [vmem:[#allocation2 + $0x321] sm:$0xff] %v8406_v52  ;;  %v10373_v2 = vmov 0.0|0.0  }
  0xf9   :  { %6456 = vmatprep.subr.bf16.mxu0 %v10373_v2 }
  0xfb   :  { %1209 = vmatmul.mubr.f32.gmra.mrb[56].mxu0 %v8397_v56  ;;  %v8412_v56 = vld [vmem:[#allocation2 + $0x168] sm:$0xff] }
  0xfc   :  { %1213 = vmatprep.mubr.f32.mxu0 %v8178_v6  ;;  %v8416_v6 = vld [vmem:[#allocation2 + $0x170] sm:$0xff] }
  0xff   :  { %1214 = vmatmul.mubr.f32.gmra.mrb[58].mxu0 %v8404_v60  ;;  %v7728_v60 = vld [vmem:[#allocation2 + $0x8] sm:$0xff] }
 0x100   :  { %1218 = vmatprep.mubr.f32.mxu0 %v8182_v10  ;;  %v8420_v10 = vld [vmem:[#allocation2 + $0x1c8] sm:$0xff] }
 0x103   :  { %1219 = vmatmul.mubr.f32.gmra.mrb[60].mxu0 %v8412_v56 }
 0x104   :  { %1223 = vmatprep.mubr.f32.mxu0 %v8186_v14  ;;  %v8424_v14 = vld [vmem:[#allocation2 + $0x1d0] sm:$0xff] }
 0x107   :  { %1224 = vmatmul.mubr.f32.gmra.mrb[62].mxu0 %v8416_v6 }
 0x108   :  { %1228 = vmatprep.mubr.f32.mxu0 %v517_v21  ;;  %v8428_v21 = vld [vmem:[#allocation2 + $0x1e0] sm:$0xff] }
 0x10b   :  { %1229 = vmatmul.mubr.f32.gmra.mrb[64].mxu0 %v453_v0  ;;  %v8533_v0 = vld [vmem:[#allocation4 + $0xf8] sm:$0xff] }
 0x10c   :  { %1233 = vmatprep.mubr.f32.mxu0 %v518_v34  ;;  %10378 = vst [vmem:[#allocation21_spill] sm:$0xff] %v8533_v0  ;;  %388 = vst [vmem:[#allocation2 + $0x189] sm:$0xff] %v8533_v0  ;;  %v190_v34 = vld [vmem:[#allocation7 + $0x200] sm:$0xff] }
 0x10f   :  { %1234 = vmatmul.mubr.f32.gmra.mrb[66].mxu0 %v7728_v60  ;;  %v8432_v60 = vld [vmem:[#allocation2 + $0x1e8] sm:$0xff] }
 0x110   :  { %1238 = vmatprep.mubr.f32.mxu0 %v8192_v46  ;;  %v8436_v46 = vld [vmem:[#allocation2 + $0x1f8] sm:$0xff] }
 0x113   :  { %1239 = vmatmul.mubr.f32.gmra.mrb[68].mxu0 %v8420_v10 }
 0x114   :  { %1243 = vmatprep.mubr.f32.mxu0 %v8196_v54  ;;  %v8440_v54 = vld [vmem:[#allocation2 + $0x200] sm:$0xff] }
 0x117   :  { %1244 = vmatmul.mubr.f32.gmra.mrb[70].mxu0 %v8424_v14 }
 0x118   :  { %1248 = vmatprep.mubr.f32.mxu0 %v8204_v61  ;;  %v8444_v61 = vld [vmem:[#allocation2 + $0x210] sm:$0xff] }
 0x11b   :  { %1249 = vmatmul.mubr.f32.gmra.mrb[72].mxu0 %v8428_v21 }
 0x11c   :  { %1253 = vmatprep.mubr.f32.mxu0 %v8212_v3  ;;  %v8448_v3 = vld [vmem:[#allocation2 + $0x218] sm:$0xff] }
 0x11f   :  { %1254 = vmatmul.mubr.f32.gmra.mrb[74].mxu0 %v8432_v60 }
 0x120   :  { %1258 = vmatprep.mubr.f32.mxu0 %v8220_v8  ;;  %v8452_v8 = vld [vmem:[#allocation2 + $0x228] sm:$0xff] }
 0x123   :  { %1259 = vmatmul.mubr.f32.gmra.mrb[76].mxu0 %v8436_v46 }
 0x124   :  { %1263 = vmatprep.mubr.f32.mxu0 %v8228_v13  ;;  %v8456_v13 = vld [vmem:[#allocation2 + $0x230] sm:$0xff] }
 0x127   :  { %1264 = vmatmul.mubr.f32.gmra.mrb[78].mxu0 %v8440_v54 }
 0x128   :  { %1268 = vmatprep.mubr.f32.mxu0 %v8236_v24  ;;  %v8460_v24 = vld [vmem:[#allocation2 + $0x240] sm:$0xff] }
 0x12b   :  { %1269 = vmatmul.mubr.f32.gmra.mrb[80].mxu0 %v8444_v61 }
 0x12c   :  { %1273 = vmatprep.mubr.f32.mxu0 %v8244_v37  ;;  %v8464_v37 = vld [vmem:[#allocation2 + $0x248] sm:$0xff] }
 0x12f   :  { %1274 = vmatmul.mubr.f32.gmra.mrb[82].mxu0 %v8448_v3 }
 0x130   :  { %1278 = vmatprep.mubr.f32.mxu0 %v8252_v49  ;;  %v8468_v49 = vld [vmem:[#allocation2 + $0x258] sm:$0xff] }
 0x133   :  { %1279 = vmatmul.mubr.f32.gmra.mrb[84].mxu0 %v8452_v8 }
 0x134   :  { %1283 = vmatprep.mubr.f32.mxu0 %v8260_v58  ;;  %v8472_v58 = vld [vmem:[#allocation2 + $0x260] sm:$0xff] }
 0x137   :  { %1284 = vmatmul.mubr.f32.gmra.mrb[86].mxu0 %v8456_v13 }
 0x138   :  { %1288 = vmatprep.mubr.f32.mxu0 %v8268_v17  ;;  %v8476_v17 = vld [vmem:[#allocation2 + $0x270] sm:$0xff] }
 0x13b   :  { %1289 = vmatmul.mubr.f32.gmra.mrb[88].mxu0 %v8460_v24 }
 0x13c   :  { %1293 = vmatprep.mubr.f32.mxu0 %v8276_v28  ;;  %v8480_v28 = vld [vmem:[#allocation2 + $0x278] sm:$0xff] }
 0x13f   :  { %1294 = vmatmul.mubr.f32.gmra.mrb[90].mxu0 %v8464_v37 }
 0x140   :  { %1298 = vmatprep.mubr.f32.mxu0 %v8283_v18  ;;  %v8484_v18 = vld [vmem:[#allocation2 + $0x288] sm:$0xff] }
 0x143   :  { %1299 = vmatmul.mubr.f32.gmra.mrb[92].mxu0 %v8468_v49 }
 0x144   :  { %1303 = vmatprep.mubr.f32.mxu0 %v8290_v11  ;;  %v8488_v11 = vld [vmem:[#allocation2 + $0x290] sm:$0xff] }
 0x147   :  { %1304 = vmatmul.mubr.f32.gmra.mrb[94].mxu0 %v8472_v58 }
 0x148   :  { %1308 = vmatprep.mubr.f32.mxu0 %v8298_v12  ;;  %v8492_v12 = vld [vmem:[#allocation2 + $0x2a0] sm:$0xff] }
 0x14b   :  { %1309 = vmatmul.mubr.f32.gmra.mrb[96].mxu0 %v8476_v17 }
 0x14c   :  { %1313 = vmatprep.mubr.f32.mxu0 %v8305_v20  ;;  %v8496_v20 = vld [vmem:[#allocation2 + $0x2a8] sm:$0xff] }
 0x14f   :  { %1314 = vmatmul.mubr.f32.gmra.mrb[98].mxu0 %v8480_v28 }
 0x150   :  { %1318 = vmatprep.mubr.f32.mxu0 %v8312_v16  ;;  %v8500_v16 = vld [vmem:[#allocation2 + $0x2b8] sm:$0xff] }
 0x153   :  { %1319 = vmatmul.mubr.f32.gmra.mrb[100].mxu0 %v8484_v18 }
 0x154   :  { %1323 = vmatprep.mubr.f32.mxu0 %v8319_v36  ;;  %v8504_v36 = vld [vmem:[#allocation2 + $0x2c0] sm:$0xff] }
 0x157   :  { %1324 = vmatmul.mubr.f32.gmra.mrb[102].mxu0 %v8488_v11 }
 0x158   :  { %1328 = vmatprep.mubr.f32.mxu0 %v8327_v22  ;;  %v8508_v22 = vld [vmem:[#allocation2 + $0x2d0] sm:$0xff] }
 0x15b   :  { %1329 = vmatmul.mubr.f32.gmra.mrb[104].mxu0 %v8492_v12 }
 0x15c   :  { %1333 = vmatprep.mubr.f32.mxu0 %v8334_v43  ;;  %v8512_v43 = vld [vmem:[#allocation2 + $0x2d8] sm:$0xff] }
 0x15f   :  { %1334 = vmatmul.mubr.f32.gmra.mrb[106].mxu0 %v8496_v20 }
 0x160   :  { %1338 = vmatprep.mubr.f32.mxu0 %v8341_v44  ;;  %v8516_v44 = vld [vmem:[#allocation2 + $0x2e8] sm:$0xff] }
 0x163   :  { %1339 = vmatmul.mubr.f32.gmra.mrb[108].mxu0 %v8500_v16 }
 0x164   :  { %1343 = vmatprep.mubr.f32.mxu0 %v8348_v27  ;;  %v8520_v27 = vld [vmem:[#allocation2 + $0x2f0] sm:$0xff] }
 0x165   :  { %10374 = vst [vmem:[#allocation17_spill] sm:$0xff] %v8520_v27 }
 0x167   :  { %1344 = vmatmul.mubr.f32.gmra.mrb[110].mxu0 %v8504_v36 }
 0x168   :  { %1348 = vmatprep.mubr.f32.mxu0 %v8356_v29  ;;  %v8524_v29 = vld [vmem:[#allocation2 + $0x300] sm:$0xff] }
 0x169   :  { %10375 = vst [vmem:[#allocation18_spill] sm:$0xff] %v8524_v29 }
 0x16b   :  { %1349 = vmatmul.mubr.f32.gmra.mrb[112].mxu0 %v8508_v22 }
 0x16c   :  { %1353 = vmatprep.mubr.f32.mxu0 %v8363_v5  ;;  %v8526_v5 = vld [vmem:[#allocation4 + $0xf0] sm:$0xff] }
 0x16d   :  { %10376 = vst [vmem:[#allocation19_spill] sm:$0xff] %v8526_v5  ;;  %387 = vst [vmem:[#allocation2 + $0x181] sm:$0xff] %v8526_v5  ;;  %v549_v5 = vld [vmem:[#allocation2 + $0x2] sm:$0xff] }
 0x16f   :  { %1354 = vmatmul.mubr.f32.gmra.mrb[114].mxu0 %v8512_v43 }
 0x170   :  { %1358 = vmatprep.mubr.f32.mxu0 %v8370_v19  ;;  %v8531_v19 = vld [vmem:[#allocation2 + $0x308] sm:$0xff] }
 0x171   :  { %10377 = vst [vmem:[#allocation20_spill] sm:$0xff] %v8531_v19 }
 0x173   :  { %1359 = vmatmul.mubr.f32.gmra.mrb[116].mxu0 %v8516_v44 }
 0x174   :  { %1363 = vmatprep.mubr.f32.mxu0 %v8377_v26  ;;  %v8538_v26 = vld [vmem:[#allocation2 + $0x318] sm:$0xff] }
 0x175   :  { %10379 = vst [vmem:[#allocation22_spill] sm:$0xff] %v8538_v26 }
 0x177   :  { %1364 = vmatmul.mubr.f32.gmra.mrb[118].mxu0 %v8520_v27  ;;  %v195_v27 = vld [vmem:[#allocation7 + $0x228] sm:$0xff] }
 0x178   :  { %1368 = vmatprep.mubr.f32.mxu0 %v8385_v53  ;;  %v8542_v53 = vld [vmem:[#allocation2 + $0x320] sm:$0xff] }
 0x179   :  { %10380 = vst [vmem:[#allocation23_spill] sm:$0xff] %v8542_v53 }
 0x17b   :  { %1369 = vmatmul.mubr.f32.gmra.mrb[120].mxu0 %v8524_v29  ;;  %v192_v29 = vld [vmem:[#allocation7 + $0x210] sm:$0xff] }
 0x17c   :  { %1373 = vmatprep.mubr.f32.mxu0 %v8392_v57  ;;  %v191_v57 = vld [vmem:[#allocation7 + $0x208] sm:$0xff] }
 0x17d   :  { %v6457_v0 = vpack.c.bf16 %v191_v57, %v190_v34  ;;  %v196_v34 = vld [vmem:[#allocation7 + $0x230] sm:$0xff]  ;;  %v8564_v57 = vld [vmem:[#allocation2 + $0x3a] sm:$0xff] }
 0x17f   :  { %1374 = vmatmul.mubr.f32.gmra.mrb[122].mxu0 %v8531_v19  ;;  %v193_v19 = vld [vmem:[#allocation7 + $0x218] sm:$0xff] }
 0x180   :  { %1378 = vmatprep.mubr.f32.mxu0 %v8399_v23  ;;  %v550_v23 = vld [vmem:[#allocation2 + $0xa] sm:$0xff] }
 0x183   :  { %1379 = vmatmul.mubr.f32.gmra.mrb[124].mxu0 %v8538_v26  ;;  %v6460_v26 = vpack.c.bf16 %v193_v19, %v192_v29  ;;  %v198_v19 = vld [vmem:[#allocation7 + $0x240] sm:$0xff] }
 0x184   :  { %1383 = vmatprep.mubr.f32.mxu0 %v8406_v52  ;;  %v194_v52 = vld [vmem:[#allocation7 + $0x220] sm:$0xff] }
 0x187   :  { %1384 = vmatmul.mubr.f32.gmra.mrb[126].mxu0 %v8542_v53  ;;  %v8549_v53 = vld [vmem:[#allocation2 + $0x1a] sm:$0xff] }
 0x188   :  { %1453 = vmatprep.mubr.f32.mxu0 %v8201_v55  ;;  %v6463_v55 = vpack.c.bf16 %v195_v27, %v194_v52  ;;  %v8559_v27 = vld [vmem:[#allocation2 + $0x32] sm:$0xff]  ;;  %v202_v52 = vld [vmem:[#allocation7 + $0x260] sm:$0xff] }
 0x18b   :  { %1454 = vmatmul.mubr.f32.vlgmr.msra.gmra.mrb[0].mxu0 %v549_v5  ;;  %v197_v5 = vld [vmem:[#allocation7 + $0x238] sm:$0xff] }
 0x18c   :  { %6458 = vmatpush1.bf16.msra.mxu0 %v6457_v0  ;;  %1458 = vmatprep.mubr.f32.mxu0 %v8209_v1  ;;  %v8554_v1 = vld [vmem:[#allocation2 + $0x22] sm:$0xff]  ;;  %v6466_v29 = vpack.c.bf16 %v197_v5, %v196_v34  ;;  %v204_v5 = vld [vmem:[#allocation7 + $0x270] sm:$0xff] }
 0x18d   :  { %6459 = vmatprep.subr.bf16.mxu0 %v10373_v2 }
 0x18f   :  { %1459 = vmatmul.mubr.f32.gmra.mrb[2].mxu0 %v550_v23 }
 0x190   :  { %1463 = vmatprep.mubr.f32.mxu0 %v8217_v4  ;;  %6461 = vmatpush1.bf16.msra.mxu0 %v6460_v26  ;;  %v199_v4 = vld [vmem:[#allocation7 + $0x248] sm:$0xff]  ;;  %v200_v26 = vld [vmem:[#allocation7 + $0x250] sm:$0xff] }
 0x191   :  { %6462 = vmatprep.subr.bf16.mxu0 %v10373_v2  ;;  %v6469_v0 = vpack.c.bf16 %v199_v4, %v198_v19  ;;  %v206_v4 = vld [vmem:[#allocation7 + $0x280] sm:$0xff] }
 0x193   :  { %1464 = vmatmul.mubr.f32.gmra.mrb[4].mxu0 %v8549_v53 }
 0x194   :  { %1468 = vmatprep.mubr.f32.mxu0 %v8225_v9  ;;  %6464 = vmatpush1.bf16.msra.mxu0 %v6463_v55  ;;  %v201_v9 = vld [vmem:[#allocation7 + $0x258] sm:$0xff]  ;;  %v8569_v55 = vld [vmem:[#allocation2 + $0x4a] sm:$0xff] }
 0x195   :  { %6465 = vmatprep.subr.bf16.mxu0 %v10373_v2  ;;  %v6472_v23 = vpack.c.bf16 %v201_v9, %v200_v26  ;;  %v208_v9 = vld [vmem:[#allocation7 + $0x290] sm:$0xff] }
 0x197   :  { %1469 = vmatmul.mubr.f32.gmra.mrb[6].mxu0 %v8554_v1 }
 0x198   :  { %1473 = vmatprep.mubr.f32.mxu0 %v8233_v15  ;;  %6467 = vmatpush1.bf16.msra.mxu0 %v6466_v29  ;;  %v203_v15 = vld [vmem:[#allocation7 + $0x268] sm:$0xff]  ;;  %v8574_v29 = vld [vmem:[#allocation2 + $0x52] sm:$0xff] }
 0x199   :  { %6468 = vmatprep.subr.bf16.mxu0 %v10373_v2  ;;  %v6475_v34 = vpack.c.bf16 %v203_v15, %v202_v52  ;;  %v210_v15 = vld [vmem:[#allocation7 + $0x2a0] sm:$0xff] }
 0x19b   :  { %1474 = vmatmul.mubr.f32.gmra.mrb[8].mxu0 %v8559_v27 }
 0x19c   :  { %1478 = vmatprep.mubr.f32.mxu0 %v8241_v25  ;;  %6470 = vmatpush1.bf16.msra.mxu0 %v6469_v0  ;;  %v205_v25 = vld [vmem:[#allocation7 + $0x278] sm:$0xff]  ;;  %v8579_v0 = vld [vmem:[#allocation2 + $0x62] sm:$0xff] }
 0x19d   :  { %6471 = vmatprep.subr.bf16.mxu0 %v10373_v2  ;;  %v6478_v19 = vpack.c.bf16 %v205_v25, %v204_v5  ;;  %v212_v25 = vld [vmem:[#allocation7 + $0x2b0] sm:$0xff] }
 0x19f   :  { %1479 = vmatmul.mubr.f32.gmra.mrb[10].mxu0 %v8564_v57 }
 0x1a0   :  { %1483 = vmatprep.mubr.f32.mxu0 %v8249_v41  ;;  %6473 = vmatpush1.bf16.msra.mxu0 %v6472_v23  ;;  %v207_v41 = vld [vmem:[#allocation7 + $0x288] sm:$0xff] }
 0x1a1   :  { %6474 = vmatprep.subr.bf16.mxu0 %v10373_v2  ;;  %v6481_v26 = vpack.c.bf16 %v207_v41, %v206_v4  ;;  %v8584_v23 = vld [vmem:[#allocation2 + $0x6a] sm:$0xff]  ;;  %v8603_v4 = vld [vmem:[#allocation2 + $0x9a] sm:$0xff] }
 0x1a2   :  { %v8608_v41 = vld [vmem:[#allocation2 + $0xaa] sm:$0xff] }
 0x1a3   :  { %1484 = vmatmul.mubr.f32.gmra.mrb[12].mxu0 %v8569_v55 }
 0x1a4   :  { %1488 = vmatprep.mubr.f32.mxu0 %v8257_v50  ;;  %6476 = vmatpush1.bf16.msra.mxu0 %v6475_v34  ;;  %v209_v50 = vld [vmem:[#allocation7 + $0x298] sm:$0xff] }
 0x1a5   :  { %6477 = vmatprep.subr.bf16.mxu0 %v10373_v2  ;;  %v6484_v52 = vpack.c.bf16 %v209_v50, %v208_v9  ;;  %v8589_v34 = vld [vmem:[#allocation2 + $0x7a] sm:$0xff]  ;;  %v215_v9 = vld [vmem:[#allocation7 + $0x2c8] sm:$0xff] }
 0x1a7   :  { %1489 = vmatmul.mubr.f32.gmra.mrb[14].mxu0 %v8574_v29 }
 0x1a8   :  { %1493 = vmatprep.mubr.f32.mxu0 %v8265_v59  ;;  %6479 = vmatpush1.bf16.msra.mxu0 %v6478_v19  ;;  %v211_v59 = vld [vmem:[#allocation7 + $0x2a8] sm:$0xff]  ;;  %v213_v19 = vld [vmem:[#allocation7 + $0x2b8] sm:$0xff] }
 0x1a9   :  { %6480 = vmatprep.subr.bf16.mxu0 %v10373_v2  ;;  %v6487_v5 = vpack.c.bf16 %v211_v59, %v210_v15  ;;  %v217_v15 = vld [vmem:[#allocation7 + $0x2d8] sm:$0xff] }
 0x1ab   :  { %1494 = vmatmul.mubr.f32.gmra.mrb[16].mxu0 %v8579_v0 }
 0x1ac   :  { %1498 = vmatprep.mubr.f32.mxu0 %v8273_v62  ;;  %6482 = vmatpush1.bf16.msra.mxu0 %v6481_v26  ;;  %v8594_v62 = vld [vmem:[#allocation2 + $0x82] sm:$0xff] }
 0x1ad   :  { %6483 = vmatprep.subr.bf16.mxu0 %v10373_v2  ;;  %v214_v26 = vld [vmem:[#allocation7 + $0x2c0] sm:$0xff] }
 0x1ae   :  { %v6493_v50 = vpack.c.bf16 %v215_v9, %v214_v26  ;;  %v8659_v26 = vld [vmem:[#allocation2 + $0x13a] sm:$0xff]  ;;  %v8663_v9 = vld [vmem:[#allocation2 + $0x142] sm:$0xff] }
 0x1af   :  { %1499 = vmatmul.mubr.f32.gmra.mrb[18].mxu0 %v8584_v23 }
 0x1b0   :  { %1503 = vmatprep.mubr.f32.mxu0 %v8281_v63  ;;  %6485 = vmatpush1.bf16.msra.mxu0 %v6484_v52  ;;  %v8599_v63 = vld [vmem:[#allocation2 + $0x92] sm:$0xff] }
 0x1b1   :  { %6486 = vmatprep.subr.bf16.mxu0 %v10373_v2  ;;  %v216_v52 = vld [vmem:[#allocation7 + $0x2d0] sm:$0xff] }
 0x1b2   :  { %v6496_v59 = vpack.c.bf16 %v217_v15, %v216_v52  ;;  %v8669_v52 = vld [vmem:[#allocation4 + $0x1f0] sm:$0xff] }
 0x1b3   :  { %1504 = vmatmul.mubr.f32.gmra.mrb[20].mxu0 %v8589_v34  ;;  %419 = vst [vmem:[#allocation2 + $0x331] sm:$0xff] %v8669_v52  ;;  %v220_v15 = vld [vmem:[#allocation7 + $0x2f0] sm:$0xff] }
 0x1b4   :  { %1508 = vmatprep.mubr.f32.mxu0 %v8288_v7  ;;  %6488 = vmatpush1.bf16.msra.mxu0 %v6487_v5  ;;  %v6490_v7 = vpack.c.bf16 %v213_v19, %v212_v25  ;;  %v218_v5 = vld [vmem:[#allocation7 + $0x2e0] sm:$0xff]  ;;  %v219_v25 = vld [vmem:[#allocation7 + $0x2e8] sm:$0xff] }
 0x1b5   :  { %6489 = vmatprep.subr.bf16.mxu0 %v10373_v2  ;;  %v10381_v19 = vld [vmem:[#allocation14_spill] sm:$0xff] }
 0x1b6   :  { %10384 = vst [vmem:[#allocation14_spill] sm:$0xff] %v8669_v52  ;;  %v8801_v52 = vld [vmem:[#allocation2 + $0x31a] sm:$0xff] }
 0x1b7   :  { %1509 = vmatmul.mubr.f32.gmra.mrb[22].mxu0 %v8594_v62  ;;  %10397 = vst [vmem:[#allocation24_spill] sm:$0xff] %v8801_v52 }
 0x1b8   :  { %1513 = vmatprep.mubr.f32.mxu0 %v8296_v30  ;;  %6491 = vmatpush1.bf16.msra.mxu0 %v6490_v7  ;;  %v8612_v30 = vld [vmem:[#allocation2 + $0xb2] sm:$0xff]  ;;  %v6499_v7 = vpack.c.bf16 %v219_v25, %v218_v5  ;;  %v8674_v5 = vld [vmem:[#allocation2 + $0x15a] sm:$0xff] }
 0x1b9   :  { %6492 = vmatprep.subr.bf16.mxu0 %v10373_v2 }
 0x1bb   :  { %1514 = vmatmul.mubr.f32.gmra.mrb[24].mxu0 %v8599_v63 }
 0x1bc   :  { %1518 = vmatprep.mubr.f32.mxu0 %v8303_v31  ;;  %v8616_v31 = vld [vmem:[#allocation2 + $0xc2] sm:$0xff]  ;;  %6494 = vmatpush1.bf16.msra.mxu0 %v6493_v50  ;;  %v8667_v50 = vld [vmem:[#allocation2 + $0x152] sm:$0xff] }
 0x1bd   :  { %6495 = vmatprep.subr.bf16.mxu0 %v10373_v2 }
 0x1bf   :  { %1519 = vmatmul.mubr.f32.gmra.mrb[26].mxu0 %v8603_v4 }
 0x1c0   :  { %1523 = vmatprep.mubr.f32.mxu0 %v8310_v32  ;;  %v8620_v32 = vld [vmem:[#allocation2 + $0xca] sm:$0xff]  ;;  %6497 = vmatpush1.bf16.msra.mxu0 %v6496_v59  ;;  %v221_v59 = vld [vmem:[#allocation7 + $0x2f8] sm:$0xff] }
 0x1c1   :  { %6498 = vmatprep.subr.bf16.mxu0 %v10373_v2  ;;  %v6502_v25 = vpack.c.bf16 %v221_v59, %v220_v15  ;;  %v582_v15 = vld [vmem:[#allocation2 + $0x1ba] sm:$0xff]  ;;  %v8690_v59 = vld [vmem:[#allocation2 + $0x1ca] sm:$0xff] }
 0x1c3   :  { %1524 = vmatmul.mubr.f32.gmra.mrb[28].mxu0 %v8608_v41 }
 0x1c4   :  { %1528 = vmatprep.mubr.f32.mxu0 %v8317_v33  ;;  %v8625_v33 = vld [vmem:[#allocation2 + $0xda] sm:$0xff]  ;;  %6500 = vmatpush1.bf16.msra.mxu0 %v6499_v7 }
 0x1c5   :  { %6501 = vmatprep.subr.bf16.mxu0 %v10373_v2  ;;  %v8676_v7 = vld [vmem:[#allocation4 + $0x1f8] sm:$0xff] }
 0x1c6   :  { %420 = vst [vmem:[#allocation2 + $0x339] sm:$0xff] %v8676_v7 }
 0x1c7   :  { %1529 = vmatmul.mubr.f32.gmra.mrb[30].mxu0 %v8612_v30 }
 0x1c8   :  { %1533 = vmatprep.mubr.f32.mxu0 %v8325_v35  ;;  %v8629_v35 = vld [vmem:[#allocation2 + $0xe2] sm:$0xff]  ;;  %6503 = vmatpush1.bf16.msra.mxu0 %v6502_v25  ;;  %v8694_v25 = vld [vmem:[#allocation2 + $0x1d2] sm:$0xff] }
 0x1c9   :  { %6504 = vmatprep.subr.bf16.mxu0 %v10373_v2 }
 0x1cb   :  { %1534 = vmatmul.mubr.f32.gmra.mrb[32].mxu0 %v8616_v31 }
 0x1cc   :  { %1538 = vmatprep.mubr.f32.mxu0 %v8332_v38  ;;  %v8633_v38 = vld [vmem:[#allocation2 + $0xf2] sm:$0xff] }
 0x1cf   :  { %1539 = vmatmul.mubr.f32.gmra.mrb[34].mxu0 %v8620_v32 }
 0x1d0   :  { %1543 = vmatprep.mubr.f32.mxu0 %v8339_v39  ;;  %v8637_v39 = vld [vmem:[#allocation2 + $0xfa] sm:$0xff] }
 0x1d3   :  { %1544 = vmatmul.mubr.f32.gmra.mrb[36].mxu0 %v8625_v33 }
 0x1d4   :  { %1548 = vmatprep.mubr.f32.mxu0 %v8346_v40  ;;  %v8642_v40 = vld [vmem:[#allocation2 + $0x10a] sm:$0xff] }
 0x1d7   :  { %1549 = vmatmul.mubr.f32.gmra.mrb[38].mxu0 %v8629_v35 }
 0x1d8   :  { %1553 = vmatprep.mubr.f32.mxu0 %v8354_v42  ;;  %v8646_v42 = vld [vmem:[#allocation2 + $0x112] sm:$0xff] }
 0x1db   :  { %1554 = vmatmul.mubr.f32.gmra.mrb[40].mxu0 %v8633_v38 }
 0x1dc   :  { %1558 = vmatprep.mubr.f32.mxu0 %v8361_v45  ;;  %v8650_v45 = vld [vmem:[#allocation2 + $0x122] sm:$0xff] }
 0x1df   :  { %1559 = vmatmul.mubr.f32.gmra.mrb[42].mxu0 %v8637_v39 }
 0x1e0   :  { %1563 = vmatprep.mubr.f32.mxu0 %v8368_v47  ;;  %v8654_v47 = vld [vmem:[#allocation2 + $0x12a] sm:$0xff] }
 0x1e3   :  { %1564 = vmatmul.mubr.f32.gmra.mrb[44].mxu0 %v8642_v40 }
 0x1e4   :  { %1568 = vmatprep.mubr.f32.mxu0 %v8375_v48  ;;  %v10382_v48 = vld [vmem:[#allocation15_spill] sm:$0xff] }
 0x1e5   :  { %10385 = vst [vmem:[#allocation15_spill] sm:$0xff] %v8676_v7  ;;  %v8798_v7 = vld [vmem:[#allocation2 + $0x30a] sm:$0xff] }
 0x1e7   :  { %1569 = vmatmul.mubr.f32.gmra.mrb[46].mxu0 %v8646_v42 }
 0x1e8   :  { %1573 = vmatprep.mubr.f32.mxu0 %v8383_v51  ;;  %v10383_v51 = vld [vmem:[#allocation16_spill] sm:$0xff] }
 0x1eb   :  { %1574 = vmatmul.mubr.f32.gmra.mrb[48].mxu0 %v8650_v45 }
 0x1ec   :  { %1578 = vmatprep.mubr.f32.mxu0 %v10381_v19  ;;  %v643_v19 = vld [vmem:[#allocation2 + $0x180] sm:$0xff] }
 0x1ef   :  { %1579 = vmatmul.mubr.f32.gmra.mrb[50].mxu0 %v8654_v47 }
 0x1f0   :  { %1583 = vmatprep.mubr.f32.mxu0 %v10382_v48  ;;  %v644_v48 = vld [vmem:[#allocation2 + $0x188] sm:$0xff] }
 0x1f3   :  { %1584 = vmatmul.mubr.f32.gmra.mrb[52].mxu0 %v8659_v26 }
 0x1f4   :  { %1588 = vmatprep.mubr.f32.mxu0 %v10383_v51  ;;  %v581_v51 = vld [vmem:[#allocation2 + $0x1b2] sm:$0xff] }
 0x1f7   :  { %1589 = vmatmul.mubr.f32.gmra.mrb[54].mxu0 %v8663_v9 }
 0x1f8   :  { %1593 = vmatprep.mubr.f32.mxu0 %v8412_v56  ;;  %v8681_v56 = vld [vmem:[#allocation2 + $0x16a] sm:$0xff] }
 0x1fb   :  { %1594 = vmatmul.mubr.f32.gmra.mrb[56].mxu0 %v8667_v50 }
 0x1fc   :  { %1598 = vmatprep.mubr.f32.mxu0 %v8416_v6  ;;  %v8684_v6 = vld [vmem:[#allocation2 + $0x172] sm:$0xff] }
 0x1ff   :  { %1599 = vmatmul.mubr.f32.gmra.mrb[58].mxu0 %v8674_v5 }
 0x200   :  { %1603 = vmatprep.mubr.f32.mxu0 %v643_v19  ;;  %v8782_v19 = vld [vmem:[#allocation2 + $0x2da] sm:$0xff] }
 0x203   :  { %1604 = vmatmul.mubr.f32.gmra.mrb[60].mxu0 %v8681_v56 }
 0x204   :  { %1608 = vmatprep.mubr.f32.mxu0 %v644_v48  ;;  %v8786_v48 = vld [vmem:[#allocation2 + $0x2ea] sm:$0xff] }
 0x207   :  { %1609 = vmatmul.mubr.f32.gmra.mrb[62].mxu0 %v8684_v6 }
 0x208   :  { %1613 = vmatprep.mubr.f32.mxu0 %v8420_v10  ;;  %v8698_v10 = vld [vmem:[#allocation2 + $0x1e2] sm:$0xff] }
 0x20b   :  { %1614 = vmatmul.mubr.f32.gmra.mrb[64].mxu0 %v581_v51  ;;  %v8790_v51 = vld [vmem:[#allocation2 + $0x2f2] sm:$0xff] }
 0x20c   :  { %1618 = vmatprep.mubr.f32.mxu0 %v8424_v14  ;;  %v8702_v14 = vld [vmem:[#allocation2 + $0x1ea] sm:$0xff] }
 0x20f   :  { %1619 = vmatmul.mubr.f32.gmra.mrb[66].mxu0 %v582_v15  ;;  %v8794_v15 = vld [vmem:[#allocation2 + $0x302] sm:$0xff] }
 0x210   :  { %1623 = vmatprep.mubr.f32.mxu0 %v8428_v21  ;;  %v8706_v21 = vld [vmem:[#allocation2 + $0x1fa] sm:$0xff] }
 0x213   :  { %1624 = vmatmul.mubr.f32.gmra.mrb[68].mxu0 %v8690_v59 }
 0x214   :  { %1628 = vmatprep.mubr.f32.mxu0 %v8432_v60  ;;  %v8710_v60 = vld [vmem:[#allocation2 + $0x202] sm:$0xff] }
 0x217   :  { %1629 = vmatmul.mubr.f32.gmra.mrb[70].mxu0 %v8694_v25 }
 0x218   :  { %1633 = vmatprep.mubr.f32.mxu0 %v8436_v46  ;;  %v8714_v46 = vld [vmem:[#allocation2 + $0x212] sm:$0xff] }
 0x21b   :  { %1634 = vmatmul.mubr.f32.gmra.mrb[72].mxu0 %v8698_v10 }
 0x21c   :  { %1638 = vmatprep.mubr.f32.mxu0 %v8440_v54  ;;  %v8718_v54 = vld [vmem:[#allocation2 + $0x21a] sm:$0xff] }
 0x21f   :  { %1639 = vmatmul.mubr.f32.gmra.mrb[74].mxu0 %v8702_v14 }
 0x220   :  { %1643 = vmatprep.mubr.f32.mxu0 %v8444_v61  ;;  %v8722_v61 = vld [vmem:[#allocation2 + $0x22a] sm:$0xff] }
 0x223   :  { %1644 = vmatmul.mubr.f32.gmra.mrb[76].mxu0 %v8706_v21 }
 0x224   :  { %1648 = vmatprep.mubr.f32.mxu0 %v8448_v3  ;;  %v8726_v3 = vld [vmem:[#allocation2 + $0x232] sm:$0xff] }
 0x227   :  { %1649 = vmatmul.mubr.f32.gmra.mrb[78].mxu0 %v8710_v60 }
 0x228   :  { %1653 = vmatprep.mubr.f32.mxu0 %v8452_v8  ;;  %v8730_v8 = vld [vmem:[#allocation2 + $0x242] sm:$0xff] }
 0x22b   :  { %1654 = vmatmul.mubr.f32.gmra.mrb[80].mxu0 %v8714_v46 }
 0x22c   :  { %1658 = vmatprep.mubr.f32.mxu0 %v8456_v13  ;;  %v8734_v13 = vld [vmem:[#allocation2 + $0x24a] sm:$0xff] }
 0x22f   :  { %1659 = vmatmul.mubr.f32.gmra.mrb[82].mxu0 %v8718_v54 }
 0x230   :  { %1663 = vmatprep.mubr.f32.mxu0 %v8460_v24  ;;  %v8738_v24 = vld [vmem:[#allocation2 + $0x25a] sm:$0xff] }
 0x233   :  { %1664 = vmatmul.mubr.f32.gmra.mrb[84].mxu0 %v8722_v61 }
 0x234   :  { %1668 = vmatprep.mubr.f32.mxu0 %v8464_v37  ;;  %v8742_v37 = vld [vmem:[#allocation2 + $0x262] sm:$0xff] }
 0x237   :  { %1669 = vmatmul.mubr.f32.gmra.mrb[86].mxu0 %v8726_v3 }
 0x238   :  { %1673 = vmatprep.mubr.f32.mxu0 %v8468_v49  ;;  %v8746_v49 = vld [vmem:[#allocation2 + $0x272] sm:$0xff] }
 0x23b   :  { %1674 = vmatmul.mubr.f32.gmra.mrb[88].mxu0 %v8730_v8 }
 0x23c   :  { %1678 = vmatprep.mubr.f32.mxu0 %v8472_v58  ;;  %v8750_v58 = vld [vmem:[#allocation2 + $0x27a] sm:$0xff] }
 0x23f   :  { %1679 = vmatmul.mubr.f32.gmra.mrb[90].mxu0 %v8734_v13 }
 0x240   :  { %1683 = vmatprep.mubr.f32.mxu0 %v8476_v17  ;;  %v8754_v17 = vld [vmem:[#allocation2 + $0x28a] sm:$0xff] }
 0x243   :  { %1684 = vmatmul.mubr.f32.gmra.mrb[92].mxu0 %v8738_v24 }
 0x244   :  { %1688 = vmatprep.mubr.f32.mxu0 %v8480_v28  ;;  %v8758_v28 = vld [vmem:[#allocation2 + $0x292] sm:$0xff] }
 0x247   :  { %1689 = vmatmul.mubr.f32.gmra.mrb[94].mxu0 %v8742_v37 }
 0x248   :  { %1693 = vmatprep.mubr.f32.mxu0 %v8484_v18  ;;  %v8762_v18 = vld [vmem:[#allocation2 + $0x2a2] sm:$0xff] }
 0x24b   :  { %1694 = vmatmul.mubr.f32.gmra.mrb[96].mxu0 %v8746_v49 }
 0x24c   :  { %1698 = vmatprep.mubr.f32.mxu0 %v8488_v11  ;;  %v8766_v11 = vld [vmem:[#allocation2 + $0x2aa] sm:$0xff] }
 0x24f   :  { %1699 = vmatmul.mubr.f32.gmra.mrb[98].mxu0 %v8750_v58 }
 0x250   :  { %1703 = vmatprep.mubr.f32.mxu0 %v8492_v12  ;;  %v8770_v12 = vld [vmem:[#allocation2 + $0x2ba] sm:$0xff] }
 0x253   :  { %1704 = vmatmul.mubr.f32.gmra.mrb[100].mxu0 %v8754_v17 }
 0x254   :  { %1708 = vmatprep.mubr.f32.mxu0 %v8496_v20  ;;  %v8774_v20 = vld [vmem:[#allocation2 + $0x2c2] sm:$0xff] }
 0x257   :  { %1709 = vmatmul.mubr.f32.gmra.mrb[102].mxu0 %v8758_v28 }
 0x258   :  { %1713 = vmatprep.mubr.f32.mxu0 %v8500_v16  ;;  %v8778_v16 = vld [vmem:[#allocation2 + $0x2d2] sm:$0xff] }
 0x259   :  { %10386 = vst [vmem:[#allocation16_spill] sm:$0xff] %v8778_v16 }
 0x25b   :  { %1714 = vmatmul.mubr.f32.gmra.mrb[104].mxu0 %v8762_v18 }
 0x25c   :  { %1718 = vmatprep.mubr.f32.mxu0 %v8504_v36  ;;  %v10387_v36 = vld [vmem:[#allocation17_spill] sm:$0xff] }
 0x25d   :  { %10388 = vst [vmem:[#allocation17_spill] sm:$0xff] %v8782_v19 }
 0x25f   :  { %1719 = vmatmul.mubr.f32.gmra.mrb[106].mxu0 %v8766_v11 }
 0x260   :  { %1723 = vmatprep.mubr.f32.mxu0 %v8508_v22  ;;  %v10389_v22 = vld [vmem:[#allocation18_spill] sm:$0xff] }
 0x261   :  { %10390 = vst [vmem:[#allocation18_spill] sm:$0xff] %v8786_v48 }
 0x263   :  { %1724 = vmatmul.mubr.f32.gmra.mrb[108].mxu0 %v8770_v12 }
 0x264   :  { %1728 = vmatprep.mubr.f32.mxu0 %v8512_v43  ;;  %v10391_v43 = vld [vmem:[#allocation20_spill] sm:$0xff] }
 0x265   :  { %10392 = vst [vmem:[#allocation20_spill] sm:$0xff] %v8790_v51 }
 0x267   :  { %1729 = vmatmul.mubr.f32.gmra.mrb[110].mxu0 %v8774_v20 }
 0x268   :  { %1733 = vmatprep.mubr.f32.mxu0 %v8516_v44  ;;  %v10393_v44 = vld [vmem:[#allocation22_spill] sm:$0xff] }
 0x269   :  { %10394 = vst [vmem:[#allocation22_spill] sm:$0xff] %v8794_v15 }
 0x26b   :  { %1734 = vmatmul.mubr.f32.gmra.mrb[112].mxu0 %v8778_v16  ;;  %v225_v16 = vld [vmem:[#allocation7 + $0x318] sm:$0xff] }
 0x26c   :  { %1738 = vmatprep.mubr.f32.mxu0 %v10387_v36  ;;  %v10395_v36 = vld [vmem:[#allocation23_spill] sm:$0xff] }
 0x26d   :  { %10396 = vst [vmem:[#allocation23_spill] sm:$0xff] %v8798_v7 }
 0x26f   :  { %1739 = vmatmul.mubr.f32.gmra.mrb[114].mxu0 %v8782_v19  ;;  %v224_v19 = vld [vmem:[#allocation7 + $0x310] sm:$0xff] }
 0x270   :  { %1743 = vmatprep.mubr.f32.mxu0 %v10389_v22  ;;  %v675_v22 = vld [vmem:[#allocation2 + $0x330] sm:$0xff] }
 0x273   :  { %1744 = vmatmul.mubr.f32.gmra.mrb[116].mxu0 %v8786_v48  ;;  %v223_v48 = vld [vmem:[#allocation7 + $0x308] sm:$0xff] }
 0x274   :  { %1748 = vmatprep.mubr.f32.mxu0 %v10391_v43  ;;  %v676_v43 = vld [vmem:[#allocation2 + $0x338] sm:$0xff] }
 0x277   :  { %1749 = vmatmul.mubr.f32.gmra.mrb[118].mxu0 %v8790_v51  ;;  %v8804_v51 = vld [vmem:[#allocation2 + $0x322] sm:$0xff] }
 0x278   :  { %1753 = vmatprep.mubr.f32.mxu0 %v10393_v44  ;;  %10398 = vst [vmem:[#allocation25_spill] sm:$0xff] %v8804_v51  ;;  %v222_v44 = vld [vmem:[#allocation7 + $0x300] sm:$0xff] }
 0x27b   :  { %1754 = vmatmul.mubr.f32.gmra.mrb[120].mxu0 %v8794_v15  ;;  %v6505_v15 = vpack.c.bf16 %v223_v48, %v222_v44  ;;  %v228_v48 = vld [vmem:[#allocation7 + $0x330] sm:$0xff]  ;;  %v229_v44 = vld [vmem:[#allocation7 + $0x338] sm:$0xff] }
 0x27c   :  { %1758 = vmatprep.mubr.f32.mxu0 %v10395_v36  ;;  %v677_v36 = vld [vmem:[#allocation2 + $0x19] sm:$0xff] }
 0x27f   :  { %1759 = vmatmul.mubr.f32.gmra.mrb[122].mxu0 %v8798_v7  ;;  %v6508_v7 = vpack.c.bf16 %v225_v16, %v224_v19  ;;  %v6514_v16 = vpack.c.bf16 %v229_v44, %v228_v48  ;;  %v230_v19 = vld [vmem:[#allocation7 + $0x340] sm:$0xff]  ;;  %v236_v44 = vld [vmem:[#allocation7 + $0x370] sm:$0xff] }
 0x280   :  { %1763 = vmatprep.mubr.f32.mxu0 %v675_v22  ;;  %v678_v22 = vld [vmem:[#allocation2 + $0x21] sm:$0xff] }
 0x283   :  { %1764 = vmatmul.mubr.f32.gmra.mrb[124].mxu0 %v8801_v52  ;;  %v227_v52 = vld [vmem:[#allocation7 + $0x328] sm:$0xff] }
 0x284   :  { %1768 = vmatprep.mubr.f32.mxu0 %v676_v43  ;;  %v226_v43 = vld [vmem:[#allocation7 + $0x320] sm:$0xff] }
 0x287   :  { %1769 = vmatmul.mubr.f32.gmra.mrb[126].mxu0 %v8804_v51  ;;  %v8811_v51 = vld [vmem:[#allocation2 + $0x31] sm:$0xff] }
 0x288   :  { %1838 = vmatprep.mubr.f32.mxu0 %v8549_v53  ;;  %v6511_v53 = vpack.c.bf16 %v227_v52, %v226_v43  ;;  %v8821_v52 = vld [vmem:[#allocation2 + $0x49] sm:$0xff]  ;;  %v234_v43 = vld [vmem:[#allocation7 + $0x360] sm:$0xff] }
 0x28b   :  { %1839 = vmatmul.mubr.f32.vlgmr.msra.gmra.mrb[0].mxu0 %v677_v36  ;;  %v8826_v36 = vld [vmem:[#allocation2 + $0x51] sm:$0xff] }
 0x28c   :  { %6506 = vmatpush1.bf16.msra.mxu0 %v6505_v15  ;;  %1843 = vmatprep.mubr.f32.mxu0 %v8554_v1  ;;  %v8816_v1 = vld [vmem:[#allocation2 + $0x39] sm:$0xff]  ;;  %v232_v15 = vld [vmem:[#allocation7 + $0x350] sm:$0xff] }
 0x28d   :  { %6507 = vmatprep.subr.bf16.mxu0 %v10373_v2 }
 0x28f   :  { %1844 = vmatmul.mubr.f32.gmra.mrb[2].mxu0 %v678_v22 }
 0x290   :  { %1848 = vmatprep.mubr.f32.mxu0 %v8559_v27  ;;  %6509 = vmatpush1.bf16.msra.mxu0 %v6508_v7  ;;  %v231_v27 = vld [vmem:[#allocation7 + $0x348] sm:$0xff] }
 0x291   :  { %6510 = vmatprep.subr.bf16.mxu0 %v10373_v2  ;;  %v6517_v7 = vpack.c.bf16 %v231_v27, %v230_v19  ;;  %v238_v27 = vld [vmem:[#allocation7 + $0x380] sm:$0xff] }
 0x293   :  { %1849 = vmatmul.mubr.f32.gmra.mrb[4].mxu0 %v8811_v51 }
 0x294   :  { %1853 = vmatprep.mubr.f32.mxu0 %v8564_v57  ;;  %6512 = vmatpush1.bf16.msra.mxu0 %v6511_v53  ;;  %v233_v57 = vld [vmem:[#allocation7 + $0x358] sm:$0xff]  ;;  %v8831_v53 = vld [vmem:[#allocation2 + $0x61] sm:$0xff] }
 0x295   :  { %6513 = vmatprep.subr.bf16.mxu0 %v10373_v2  ;;  %v6520_v22 = vpack.c.bf16 %v233_v57, %v232_v15  ;;  %v240_v57 = vld [vmem:[#allocation7 + $0x390] sm:$0xff] }
 0x297   :  { %1854 = vmatmul.mubr.f32.gmra.mrb[6].mxu0 %v8816_v1 }
 0x298   :  { %1858 = vmatprep.mubr.f32.mxu0 %v8569_v55  ;;  %6515 = vmatpush1.bf16.msra.mxu0 %v6514_v16  ;;  %v235_v55 = vld [vmem:[#allocation7 + $0x368] sm:$0xff] }
 0x299   :  { %6516 = vmatprep.subr.bf16.mxu0 %v10373_v2  ;;  %v6523_v48 = vpack.c.bf16 %v235_v55, %v234_v43  ;;  %v8836_v16 = vld [vmem:[#allocation2 + $0x69] sm:$0xff]  ;;  %v242_v55 = vld [vmem:[#allocation7 + $0x3a0] sm:$0xff] }
 0x29b   :  { %1859 = vmatmul.mubr.f32.gmra.mrb[8].mxu0 %v8821_v52 }
 0x29c   :  { %1863 = vmatprep.mubr.f32.mxu0 %v8574_v29  ;;  %6518 = vmatpush1.bf16.msra.mxu0 %v6517_v7  ;;  %v237_v29 = vld [vmem:[#allocation7 + $0x378] sm:$0xff] }
 0x29d   :  { %6519 = vmatprep.subr.bf16.mxu0 %v10373_v2  ;;  %v6526_v19 = vpack.c.bf16 %v237_v29, %v236_v44  ;;  %v8841_v7 = vld [vmem:[#allocation2 + $0x79] sm:$0xff]  ;;  %v244_v29 = vld [vmem:[#allocation7 + $0x3b0] sm:$0xff] }
 0x29f   :  { %1864 = vmatmul.mubr.f32.gmra.mrb[10].mxu0 %v8826_v36 }
 0x2a0   :  { %1868 = vmatprep.mubr.f32.mxu0 %v8579_v0  ;;  %6521 = vmatpush1.bf16.msra.mxu0 %v6520_v22  ;;  %v239_v0 = vld [vmem:[#allocation7 + $0x388] sm:$0xff] }
 0x2a1   :  { %6522 = vmatprep.subr.bf16.mxu0 %v10373_v2  ;;  %v6529_v15 = vpack.c.bf16 %v239_v0, %v238_v27  ;;  %v8846_v22 = vld [vmem:[#allocation2 + $0x81] sm:$0xff]  ;;  %v8865_v27 = vld [vmem:[#allocation2 + $0xb1] sm:$0xff] }
 0x2a2   :  { %v8870_v0 = vld [vmem:[#allocation2 + $0xc1] sm:$0xff] }
 0x2a3   :  { %1869 = vmatmul.mubr.f32.gmra.mrb[12].mxu0 %v8831_v53 }
 0x2a4   :  { %1873 = vmatprep.mubr.f32.mxu0 %v8584_v23  ;;  %6524 = vmatpush1.bf16.msra.mxu0 %v6523_v48  ;;  %v241_v23 = vld [vmem:[#allocation7 + $0x398] sm:$0xff] }
 0x2a5   :  { %6525 = vmatprep.subr.bf16.mxu0 %v10373_v2  ;;  %v6532_v43 = vpack.c.bf16 %v241_v23, %v240_v57  ;;  %v8851_v48 = vld [vmem:[#allocation2 + $0x91] sm:$0xff]  ;;  %v247_v57 = vld [vmem:[#allocation7 + $0x3c8] sm:$0xff] }
 0x2a7   :  { %1874 = vmatmul.mubr.f32.gmra.mrb[14].mxu0 %v8836_v16 }
 0x2a8   :  { %1878 = vmatprep.mubr.f32.mxu0 %v8589_v34  ;;  %6527 = vmatpush1.bf16.msra.mxu0 %v6526_v19  ;;  %v243_v34 = vld [vmem:[#allocation7 + $0x3a8] sm:$0xff]  ;;  %v245_v19 = vld [vmem:[#allocation7 + $0x3b8] sm:$0xff] }
 0x2a9   :  { %6528 = vmatprep.subr.bf16.mxu0 %v10373_v2  ;;  %v6535_v44 = vpack.c.bf16 %v243_v34, %v242_v55  ;;  %v249_v55 = vld [vmem:[#allocation7 + $0x3d8] sm:$0xff] }
 0x2ab   :  { %1879 = vmatmul.mubr.f32.gmra.mrb[16].mxu0 %v8841_v7 }
 0x2ac   :  { %1883 = vmatprep.mubr.f32.mxu0 %v8594_v62  ;;  %6530 = vmatpush1.bf16.msra.mxu0 %v6529_v15  ;;  %v8856_v62 = vld [vmem:[#allocation2 + $0x99] sm:$0xff] }
 0x2ad   :  { %6531 = vmatprep.subr.bf16.mxu0 %v10373_v2  ;;  %v246_v15 = vld [vmem:[#allocation7 + $0x3c0] sm:$0xff] }
 0x2ae   :  { %v6541_v23 = vpack.c.bf16 %v247_v57, %v246_v15  ;;  %v8916_v15 = vld [vmem:[#allocation2 + $0x141] sm:$0xff]  ;;  %v256_v57 = vld [vmem:[#allocation7 + $0x410] sm:$0xff] }
 0x2af   :  { %1884 = vmatmul.mubr.f32.gmra.mrb[18].mxu0 %v8846_v22 }
 0x2b0   :  { %1888 = vmatprep.mubr.f32.mxu0 %v8599_v63  ;;  %6533 = vmatpush1.bf16.msra.mxu0 %v6532_v43  ;;  %v8861_v63 = vld [vmem:[#allocation2 + $0xa9] sm:$0xff] }
 0x2b1   :  { %6534 = vmatprep.subr.bf16.mxu0 %v10373_v2  ;;  %v248_v43 = vld [vmem:[#allocation7 + $0x3d0] sm:$0xff] }
 0x2b2   :  { %v6544_v34 = vpack.c.bf16 %v249_v55, %v248_v43  ;;  %v258_v55 = vld [vmem:[#allocation7 + $0x420] sm:$0xff] }
 0x2b3   :  { %1889 = vmatmul.mubr.f32.gmra.mrb[20].mxu0 %v8851_v48 }
 0x2b4   :  { %1893 = vmatprep.mubr.f32.mxu0 %v8603_v4  ;;  %6536 = vmatpush1.bf16.msra.mxu0 %v6535_v44  ;;  %v6538_v4 = vpack.c.bf16 %v245_v19, %v244_v29  ;;  %v254_v44 = vld [vmem:[#allocation7 + $0x400] sm:$0xff]  ;;  %v255_v29 = vld [vmem:[#allocation7 + $0x408] sm:$0xff] }
 0x2b5   :  { %6537 = vmatprep.subr.bf16.mxu0 %v10373_v2  ;;  %v6552_v19 = vpack.c.bf16 %v255_v29, %v254_v44  ;;  %v260_v29 = vld [vmem:[#allocation7 + $0x430] sm:$0xff] }
 0x2b7   :  { %1894 = vmatmul.mubr.f32.gmra.mrb[22].mxu0 %v8856_v62  ;;  %6553 = vmatprep.subr.bf16.mxu1 %v6552_v19 }
 0x2b8   :  { %1898 = vmatprep.mubr.f32.mxu0 %v8608_v41  ;;  %6539 = vmatpush1.bf16.msra.mxu0 %v6538_v4  ;;  %v8874_v41 = vld [vmem:[#allocation2 + $0xc9] sm:$0xff] }
 0x2b9   :  { %6540 = vmatprep.subr.bf16.mxu0 %v10373_v2  ;;  %v251_v4 = vld [vmem:[#allocation7 + $0x3e8] sm:$0xff]  ;;  %6555 = vmatpush3.bf16.msra.mxu1 %v6552_v19  ;;  %v261_v19 = vld [vmem:[#allocation7 + $0x438] sm:$0xff] }
 0x2bb   :  { %1899 = vmatmul.mubr.f32.gmra.mrb[24].mxu0 %v8861_v63 }
 0x2bc   :  { %1903 = vmatprep.mubr.f32.mxu0 %v8612_v30  ;;  %v8878_v30 = vld [vmem:[#allocation2 + $0xd9] sm:$0xff]  ;;  %6542 = vmatpush1.bf16.msra.mxu0 %v6541_v23 }
 0x2bd   :  { %6543 = vmatprep.subr.bf16.mxu0 %v10373_v2  ;;  %v257_v23 = vld [vmem:[#allocation7 + $0x418] sm:$0xff] }
 0x2be   :  { %v6556_v43 = vpack.c.bf16 %v257_v23, %v256_v57  ;;  %v253_v23 = vld [vmem:[#allocation7 + $0x3f8] sm:$0xff] }
 0x2bf   :  { %1904 = vmatmul.mubr.f32.gmra.mrb[26].mxu0 %v8865_v27 }
 0x2c0   :  { %1908 = vmatprep.mubr.f32.mxu0 %v8616_v31  ;;  %v8882_v31 = vld [vmem:[#allocation2 + $0xe1] sm:$0xff]  ;;  %6545 = vmatpush1.bf16.msra.mxu0 %v6544_v34 }
 0x2c1   :  { %6546 = vmatprep.subr.bf16.mxu0 %v10373_v2  ;;  %6557 = vmatprep.subr.bf16.mxu1 %v6556_v43  ;;  %v259_v34 = vld [vmem:[#allocation7 + $0x428] sm:$0xff] }
 0x2c2   :  { %6559 = vmatpush3.bf16.msra.mxu1 %v6556_v43  ;;  %v6560_v44 = vpack.c.bf16 %v259_v34, %v258_v55  ;;  %v8933_v43 = vld [vmem:[#allocation2 + $0x171] sm:$0xff] }
 0x2c3   :  { %1909 = vmatmul.mubr.f32.gmra.mrb[28].mxu0 %v8870_v0  ;;  %v264_v34 = vld [vmem:[#allocation7 + $0x450] sm:$0xff] }
 0x2c4   :  { %1913 = vmatprep.mubr.f32.mxu0 %v8620_v32  ;;  %v8887_v32 = vld [vmem:[#allocation2 + $0xf1] sm:$0xff]  ;;  %6561 = vmatprep.subr.bf16.mxu1 %v6560_v44 }
 0x2c6   :  { %6563 = vmatpush3.bf16.msra.mxu1 %v6560_v44  ;;  %v265_v44 = vld [vmem:[#allocation7 + $0x458] sm:$0xff] }
 0x2c7   :  { %1914 = vmatmul.mubr.f32.gmra.mrb[30].mxu0 %v8874_v41 }
 0x2c8   :  { %1918 = vmatprep.mubr.f32.mxu0 %v8625_v33  ;;  %v8891_v33 = vld [vmem:[#allocation2 + $0xf9] sm:$0xff] }
 0x2cb   :  { %1919 = vmatmul.mubr.f32.gmra.mrb[32].mxu0 %v8878_v30 }
 0x2cc   :  { %1923 = vmatprep.mubr.f32.mxu0 %v8629_v35  ;;  %v8895_v35 = vld [vmem:[#allocation2 + $0x109] sm:$0xff] }
 0x2cf   :  { %1924 = vmatmul.mubr.f32.gmra.mrb[34].mxu0 %v8882_v31 }
 0x2d0   :  { %1928 = vmatprep.mubr.f32.mxu0 %v8633_v38  ;;  %v8899_v38 = vld [vmem:[#allocation2 + $0x111] sm:$0xff] }
 0x2d3   :  { %1929 = vmatmul.mubr.f32.gmra.mrb[36].mxu0 %v8887_v32 }
 0x2d4   :  { %1933 = vmatprep.mubr.f32.mxu0 %v8637_v39  ;;  %v8904_v39 = vld [vmem:[#allocation2 + $0x121] sm:$0xff] }
 0x2d7   :  { %1934 = vmatmul.mubr.f32.gmra.mrb[38].mxu0 %v8891_v33 }
 0x2d8   :  { %1938 = vmatprep.mubr.f32.mxu0 %v8642_v40  ;;  %v8908_v40 = vld [vmem:[#allocation2 + $0x129] sm:$0xff] }
 0x2db   :  { %1939 = vmatmul.mubr.f32.gmra.mrb[40].mxu0 %v8895_v35 }
 0x2dc   :  { %1943 = vmatprep.mubr.f32.mxu0 %v8646_v42  ;;  %v8912_v42 = vld [vmem:[#allocation2 + $0x139] sm:$0xff] }
 0x2df   :  { %1944 = vmatmul.mubr.f32.gmra.mrb[42].mxu0 %v8899_v38 }
 0x2e0   :  { %1948 = vmatprep.mubr.f32.mxu0 %v8650_v45  ;;  %v250_v45 = vld [vmem:[#allocation7 + $0x3e0] sm:$0xff] }
 0x2e3   :  { %1949 = vmatmul.mubr.f32.gmra.mrb[44].mxu0 %v8904_v39 }
 0x2e4   :  { %1953 = vmatprep.mubr.f32.mxu0 %v8654_v47  ;;  %v6547_v47 = vpack.c.bf16 %v251_v4, %v250_v45  ;;  %v6564_v45 = vpack.c.bf16 %v261_v19, %v260_v29  ;;  %v262_v4 = vld [vmem:[#allocation7 + $0x440] sm:$0xff]  ;;  %v6572_v29 = vpack.c.bf16 %v265_v44, %v264_v34  ;;  %v709_v34 = vld [vmem:[#allocation2 + $0x1c9] sm:$0xff]  ;;  %v934_v44 = vld [vmem:[#allocation2 + $0x32] sm:$0xff] }
 0x2e5   :  { %v266_v19 = vld [vmem:[#allocation7 + $0x460] sm:$0xff]  ;;  %6136 = vmatprep.mubr.f32.mxu1 %v934_v44  ;;  %v8976_v44 = vld [vmem:[#allocation2 + $0x231] sm:$0xff] }
 0x2e6   :  { %6548 = vmatpush1.bf16.msra.mxu0 %v6547_v47  ;;  %6565 = vmatprep.subr.bf16.mxu1 %v6564_v45  ;;  %v263_v47 = vld [vmem:[#allocation7 + $0x448] sm:$0xff] }
 0x2e7   :  { %1954 = vmatmul.mubr.f32.gmra.mrb[46].mxu0 %v8908_v40  ;;  %6549 = vmatprep.subr.bf16.mxu0 %v10373_v2  ;;  %v6568_v57 = vpack.c.bf16 %v263_v47, %v262_v4  ;;  %v8939_v4 = vld [vmem:[#allocation2 + $0x18a] sm:$0xff] }
 0x2e8   :  { %1958 = vmatprep.mubr.f32.mxu0 %v8659_v26  ;;  %v8920_v26 = vld [vmem:[#allocation2 + $0x151] sm:$0xff]  ;;  %6567 = vmatpush3.bf16.msra.mxu1 %v6564_v45  ;;  %v267_v45 = vld [vmem:[#allocation7 + $0x468] sm:$0xff] }
 0x2e9   :  { %6569 = vmatprep.subr.bf16.mxu1 %v6568_v57  ;;  %v10399_v47 = vld [vmem:[#allocation19_spill] sm:$0xff] }
 0x2eb   :  { %1959 = vmatmul.mubr.f32.gmra.mrb[48].mxu0 %v8912_v42 }
 0x2ec   :  { %1963 = vmatprep.mubr.f32.mxu0 %v8663_v9  ;;  %v8925_v9 = vld [vmem:[#allocation2 + $0x159] sm:$0xff]  ;;  %6571 = vmatpush3.bf16.msra.mxu1 %v6568_v57  ;;  %v268_v57 = vld [vmem:[#allocation7 + $0x470] sm:$0xff] }
 0x2ed   :  { %6573 = vmatprep.subr.bf16.mxu1 %v6572_v29 }
 0x2ef   :  { %1964 = vmatmul.mubr.f32.gmra.mrb[50].mxu0 %v8916_v15 }
 0x2f0   :  { %1968 = vmatprep.mubr.f32.mxu0 %v8667_v50  ;;  %v8929_v50 = vld [vmem:[#allocation2 + $0x169] sm:$0xff]  ;;  %6575 = vmatpush3.bf16.msra.mxu1 %v6572_v29  ;;  %v935_v29 = vld [vmem:[#allocation2 + $0x3a] sm:$0xff] }
 0x2f3   :  { %1969 = vmatmul.mubr.f32.gmra.mrb[52].mxu0 %v8920_v26 }
 0x2f4   :  { %1973 = vmatprep.mubr.f32.mxu0 %v8674_v5  ;;  %v252_v5 = vld [vmem:[#allocation7 + $0x3f0] sm:$0xff] }
 0x2f5   :  { %v6550_v55 = vpack.c.bf16 %v253_v23, %v252_v5  ;;  %v269_v5 = vld [vmem:[#allocation7 + $0x478] sm:$0xff] }
 0x2f6   :  { %v6580_v23 = vpack.c.bf16 %v269_v5, %v268_v57  ;;  %v938_v57 = vld [vmem:[#allocation2 + $0x62] sm:$0xff] }
 0x2f7   :  { %1974 = vmatmul.mubr.f32.gmra.mrb[54].mxu0 %v8925_v9  ;;  %v8960_v5 = vld [vmem:[#allocation2 + $0x201] sm:$0xff] }
 0x2f8   :  { %1978 = vmatprep.mubr.f32.mxu0 %v8681_v56  ;;  %v8935_v56 = vld [vmem:[#allocation2 + $0x182] sm:$0xff]  ;;  %6551 = vmatpush1.bf16.msra.mxu0 %v6550_v55  ;;  %v10400_v55 = vld [vmem:[#allocation21_spill] sm:$0xff] }
 0x2fb   :  { %1979 = vmatmul.mubr.f32.gmra.mrb[56].mxu0 %v8929_v50 }
 0x2fc   :  { %1983 = vmatprep.mubr.f32.mxu0 %v8684_v6  ;;  %v6576_v6 = vpack.c.bf16 %v267_v45, %v266_v19  ;;  %v710_v19 = vld [vmem:[#allocation2 + $0x1d1] sm:$0xff]  ;;  %v8948_v45 = vld [vmem:[#allocation2 + $0x1e1] sm:$0xff] }
 0x2fe   :  { %6577 = vmatprep.subr.bf16.mxu1 %v6576_v6 }
 0x2ff   :  { %1984 = vmatmul.mubr.f32.gmra.mrb[58].mxu0 %v8933_v43  ;;  %6579 = vmatpush3.bf16.msra.mxu1 %v6576_v6  ;;  %v936_v6 = vld [vmem:[#allocation2 + $0x4a] sm:$0xff] }
 0x300   :  { %1988 = vmatprep.mubr.f32.mxu0 %v8935_v56  ;;  %6581 = vmatprep.subr.bf16.mxu1 %v6580_v23 }
 0x303   :  { %1989 = vmatmul.mubr.f32.gmra.mrb[60].mxu0 %v10399_v47  ;;  %6583 = vmatpush3.bf16.msra.mxu1 %v6580_v23  ;;  %v8952_v47 = vld [vmem:[#allocation2 + $0x1e9] sm:$0xff]  ;;  %v940_v23 = vld [vmem:[#allocation2 + $0x7a] sm:$0xff] }
 0x304   :  { %1993 = vmatprep.mubr.f32.mxu0 %v8939_v4  ;;  %6584 = vmatprep.subr.bf16.mxu1 %v10373_v2 }
 0x306   :  { %6137 = vmatmul.mubr.f32.vlgmr.msra.gmra.mrb[0].mxu1 %v935_v29  ;;  %v944_v29 = vld [vmem:[#allocation2 + $0xaa] sm:$0xff] }
 0x307   :  { %1994 = vmatmul.mubr.f32.gmra.mrb[62].mxu0 %v10400_v55  ;;  %6139 = vmatprep.mubr.f32.mxu1 %v936_v6  ;;  %v8968_v55 = vld [vmem:[#allocation2 + $0x219] sm:$0xff]  ;;  %v946_v6 = vld [vmem:[#allocation2 + $0xc2] sm:$0xff] }
 0x308   :  { %1998 = vmatprep.mubr.f32.mxu0 %v8690_v59  ;;  %v937_v59 = vld [vmem:[#allocation2 + $0x52] sm:$0xff] }
 0x30a   :  { %6140 = vmatmul.mubr.f32.gmra.mrb[2].mxu1 %v937_v59  ;;  %v8992_v59 = vld [vmem:[#allocation2 + $0x261] sm:$0xff] }
 0x30b   :  { %1999 = vmatmul.mubr.f32.gmra.mrb[64].mxu0 %v709_v34  ;;  %6142 = vmatprep.mubr.f32.mxu1 %v938_v57  ;;  %v942_v34 = vld [vmem:[#allocation2 + $0x92] sm:$0xff]  ;;  %v948_v57 = vld [vmem:[#allocation2 + $0xda] sm:$0xff] }
 0x30c   :  { %2003 = vmatprep.mubr.f32.mxu0 %v8694_v25  ;;  %v8956_v25 = vld [vmem:[#allocation2 + $0x1f9] sm:$0xff] }
 0x30f   :  { %2004 = vmatmul.mubr.f32.gmra.mrb[66].mxu0 %v710_v19  ;;  %v8984_v19 = vld [vmem:[#allocation2 + $0x249] sm:$0xff] }
 0x310   :  { %2008 = vmatprep.mubr.f32.mxu0 %v8698_v10  ;;  %v939_v10 = vld [vmem:[#allocation2 + $0x6a] sm:$0xff] }
 0x311   :  { %6143 = vmatmul.mubr.f32.gmra.mrb[4].mxu1 %v939_v10  ;;  %v9000_v10 = vld [vmem:[#allocation2 + $0x279] sm:$0xff] }
 0x312   :  { %6145 = vmatprep.mubr.f32.mxu1 %v940_v23  ;;  %v950_v23 = vld [vmem:[#allocation2 + $0xf2] sm:$0xff] }
 0x313   :  { %2009 = vmatmul.mubr.f32.gmra.mrb[68].mxu0 %v8948_v45 }
 0x314   :  { %2013 = vmatprep.mubr.f32.mxu0 %v8702_v14  ;;  %v8964_v14 = vld [vmem:[#allocation2 + $0x211] sm:$0xff] }
 0x317   :  { %2014 = vmatmul.mubr.f32.gmra.mrb[70].mxu0 %v8952_v47 }
 0x318   :  { %2018 = vmatprep.mubr.f32.mxu0 %v8706_v21  ;;  %v941_v21 = vld [vmem:[#allocation2 + $0x82] sm:$0xff] }
 0x319   :  { %6146 = vmatmul.mubr.f32.gmra.mrb[6].mxu1 %v941_v21  ;;  %v9008_v21 = vld [vmem:[#allocation2 + $0x291] sm:$0xff] }
 0x31a   :  { %6148 = vmatprep.mubr.f32.mxu1 %v942_v34  ;;  %v952_v34 = vld [vmem:[#allocation2 + $0x10a] sm:$0xff] }
 0x31b   :  { %2019 = vmatmul.mubr.f32.gmra.mrb[72].mxu0 %v8956_v25 }
 0x31c   :  { %2023 = vmatprep.mubr.f32.mxu0 %v8710_v60  ;;  %v8972_v60 = vld [vmem:[#allocation2 + $0x229] sm:$0xff] }
 0x31f   :  { %2024 = vmatmul.mubr.f32.gmra.mrb[74].mxu0 %v8960_v5 }
 0x320   :  { %2028 = vmatprep.mubr.f32.mxu0 %v8714_v46  ;;  %v943_v46 = vld [vmem:[#allocation2 + $0x9a] sm:$0xff] }
 0x321   :  { %6149 = vmatmul.mubr.f32.gmra.mrb[8].mxu1 %v943_v46  ;;  %v9016_v46 = vld [vmem:[#allocation2 + $0x2a9] sm:$0xff] }
 0x322   :  { %6151 = vmatprep.mubr.f32.mxu1 %v944_v29  ;;  %v954_v29 = vld [vmem:[#allocation2 + $0x122] sm:$0xff] }
 0x323   :  { %2029 = vmatmul.mubr.f32.gmra.mrb[76].mxu0 %v8964_v14 }
 0x324   :  { %2033 = vmatprep.mubr.f32.mxu0 %v8718_v54  ;;  %v8980_v54 = vld [vmem:[#allocation2 + $0x241] sm:$0xff] }
 0x327   :  { %2034 = vmatmul.mubr.f32.gmra.mrb[78].mxu0 %v8968_v55 }
 0x328   :  { %2038 = vmatprep.mubr.f32.mxu0 %v8722_v61  ;;  %v945_v61 = vld [vmem:[#allocation2 + $0xb2] sm:$0xff] }
 0x329   :  { %6152 = vmatmul.mubr.f32.gmra.mrb[10].mxu1 %v945_v61  ;;  %v9024_v61 = vld [vmem:[#allocation2 + $0x2c1] sm:$0xff] }
 0x32a   :  { %6154 = vmatprep.mubr.f32.mxu1 %v946_v6  ;;  %10401 = vst [vmem:[#allocation19_spill] sm:$0xff] %v9024_v61  ;;  %v9028_v6 = vld [vmem:[#allocation2 + $0x2d1] sm:$0xff] }
 0x32b   :  { %2039 = vmatmul.mubr.f32.gmra.mrb[80].mxu0 %v8972_v60  ;;  %10403 = vst [vmem:[#allocation21_spill] sm:$0xff] %v9028_v6 }
 0x32c   :  { %2043 = vmatprep.mubr.f32.mxu0 %v8726_v3  ;;  %v8988_v3 = vld [vmem:[#allocation2 + $0x259] sm:$0xff] }
 0x32f   :  { %2044 = vmatmul.mubr.f32.gmra.mrb[82].mxu0 %v8976_v44 }
 0x330   :  { %2048 = vmatprep.mubr.f32.mxu0 %v8730_v8  ;;  %v947_v8 = vld [vmem:[#allocation2 + $0xca] sm:$0xff] }
 0x331   :  { %6155 = vmatmul.mubr.f32.gmra.mrb[12].mxu1 %v947_v8  ;;  %v956_v8 = vld [vmem:[#allocation2 + $0x13a] sm:$0xff] }
 0x332   :  { %6157 = vmatprep.mubr.f32.mxu1 %v948_v57  ;;  %v10404_v57 = vld [vmem:[#allocation17_spill] sm:$0xff] }
 0x333   :  { %2049 = vmatmul.mubr.f32.gmra.mrb[84].mxu0 %v8980_v54 }
 0x334   :  { %2053 = vmatprep.mubr.f32.mxu0 %v8734_v13  ;;  %v8996_v13 = vld [vmem:[#allocation2 + $0x271] sm:$0xff] }
 0x337   :  { %2054 = vmatmul.mubr.f32.gmra.mrb[86].mxu0 %v8984_v19 }
 0x338   :  { %2058 = vmatprep.mubr.f32.mxu0 %v8738_v24  ;;  %v949_v24 = vld [vmem:[#allocation2 + $0xe2] sm:$0xff] }
 0x339   :  { %6158 = vmatmul.mubr.f32.gmra.mrb[14].mxu1 %v949_v24  ;;  %v9032_v24 = vld [vmem:[#allocation2 + $0x2d9] sm:$0xff] }
 0x33a   :  { %6160 = vmatprep.mubr.f32.mxu1 %v950_v23  ;;  %v2994_v23 = vld [vmem:[#allocation9 + $0x8] sm:$0xff] }
 0x33b   :  { %2059 = vmatmul.mubr.f32.gmra.mrb[88].mxu0 %v8988_v3 }
 0x33c   :  { %2063 = vmatprep.mubr.f32.mxu0 %v8742_v37  ;;  %v9004_v37 = vld [vmem:[#allocation2 + $0x289] sm:$0xff] }
 0x33f   :  { %2064 = vmatmul.mubr.f32.gmra.mrb[90].mxu0 %v8992_v59 }
 0x340   :  { %2068 = vmatprep.mubr.f32.mxu0 %v8746_v49  ;;  %v951_v49 = vld [vmem:[#allocation2 + $0xfa] sm:$0xff] }
 0x341   :  { %6161 = vmatmul.mubr.f32.gmra.mrb[16].mxu1 %v951_v49  ;;  %v10406_v49 = vld [vmem:[#allocation18_spill] sm:$0xff] }
 0x342   :  { %6163 = vmatprep.mubr.f32.mxu1 %v952_v34  ;;  %v733_v34 = vld [vmem:[#allocation2 + $0x2e9] sm:$0xff] }
 0x343   :  { %2069 = vmatmul.mubr.f32.gmra.mrb[92].mxu0 %v8996_v13 }
 0x344   :  { %2073 = vmatprep.mubr.f32.mxu0 %v8750_v58  ;;  %v9012_v58 = vld [vmem:[#allocation2 + $0x2a1] sm:$0xff] }
 0x347   :  { %2074 = vmatmul.mubr.f32.gmra.mrb[94].mxu0 %v9000_v10 }
 0x348   :  { %2078 = vmatprep.mubr.f32.mxu0 %v8754_v17  ;;  %v953_v17 = vld [vmem:[#allocation2 + $0x112] sm:$0xff] }
 0x349   :  { %6164 = vmatmul.mubr.f32.gmra.mrb[18].mxu1 %v953_v17 }
 0x34a   :  { %6166 = vmatprep.mubr.f32.mxu1 %v954_v29  ;;  %v958_v29 = vld [vmem:[#allocation2 + $0x152] sm:$0xff] }
 0x34b   :  { %2079 = vmatmul.mubr.f32.gmra.mrb[96].mxu0 %v9004_v37 }
 0x34c   :  { %2083 = vmatprep.mubr.f32.mxu0 %v8758_v28  ;;  %v9020_v28 = vld [vmem:[#allocation2 + $0x2b9] sm:$0xff] }
 0x34f   :  { %2084 = vmatmul.mubr.f32.gmra.mrb[98].mxu0 %v9008_v21 }
 0x350   :  { %2088 = vmatprep.mubr.f32.mxu0 %v8762_v18  ;;  %v955_v18 = vld [vmem:[#allocation2 + $0x12a] sm:$0xff] }
 0x351   :  { %6167 = vmatmul.mubr.f32.gmra.mrb[20].mxu1 %v955_v18  ;;  %v959_v18 = vld [vmem:[#allocation2 + $0x15a] sm:$0xff] }
 0x352   :  { %6169 = vmatprep.mubr.f32.mxu1 %v956_v8  ;;  %v734_v8 = vld [vmem:[#allocation2 + $0x2f1] sm:$0xff] }
 0x353   :  { %2089 = vmatmul.mubr.f32.gmra.mrb[100].mxu0 %v9012_v58 }
 0x354   :  { %2093 = vmatprep.mubr.f32.mxu0 %v8766_v11  ;;  %v10402_v11 = vld [vmem:[#allocation16_spill] sm:$0xff] }
 0x355   :  { %10405 = vst [vmem:[#allocation16_spill] sm:$0xff] %v9032_v24 }
 0x357   :  { %2094 = vmatmul.mubr.f32.gmra.mrb[102].mxu0 %v9016_v46 }
 0x358   :  { %2098 = vmatprep.mubr.f32.mxu0 %v8770_v12  ;;  %v957_v12 = vld [vmem:[#allocation2 + $0x142] sm:$0xff] }
 0x359   :  { %6170 = vmatmul.mubr.f32.gmra.mrb[22].mxu1 %v957_v12  ;;  %v2995_v12 = vld [vmem:[#allocation9 + $0x10] sm:$0xff] }
 0x35a   :  { %6172 = vmatprep.mubr.f32.mxu1 %v958_v29  ;;  %v2998_v29 = vld [vmem:[#allocation9 + $0x28] sm:$0xff] }
 0x35b   :  { %2099 = vmatmul.mubr.f32.gmra.mrb[104].mxu0 %v9020_v28 }
 0x35c   :  { %2103 = vmatprep.mubr.f32.mxu0 %v8774_v20  ;;  %v2993_v20 = vld [vmem:[#allocation9] sm:$0xff] }
 0x35d   :  { %v6585_v17 = vpack.c.bf16 %v2994_v23, %v2993_v20  ;;  %6173 = vmatmul.mubr.f32.gmra.mrb[24].mxu1 %v959_v18  ;;  %v961_v20 = vld [vmem:[#allocation2 + $0x172] sm:$0xff]  ;;  %v10409_v23 = vld [vmem:[#allocation23_spill] sm:$0xff] }
 0x35e   :  { %v737_v18 = vld [vmem:[#allocation2 + $0x319] sm:$0xff] }
 0x35f   :  { %2104 = vmatmul.mubr.f32.gmra.mrb[106].mxu0 %v9024_v61  ;;  %6586 = vmatpush1.bf16.msra.mxu1 %v6585_v17  ;;  %v960_v61 = vld [vmem:[#allocation2 + $0x16a] sm:$0xff]  ;;  %v2997_v17 = vld [vmem:[#allocation9 + $0x20] sm:$0xff] }
 0x360   :  { %2108 = vmatprep.mubr.f32.mxu0 %v10402_v11  ;;  %v10407_v11 = vld [vmem:[#allocation20_spill] sm:$0xff]  ;;  %6587 = vmatprep.subr.bf16.mxu1 %v10373_v2 }
 0x361   :  { %6175 = vmatprep.mubr.f32.mxu1 %v960_v61  ;;  %v10411_v61 = vld [vmem:[#allocation25_spill] sm:$0xff] }
 0x362   :  { %6176 = vmatmul.mubr.f32.gmra.mrb[26].mxu1 %v961_v20  ;;  %v10412_v20 = vld [vmem:[#allocation14_spill] sm:$0xff] }
 0x363   :  { %2109 = vmatmul.mubr.f32.gmra.mrb[108].mxu0 %v9028_v6  ;;  %v735_v6 = vld [vmem:[#allocation2 + $0x301] sm:$0xff]  ;;  %6178 = vmatprep.mubr.f32.mxu1 %v8935_v56  ;;  %v2999_v56 = vld [vmem:[#allocation9 + $0x30] sm:$0xff] }
 0x364   :  { %2113 = vmatprep.mubr.f32.mxu0 %v10404_v57  ;;  %v2996_v57 = vld [vmem:[#allocation9 + $0x18] sm:$0xff] }
 0x366   :  { %6179 = vmatmul.mubr.f32.gmra.mrb[28].mxu1 %v8939_v4  ;;  %v9049_v4 = vld [vmem:[#allocation2 + $0x33a] sm:$0xff] }
 0x367   :  { %2114 = vmatmul.mubr.f32.gmra.mrb[110].mxu0 %v9032_v24  ;;  %v10408_v24 = vld [vmem:[#allocation22_spill] sm:$0xff] }
 0x368   :  { %2118 = vmatprep.mubr.f32.mxu0 %v10406_v49  ;;  %v6588_v49 = vpack.c.bf16 %v2996_v57, %v2995_v12  ;;  %v3000_v12 = vld [vmem:[#allocation9 + $0x38] sm:$0xff] }
 0x369   :  { %v6594_v57 = vpack.c.bf16 %v3000_v12, %v2999_v56  ;;  %v3003_v56 = vld [vmem:[#allocation9 + $0x50] sm:$0xff]  ;;  %v3004_v12 = vld [vmem:[#allocation9 + $0x58] sm:$0xff] }
 0x36a   :  { %6589 = vmatpush1.bf16.msra.mxu1 %v6588_v49  ;;  %v964_v49 = vld [vmem:[#allocation2 + $0x19a] sm:$0xff] }
 0x36b   :  { %2119 = vmatmul.mubr.f32.gmra.mrb[112].mxu0 %v733_v34  ;;  %v736_v34 = vld [vmem:[#allocation2 + $0x309] sm:$0xff]  ;;  %6590 = vmatprep.subr.bf16.mxu1 %v10373_v2 }
 0x36c   :  { %2123 = vmatprep.mubr.f32.mxu0 %v10407_v11  ;;  %v6591_v11 = vpack.c.bf16 %v2998_v29, %v2997_v17  ;;  %6181 = vmatprep.mubr.f32.mxu1 %v964_v49  ;;  %v3001_v17 = vld [vmem:[#allocation9 + $0x40] sm:$0xff]  ;;  %v3002_v29 = vld [vmem:[#allocation9 + $0x48] sm:$0xff] }
 0x36d   :  { %v968_v49 = vld [vmem:[#allocation2 + $0x1fa] sm:$0xff] }
 0x36e   :  { %6592 = vmatpush1.bf16.msra.mxu1 %v6591_v11  ;;  %v966_v11 = vld [vmem:[#allocation2 + $0x1e2] sm:$0xff] }
 0x36f   :  { %2124 = vmatmul.mubr.f32.gmra.mrb[114].mxu0 %v734_v8  ;;  %6593 = vmatprep.subr.bf16.mxu1 %v10373_v2  ;;  %v9046_v8 = vld [vmem:[#allocation2 + $0x332] sm:$0xff] }
 0x370   :  { %2128 = vmatprep.mubr.f32.mxu0 %v10408_v24  ;;  %v10410_v24 = vld [vmem:[#allocation24_spill] sm:$0xff] }
 0x372   :  { %6595 = vmatpush1.bf16.msra.mxu1 %v6594_v57  ;;  %v808_v57 = vld [vmem:[#allocation2 + $0x48] sm:$0xff] }
 0x373   :  { %2129 = vmatmul.mubr.f32.gmra.mrb[116].mxu0 %v735_v6  ;;  %v738_v6 = vld [vmem:[#allocation2 + $0x321] sm:$0xff]  ;;  %6596 = vmatprep.subr.bf16.mxu1 %v10373_v2 }
 0x374   :  { %2133 = vmatprep.mubr.f32.mxu0 %v10409_v23  ;;  %v965_v23 = vld [vmem:[#allocation2 + $0x1a2] sm:$0xff] }
 0x375   :  { %6182 = vmatmul.mubr.f32.gmra.mrb[30].mxu1 %v965_v23  ;;  %v809_v23 = vld [vmem:[#allocation2 + $0x50] sm:$0xff] }
 0x376   :  { %6184 = vmatprep.mubr.f32.mxu1 %v966_v11  ;;  %v3008_v11 = vld [vmem:[#allocation9 + $0x78] sm:$0xff] }
 0x377   :  { %2134 = vmatmul.mubr.f32.gmra.mrb[118].mxu0 %v736_v34  ;;  %v10413_v34 = vld [vmem:[#allocation15_spill] sm:$0xff] }
 0x378   :  { %2138 = vmatprep.mubr.f32.mxu0 %v10410_v24  ;;  %v806_v24 = vld [vmem:[#allocation2 + $0x30] sm:$0xff] }
 0x37b   :  { %2139 = vmatmul.mubr.f32.gmra.mrb[120].mxu0 %v737_v18  ;;  %v6597_v18 = vpack.c.bf16 %v3002_v29, %v3001_v17  ;;  %v810_v17 = vld [vmem:[#allocation2 + $0x60] sm:$0xff]  ;;  %v970_v29 = vld [vmem:[#allocation2 + $0x212] sm:$0xff] }
 0x37c   :  { %2143 = vmatprep.mubr.f32.mxu0 %v10411_v61  ;;  %v967_v61 = vld [vmem:[#allocation2 + $0x1ea] sm:$0xff] }
 0x37d   :  { %6598 = vmatpush1.bf16.msra.mxu1 %v6597_v18  ;;  %v811_v18 = vld [vmem:[#allocation2 + $0x68] sm:$0xff] }
 0x37e   :  { %6185 = vmatmul.mubr.f32.gmra.mrb[32].mxu1 %v967_v61  ;;  %6599 = vmatprep.subr.bf16.mxu1 %v10373_v2  ;;  %v812_v61 = vld [vmem:[#allocation2 + $0x78] sm:$0xff] }
 0x37f   :  { %2144 = vmatmul.mubr.f32.gmra.mrb[122].mxu0 %v738_v6  ;;  %v807_v6 = vld [vmem:[#allocation2 + $0x38] sm:$0xff]  ;;  %6187 = vmatprep.mubr.f32.mxu1 %v968_v49  ;;  %v974_v49 = vld [vmem:[#allocation2 + $0x242] sm:$0xff] }
 0x380   :  { %2148 = vmatprep.mubr.f32.mxu0 %v9046_v8 }
 0x383   :  { %2149 = vmatmul.mubr.f32.gmra.mrb[124].mxu0 %v10412_v20  ;;  %v969_v20 = vld [vmem:[#allocation2 + $0x202] sm:$0xff] }
 0x384   :  { %2153 = vmatprep.mubr.f32.mxu0 %v9049_v4  ;;  %6188 = vmatmul.mubr.f32.gmra.mrb[34].mxu1 %v969_v20  ;;  %v975_v20 = vld [vmem:[#allocation2 + $0x24a] sm:$0xff] }
 0x385   :  { %6190 = vmatprep.mubr.f32.mxu1 %v970_v29  ;;  %v817_v29 = vld [vmem:[#allocation2 + $0xb0] sm:$0xff] }
 0x387   :  { %2154 = vmatmul.mubr.f32.gmra.mrb[126].mxu0 %v10413_v34  ;;  %v3006_v34 = vld [vmem:[#allocation9 + $0x68] sm:$0xff] }
 0x388   :  { %2223 = vmatprep.mubr.f32.mxu0 %v8811_v51  ;;  %v6600_v51 = vpack.c.bf16 %v3004_v12, %v3003_v56  ;;  %v973_v56 = vld [vmem:[#allocation2 + $0x232] sm:$0xff]  ;;  %v813_v12 = vld [vmem:[#allocation2 + $0x80] sm:$0xff] }
 0x38a   :  { %6601 = vmatpush1.bf16.msra.mxu1 %v6600_v51  ;;  %v814_v51 = vld [vmem:[#allocation2 + $0x90] sm:$0xff] }
 0x38b   :  { %2224 = vmatmul.mubr.f32.vlgmr.msra.gmra.mrb[0].mxu0 %v806_v24  ;;  %6602 = vmatprep.subr.bf16.mxu1 %v10373_v2  ;;  %v971_v24 = vld [vmem:[#allocation2 + $0x21a] sm:$0xff] }
 0x38c   :  { %2228 = vmatprep.mubr.f32.mxu0 %v8816_v1  ;;  %v3005_v1 = vld [vmem:[#allocation9 + $0x60] sm:$0xff]  ;;  %6191 = vmatmul.mubr.f32.gmra.mrb[36].mxu1 %v971_v24 }
 0x38d   :  { %v3013_v24 = vld [vmem:[#allocation9 + $0xa0] sm:$0xff] }
 0x38f   :  { %2229 = vmatmul.mubr.f32.gmra.mrb[2].mxu0 %v807_v6  ;;  %v972_v6 = vld [vmem:[#allocation2 + $0x22a] sm:$0xff] }
 0x390   :  { %2233 = vmatprep.mubr.f32.mxu0 %v8821_v52  ;;  %v6603_v52 = vpack.c.bf16 %v3006_v34, %v3005_v1  ;;  %6193 = vmatprep.mubr.f32.mxu1 %v972_v6  ;;  %v3012_v1 = vld [vmem:[#allocation9 + $0x98] sm:$0xff]  ;;  %v816_v34 = vld [vmem:[#allocation2 + $0xa8] sm:$0xff] }
 0x391   :  { %6194 = vmatmul.mubr.f32.gmra.mrb[38].mxu1 %v973_v56  ;;  %v982_v6 = vld [vmem:[#allocation2 + $0x2a2] sm:$0xff]  ;;  %v3015_v56 = vld [vmem:[#allocation9 + $0xb0] sm:$0xff] }
 0x392   :  { %6604 = vmatpush1.bf16.msra.mxu1 %v6603_v52  ;;  %6196 = vmatprep.mubr.f32.mxu1 %v974_v49  ;;  %v977_v52 = vld [vmem:[#allocation2 + $0x262] sm:$0xff]  ;;  %v986_v49 = vld [vmem:[#allocation2 + $0x2d2] sm:$0xff] }
 0x393   :  { %2234 = vmatmul.mubr.f32.gmra.mrb[4].mxu0 %v808_v57  ;;  %6605 = vmatprep.subr.bf16.mxu1 %v10373_v2  ;;  %v3010_v57 = vld [vmem:[#allocation9 + $0x88] sm:$0xff] }
 0x394   :  { %2238 = vmatprep.mubr.f32.mxu0 %v8826_v36  ;;  %v3007_v36 = vld [vmem:[#allocation9 + $0x70] sm:$0xff] }
 0x395   :  { %6197 = vmatmul.mubr.f32.gmra.mrb[40].mxu1 %v975_v20  ;;  %v3017_v20 = vld [vmem:[#allocation9 + $0xc0] sm:$0xff] }
 0x397   :  { %2239 = vmatmul.mubr.f32.gmra.mrb[6].mxu0 %v809_v23  ;;  %v815_v23 = vld [vmem:[#allocation2 + $0x98] sm:$0xff] }
 0x398   :  { %2243 = vmatprep.mubr.f32.mxu0 %v8831_v53  ;;  %v6606_v53 = vpack.c.bf16 %v3008_v11, %v3007_v36  ;;  %v979_v36 = vld [vmem:[#allocation2 + $0x27a] sm:$0xff] }
 0x39a   :  { %6607 = vmatpush1.bf16.msra.mxu1 %v6606_v53  ;;  %v819_v53 = vld [vmem:[#allocation2 + $0xc8] sm:$0xff] }
 0x39b   :  { %2244 = vmatmul.mubr.f32.gmra.mrb[8].mxu0 %v810_v17  ;;  %6608 = vmatprep.subr.bf16.mxu1 %v10373_v2  ;;  %v976_v17 = vld [vmem:[#allocation2 + $0x25a] sm:$0xff] }
 0x39c   :  { %2248 = vmatprep.mubr.f32.mxu0 %v8836_v16  ;;  %v3009_v16 = vld [vmem:[#allocation9 + $0x80] sm:$0xff]  ;;  %6199 = vmatprep.mubr.f32.mxu1 %v976_v17 }
 0x39d   :  { %6200 = vmatmul.mubr.f32.gmra.mrb[42].mxu1 %v977_v52  ;;  %v990_v17 = vld [vmem:[#allocation2 + $0x302] sm:$0xff]  ;;  %v3019_v52 = vld [vmem:[#allocation9 + $0xd0] sm:$0xff] }
 0x39f   :  { %2249 = vmatmul.mubr.f32.gmra.mrb[10].mxu0 %v811_v18  ;;  %v3014_v18 = vld [vmem:[#allocation9 + $0xa8] sm:$0xff] }
 0x3a0   :  { %2253 = vmatprep.mubr.f32.mxu0 %v8841_v7  ;;  %v6609_v7 = vpack.c.bf16 %v3010_v57, %v3009_v16  ;;  %v6615_v11 = vpack.c.bf16 %v3014_v18, %v3013_v24  ;;  %v820_v16 = vld [vmem:[#allocation2 + $0xd8] sm:$0xff] }
 0x3a1   :  { %v992_v18 = vld [vmem:[#allocation2 + $0x31a] sm:$0xff] }
 0x3a2   :  { %6610 = vmatpush1.bf16.msra.mxu1 %v6609_v7  ;;  %v821_v7 = vld [vmem:[#allocation2 + $0xe0] sm:$0xff] }
 0x3a3   :  { %2254 = vmatmul.mubr.f32.gmra.mrb[12].mxu0 %v812_v61  ;;  %6611 = vmatprep.subr.bf16.mxu1 %v10373_v2  ;;  %v980_v61 = vld [vmem:[#allocation2 + $0x28a] sm:$0xff] }
 0x3a4   :  { %2258 = vmatprep.mubr.f32.mxu0 %v8846_v22  ;;  %v3011_v22 = vld [vmem:[#allocation9 + $0x90] sm:$0xff] }
 0x3a7   :  { %2259 = vmatmul.mubr.f32.gmra.mrb[14].mxu0 %v813_v12  ;;  %v3016_v12 = vld [vmem:[#allocation9 + $0xb8] sm:$0xff] }
 0x3a8   :  { %2263 = vmatprep.mubr.f32.mxu0 %v8851_v48  ;;  %v6612_v48 = vpack.c.bf16 %v3012_v1, %v3011_v22  ;;  %v6618_v57 = vpack.c.bf16 %v3016_v12, %v3015_v56  ;;  %v822_v22 = vld [vmem:[#allocation2 + $0xf0] sm:$0xff] }
 0x3a9   :  { %v997_v56 = vld [vmem:[#allocation2 + $0x352] sm:$0xff] }
 0x3aa   :  { %6613 = vmatpush1.bf16.msra.mxu1 %v6612_v48  ;;  %v823_v48 = vld [vmem:[#allocation2 + $0xf8] sm:$0xff] }
 0x3ab   :  { %2264 = vmatmul.mubr.f32.gmra.mrb[16].mxu0 %v814_v51  ;;  %6614 = vmatprep.subr.bf16.mxu1 %v10373_v2  ;;  %v984_v51 = vld [vmem:[#allocation2 + $0x2ba] sm:$0xff] }
 0x3ac   :  { %2268 = vmatprep.mubr.f32.mxu0 %v8856_v62  ;;  %v978_v62 = vld [vmem:[#allocation2 + $0x272] sm:$0xff] }
 0x3ad   :  { %6202 = vmatprep.mubr.f32.mxu1 %v978_v62  ;;  %v824_v62 = vld [vmem:[#allocation2 + $0x108] sm:$0xff] }
 0x3ae   :  { %6203 = vmatmul.mubr.f32.gmra.mrb[44].mxu1 %v979_v36  ;;  %v825_v36 = vld [vmem:[#allocation2 + $0x110] sm:$0xff] }
 0x3af   :  { %2269 = vmatmul.mubr.f32.gmra.mrb[18].mxu0 %v815_v23  ;;  %6616 = vmatpush1.bf16.msra.mxu1 %v6615_v11  ;;  %v3018_v23 = vld [vmem:[#allocation9 + $0xc8] sm:$0xff] }
 0x3b0   :  { %2273 = vmatprep.mubr.f32.mxu0 %v8861_v63  ;;  %v818_v63 = vld [vmem:[#allocation2 + $0xc0] sm:$0xff]  ;;  %6617 = vmatprep.subr.bf16.mxu1 %v10373_v2  ;;  %v6621_v1 = vpack.c.bf16 %v3018_v23, %v3017_v20  ;;  %v3022_v11 = vld [vmem:[#allocation9 + $0xe8] sm:$0xff] }
 0x3b1   :  { %6205 = vmatprep.mubr.f32.mxu1 %v980_v61  ;;  %v826_v61 = vld [vmem:[#allocation2 + $0x120] sm:$0xff]  ;;  %v3122_v20 = vld [vmem:[#allocation9 + $0x408] sm:$0xff] }
 0x3b2   :  { %v3025_v23 = vld [vmem:[#allocation9 + $0x100] sm:$0xff] }
 0x3b3   :  { %2274 = vmatmul.mubr.f32.gmra.mrb[20].mxu0 %v816_v34  ;;  %6619 = vmatpush1.bf16.msra.mxu1 %v6618_v57  ;;  %v988_v34 = vld [vmem:[#allocation2 + $0x2ea] sm:$0xff] }
 0x3b4   :  { %2278 = vmatprep.mubr.f32.mxu0 %v8865_v27  ;;  %v981_v27 = vld [vmem:[#allocation2 + $0x292] sm:$0xff]  ;;  %6620 = vmatprep.subr.bf16.mxu1 %v10373_v2  ;;  %v3353_v57 = vld [vmem:[#allocation3 + $0x9] sm:$0xff] }
 0x3b5   :  { %6206 = vmatmul.mubr.f32.gmra.mrb[46].mxu1 %v981_v27  ;;  %v3023_v27 = vld [vmem:[#allocation9 + $0xf0] sm:$0xff] }
 0x3b6   :  { %6208 = vmatprep.mubr.f32.mxu1 %v982_v6 }
 0x3b7   :  { %2279 = vmatmul.mubr.f32.gmra.mrb[22].mxu0 %v817_v29  ;;  %6622 = vmatpush1.bf16.msra.mxu1 %v6621_v1  ;;  %v3020_v29 = vld [vmem:[#allocation9 + $0xd8] sm:$0xff] }
 0x3b8   :  { %2283 = vmatprep.mubr.f32.mxu0 %v8870_v0  ;;  %v983_v0 = vld [vmem:[#allocation2 + $0x2aa] sm:$0xff]  ;;  %6623 = vmatprep.subr.bf16.mxu1 %v10373_v2  ;;  %v6624_v24 = vpack.c.bf16 %v3020_v29, %v3019_v52  ;;  %v831_v1 = vld [vmem:[#allocation2 + $0x158] sm:$0xff]  ;;  %v3125_v52 = vld [vmem:[#allocation9 + $0x420] sm:$0xff] }
 0x3b9   :  { %6209 = vmatmul.mubr.f32.gmra.mrb[48].mxu1 %v983_v0  ;;  %v3288_v0 = vld [vmem:[#allocation3] sm:$0xff]  ;;  %v3126_v29 = vld [vmem:[#allocation9 + $0x428] sm:$0xff] }
 0x3ba   :  { %6211 = vmatprep.mubr.f32.mxu1 %v984_v51 }
 0x3bb   :  { %2284 = vmatmul.mubr.f32.gmra.mrb[24].mxu0 %v818_v63  ;;  %6625 = vmatpush1.bf16.msra.mxu1 %v6624_v24  ;;  %v3021_v63 = vld [vmem:[#allocation9 + $0xe0] sm:$0xff]  ;;  %v3127_v24 = vld [vmem:[#allocation9 + $0x430] sm:$0xff] }
 0x3bc   :  { %2288 = vmatprep.mubr.f32.mxu0 %v8874_v41  ;;  %v985_v41 = vld [vmem:[#allocation2 + $0x2c2] sm:$0xff]  ;;  %6626 = vmatprep.subr.bf16.mxu1 %v10373_v2 }
 0x3bd   :  { %6212 = vmatmul.mubr.f32.gmra.mrb[50].mxu1 %v985_v41  ;;  %v9099_v41 = vld [vmem:[#allocation2 + $0x8] sm:$0xff] }
 0x3be   :  { %6214 = vmatprep.mubr.f32.mxu1 %v986_v49  ;;  %v3121_v49 = vld [vmem:[#allocation9 + $0x400] sm:$0xff] }
 0x3bf   :  { %2289 = vmatmul.mubr.f32.gmra.mrb[26].mxu0 %v819_v53  ;;  %v3024_v53 = vld [vmem:[#allocation9 + $0xf8] sm:$0xff] }
 0x3c0   :  { %2293 = vmatprep.mubr.f32.mxu0 %v8878_v30  ;;  %v987_v30 = vld [vmem:[#allocation2 + $0x2da] sm:$0xff]  ;;  %v6630_v6 = vpack.c.bf16 %v3024_v53, %v3023_v27  ;;  %v3027_v27 = vld [vmem:[#allocation9 + $0x110] sm:$0xff] }
 0x3c1   :  { %6215 = vmatmul.mubr.f32.gmra.mrb[52].mxu1 %v987_v30  ;;  %v3026_v30 = vld [vmem:[#allocation9 + $0x108] sm:$0xff]  ;;  %v3028_v53 = vld [vmem:[#allocation9 + $0x118] sm:$0xff] }
 0x3c2   :  { %6217 = vmatprep.mubr.f32.mxu1 %v988_v34  ;;  %v3123_v34 = vld [vmem:[#allocation9 + $0x410] sm:$0xff] }
 0x3c3   :  { %2294 = vmatmul.mubr.f32.gmra.mrb[28].mxu0 %v820_v16  ;;  %v828_v16 = vld [vmem:[#allocation2 + $0x138] sm:$0xff] }
 0x3c4   :  { %2298 = vmatprep.mubr.f32.mxu0 %v8882_v31  ;;  %v989_v31 = vld [vmem:[#allocation2 + $0x2f2] sm:$0xff] }
 0x3c5   :  { %6218 = vmatmul.mubr.f32.gmra.mrb[54].mxu1 %v989_v31  ;;  %v3124_v31 = vld [vmem:[#allocation9 + $0x418] sm:$0xff] }
 0x3c6   :  { %6220 = vmatprep.mubr.f32.mxu1 %v990_v17 }
 0x3c7   :  { %2299 = vmatmul.mubr.f32.gmra.mrb[30].mxu0 %v821_v7 }
 0x3c8   :  { %2303 = vmatprep.mubr.f32.mxu0 %v8887_v32  ;;  %v991_v32 = vld [vmem:[#allocation2 + $0x30a] sm:$0xff] }
 0x3c9   :  { %6221 = vmatmul.mubr.f32.gmra.mrb[56].mxu1 %v991_v32  ;;  %v9120_v32 = vpack.c.bf16 %v3126_v29, %v3125_v52  ;;  %v838_v52 = vld [vmem:[#allocation2 + $0x1e0] sm:$0xff] }
 0x3ca   :  { %6223 = vmatprep.mubr.f32.mxu1 %v992_v18  ;;  %v3128_v18 = vld [vmem:[#allocation9 + $0x438] sm:$0xff]  ;;  %v3029_v29 = vld [vmem:[#allocation9 + $0x120] sm:$0xff] }
 0x3cb   :  { %2304 = vmatmul.mubr.f32.gmra.mrb[32].mxu0 %v822_v22  ;;  %v9105_v22 = vpack.c.bf16 %v3122_v20, %v3121_v49  ;;  %10416 = vst [vmem:[#allocation20_spill] sm:$0xff] %v9120_v32  ;;  %v3133_v49 = vld [vmem:[#allocation9 + $0x460] sm:$0xff]  ;;  %v3134_v20 = vld [vmem:[#allocation9 + $0x468] sm:$0xff] }
 0x3cc   :  { %2308 = vmatprep.mubr.f32.mxu0 %v8891_v33  ;;  %v993_v33 = vld [vmem:[#allocation2 + $0x322] sm:$0xff] }
 0x3cd   :  { %6224 = vmatmul.mubr.f32.gmra.mrb[58].mxu1 %v993_v33  ;;  %10414 = vst [vmem:[#allocation17_spill] sm:$0xff] %v9105_v22  ;;  %6777 = vmatprep.subr.bf16.mxu0 %v9105_v22  ;;  %v898_v33 = vld [vmem:[#allocation2 + $0x181] sm:$0xff] }
 0x3ce   :  { %6226 = vmatprep.mubr.f32.mxu1 %v9046_v8  ;;  %v827_v8 = vld [vmem:[#allocation2 + $0x128] sm:$0xff]  ;;  %6779 = vmatpush3.bf16.msra.mxu0 %v9105_v22 }
 0x3cf   :  { %2309 = vmatmul.mubr.f32.gmra.mrb[34].mxu0 %v823_v48  ;;  %v3086_v22 = vld [vmem:[#allocation9 + $0x2e8] sm:$0xff] }
 0x3d0   :  { %2313 = vmatprep.mubr.f32.mxu0 %v8895_v35  ;;  %v6627_v35 = vpack.c.bf16 %v3022_v11, %v3021_v63  ;;  %v834_v11 = vld [vmem:[#allocation2 + $0x180] sm:$0xff] }
 0x3d1   :  { %6227 = vmatmul.mubr.f32.gmra.mrb[60].mxu1 %v9049_v4 }
 0x3d2   :  { %6628 = vmatpush1.bf16.msra.mxu1 %v6627_v35  ;;  %v3129_v35 = vld [vmem:[#allocation9 + $0x440] sm:$0xff] }
 0x3d3   :  { %2314 = vmatmul.mubr.f32.gmra.mrb[36].mxu0 %v824_v62  ;;  %6629 = vmatprep.subr.bf16.mxu1 %v10373_v2  ;;  %v833_v62 = vld [vmem:[#allocation2 + $0x170] sm:$0xff] }
 0x3d4   :  { %2318 = vmatprep.mubr.f32.mxu0 %v8899_v38  ;;  %v996_v38 = vld [vmem:[#allocation2 + $0x34a] sm:$0xff] }
 0x3d5   :  { %6229 = vmatprep.mubr.f32.mxu1 %v996_v38 }
 0x3d6   :  { %6631 = vmatpush1.bf16.msra.mxu1 %v6630_v6  ;;  %v6636_v6 = vpack.c.bf16 %v3028_v53, %v3027_v27  ;;  %v3031_v27 = vld [vmem:[#allocation9 + $0x130] sm:$0xff]  ;;  %v3032_v53 = vld [vmem:[#allocation9 + $0x138] sm:$0xff] }
 0x3d7   :  { %2319 = vmatmul.mubr.f32.gmra.mrb[38].mxu0 %v825_v36  ;;  %6230 = vmatmul.mubr.f32.gmra.mrb[62].mxu1 %v997_v56  ;;  %v9125_v36 = vpack.c.bf16 %v3128_v18, %v3127_v24  ;;  %v835_v56 = vld [vmem:[#allocation2 + $0x188] sm:$0xff] }
 0x3d8   :  { %2323 = vmatprep.mubr.f32.mxu0 %v8904_v39  ;;  %v3352_v39 = vld [vmem:[#allocation3 + $0x1] sm:$0xff]  ;;  %6632 = vmatprep.subr.bf16.mxu1 %v10373_v2 }
 0x3d9   :  { %v9090_v12 = vpop.f32.mrb[0].mxu1  ;;  %3935 = vmatprep.mubr.f32.mxu1 %v3352_v39  ;;  %10417 = vst [vmem:[#allocation22_spill] sm:$0xff] %v9125_v36  ;;  %v3132_v39 = vld [vmem:[#allocation9 + $0x458] sm:$0xff]  ;;  %v839_v18 = vld [vmem:[#allocation2 + $0x1e8] sm:$0xff] }
 0x3da   :  { %v9093_v4 = vpop.f32.mrb[1].mxu1 }
 0x3db   :  { %2324 = vmatmul.mubr.f32.gmra.mrb[40].mxu0 %v826_v61  ;;  %3936 = vmatmul.mubr.f32.vlgmr.msra.gmra.mrb[64].mxu1 %v3288_v0  ;;  %v3130_v61 = vld [vmem:[#allocation9 + $0x448] sm:$0xff]  ;;  %v900_v0 = vld [vmem:[#allocation2 + $0x199] sm:$0xff] }
 0x3dc   :  { %2328 = vmatprep.mubr.f32.mxu0 %v8908_v40  ;;  %3940 = vmatprep.mubr.f32.mxu1 %v3353_v57  ;;  %v829_v40 = vld [vmem:[#allocation2 + $0x140] sm:$0xff]  ;;  %v9133_v38 = vpack.c.bf16 %v3130_v61, %v3129_v35 }
 0x3dd   :  { %v9097_v51 = vpop.f32.mrb[2].mxu1  ;;  %v841_v35 = vld [vmem:[#allocation2 + $0x200] sm:$0xff] }
 0x3de   :  { %v9102_v7 = vpop.f32.mrb[3].mxu1  ;;  %10418 = vst [vmem:[#allocation23_spill] sm:$0xff] %v9133_v38 }
 0x3df   :  { %2329 = vmatmul.mubr.f32.gmra.mrb[42].mxu0 %v827_v8  ;;  %3941 = vmatmul.mubr.f32.gmra.mrb[66].mxu1 %v9099_v41  ;;  %v3131_v8 = vld [vmem:[#allocation9 + $0x450] sm:$0xff] }
 0x3e0   :  { %2333 = vmatprep.mubr.f32.mxu0 %v8912_v42  ;;  %v830_v42 = vld [vmem:[#allocation2 + $0x150] sm:$0xff] }
 0x3e3   :  { %2334 = vmatmul.mubr.f32.gmra.mrb[44].mxu0 %v828_v16  ;;  %v9137_v16 = vpack.c.bf16 %v3132_v39, %v3131_v8  ;;  %v844_v8 = vld [vmem:[#allocation2 + $0x228] sm:$0xff] }
 0x3e4   :  { %2338 = vmatprep.mubr.f32.mxu0 %v8916_v15  ;;  %v6633_v15 = vpack.c.bf16 %v3026_v30, %v3025_v23  ;;  %v9113_v48 = vpop.f32.mrb[4].mxu1  ;;  %v901_v23 = vld [vmem:[#allocation2 + $0x1a1] sm:$0xff]  ;;  %v9146_v30 = vpack.c.bf16 %v3134_v20, %v3133_v49 }
 0x3e5   :  { %v9116_v17 = vpop.f32.mrb[5].mxu1  ;;  %10419 = vst [vmem:[#allocation24_spill] sm:$0xff] %v9137_v16  ;;  %v3034_v49 = vld [vmem:[#allocation9 + $0x148] sm:$0xff] }
 0x3e6   :  { %6634 = vmatpush1.bf16.msra.mxu1 %v6633_v15  ;;  %10420 = vst [vmem:[#allocation25_spill] sm:$0xff] %v9146_v30  ;;  %v3135_v15 = vld [vmem:[#allocation9 + $0x470] sm:$0xff] }
 0x3e7   :  { %2339 = vmatmul.mubr.f32.gmra.mrb[46].mxu0 %v829_v40  ;;  %6635 = vmatprep.subr.bf16.mxu1 %v10373_v2 }
 0x3e8   :  { %2343 = vmatprep.mubr.f32.mxu0 %v8920_v26  ;;  %v9110_v26 = vpack.c.bf16 %v3124_v31, %v3123_v34 }
 0x3ea   :  { %10415 = vst [vmem:[#allocation18_spill] sm:$0xff] %v9110_v26  ;;  %6781 = vmatprep.subr.bf16.mxu0 %v9110_v26  ;;  %6637 = vmatpush1.bf16.msra.mxu1 %v6636_v6  ;;  %v6642_v6 = vpack.c.bf16 %v3032_v53, %v3031_v27  ;;  %v3037_v27 = vld [vmem:[#allocation9 + $0x160] sm:$0xff]  ;;  %v3038_v53 = vld [vmem:[#allocation9 + $0x168] sm:$0xff] }
 0x3eb   :  { %2344 = vmatmul.mubr.f32.gmra.mrb[48].mxu0 %v830_v42  ;;  %6638 = vmatprep.subr.bf16.mxu1 %v10373_v2  ;;  %v836_v42 = vld [vmem:[#allocation2 + $0x198] sm:$0xff] }
 0x3ec   :  { %2348 = vmatprep.mubr.f32.mxu0 %v8925_v9  ;;  %v832_v9 = vld [vmem:[#allocation2 + $0x168] sm:$0xff]  ;;  %6783 = vmatpush3.bf16.msra.mxu0 %v9110_v26  ;;  %v3085_v26 = vld [vmem:[#allocation9 + $0x2e0] sm:$0xff] }
 0x3ed   :  { %6785 = vmatprep.subr.bf16.mxu0 %v9120_v32 }
 0x3ef   :  { %2349 = vmatmul.mubr.f32.gmra.mrb[50].mxu0 %v831_v1  ;;  %v3136_v1 = vld [vmem:[#allocation9 + $0x478] sm:$0xff] }
 0x3f0   :  { %2353 = vmatprep.mubr.f32.mxu0 %v8929_v50  ;;  %6787 = vmatpush3.bf16.msra.mxu0 %v9120_v32  ;;  %v9127_v50 = vpop.f32.mrb[6].mxu1  ;;  %v9150_v34 = vpack.c.bf16 %v3136_v1, %v3135_v15  ;;  %v848_v15 = vld [vmem:[#allocation2 + $0x258] sm:$0xff] }
 0x3f1   :  { %6789 = vmatprep.subr.bf16.mxu0 %v9125_v36  ;;  %v9130_v63 = vpop.f32.mrb[7].mxu1 }
 0x3f2   :  { %10421 = vst [vmem:[#allocation14_spill] sm:$0xff] %v9150_v34 }
 0x3f3   :  { %2354 = vmatmul.mubr.f32.gmra.mrb[52].mxu0 %v832_v9 }
 0x3f4   :  { %2358 = vmatprep.mubr.f32.mxu0 %v8933_v43  ;;  %v899_v43 = vld [vmem:[#allocation2 + $0x189] sm:$0xff]  ;;  %6791 = vmatpush3.bf16.msra.mxu0 %v9125_v36  ;;  %v9140_v57 = vpop.f32.mrb[8].mxu1 }
 0x3f5   :  { %6793 = vmatprep.subr.bf16.mxu0 %v9133_v38  ;;  %v9143_v40 = vpop.f32.mrb[9].mxu1 }
 0x3f7   :  { %2359 = vmatmul.mubr.f32.gmra.mrb[54].mxu0 %v833_v62  ;;  %v3030_v62 = vld [vmem:[#allocation9 + $0x128] sm:$0xff] }
 0x3f8   :  { %2363 = vmatprep.mubr.f32.mxu0 %v898_v33  ;;  %6795 = vmatpush3.bf16.msra.mxu0 %v9133_v38  ;;  %v6639_v24 = vpack.c.bf16 %v3030_v62, %v3029_v29  ;;  %v3035_v29 = vld [vmem:[#allocation9 + $0x150] sm:$0xff]  ;;  %v3036_v62 = vld [vmem:[#allocation9 + $0x158] sm:$0xff] }
 0x3f9   :  { %6797 = vmatprep.subr.bf16.mxu0 %v9137_v16 }
 0x3fa   :  { %6640 = vmatpush1.bf16.msra.mxu1 %v6639_v24  ;;  %v6648_v24 = vpack.c.bf16 %v3036_v62, %v3035_v29  ;;  %v924_v29 = vld [vmem:[#allocation2 + $0x2e9] sm:$0xff] }
 0x3fb   :  { %2364 = vmatmul.mubr.f32.gmra.mrb[56].mxu0 %v834_v11  ;;  %6641 = vmatprep.subr.bf16.mxu1 %v10373_v2 }
 0x3fc   :  { %2368 = vmatprep.mubr.f32.mxu0 %v899_v43  ;;  %6799 = vmatpush3.bf16.msra.mxu0 %v9137_v16  ;;  %v9152_v31 = vpop.f32.mrb[10].mxu1  ;;  %v842_v43 = vld [vmem:[#allocation2 + $0x210] sm:$0xff] }
 0x3fd   :  { %6801 = vmatprep.subr.bf16.mxu0 %v9146_v30  ;;  %v9156_v9 = vpop.f32.mrb[11].mxu1 }
 0x3fe   :  { %6643 = vmatpush1.bf16.msra.mxu1 %v6642_v6  ;;  %v6651_v6 = vpack.c.bf16 %v3038_v53, %v3037_v27  ;;  %v925_v53 = vld [vmem:[#allocation2 + $0x2f1] sm:$0xff] }
 0x3ff   :  { %2369 = vmatmul.mubr.f32.gmra.mrb[58].mxu0 %v835_v56  ;;  %6644 = vmatprep.subr.bf16.mxu1 %v10373_v2 }
 0x400   :  { %2373 = vmatprep.mubr.f32.mxu0 %v900_v0  ;;  %6803 = vmatpush3.bf16.msra.mxu0 %v9146_v30  ;;  %v846_v0 = vld [vmem:[#allocation2 + $0x240] sm:$0xff] }
 0x401   :  { %6805 = vmatprep.subr.bf16.mxu0 %v9150_v34  ;;  %v3049_v30 = vld [vmem:[#allocation9 + $0x1c0] sm:$0xff] }
 0x403   :  { %2374 = vmatmul.mubr.f32.gmra.mrb[60].mxu0 %v836_v42  ;;  %v3033_v42 = vld [vmem:[#allocation9 + $0x140] sm:$0xff] }
 0x404   :  { %2378 = vmatprep.mubr.f32.mxu0 %v901_v23  ;;  %6807 = vmatpush3.bf16.msra.mxu0 %v9150_v34  ;;  %v9162_v33 = vpop.f32.mrb[12].mxu1  ;;  %v6645_v20 = vpack.c.bf16 %v3034_v49, %v3033_v42  ;;  %v858_v42 = vld [vmem:[#allocation2 + $0x2d0] sm:$0xff] }
 0x405   :  { %v9164_v11 = vpop.f32.mrb[13].mxu1 }
 0x406   :  { %6646 = vmatpush1.bf16.msra.mxu1 %v6645_v20  ;;  %v3039_v20 = vld [vmem:[#allocation9 + $0x170] sm:$0xff] }
 0x407   :  { %2379 = vmatmul.mubr.f32.gmra.mrb[62].mxu0 %v9099_v41  ;;  %6647 = vmatprep.subr.bf16.mxu1 %v10373_v2 }
 0x408   :  { %2383 = vmatprep.mubr.f32.mxu0 %v8948_v45  ;;  %v840_v45 = vld [vmem:[#allocation2 + $0x1f8] sm:$0xff] }
 0x40a   :  { %6649 = vmatpush1.bf16.msra.mxu1 %v6648_v24 }
 0x40b   :  { %2384 = vmatmul.mubr.f32.gmra.mrb[64].mxu0 %v838_v52  ;;  %v850_v52 = vld [vmem:[#allocation2 + $0x270] sm:$0xff]  ;;  %6650 = vmatprep.subr.bf16.mxu1 %v10373_v2 }
 0x40c   :  { %2388 = vmatprep.mubr.f32.mxu0 %v8952_v47  ;;  %v9168_v61 = vpop.f32.mrb[14].mxu1 }
 0x40d   :  { %v9170_v47 = vpop.f32.mrb[15].mxu1 }
 0x40e   :  { %6652 = vmatpush1.bf16.msra.mxu1 %v6651_v6 }
 0x40f   :  { %2389 = vmatmul.mubr.f32.gmra.mrb[66].mxu0 %v839_v18  ;;  %6653 = vmatprep.subr.bf16.mxu1 %v10373_v2 }
 0x410   :  { %2393 = vmatprep.mubr.f32.mxu0 %v8956_v25  ;;  %v843_v25 = vld [vmem:[#allocation2 + $0x218] sm:$0xff] }
 0x413   :  { %2394 = vmatmul.mubr.f32.gmra.mrb[68].mxu0 %v840_v45  ;;  %v852_v45 = vld [vmem:[#allocation2 + $0x288] sm:$0xff] }
 0x414   :  { %2398 = vmatprep.mubr.f32.mxu0 %v8960_v5  ;;  %v9175_v5 = vpop.f32.mrb[16].mxu1 }
 0x415   :  { %v9177_v56 = vpop.f32.mrb[17].mxu1 }
 0x417   :  { %2399 = vmatmul.mubr.f32.gmra.mrb[70].mxu0 %v841_v35 }
 0x418   :  { %2403 = vmatprep.mubr.f32.mxu0 %v8964_v14  ;;  %v845_v14 = vld [vmem:[#allocation2 + $0x230] sm:$0xff] }
 0x41b   :  { %2404 = vmatmul.mubr.f32.gmra.mrb[72].mxu0 %v842_v43  ;;  %v854_v43 = vld [vmem:[#allocation2 + $0x2a0] sm:$0xff] }
 0x41c   :  { %2408 = vmatprep.mubr.f32.mxu0 %v8968_v55  ;;  %v9181_v39 = vpop.f32.mrb[18].mxu1 }
 0x41d   :  { %v9183_v55 = vpop.f32.mrb[19].mxu1 }
 0x41f   :  { %2409 = vmatmul.mubr.f32.gmra.mrb[74].mxu0 %v843_v25 }
 0x420   :  { %2413 = vmatprep.mubr.f32.mxu0 %v8972_v60  ;;  %v847_v60 = vld [vmem:[#allocation2 + $0x248] sm:$0xff] }
 0x423   :  { %2414 = vmatmul.mubr.f32.gmra.mrb[76].mxu0 %v844_v8  ;;  %v856_v8 = vld [vmem:[#allocation2 + $0x2b8] sm:$0xff] }
 0x424   :  { %2418 = vmatprep.mubr.f32.mxu0 %v8976_v44  ;;  %v9188_v44 = vpop.f32.mrb[20].mxu1 }
 0x425   :  { %v9190_v23 = vpop.f32.mrb[21].mxu1 }
 0x427   :  { %2419 = vmatmul.mubr.f32.gmra.mrb[78].mxu0 %v845_v14  ;;  %v857_v14 = vld [vmem:[#allocation2 + $0x2c0] sm:$0xff] }
 0x428   :  { %2423 = vmatprep.mubr.f32.mxu0 %v8980_v54  ;;  %v849_v54 = vld [vmem:[#allocation2 + $0x260] sm:$0xff] }
 0x42b   :  { %2424 = vmatmul.mubr.f32.gmra.mrb[80].mxu0 %v846_v0 }
 0x42c   :  { %2428 = vmatprep.mubr.f32.mxu0 %v8984_v19  ;;  %v9194_v1 = vpop.f32.mrb[22].mxu1 }
 0x42d   :  { %v9196_v19 = vpop.f32.mrb[23].mxu1 }
 0x42f   :  { %2429 = vmatmul.mubr.f32.gmra.mrb[82].mxu0 %v847_v60  ;;  %v3040_v60 = vld [vmem:[#allocation9 + $0x178] sm:$0xff] }
 0x430   :  { %2433 = vmatprep.mubr.f32.mxu0 %v8988_v3  ;;  %v851_v3 = vld [vmem:[#allocation2 + $0x278] sm:$0xff] }
 0x433   :  { %2434 = vmatmul.mubr.f32.gmra.mrb[84].mxu0 %v848_v15  ;;  %v6654_v15 = vpack.c.bf16 %v3040_v60, %v3039_v20 }
 0x434   :  { %2438 = vmatprep.mubr.f32.mxu0 %v8992_v59  ;;  %v9201_v59 = vpop.f32.mrb[24].mxu1 }
 0x435   :  { %v9203_v18 = vpop.f32.mrb[25].mxu1  ;;  %6655 = vmatpush1.bf16.msra.mxu1 %v6654_v15 }
 0x436   :  { %v9207_v35 = vpop.f32.mrb[26].mxu1  ;;  %6656 = vmatprep.subr.bf16.mxu1 %v10373_v2 }
 0x437   :  { %2439 = vmatmul.mubr.f32.gmra.mrb[86].mxu0 %v849_v54  ;;  %v10424_v54 = vld [vmem:[#allocation16_spill] sm:$0xff] }
 0x438   :  { %2443 = vmatprep.mubr.f32.mxu0 %v8996_v13  ;;  %v853_v13 = vld [vmem:[#allocation2 + $0x290] sm:$0xff] }
 0x43b   :  { %2444 = vmatmul.mubr.f32.gmra.mrb[88].mxu0 %v850_v52  ;;  %v859_v52 = vld [vmem:[#allocation2 + $0x2d8] sm:$0xff] }
 0x43c   :  { %2448 = vmatprep.mubr.f32.mxu0 %v9000_v10  ;;  %v9209_v10 = vpop.f32.mrb[27].mxu1 }
 0x43f   :  { %2449 = vmatmul.mubr.f32.gmra.mrb[90].mxu0 %v851_v3 }
 0x440   :  { %2453 = vmatprep.mubr.f32.mxu0 %v9004_v37  ;;  %v855_v37 = vld [vmem:[#allocation2 + $0x2a8] sm:$0xff] }
 0x443   :  { %2454 = vmatmul.mubr.f32.gmra.mrb[92].mxu0 %v852_v45 }
 0x444   :  { %2458 = vmatprep.mubr.f32.mxu0 %v9008_v21  ;;  %v9214_v21 = vpop.f32.mrb[28].mxu1 }
 0x445   :  { %v9216_v25 = vpop.f32.mrb[29].mxu1 }
 0x447   :  { %2459 = vmatmul.mubr.f32.gmra.mrb[94].mxu0 %v853_v13 }
 0x448   :  { %2463 = vmatprep.mubr.f32.mxu0 %v9012_v58  ;;  %v10422_v58 = vld [vmem:[#allocation19_spill] sm:$0xff]  ;;  %v9220_v0 = vpop.f32.mrb[30].mxu1 }
 0x449   :  { %v9223_v49 = vpop.f32.mrb[31].mxu1 }
 0x44b   :  { %2464 = vmatmul.mubr.f32.gmra.mrb[96].mxu0 %v854_v43  ;;  %v860_v43 = vld [vmem:[#allocation2 + $0x2e8] sm:$0xff] }
 0x44c   :  { %2468 = vmatprep.mubr.f32.mxu0 %v9016_v46  ;;  %v10423_v46 = vld [vmem:[#allocation21_spill] sm:$0xff] }
 0x44f   :  { %2469 = vmatmul.mubr.f32.gmra.mrb[98].mxu0 %v855_v37 }
 0x450   :  { %2473 = vmatprep.mubr.f32.mxu0 %v9020_v28  ;;  %v9228_v28 = vld [vmem:[%s10307_s2] ss:$0 sm:$0xff] }
 0x451   :  { %v9232_v24 = vpop.f32.mrb[32].mxu1 }
 0x452   :  { %v9235_v13 = vpop.f32.mrb[33].mxu1 }
 0x453   :  { %2474 = vmatmul.mubr.f32.gmra.mrb[100].mxu0 %v856_v8 }
 0x454   :  { %2478 = vmatprep.mubr.f32.mxu0 %v10422_v58 }
 0x457   :  { %2479 = vmatmul.mubr.f32.gmra.mrb[102].mxu0 %v857_v14  ;;  %v861_v14 = vld [vmem:[#allocation2 + $0x2f0] sm:$0xff]  ;;  %v9240_v60 = vpop.f32.mrb[34].mxu1 }
 0x458   :  { %2483 = vmatprep.mubr.f32.mxu0 %v10423_v46 }
 0x45b   :  { %2484 = vmatmul.mubr.f32.gmra.mrb[104].mxu0 %v858_v42  ;;  %v926_v42 = vld [vmem:[#allocation2 + $0x301] sm:$0xff] }
 0x45c   :  { %2488 = vmatprep.mubr.f32.mxu0 %v10424_v54 }
 0x45e   :  { %v2225_v62 = vpop.f32.mrb[0].mxu0 }
 0x45f   :  { %v6824_v3 = vadd.f32 %v9228_v28, %v2225_v62  ;;  %v2227_v45 = vpop.f32.mrb[1].mxu0  ;;  %2489 = vmatmul.mubr.f32.gmra.mrb[106].mxu0 %v859_v52  ;;  %v9243_v52 = vpop.f32.mrb[35].mxu1 }
 0x460   :  { %2493 = vmatprep.mubr.f32.mxu0 %v924_v29  ;;  %v862_v29 = vld [vmem:[#allocation2 + $0x300] sm:$0xff] }
 0x461   :  { %v2611_v27 = vadd.f32 %v6824_v3, %v9093_v4  ;;  %v927_v3 = vld [vmem:[#allocation2 + $0x309] sm:$0xff]  ;;  %v3041_v45 = vld [vmem:[#allocation9 + $0x180] sm:$0xff] }
 0x462   :  { %v2230_v6 = vpop.f32.mrb[2].mxu0 }
 0x463   :  { %v2929_v37 = vmax.f32 %v2611_v27, 0.0  ;;  %v6825_v8 = vadd.f32 %v9228_v28, %v2230_v6  ;;  %v2232_v58 = vpop.f32.mrb[3].mxu0  ;;  %2494 = vmatmul.mubr.f32.gmra.mrb[108].mxu0 %v860_v43 }
 0x464   :  { %2498 = vmatprep.mubr.f32.mxu0 %v925_v53  ;;  %v863_v58 = vld [vmem:[#allocation2 + $0x308] sm:$0xff] }
 0x465   :  { %3224 = vst [vmem:[#allocation3 + $0x19] sm:$0xff] %v2929_v37  ;;  %v2616_v46 = vadd.f32 %v6825_v8, %v9090_v12  ;;  %3945 = vmatprep.mubr.f32.mxu1 %v2929_v37  ;;  %v3042_v12 = vld [vmem:[#allocation9 + $0x188] sm:$0xff] }
 0x466   :  { %v2235_v20 = vpop.f32.mrb[4].mxu0  ;;  %v6657_v27 = vpack.c.bf16 %v3042_v12, %v3041_v45  ;;  %v929_v45 = vld [vmem:[#allocation2 + $0x321] sm:$0xff] }
 0x467   :  { %v2930_v15 = vmax.f32 %v2616_v46, 0.0  ;;  %v6826_v4 = vadd.f32 %v9228_v28, %v2235_v20  ;;  %v2237_v54 = vpop.f32.mrb[5].mxu0  ;;  %2499 = vmatmul.mubr.f32.gmra.mrb[110].mxu0 %v861_v14  ;;  %v928_v46 = vld [vmem:[#allocation2 + $0x319] sm:$0xff] }
 0x468   :  { %2503 = vmatprep.mubr.f32.mxu0 %v926_v42  ;;  %6658 = vmatpush1.bf16.msra.mxu1 %v6657_v27  ;;  %v9249_v42 = vpop.f32.mrb[36].mxu1 }
 0x469   :  { %3225 = vst [vmem:[#allocation3 + $0x21] sm:$0xff] %v2930_v15  ;;  %v2621_v62 = vadd.f32 %v6826_v4, %v9102_v7  ;;  %6659 = vmatprep.subr.bf16.mxu1 %v10373_v2 }
 0x46a   :  { %v2240_v43 = vpop.f32.mrb[6].mxu0 }
 0x46b   :  { %v2931_v53 = vmax.f32 %v2621_v62, 0.0  ;;  %v6827_v6 = vadd.f32 %v9228_v28, %v2240_v43  ;;  %v2242_v37 = vpop.f32.mrb[7].mxu0  ;;  %2504 = vmatmul.mubr.f32.gmra.mrb[112].mxu0 %v862_v29  ;;  %v9252_v29 = vpop.f32.mrb[37].mxu1 }
 0x46c   :  { %2508 = vmatprep.mubr.f32.mxu0 %v927_v3  ;;  %v3290_v8 = vld [vmem:[#allocation3 + $0x18] sm:$0xff]  ;;  %v865_v37 = vld [vmem:[#allocation2 + $0x320] sm:$0xff] }
 0x46d   :  { %3226 = vst [vmem:[#allocation3 + $0x31] sm:$0xff] %v2931_v53  ;;  %v2626_v14 = vadd.f32 %v6827_v6, %v9097_v51  ;;  %3946 = vmatmul.mubr.f32.gmra.mrb[68].mxu1 %v3290_v8  ;;  %v864_v3 = vld [vmem:[#allocation2 + $0x318] sm:$0xff] }
 0x46e   :  { %v2245_v7 = vpop.f32.mrb[8].mxu0  ;;  %3950 = vmatprep.mubr.f32.mxu1 %v2930_v15 }
 0x46f   :  { %v2932_v20 = vmax.f32 %v2626_v14, 0.0  ;;  %v6828_v4 = vadd.f32 %v9228_v28, %v2245_v7  ;;  %v2247_v54 = vpop.f32.mrb[9].mxu0  ;;  %2509 = vmatmul.mubr.f32.gmra.mrb[114].mxu0 %v863_v58  ;;  %v930_v58 = vld [vmem:[#allocation2 + $0x331] sm:$0xff] }
 0x470   :  { %2513 = vmatprep.mubr.f32.mxu0 %v928_v46  ;;  %v3291_v62 = vld [vmem:[#allocation3 + $0x20] sm:$0xff] }
 0x471   :  { %3227 = vst [vmem:[#allocation3 + $0x39] sm:$0xff] %v2932_v20  ;;  %v2631_v51 = vadd.f32 %v6828_v4, %v9116_v17  ;;  %3951 = vmatmul.mubr.f32.gmra.mrb[70].mxu1 %v3291_v62  ;;  %v9257_v17 = vpop.f32.mrb[38].mxu1  ;;  %v866_v62 = vld [vmem:[#allocation2 + $0x330] sm:$0xff] }
 0x472   :  { %v2250_v12 = vpop.f32.mrb[10].mxu0  ;;  %3955 = vmatprep.mubr.f32.mxu1 %v2931_v53  ;;  %v9260_v4 = vpop.f32.mrb[39].mxu1 }
 0x473   :  { %v2933_v15 = vmax.f32 %v2631_v51, 0.0  ;;  %v6829_v43 = vadd.f32 %v9228_v28, %v2250_v12  ;;  %v2252_v27 = vpop.f32.mrb[11].mxu0  ;;  %2514 = vmatmul.mubr.f32.gmra.mrb[116].mxu0 %v864_v3  ;;  %v3043_v51 = vld [vmem:[#allocation9 + $0x190] sm:$0xff] }
 0x474   :  { %2518 = vmatprep.mubr.f32.mxu0 %v929_v45  ;;  %v3292_v6 = vld [vmem:[#allocation3 + $0x30] sm:$0xff]  ;;  %v3044_v45 = vld [vmem:[#allocation9 + $0x198] sm:$0xff] }
 0x475   :  { %3228 = vst [vmem:[#allocation3 + $0x49] sm:$0xff] %v2933_v15  ;;  %v2636_v8 = vadd.f32 %v6829_v43, %v9113_v48  ;;  %3956 = vmatmul.mubr.f32.gmra.mrb[72].mxu1 %v3292_v6  ;;  %v931_v48 = vld [vmem:[#allocation2 + $0x339] sm:$0xff]  ;;  %v6660_v12 = vpack.c.bf16 %v3044_v45, %v3043_v51  ;;  %v933_v51 = vld [vmem:[#allocation2 + $0x351] sm:$0xff] }
 0x476   :  { %v2255_v14 = vpop.f32.mrb[12].mxu0  ;;  %3960 = vmatprep.mubr.f32.mxu1 %v2932_v20 }
 0x477   :  { %v2934_v46 = vmax.f32 %v2636_v8, 0.0  ;;  %v6830_v53 = vadd.f32 %v9228_v28, %v2255_v14  ;;  %v2257_v7 = vpop.f32.mrb[13].mxu0  ;;  %2519 = vmatmul.mubr.f32.gmra.mrb[118].mxu0 %v865_v37  ;;  %v867_v8 = vld [vmem:[#allocation2 + $0x338] sm:$0xff]  ;;  %6661 = vmatpush1.bf16.msra.mxu1 %v6660_v12 }
 0x478   :  { %2523 = vmatprep.mubr.f32.mxu0 %v930_v58  ;;  %v3293_v54 = vld [vmem:[#allocation3 + $0x38] sm:$0xff]  ;;  %6662 = vmatprep.subr.bf16.mxu1 %v10373_v2 }
 0x479   :  { %3229 = vst [vmem:[#allocation3 + $0x51] sm:$0xff] %v2934_v46  ;;  %v2641_v3 = vadd.f32 %v6830_v53, %v9130_v63  ;;  %3961 = vmatmul.mubr.f32.gmra.mrb[74].mxu1 %v3293_v54  ;;  %v932_v63 = vld [vmem:[#allocation2 + $0x349] sm:$0xff] }
 0x47a   :  { %v2260_v20 = vpop.f32.mrb[14].mxu0  ;;  %3965 = vmatprep.mubr.f32.mxu1 %v2933_v15  ;;  %v9266_v15 = vpop.f32.mrb[40].mxu1 }
 0x47b   :  { %v2935_v43 = vmax.f32 %v2641_v3, 0.0  ;;  %v6831_v27 = vadd.f32 %v9228_v28, %v2260_v20  ;;  %v2262_v6 = vpop.f32.mrb[15].mxu0  ;;  %2524 = vmatmul.mubr.f32.gmra.mrb[120].mxu0 %v866_v62  ;;  %v9269_v62 = vpop.f32.mrb[41].mxu1 }
 0x47c   :  { %2528 = vmatprep.mubr.f32.mxu0 %v931_v48  ;;  %v3294_v37 = vld [vmem:[#allocation3 + $0x48] sm:$0xff] }
 0x47d   :  { %3230 = vst [vmem:[#allocation3 + $0x61] sm:$0xff] %v2935_v43  ;;  %v2646_v58 = vadd.f32 %v6831_v27, %v9127_v50  ;;  %3966 = vmatmul.mubr.f32.gmra.mrb[76].mxu1 %v3294_v37  ;;  %v868_v48 = vld [vmem:[#allocation2 + $0x348] sm:$0xff] }
 0x47e   :  { %v2265_v14 = vpop.f32.mrb[16].mxu0  ;;  %3970 = vmatprep.mubr.f32.mxu1 %v2934_v46 }
 0x47f   :  { %v2936_v53 = vmax.f32 %v2646_v58, 0.0  ;;  %v6832_v7 = vadd.f32 %v9228_v28, %v2265_v14  ;;  %v2267_v54 = vpop.f32.mrb[17].mxu0  ;;  %2529 = vmatmul.mubr.f32.gmra.mrb[122].mxu0 %v867_v8  ;;  %v9274_v8 = vpop.f32.mrb[42].mxu1 }
 0x480   :  { %2533 = vmatprep.mubr.f32.mxu0 %v932_v63  ;;  %v3295_v3 = vld [vmem:[#allocation3 + $0x50] sm:$0xff]  ;;  %v9278_v14 = vpop.f32.mrb[43].mxu1 }
 0x481   :  { %3231 = vst [vmem:[#allocation3 + $0x69] sm:$0xff] %v2936_v53  ;;  %v2651_v50 = vadd.f32 %v6832_v7, %v9143_v40  ;;  %3971 = vmatmul.mubr.f32.gmra.mrb[78].mxu1 %v3295_v3  ;;  %v3046_v3 = vld [vmem:[#allocation9 + $0x1a8] sm:$0xff] }
 0x482   :  { %v2270_v45 = vpop.f32.mrb[18].mxu0  ;;  %3975 = vmatprep.mubr.f32.mxu1 %v2935_v43  ;;  %v3801_v43 = vld [vmem:[#allocation3 + $0x32] sm:$0xff] }
 0x483   :  { %v2937_v46 = vmax.f32 %v2651_v50, 0.0  ;;  %v6833_v20 = vadd.f32 %v9228_v28, %v2270_v45  ;;  %v2272_v12 = vpop.f32.mrb[19].mxu0  ;;  %2534 = vmatmul.mubr.f32.gmra.mrb[124].mxu0 %v868_v48  ;;  %v3802_v48 = vld [vmem:[#allocation3 + $0x3a] sm:$0xff] }
 0x484   :  { %2538 = vmatprep.mubr.f32.mxu0 %v933_v51  ;;  %v3296_v27 = vld [vmem:[#allocation3 + $0x60] sm:$0xff] }
 0x485   :  { %3232 = vst [vmem:[#allocation3 + $0x79] sm:$0xff] %v2937_v46  ;;  %v2656_v6 = vadd.f32 %v6833_v20, %v9140_v57  ;;  %3976 = vmatmul.mubr.f32.gmra.mrb[80].mxu1 %v3296_v27  ;;  %v3045_v57 = vld [vmem:[#allocation9 + $0x1a0] sm:$0xff] }
 0x486   :  { %v2275_v37 = vpop.f32.mrb[20].mxu0  ;;  %3980 = vmatprep.mubr.f32.mxu1 %v2936_v53  ;;  %v6663_v50 = vpack.c.bf16 %v3046_v3, %v3045_v57 }
 0x487   :  { %v2938_v40 = vmax.f32 %v2656_v6, 0.0  ;;  %v6834_v58 = vadd.f32 %v9228_v28, %v2275_v37  ;;  %v2277_v63 = vpop.f32.mrb[21].mxu0  ;;  %2539 = vmatmul.mubr.f32.gmra.mrb[126].mxu0 %v9099_v41  ;;  %v3803_v41 = vld [vmem:[#allocation3 + $0x4a] sm:$0xff]  ;;  %v3804_v6 = vld [vmem:[#allocation3 + $0x52] sm:$0xff] }
 0x488   :  { %6264 = vmatprep.mubr.f32.mxu0 %v3801_v43  ;;  %v3297_v7 = vld [vmem:[#allocation3 + $0x68] sm:$0xff]  ;;  %6664 = vmatpush1.bf16.msra.mxu1 %v6663_v50 }
 0x489   :  { %3233 = vst [vmem:[#allocation3 + $0x81] sm:$0xff] %v2938_v40  ;;  %v2661_v54 = vadd.f32 %v6834_v58, %v9156_v9  ;;  %3981 = vmatmul.mubr.f32.gmra.mrb[82].mxu1 %v3297_v7  ;;  %6665 = vmatprep.subr.bf16.mxu1 %v10373_v2  ;;  %v3805_v43 = vld [vmem:[#allocation3 + $0x62] sm:$0xff]  ;;  %v3806_v3 = vld [vmem:[#allocation3 + $0x6a] sm:$0xff] }
 0x48a   :  { %v2280_v53 = vpop.f32.mrb[22].mxu0  ;;  %3985 = vmatprep.mubr.f32.mxu1 %v2937_v46  ;;  %v9284_v46 = vpop.f32.mrb[44].mxu1 }
 0x48b   :  { %v2939_v51 = vmax.f32 %v2661_v54, 0.0  ;;  %v6835_v45 = vadd.f32 %v9228_v28, %v2280_v53  ;;  %v2282_v20 = vpop.f32.mrb[23].mxu0  ;;  %6265 = vmatmul.mubr.f32.vlgmr.msra.gmra.mrb[128].mxu0 %v3802_v48  ;;  %v9287_v7 = vpop.f32.mrb[45].mxu1 }
 0x48c   :  { %6267 = vmatprep.mubr.f32.mxu0 %v3803_v41  ;;  %v3298_v12 = vld [vmem:[#allocation3 + $0x78] sm:$0xff] }
 0x48d   :  { %3234 = vst [vmem:[#allocation3 + $0x91] sm:$0xff] %v2939_v51  ;;  %v2666_v27 = vadd.f32 %v6835_v45, %v9152_v31  ;;  %3986 = vmatmul.mubr.f32.gmra.mrb[84].mxu1 %v3298_v12  ;;  %v9291_v45 = vpop.f32.mrb[46].mxu1 }
 0x48e   :  { %v2285_v9 = vpop.f32.mrb[24].mxu0  ;;  %3990 = vmatprep.mubr.f32.mxu1 %v2938_v40  ;;  %v9293_v41 = vpop.f32.mrb[47].mxu1 }
 0x48f   :  { %v2940_v37 = vmax.f32 %v2666_v27, 0.0  ;;  %v6836_v58 = vadd.f32 %v9228_v28, %v2285_v9  ;;  %v2287_v63 = vpop.f32.mrb[25].mxu0  ;;  %6268 = vmatmul.mubr.f32.gmra.mrb[130].mxu0 %v3804_v6 }
 0x490   :  { %6270 = vmatprep.mubr.f32.mxu0 %v3805_v43  ;;  %v3299_v54 = vld [vmem:[#allocation3 + $0x80] sm:$0xff] }
 0x491   :  { %3235 = vst [vmem:[#allocation3 + $0x99] sm:$0xff] %v2940_v37  ;;  %v2671_v31 = vadd.f32 %v6836_v58, %v9164_v11  ;;  %3991 = vmatmul.mubr.f32.gmra.mrb[86].mxu1 %v3299_v54  ;;  %v3807_v50 = vld [vmem:[#allocation3 + $0x7a] sm:$0xff]  ;;  %v3808_v27 = vld [vmem:[#allocation3 + $0x82] sm:$0xff]  ;;  %v9297_v58 = vpop.f32.mrb[48].mxu1 }
 0x492   :  { %v2290_v57 = vpop.f32.mrb[26].mxu0  ;;  %3995 = vmatprep.mubr.f32.mxu1 %v2939_v51  ;;  %v9299_v54 = vpop.f32.mrb[49].mxu1 }
 0x493   :  { %v2941_v40 = vmax.f32 %v2671_v31, 0.0  ;;  %v6837_v53 = vadd.f32 %v9228_v28, %v2290_v57  ;;  %v2292_v48 = vpop.f32.mrb[27].mxu0  ;;  %6271 = vmatmul.mubr.f32.gmra.mrb[132].mxu0 %v3806_v3 }
 0x494   :  { %6273 = vmatprep.mubr.f32.mxu0 %v3807_v50  ;;  %v3300_v20 = vld [vmem:[#allocation3 + $0x90] sm:$0xff]  ;;  %v9303_v48 = vpop.f32.mrb[50].mxu1 }
 0x495   :  { %3236 = vst [vmem:[#allocation3 + $0xa9] sm:$0xff] %v2941_v40  ;;  %v2676_v12 = vadd.f32 %v6837_v53, %v9162_v33  ;;  %3996 = vmatmul.mubr.f32.gmra.mrb[88].mxu1 %v3300_v20  ;;  %v9305_v20 = vpop.f32.mrb[51].mxu1 }
 0x496   :  { %v2295_v11 = vpop.f32.mrb[28].mxu0  ;;  %4000 = vmatprep.mubr.f32.mxu1 %v2940_v37 }
 0x497   :  { %v2942_v51 = vmax.f32 %v2676_v12, 0.0  ;;  %v6838_v9 = vadd.f32 %v9228_v28, %v2295_v11  ;;  %v2297_v6 = vpop.f32.mrb[29].mxu0  ;;  %6274 = vmatmul.mubr.f32.gmra.mrb[134].mxu0 %v3808_v27  ;;  %v3048_v11 = vld [vmem:[#allocation9 + $0x1b8] sm:$0xff] }
 0x498   :  { %v3809_v63 = vld [vmem:[#allocation3 + $0x92] sm:$0xff]  ;;  %v3810_v57 = vld [vmem:[#allocation3 + $0x9a] sm:$0xff] }
 0x499   :  { %v3301_v43 = vld [vmem:[#allocation3 + $0x98] sm:$0xff]  ;;  %3237 = vst [vmem:[#allocation3 + $0xb1] sm:$0xff] %v2942_v51  ;;  %v2681_v31 = vadd.f32 %v6838_v9, %v9170_v47  ;;  %6276 = vmatprep.mubr.f32.mxu0 %v3809_v63  ;;  %v3047_v47 = vld [vmem:[#allocation9 + $0x1b0] sm:$0xff] }
 0x49a   :  { %4001 = vmatmul.mubr.f32.gmra.mrb[90].mxu1 %v3301_v43  ;;  %v2300_v33 = vpop.f32.mrb[30].mxu0  ;;  %v6666_v9 = vpack.c.bf16 %v3048_v11, %v3047_v47  ;;  %v9309_v43 = vpop.f32.mrb[52].mxu1 }
 0x49b   :  { %4005 = vmatprep.mubr.f32.mxu1 %v2941_v40  ;;  %v2943_v37 = vmax.f32 %v2681_v31, 0.0  ;;  %v6839_v3 = vadd.f32 %v9228_v28, %v2300_v33  ;;  %v2302_v53 = vpop.f32.mrb[31].mxu0  ;;  %6277 = vmatmul.mubr.f32.gmra.mrb[136].mxu0 %v3810_v57 }
 0x49c   :  { %v3302_v50 = vld [vmem:[#allocation3 + $0xa8] sm:$0xff]  ;;  %6667 = vmatpush1.bf16.msra.mxu1 %v6666_v9  ;;  %v9311_v53 = vpop.f32.mrb[53].mxu1 }
 0x49d   :  { %3238 = vst [vmem:[#allocation3 + $0xc1] sm:$0xff] %v2943_v37  ;;  %v2686_v12 = vadd.f32 %v6839_v3, %v9168_v61  ;;  %v9315_v47 = vpop.f32.mrb[54].mxu1  ;;  %6668 = vmatprep.subr.bf16.mxu1 %v10373_v2 }
 0x49e   :  { %4006 = vmatmul.mubr.f32.gmra.mrb[92].mxu1 %v3302_v50  ;;  %v2305_v27 = vpop.f32.mrb[32].mxu0 }
 0x49f   :  { %4010 = vmatprep.mubr.f32.mxu1 %v2942_v51  ;;  %v2944_v40 = vmax.f32 %v2686_v12, 0.0  ;;  %v6840_v6 = vadd.f32 %v9228_v28, %v2305_v27  ;;  %v2307_v63 = vpop.f32.mrb[33].mxu0  ;;  %v9318_v27 = vpop.f32.mrb[55].mxu1 }
 0x4a0   :  { %v3811_v31 = vld [vmem:[#allocation3 + $0xaa] sm:$0xff]  ;;  %v3812_v57 = vld [vmem:[#allocation3 + $0xb2] sm:$0xff] }
 0x4a1   :  { %v3303_v33 = vld [vmem:[#allocation3 + $0xb0] sm:$0xff]  ;;  %3239 = vst [vmem:[#allocation3 + $0xc9] sm:$0xff] %v2944_v40  ;;  %v2691_v61 = vadd.f32 %v6840_v6, %v9177_v56  ;;  %6279 = vmatprep.mubr.f32.mxu0 %v3811_v31  ;;  %v9322_v31 = vpop.f32.mrb[56].mxu1 }
 0x4a2   :  { %4011 = vmatmul.mubr.f32.gmra.mrb[94].mxu1 %v3303_v33  ;;  %v2310_v3 = vpop.f32.mrb[34].mxu0  ;;  %6280 = vmatmul.mubr.f32.gmra.mrb[138].mxu0 %v3812_v57 }
 0x4a3   :  { %4015 = vmatprep.mubr.f32.mxu1 %v2943_v37  ;;  %v2945_v51 = vmax.f32 %v2691_v61, 0.0  ;;  %v6841_v50 = vadd.f32 %v9228_v28, %v2310_v3  ;;  %v2312_v12 = vpop.f32.mrb[35].mxu0  ;;  %v9324_v3 = vpop.f32.mrb[57].mxu1 }
 0x4a4   :  { %v3304_v11 = vld [vmem:[#allocation3 + $0xc0] sm:$0xff] }
 0x4a5   :  { %3240 = vst [vmem:[#allocation3 + $0xd9] sm:$0xff] %v2945_v51  ;;  %v2696_v9 = vadd.f32 %v6841_v50, %v9175_v5 }
 0x4a6   :  { %4016 = vmatmul.mubr.f32.gmra.mrb[96].mxu1 %v3304_v11  ;;  %v2315_v56 = vpop.f32.mrb[36].mxu0 }
 0x4a7   :  { %4020 = vmatprep.mubr.f32.mxu1 %v2944_v40  ;;  %v2946_v6 = vmax.f32 %v2696_v9, 0.0  ;;  %v6842_v37 = vadd.f32 %v9228_v28, %v2315_v56  ;;  %v2317_v63 = vpop.f32.mrb[37].mxu0  ;;  %v9328_v9 = vpop.f32.mrb[58].mxu1 }
 0x4a8   :  { %v3813_v33 = vld [vmem:[#allocation3 + $0xc2] sm:$0xff]  ;;  %v3814_v61 = vld [vmem:[#allocation3 + $0xca] sm:$0xff]  ;;  %v9330_v63 = vpop.f32.mrb[59].mxu1 }
 0x4a9   :  { %v3305_v57 = vld [vmem:[#allocation3 + $0xc8] sm:$0xff]  ;;  %3241 = vst [vmem:[#allocation3 + $0xe1] sm:$0xff] %v2946_v6  ;;  %v2701_v12 = vadd.f32 %v6842_v37, %v9183_v55  ;;  %6282 = vmatprep.mubr.f32.mxu0 %v3813_v33 }
 0x4aa   :  { %4021 = vmatmul.mubr.f32.gmra.mrb[98].mxu1 %v3305_v57  ;;  %v2320_v5 = vpop.f32.mrb[38].mxu0  ;;  %6283 = vmatmul.mubr.f32.gmra.mrb[140].mxu0 %v3814_v61  ;;  %v3050_v55 = vld [vmem:[#allocation9 + $0x1c8] sm:$0xff] }
 0x4ab   :  { %4025 = vmatprep.mubr.f32.mxu1 %v2945_v51  ;;  %v2947_v40 = vmax.f32 %v2701_v12, 0.0  ;;  %v6843_v50 = vadd.f32 %v9228_v28, %v2320_v5  ;;  %v2322_v11 = vpop.f32.mrb[39].mxu0  ;;  %v6669_v33 = vpack.c.bf16 %v3050_v55, %v3049_v30  ;;  %v9334_v12 = vpop.f32.mrb[60].mxu1 }
 0x4ac   :  { %v3306_v56 = vld [vmem:[#allocation3 + $0xd8] sm:$0xff]  ;;  %v9336_v38 = vpop.f32.mrb[61].mxu1 }
 0x4ad   :  { %3242 = vst [vmem:[#allocation3 + $0xf1] sm:$0xff] %v2947_v40  ;;  %v2706_v34 = vadd.f32 %v6843_v50, %v9181_v39  ;;  %6670 = vmatpush1.bf16.msra.mxu1 %v6669_v33 }
 0x4ae   :  { %4026 = vmatmul.mubr.f32.gmra.mrb[100].mxu1 %v3306_v56  ;;  %v2325_v37 = vpop.f32.mrb[40].mxu0  ;;  %v9340_v56 = vpop.f32.mrb[62].mxu1  ;;  %6671 = vmatprep.subr.bf16.mxu1 %v10373_v2 }
 0x4af   :  { %4030 = vmatprep.mubr.f32.mxu1 %v2946_v6  ;;  %v2948_v57 = vmax.f32 %v2706_v34, 0.0  ;;  %v6844_v51 = vadd.f32 %v9228_v28, %v2325_v37  ;;  %v2327_v61 = vpop.f32.mrb[41].mxu0  ;;  %v9343_v37 = vpop.f32.mrb[63].mxu1 }
 0x4b0   :  { %v3815_v5 = vld [vmem:[#allocation3 + $0xda] sm:$0xff]  ;;  %v3816_v16 = vld [vmem:[#allocation3 + $0xe2] sm:$0xff] }
 0x4b1   :  { %v3307_v11 = vld [vmem:[#allocation3 + $0xe0] sm:$0xff]  ;;  %3243 = vst [vmem:[#allocation3 + $0xf9] sm:$0xff] %v2948_v57  ;;  %v2711_v39 = vadd.f32 %v6844_v51, %v9190_v23  ;;  %6285 = vmatprep.mubr.f32.mxu0 %v3815_v5 }
 0x4b2   :  { %4031 = vmatmul.mubr.f32.gmra.mrb[102].mxu1 %v3307_v11  ;;  %v2330_v50 = vpop.f32.mrb[42].mxu0  ;;  %6286 = vmatmul.mubr.f32.gmra.mrb[142].mxu0 %v3816_v16 }
 0x4b3   :  { %4035 = vmatprep.mubr.f32.mxu1 %v2947_v40  ;;  %v2949_v30 = vmax.f32 %v2711_v39, 0.0  ;;  %v6845_v34 = vadd.f32 %v9228_v28, %v2330_v50  ;;  %v2332_v6 = vpop.f32.mrb[43].mxu0 }
 0x4b4   :  { %v3308_v55 = vld [vmem:[#allocation3 + $0xf0] sm:$0xff] }
 0x4b5   :  { %3244 = vst [vmem:[#allocation3 + $0x109] sm:$0xff] %v2949_v30  ;;  %v2716_v33 = vadd.f32 %v6845_v34, %v9188_v44 }
 0x4b6   :  { %4036 = vmatmul.mubr.f32.gmra.mrb[104].mxu1 %v3308_v55  ;;  %v2335_v23 = vpop.f32.mrb[44].mxu0 }
 0x4b7   :  { %4040 = vmatprep.mubr.f32.mxu1 %v2948_v57  ;;  %v2950_v51 = vmax.f32 %v2716_v33, 0.0  ;;  %v6846_v16 = vadd.f32 %v9228_v28, %v2335_v23  ;;  %v2337_v40 = vpop.f32.mrb[45].mxu0  ;;  %v3051_v33 = vld [vmem:[#allocation9 + $0x1d0] sm:$0xff]  ;;  %v3052_v23 = vld [vmem:[#allocation9 + $0x1d8] sm:$0xff] }
 0x4b8   :  { %v3817_v61 = vld [vmem:[#allocation3 + $0xf2] sm:$0xff]  ;;  %v3818_v11 = vld [vmem:[#allocation3 + $0xfa] sm:$0xff]  ;;  %v6672_v36 = vpack.c.bf16 %v3052_v23, %v3051_v33 }
 0x4b9   :  { %v3309_v5 = vld [vmem:[#allocation3 + $0xf8] sm:$0xff]  ;;  %3245 = vst [vmem:[#allocation3 + $0x111] sm:$0xff] %v2950_v51  ;;  %v2721_v39 = vadd.f32 %v6846_v16, %v9196_v19  ;;  %6288 = vmatprep.mubr.f32.mxu0 %v3817_v61 }
 0x4ba   :  { %4041 = vmatmul.mubr.f32.gmra.mrb[106].mxu1 %v3309_v5  ;;  %v2340_v50 = vpop.f32.mrb[46].mxu0  ;;  %6289 = vmatmul.mubr.f32.gmra.mrb[144].mxu0 %v3818_v11 }
 0x4bb   :  { %4045 = vmatprep.mubr.f32.mxu1 %v2949_v30  ;;  %v2951_v6 = vmax.f32 %v2721_v39, 0.0  ;;  %v6847_v44 = vadd.f32 %v9228_v28, %v2340_v50  ;;  %v2342_v34 = vpop.f32.mrb[47].mxu0  ;;  %6673 = vmatpush1.bf16.msra.mxu1 %v6672_v36 }
 0x4bc   :  { %v3310_v57 = vld [vmem:[#allocation3 + $0x108] sm:$0xff]  ;;  %6674 = vmatprep.subr.bf16.mxu1 %v10373_v2 }
 0x4bd   :  { %3246 = vst [vmem:[#allocation3 + $0x121] sm:$0xff] %v2951_v6  ;;  %v2726_v55 = vadd.f32 %v6847_v44, %v9194_v1 }
 0x4be   :  { %4046 = vmatmul.mubr.f32.gmra.mrb[108].mxu1 %v3310_v57  ;;  %v2345_v40 = vpop.f32.mrb[48].mxu0 }
 0x4bf   :  { %4050 = vmatprep.mubr.f32.mxu1 %v2950_v51  ;;  %v2952_v19 = vmax.f32 %v2726_v55, 0.0  ;;  %v6848_v16 = vadd.f32 %v9228_v28, %v2345_v40  ;;  %v2347_v61 = vpop.f32.mrb[49].mxu0 }
 0x4c0   :  { %v3819_v5 = vld [vmem:[#allocation3 + $0x10a] sm:$0xff]  ;;  %v3820_v11 = vld [vmem:[#allocation3 + $0x112] sm:$0xff] }
 0x4c1   :  { %v3311_v30 = vld [vmem:[#allocation3 + $0x110] sm:$0xff]  ;;  %3247 = vst [vmem:[#allocation3 + $0x129] sm:$0xff] %v2952_v19  ;;  %v2731_v39 = vadd.f32 %v6848_v16, %v9203_v18  ;;  %6291 = vmatprep.mubr.f32.mxu0 %v3819_v5 }
 0x4c2   :  { %4051 = vmatmul.mubr.f32.gmra.mrb[110].mxu1 %v3311_v30  ;;  %v2350_v1 = vpop.f32.mrb[50].mxu0  ;;  %6292 = vmatmul.mubr.f32.gmra.mrb[146].mxu0 %v3820_v11 }
 0x4c3   :  { %4055 = vmatprep.mubr.f32.mxu1 %v2951_v6  ;;  %v2953_v50 = vmax.f32 %v2731_v39, 0.0  ;;  %v6849_v51 = vadd.f32 %v9228_v28, %v2350_v1  ;;  %v2352_v44 = vpop.f32.mrb[51].mxu0  ;;  %v3053_v39 = vld [vmem:[#allocation9 + $0x1e0] sm:$0xff]  ;;  %v3054_v1 = vld [vmem:[#allocation9 + $0x1e8] sm:$0xff] }
 0x4c4   :  { %v3312_v34 = vld [vmem:[#allocation3 + $0x120] sm:$0xff]  ;;  %v6675_v44 = vpack.c.bf16 %v3054_v1, %v3053_v39 }
 0x4c5   :  { %3248 = vst [vmem:[#allocation3 + $0x139] sm:$0xff] %v2953_v50  ;;  %v2736_v57 = vadd.f32 %v6849_v51, %v9201_v59 }
 0x4c6   :  { %4056 = vmatmul.mubr.f32.gmra.mrb[112].mxu1 %v3312_v34  ;;  %v2355_v36 = vpop.f32.mrb[52].mxu0 }
 0x4c7   :  { %4060 = vmatprep.mubr.f32.mxu1 %v2952_v19  ;;  %v2954_v55 = vmax.f32 %v2736_v57, 0.0  ;;  %v6850_v18 = vadd.f32 %v9228_v28, %v2355_v36  ;;  %v2357_v33 = vpop.f32.mrb[53].mxu0  ;;  %6676 = vmatpush1.bf16.msra.mxu1 %v6675_v44 }
 0x4c8   :  { %v3821_v23 = vld [vmem:[#allocation3 + $0x122] sm:$0xff]  ;;  %v3822_v6 = vld [vmem:[#allocation3 + $0x12a] sm:$0xff]  ;;  %6677 = vmatprep.subr.bf16.mxu1 %v10373_v2 }
 0x4c9   :  { %v3313_v40 = vld [vmem:[#allocation3 + $0x128] sm:$0xff]  ;;  %3249 = vst [vmem:[#allocation3 + $0x141] sm:$0xff] %v2954_v55  ;;  %v2741_v16 = vadd.f32 %v6850_v18, %v9209_v10  ;;  %6294 = vmatprep.mubr.f32.mxu0 %v3821_v23 }
 0x4ca   :  { %4061 = vmatmul.mubr.f32.gmra.mrb[114].mxu1 %v3313_v40  ;;  %v2360_v61 = vpop.f32.mrb[54].mxu0  ;;  %6295 = vmatmul.mubr.f32.gmra.mrb[148].mxu0 %v3822_v6 }
 0x4cb   :  { %4065 = vmatprep.mubr.f32.mxu1 %v2953_v50  ;;  %v2955_v5 = vmax.f32 %v2741_v16, 0.0  ;;  %v6851_v59 = vadd.f32 %v9228_v28, %v2360_v61  ;;  %v2362_v30 = vpop.f32.mrb[55].mxu0 }
 0x4cc   :  { %v3314_v19 = vld [vmem:[#allocation3 + $0x138] sm:$0xff] }
 0x4cd   :  { %3250 = vst [vmem:[#allocation3 + $0x151] sm:$0xff] %v2955_v5  ;;  %v2746_v11 = vadd.f32 %v6851_v59, %v9207_v35 }
 0x4ce   :  { %4066 = vmatmul.mubr.f32.gmra.mrb[116].mxu1 %v3314_v19  ;;  %v2365_v51 = vpop.f32.mrb[56].mxu0 }
 0x4cf   :  { %4070 = vmatprep.mubr.f32.mxu1 %v2954_v55  ;;  %v2956_v10 = vmax.f32 %v2746_v11, 0.0  ;;  %v6852_v34 = vadd.f32 %v9228_v28, %v2365_v51  ;;  %v2367_v57 = vpop.f32.mrb[57].mxu0 }
 0x4d0   :  { %v3823_v36 = vld [vmem:[#allocation3 + $0x13a] sm:$0xff]  ;;  %v3824_v18 = vld [vmem:[#allocation3 + $0x142] sm:$0xff]  ;;  %v3055_v57 = vld [vmem:[#allocation9 + $0x1f0] sm:$0xff] }
 0x4d1   :  { %v3315_v50 = vld [vmem:[#allocation3 + $0x140] sm:$0xff]  ;;  %3251 = vst [vmem:[#allocation3 + $0x159] sm:$0xff] %v2956_v10  ;;  %v2751_v33 = vadd.f32 %v6852_v34, %v9216_v25  ;;  %6297 = vmatprep.mubr.f32.mxu0 %v3823_v36  ;;  %v3056_v36 = vld [vmem:[#allocation9 + $0x1f8] sm:$0xff] }
 0x4d2   :  { %4071 = vmatmul.mubr.f32.gmra.mrb[118].mxu1 %v3315_v50  ;;  %v2370_v35 = vpop.f32.mrb[58].mxu0  ;;  %6298 = vmatmul.mubr.f32.gmra.mrb[150].mxu0 %v3824_v18  ;;  %v6678_v18 = vpack.c.bf16 %v3056_v36, %v3055_v57 }
 0x4d3   :  { %4075 = vmatprep.mubr.f32.mxu1 %v2955_v5  ;;  %v2957_v23 = vmax.f32 %v2751_v33, 0.0  ;;  %v6853_v55 = vadd.f32 %v9228_v28, %v2370_v35  ;;  %v2372_v40 = vpop.f32.mrb[59].mxu0 }
 0x4d4   :  { %v3316_v6 = vld [vmem:[#allocation3 + $0x150] sm:$0xff]  ;;  %6679 = vmatpush1.bf16.msra.mxu1 %v6678_v18  ;;  %v3832_v18 = vld [vmem:[#allocation3 + $0x1a2] sm:$0xff] }
 0x4d5   :  { %3252 = vst [vmem:[#allocation3 + $0x169] sm:$0xff] %v2957_v23  ;;  %v2756_v16 = vadd.f32 %v6853_v55, %v9214_v21  ;;  %v3384_v55 = vld [vmem:[#allocation3 + $0x1b1] sm:$0xff]  ;;  %6680 = vmatprep.subr.bf16.mxu1 %v10373_v2 }
 0x4d6   :  { %4076 = vmatmul.mubr.f32.gmra.mrb[120].mxu1 %v3316_v6  ;;  %v2375_v61 = vpop.f32.mrb[60].mxu0 }
 0x4d7   :  { %4080 = vmatprep.mubr.f32.mxu1 %v2956_v10  ;;  %v2958_v59 = vmax.f32 %v2756_v16, 0.0  ;;  %v6854_v25 = vadd.f32 %v9228_v28, %v2375_v61  ;;  %v2377_v30 = vpop.f32.mrb[61].mxu0  ;;  %v3320_v61 = vld [vmem:[#allocation3 + $0x1b0] sm:$0xff] }
 0x4d8   :  { %v3825_v19 = vld [vmem:[#allocation3 + $0x152] sm:$0xff]  ;;  %v3826_v5 = vld [vmem:[#allocation3 + $0x15a] sm:$0xff] }
 0x4d9   :  { %v3317_v11 = vld [vmem:[#allocation3 + $0x158] sm:$0xff]  ;;  %3253 = vst [vmem:[#allocation3 + $0x171] sm:$0xff] %v2958_v59  ;;  %v2761_v39 = vadd.f32 %v6854_v25, %v9223_v49  ;;  %6300 = vmatprep.mubr.f32.mxu0 %v3825_v19 }
 0x4da   :  { %4081 = vmatmul.mubr.f32.gmra.mrb[122].mxu1 %v3317_v11  ;;  %v2380_v1 = vpop.f32.mrb[62].mxu0  ;;  %6301 = vmatmul.mubr.f32.gmra.mrb[152].mxu0 %v3826_v5  ;;  %v3385_v19 = vld [vmem:[#allocation3 + $0x1b9] sm:$0xff] }
 0x4db   :  { %4085 = vmatprep.mubr.f32.mxu1 %v2957_v23  ;;  %v2959_v51 = vmax.f32 %v2761_v39, 0.0  ;;  %v6855_v21 = vadd.f32 %v9228_v28, %v2380_v1  ;;  %v2382_v44 = vpop.f32.mrb[63].mxu0 }
 0x4dc   :  { %v3318_v10 = vld [vmem:[#allocation3 + $0x168] sm:$0xff]  ;;  %v3831_v44 = vld [vmem:[#allocation3 + $0x19a] sm:$0xff] }
 0x4dd   :  { %3254 = vst [vmem:[#allocation3 + $0x181] sm:$0xff] %v2959_v51  ;;  %v2766_v34 = vadd.f32 %v6855_v21, %v9220_v0 }
 0x4de   :  { %4086 = vmatmul.mubr.f32.gmra.mrb[124].mxu1 %v3318_v10  ;;  %v2385_v50 = vpop.f32.mrb[64].mxu0 }
 0x4df   :  { %4090 = vmatprep.mubr.f32.mxu1 %v2958_v59  ;;  %v2960_v49 = vmax.f32 %v2766_v34, 0.0  ;;  %v6856_v33 = vadd.f32 %v9228_v28, %v2385_v50  ;;  %v2387_v35 = vpop.f32.mrb[65].mxu0  ;;  %v7730_v34 = vld [vmem:[#allocation2 + $0x8] sm:$0xff] }
 0x4e0   :  { %v3827_v23 = vld [vmem:[#allocation3 + $0x16a] sm:$0xff]  ;;  %v3828_v6 = vld [vmem:[#allocation3 + $0x172] sm:$0xff] }
 0x4e1   :  { %v3319_v40 = vld [vmem:[#allocation3 + $0x170] sm:$0xff]  ;;  %3255 = vst [vmem:[#allocation3 + $0x189] sm:$0xff] %v2960_v49  ;;  %v2771_v16 = vadd.f32 %v6856_v33, %v9235_v13  ;;  %6303 = vmatprep.mubr.f32.mxu0 %v3827_v23 }
 0x4e2   :  { %4091 = vmatmul.mubr.f32.gmra.mrb[126].mxu1 %v3319_v40  ;;  %v2390_v0 = vpop.f32.mrb[66].mxu0  ;;  %6304 = vmatmul.mubr.f32.gmra.mrb[154].mxu0 %v3828_v6 }
 0x4e3   :  { %4095 = vmatprep.mubr.f32.mxu1 %v3384_v55  ;;  %v2961_v59 = vmax.f32 %v2771_v16, 0.0  ;;  %v6857_v25 = vadd.f32 %v9228_v28, %v2390_v0  ;;  %v2392_v30 = vpop.f32.mrb[67].mxu0 }
 0x4e5   :  { %3256 = vst [vmem:[#allocation3 + $0x1c9] sm:$0xff] %v2961_v59  ;;  %v2776_v11 = vadd.f32 %v6857_v25, %v9232_v24 }
 0x4e6   :  { %4096 = vmatmul.mubr.f32.gmra.mrb[128].mxu1 %v3320_v61  ;;  %v2395_v5 = vpop.f32.mrb[68].mxu0 }
 0x4e7   :  { %4100 = vmatprep.mubr.f32.mxu1 %v3385_v19  ;;  %v2962_v13 = vmax.f32 %v2776_v11, 0.0  ;;  %v6858_v39 = vadd.f32 %v9228_v28, %v2395_v5  ;;  %v2397_v1 = vpop.f32.mrb[69].mxu0  ;;  %v9384_v11 = vld [vmem:[%s10307_s2] ss:$0 sm:$0xff] }
 0x4e8   :  { %v3829_v51 = vld [vmem:[#allocation3 + $0x182] sm:$0xff]  ;;  %v3830_v21 = vld [vmem:[#allocation3 + $0x18a] sm:$0xff] }
 0x4e9   :  { %3257 = vst [vmem:[#allocation3 + $0x1d1] sm:$0xff] %v2962_v13  ;;  %v2781_v10 = vadd.f32 %v6858_v39, %v9243_v52  ;;  %6306 = vmatprep.mubr.f32.mxu0 %v3829_v51 }
 0x4ea   :  { %4101 = vmatmul.mubr.f32.gmra.mrb[130].mxu1 %v7730_v34  ;;  %v2400_v57 = vpop.f32.mrb[70].mxu0  ;;  %6307 = vmatmul.mubr.f32.gmra.mrb[156].mxu0 %v3830_v21 }
 0x4eb   :  { %4105 = vmatprep.mubr.f32.mxu1 %v2961_v59  ;;  %v2963_v24 = vmax.f32 %v2781_v10, 0.0  ;;  %v6859_v36 = vadd.f32 %v9228_v28, %v2400_v57  ;;  %v2402_v50 = vpop.f32.mrb[71].mxu0  ;;  %6309 = vmatprep.mubr.f32.mxu0 %v3831_v44 }
 0x4ec   :  { %v3322_v49 = vld [vmem:[#allocation3 + $0x1c8] sm:$0xff] }
 0x4ed   :  { %3258 = vst [vmem:[#allocation3 + $0x1e1] sm:$0xff] %v2963_v24  ;;  %v2786_v33 = vadd.f32 %v6859_v36, %v9240_v60 }
 0x4ee   :  { %4106 = vmatmul.mubr.f32.gmra.mrb[132].mxu1 %v3322_v49  ;;  %v2405_v35 = vpop.f32.mrb[72].mxu0  ;;  %6310 = vmatmul.mubr.f32.gmra.mrb[158].mxu0 %v3832_v18 }
 0x4ef   :  { %4110 = vmatprep.mubr.f32.mxu1 %v2962_v13  ;;  %v2964_v52 = vmax.f32 %v2786_v33, 0.0  ;;  %v6860_v55 = vadd.f32 %v9228_v28, %v2405_v35  ;;  %v2407_v23 = vpop.f32.mrb[73].mxu0 }
 0x4f0   :  { %v3323_v40 = vld [vmem:[#allocation3 + $0x1d0] sm:$0xff] }
 0x4f1   :  { %3259 = vst [vmem:[#allocation3 + $0x1e9] sm:$0xff] %v2964_v52  ;;  %v2791_v6 = vadd.f32 %v6860_v55, %v9252_v29 }
 0x4f2   :  { %4111 = vmatmul.mubr.f32.gmra.mrb[134].mxu1 %v3323_v40  ;;  %v2410_v16 = vpop.f32.mrb[74].mxu0 }
 0x4f3   :  { %4115 = vmatprep.mubr.f32.mxu1 %v2963_v24  ;;  %v2965_v0 = vmax.f32 %v2791_v6, 0.0  ;;  %v6861_v61 = vadd.f32 %v9228_v28, %v2410_v16  ;;  %v2412_v59 = vpop.f32.mrb[75].mxu0 }
 0x4f4   :  { %v3324_v60 = vld [vmem:[#allocation3 + $0x1e0] sm:$0xff] }
 0x4f5   :  { %3260 = vst [vmem:[#allocation3 + $0x1f9] sm:$0xff] %v2965_v0  ;;  %v2796_v25 = vadd.f32 %v6861_v61, %v9249_v42 }
 0x4f6   :  { %4116 = vmatmul.mubr.f32.gmra.mrb[136].mxu1 %v3324_v60  ;;  %v2415_v30 = vpop.f32.mrb[76].mxu0 }
 0x4f7   :  { %4120 = vmatprep.mubr.f32.mxu1 %v2964_v52  ;;  %v2966_v19 = vmax.f32 %v2796_v25, 0.0  ;;  %v6862_v29 = vadd.f32 %v9384_v11, %v2415_v30  ;;  %v2417_v5 = vpop.f32.mrb[77].mxu0 }
 0x4f8   :  { %v3833_v13 = vld [vmem:[#allocation3 + $0x1e2] sm:$0xff]  ;;  %v3834_v28 = vld [vmem:[#allocation3 + $0x1ea] sm:$0xff] }
 0x4f9   :  { %v3325_v39 = vld [vmem:[#allocation3 + $0x1e8] sm:$0xff]  ;;  %3261 = vst [vmem:[#allocation3 + $0x201] sm:$0xff] %v2966_v19  ;;  %v2801_v1 = vadd.f32 %v6862_v29, %v9260_v4  ;;  %6312 = vmatprep.mubr.f32.mxu0 %v3833_v13 }
 0x4fa   :  { %4121 = vmatmul.mubr.f32.gmra.mrb[138].mxu1 %v3325_v39  ;;  %v2420_v42 = vpop.f32.mrb[78].mxu0  ;;  %6313 = vmatmul.mubr.f32.gmra.mrb[160].mxu0 %v3834_v28 }
 0x4fb   :  { %4125 = vmatprep.mubr.f32.mxu1 %v2965_v0  ;;  %v2967_v51 = vmax.f32 %v2801_v1, 0.0  ;;  %v6863_v21 = vadd.f32 %v9384_v11, %v2420_v42  ;;  %v2422_v44 = vpop.f32.mrb[79].mxu0 }
 0x4fc   :  { %v3326_v10 = vld [vmem:[#allocation3 + $0x1f8] sm:$0xff] }
 0x4fd   :  { %3262 = vst [vmem:[#allocation3 + $0x211] sm:$0xff] %v2967_v51  ;;  %v2806_v34 = vadd.f32 %v6863_v21, %v9257_v17 }
 0x4fe   :  { %4126 = vmatmul.mubr.f32.gmra.mrb[140].mxu1 %v3326_v10  ;;  %v2425_v57 = vpop.f32.mrb[80].mxu0 }
 0x4ff   :  { %4130 = vmatprep.mubr.f32.mxu1 %v2966_v19  ;;  %v2968_v24 = vmax.f32 %v2806_v34, 0.0  ;;  %v6864_v36 = vadd.f32 %v9384_v11, %v2425_v57  ;;  %v2427_v4 = vpop.f32.mrb[81].mxu0 }
 0x500   :  { %v3835_v50 = vld [vmem:[#allocation3 + $0x1fa] sm:$0xff]  ;;  %v3836_v49 = vld [vmem:[#allocation3 + $0x202] sm:$0xff] }
 0x501   :  { %v3327_v18 = vld [vmem:[#allocation3 + $0x200] sm:$0xff]  ;;  %3263 = vst [vmem:[#allocation3 + $0x219] sm:$0xff] %v2968_v24  ;;  %v2811_v33 = vadd.f32 %v6864_v36, %v9269_v62  ;;  %6315 = vmatprep.mubr.f32.mxu0 %v3835_v50 }
 0x502   :  { %4131 = vmatmul.mubr.f32.gmra.mrb[142].mxu1 %v3327_v18  ;;  %v2430_v35 = vpop.f32.mrb[82].mxu0  ;;  %6316 = vmatmul.mubr.f32.gmra.mrb[162].mxu0 %v3836_v49 }
 0x503   :  { %4135 = vmatprep.mubr.f32.mxu1 %v2967_v51  ;;  %v2969_v52 = vmax.f32 %v2811_v33, 0.0  ;;  %v6865_v17 = vadd.f32 %v9384_v11, %v2430_v35  ;;  %v2432_v55 = vpop.f32.mrb[83].mxu0 }
 0x504   :  { %v3328_v23 = vld [vmem:[#allocation3 + $0x210] sm:$0xff] }
 0x505   :  { %3264 = vst [vmem:[#allocation3 + $0x229] sm:$0xff] %v2969_v52  ;;  %v2816_v40 = vadd.f32 %v6865_v17, %v9266_v15 }
 0x506   :  { %4136 = vmatmul.mubr.f32.gmra.mrb[144].mxu1 %v3328_v23  ;;  %v2435_v6 = vpop.f32.mrb[84].mxu0 }
 0x507   :  { %4140 = vmatprep.mubr.f32.mxu1 %v2968_v24  ;;  %v2970_v16 = vmax.f32 %v2816_v40, 0.0  ;;  %v6866_v0 = vadd.f32 %v9384_v11, %v2435_v6  ;;  %v2437_v62 = vpop.f32.mrb[85].mxu0 }
 0x508   :  { %v3837_v61 = vld [vmem:[#allocation3 + $0x212] sm:$0xff]  ;;  %v3838_v60 = vld [vmem:[#allocation3 + $0x21a] sm:$0xff] }
 0x509   :  { %v3329_v59 = vld [vmem:[#allocation3 + $0x218] sm:$0xff]  ;;  %3265 = vst [vmem:[#allocation3 + $0x231] sm:$0xff] %v2970_v16  ;;  %v2821_v25 = vadd.f32 %v6866_v0, %v9278_v14  ;;  %6318 = vmatprep.mubr.f32.mxu0 %v3837_v61 }
 0x50a   :  { %4141 = vmatmul.mubr.f32.gmra.mrb[146].mxu1 %v3329_v59  ;;  %v2440_v30 = vpop.f32.mrb[86].mxu0  ;;  %6319 = vmatmul.mubr.f32.gmra.mrb[164].mxu0 %v3838_v60 }
 0x50b   :  { %4145 = vmatprep.mubr.f32.mxu1 %v2969_v52  ;;  %v2971_v19 = vmax.f32 %v2821_v25, 0.0  ;;  %v6867_v15 = vadd.f32 %v9384_v11, %v2440_v30  ;;  %v2442_v29 = vpop.f32.mrb[87].mxu0 }
 0x50c   :  { %v3330_v5 = vld [vmem:[#allocation3 + $0x228] sm:$0xff] }
 0x50d   :  { %3266 = vst [vmem:[#allocation3 + $0x241] sm:$0xff] %v2971_v19  ;;  %v2826_v13 = vadd.f32 %v6867_v15, %v9274_v8 }
 0x50e   :  { %4146 = vmatmul.mubr.f32.gmra.mrb[148].mxu1 %v3330_v5  ;;  %v2445_v39 = vpop.f32.mrb[88].mxu0 }
 0x50f   :  { %4150 = vmatprep.mubr.f32.mxu1 %v2970_v16  ;;  %v2972_v28 = vmax.f32 %v2826_v13, 0.0  ;;  %v6868_v1 = vadd.f32 %v9384_v11, %v2445_v39  ;;  %v2447_v14 = vpop.f32.mrb[89].mxu0 }
 0x510   :  { %v3839_v42 = vld [vmem:[#allocation3 + $0x22a] sm:$0xff]  ;;  %v3840_v21 = vld [vmem:[#allocation3 + $0x232] sm:$0xff] }
 0x511   :  { %v3331_v51 = vld [vmem:[#allocation3 + $0x230] sm:$0xff]  ;;  %3267 = vst [vmem:[#allocation3 + $0x249] sm:$0xff] %v2972_v28  ;;  %v2831_v44 = vadd.f32 %v6868_v1, %v9287_v7  ;;  %6321 = vmatprep.mubr.f32.mxu0 %v3839_v42 }
 0x512   :  { %4151 = vmatmul.mubr.f32.gmra.mrb[150].mxu1 %v3331_v51  ;;  %v2450_v10 = vpop.f32.mrb[90].mxu0  ;;  %6322 = vmatmul.mubr.f32.gmra.mrb[166].mxu0 %v3840_v21 }
 0x513   :  { %4155 = vmatprep.mubr.f32.mxu1 %v2971_v19  ;;  %v2973_v34 = vmax.f32 %v2831_v44, 0.0  ;;  %v6869_v8 = vadd.f32 %v9384_v11, %v2450_v10  ;;  %v2452_v57 = vpop.f32.mrb[91].mxu0 }
 0x514   :  { %v3332_v24 = vld [vmem:[#allocation3 + $0x240] sm:$0xff] }
 0x515   :  { %3268 = vst [vmem:[#allocation3 + $0x259] sm:$0xff] %v2973_v34  ;;  %v2836_v36 = vadd.f32 %v6869_v8, %v9284_v46 }
 0x516   :  { %4156 = vmatmul.mubr.f32.gmra.mrb[152].mxu1 %v3332_v24  ;;  %v2455_v4 = vpop.f32.mrb[92].mxu0 }
 0x517   :  { %4160 = vmatprep.mubr.f32.mxu1 %v2972_v28  ;;  %v2974_v50 = vmax.f32 %v2836_v36, 0.0  ;;  %v6870_v18 = vadd.f32 %v9384_v11, %v2455_v4  ;;  %v2457_v7 = vpop.f32.mrb[93].mxu0 }
 0x518   :  { %v3841_v49 = vld [vmem:[#allocation3 + $0x242] sm:$0xff]  ;;  %v3842_v35 = vld [vmem:[#allocation3 + $0x24a] sm:$0xff] }
 0x519   :  { %v9403_v33 = vld [vmem:[#allocation3 + $0x248] sm:$0xff]  ;;  %3269 = vst [vmem:[#allocation3 + $0x261] sm:$0xff] %v2974_v50  ;;  %v2841_v52 = vadd.f32 %v6870_v18, %v9293_v41  ;;  %6324 = vmatprep.mubr.f32.mxu0 %v3841_v49 }
 0x51a   :  { %4161 = vmatmul.mubr.f32.gmra.mrb[154].mxu1 %v9403_v33  ;;  %v2460_v17 = vpop.f32.mrb[94].mxu0  ;;  %6325 = vmatmul.mubr.f32.gmra.mrb[168].mxu0 %v3842_v35 }
 0x51b   :  { %4165 = vmatprep.mubr.f32.mxu1 %v2973_v34  ;;  %v2975_v46 = vmax.f32 %v2841_v52, 0.0  ;;  %v6871_v55 = vadd.f32 %v9384_v11, %v2460_v17  ;;  %v2462_v23 = vpop.f32.mrb[95].mxu0 }
 0x51c   :  { %v9408_v40 = vld [vmem:[#allocation3 + $0x258] sm:$0xff] }
 0x51d   :  { %3270 = vst [vmem:[#allocation3 + $0x271] sm:$0xff] %v2975_v46  ;;  %v2846_v6 = vadd.f32 %v6871_v55, %v9291_v45 }
 0x51e   :  { %4166 = vmatmul.mubr.f32.gmra.mrb[156].mxu1 %v9408_v40  ;;  %v2465_v16 = vpop.f32.mrb[96].mxu0 }
 0x51f   :  { %4170 = vmatprep.mubr.f32.mxu1 %v2974_v50  ;;  %v2976_v41 = vmax.f32 %v2846_v6, 0.0  ;;  %v6872_v0 = vadd.f32 %v9384_v11, %v2465_v16  ;;  %v2467_v62 = vpop.f32.mrb[97].mxu0 }
 0x520   :  { %v3843_v61 = vld [vmem:[#allocation3 + $0x25a] sm:$0xff]  ;;  %v9415_v60 = vld [vmem:[#allocation3 + $0x262] sm:$0xff] }
 0x521   :  { %v9413_v59 = vld [vmem:[#allocation3 + $0x260] sm:$0xff]  ;;  %3271 = vst [vmem:[#allocation3 + $0x279] sm:$0xff] %v2976_v41  ;;  %v2851_v25 = vadd.f32 %v6872_v0, %v9299_v54  ;;  %6327 = vmatprep.mubr.f32.mxu0 %v3843_v61 }
 0x522   :  { %4171 = vmatmul.mubr.f32.gmra.mrb[158].mxu1 %v9413_v59  ;;  %v2470_v45 = vpop.f32.mrb[98].mxu0  ;;  %6328 = vmatmul.mubr.f32.gmra.mrb[170].mxu0 %v9415_v60 }
 0x523   :  { %4175 = vmatprep.mubr.f32.mxu1 %v2975_v46  ;;  %v2977_v30 = vmax.f32 %v2851_v25, 0.0  ;;  %v6873_v19 = vadd.f32 %v9384_v11, %v2470_v45  ;;  %v2472_v15 = vpop.f32.mrb[99].mxu0 }
 0x524   :  { %v9421_v29 = vld [vmem:[#allocation3 + $0x270] sm:$0xff] }
 0x525   :  { %3272 = vst [vmem:[#allocation3 + $0x289] sm:$0xff] %v2977_v30  ;;  %v2856_v5 = vadd.f32 %v6873_v19, %v9297_v58 }
 0x526   :  { %4176 = vmatmul.mubr.f32.gmra.mrb[160].mxu1 %v9421_v29  ;;  %v2475_v13 = vpop.f32.mrb[100].mxu0 }
 0x527   :  { %4180 = vmatprep.mubr.f32.mxu1 %v2976_v41  ;;  %v2978_v54 = vmax.f32 %v2856_v5, 0.0  ;;  %v6874_v39 = vadd.f32 %v9384_v11, %v2475_v13  ;;  %v2477_v28 = vpop.f32.mrb[101].mxu0 }
 0x528   :  { %v9426_v1 = vld [vmem:[#allocation3 + $0x272] sm:$0xff]  ;;  %v9430_v42 = vld [vmem:[#allocation3 + $0x27a] sm:$0xff] }
 0x529   :  { %v9428_v14 = vld [vmem:[#allocation3 + $0x278] sm:$0xff]  ;;  %3273 = vst [vmem:[#allocation3 + $0x291] sm:$0xff] %v2978_v54  ;;  %v2861_v51 = vadd.f32 %v6874_v39, %v9305_v20  ;;  %6330 = vmatprep.mubr.f32.mxu0 %v9426_v1 }
 0x52a   :  { %4181 = vmatmul.mubr.f32.gmra.mrb[162].mxu1 %v9428_v14  ;;  %v2480_v58 = vpop.f32.mrb[102].mxu0  ;;  %6331 = vmatmul.mubr.f32.gmra.mrb[172].mxu0 %v9430_v42 }
 0x52b   :  { %4185 = vmatprep.mubr.f32.mxu1 %v2977_v30  ;;  %v2979_v21 = vmax.f32 %v2861_v51, 0.0  ;;  %v6875_v44 = vadd.f32 %v9384_v11, %v2480_v58  ;;  %v2482_v10 = vpop.f32.mrb[103].mxu0 }
 0x52c   :  { %v9437_v34 = vld [vmem:[#allocation3 + $0x288] sm:$0xff] }
 0x52d   :  { %3274 = vst [vmem:[#allocation3 + $0x2a1] sm:$0xff] %v2979_v21  ;;  %v2866_v8 = vadd.f32 %v6875_v44, %v9303_v48 }
 0x52e   :  { %4186 = vmatmul.mubr.f32.gmra.mrb[164].mxu1 %v9437_v34  ;;  %v2485_v20 = vpop.f32.mrb[104].mxu0 }
 0x52f   :  { %4190 = vmatprep.mubr.f32.mxu1 %v2978_v54  ;;  %v2980_v57 = vmax.f32 %v2866_v8, 0.0  ;;  %v6876_v24 = vadd.f32 %v9384_v11, %v2485_v20  ;;  %v2487_v36 = vpop.f32.mrb[105].mxu0 }
 0x530   :  { %v9442_v4 = vld [vmem:[#allocation3 + $0x28a] sm:$0xff]  ;;  %v9446_v18 = vld [vmem:[#allocation3 + $0x292] sm:$0xff] }
 0x531   :  { %v9444_v50 = vld [vmem:[#allocation3 + $0x290] sm:$0xff]  ;;  %3275 = vst [vmem:[#allocation3 + $0x2a9] sm:$0xff] %v2980_v57  ;;  %v2871_v7 = vadd.f32 %v6876_v24, %v9311_v53  ;;  %6333 = vmatprep.mubr.f32.mxu0 %v9442_v4 }
 0x532   :  { %4191 = vmatmul.mubr.f32.gmra.mrb[166].mxu1 %v9444_v50  ;;  %v2490_v48 = vpop.f32.mrb[106].mxu0  ;;  %6334 = vmatmul.mubr.f32.gmra.mrb[174].mxu0 %v9446_v18 }
 0x533   :  { %4195 = vmatprep.mubr.f32.mxu1 %v2979_v21  ;;  %v2981_v49 = vmax.f32 %v2871_v7, 0.0  ;;  %v6877_v35 = vadd.f32 %v9384_v11, %v2490_v48  ;;  %v2492_v52 = vpop.f32.mrb[107].mxu0 }
 0x534   :  { %v9453_v17 = vld [vmem:[#allocation3 + $0x2a0] sm:$0xff] }
 0x535   :  { %3276 = vst [vmem:[#allocation3 + $0x2b9] sm:$0xff] %v2981_v49  ;;  %v2876_v46 = vadd.f32 %v6877_v35, %v9309_v43 }
 0x536   :  { %4196 = vmatmul.mubr.f32.gmra.mrb[168].mxu1 %v9453_v17  ;;  %v2495_v53 = vpop.f32.mrb[108].mxu0 }
 0x537   :  { %4200 = vmatprep.mubr.f32.mxu1 %v2980_v57  ;;  %v2982_v55 = vmax.f32 %v2876_v46, 0.0  ;;  %v6878_v23 = vadd.f32 %v9384_v11, %v2495_v53  ;;  %v2497_v6 = vpop.f32.mrb[109].mxu0 }
 0x538   :  { %v9458_v16 = vld [vmem:[#allocation3 + $0x2a2] sm:$0xff]  ;;  %v9462_v0 = vld [vmem:[#allocation3 + $0x2aa] sm:$0xff] }
 0x539   :  { %v9460_v41 = vld [vmem:[#allocation3 + $0x2a8] sm:$0xff]  ;;  %3277 = vst [vmem:[#allocation3 + $0x2c1] sm:$0xff] %v2982_v55  ;;  %v2881_v62 = vadd.f32 %v6878_v23, %v9318_v27  ;;  %6336 = vmatprep.mubr.f32.mxu0 %v9458_v16 }
 0x53a   :  { %4201 = vmatmul.mubr.f32.gmra.mrb[170].mxu1 %v9460_v41  ;;  %v2500_v43 = vpop.f32.mrb[110].mxu0  ;;  %6337 = vmatmul.mubr.f32.gmra.mrb[176].mxu0 %v9462_v0 }
 0x53b   :  { %4205 = vmatprep.mubr.f32.mxu1 %v2981_v49  ;;  %v2983_v61 = vmax.f32 %v2881_v62, 0.0  ;;  %v6879_v25 = vadd.f32 %v9384_v11, %v2500_v43  ;;  %v2502_v45 = vpop.f32.mrb[111].mxu0 }
 0x53c   :  { %v9469_v30 = vld [vmem:[#allocation3 + $0x2b8] sm:$0xff] }
 0x53d   :  { %3278 = vst [vmem:[#allocation3 + $0x2d1] sm:$0xff] %v2983_v61  ;;  %v2886_v19 = vadd.f32 %v6879_v25, %v9315_v47 }
 0x53e   :  { %4206 = vmatmul.mubr.f32.gmra.mrb[172].mxu1 %v9469_v30  ;;  %v2505_v27 = vpop.f32.mrb[112].mxu0 }
 0x53f   :  { %4210 = vmatprep.mubr.f32.mxu1 %v2982_v55  ;;  %v2984_v15 = vmax.f32 %v2886_v19, 0.0  ;;  %v6880_v5 = vadd.f32 %v9384_v11, %v2505_v27  ;;  %v2507_v13 = vpop.f32.mrb[113].mxu0 }
 0x540   :  { %v9474_v54 = vld [vmem:[#allocation3 + $0x2ba] sm:$0xff]  ;;  %v9478_v28 = vld [vmem:[#allocation3 + $0x2c2] sm:$0xff] }
 0x541   :  { %v9476_v39 = vld [vmem:[#allocation3 + $0x2c0] sm:$0xff]  ;;  %3279 = vst [vmem:[#allocation3 + $0x2d9] sm:$0xff] %v2984_v15  ;;  %v2891_v51 = vadd.f32 %v6880_v5, %v9324_v3  ;;  %6339 = vmatprep.mubr.f32.mxu0 %v9474_v54 }
 0x542   :  { %4211 = vmatmul.mubr.f32.gmra.mrb[174].mxu1 %v9476_v39  ;;  %v2510_v47 = vpop.f32.mrb[114].mxu0  ;;  %6340 = vmatmul.mubr.f32.gmra.mrb[178].mxu0 %v9478_v28 }
 0x543   :  { %4215 = vmatprep.mubr.f32.mxu1 %v2983_v61  ;;  %v2985_v58 = vmax.f32 %v2891_v51, 0.0  ;;  %v6881_v21 = vadd.f32 %v9384_v11, %v2510_v47  ;;  %v2512_v44 = vpop.f32.mrb[115].mxu0 }
 0x544   :  { %v9485_v10 = vld [vmem:[#allocation3 + $0x2d0] sm:$0xff] }
 0x545   :  { %3280 = vst [vmem:[#allocation3 + $0x2e9] sm:$0xff] %v2985_v58  ;;  %v2896_v8 = vadd.f32 %v6881_v21, %v9322_v31 }
 0x546   :  { %4216 = vmatmul.mubr.f32.gmra.mrb[176].mxu1 %v9485_v10  ;;  %v2515_v3 = vpop.f32.mrb[116].mxu0 }
 0x547   :  { %4220 = vmatprep.mubr.f32.mxu1 %v2984_v15  ;;  %v2986_v20 = vmax.f32 %v2896_v8, 0.0  ;;  %v6882_v57 = vadd.f32 %v9384_v11, %v2515_v3  ;;  %v2517_v24 = vpop.f32.mrb[117].mxu0 }
 0x548   :  { %v9490_v36 = vld [vmem:[#allocation3 + $0x2d2] sm:$0xff]  ;;  %v9494_v48 = vld [vmem:[#allocation3 + $0x2da] sm:$0xff] }
 0x549   :  { %v9492_v7 = vld [vmem:[#allocation3 + $0x2d8] sm:$0xff]  ;;  %3281 = vst [vmem:[#allocation3 + $0x2f1] sm:$0xff] %v2986_v20  ;;  %v2901_v49 = vadd.f32 %v6882_v57, %v9330_v63  ;;  %6342 = vmatprep.mubr.f32.mxu0 %v9490_v36 }
 0x54a   :  { %4221 = vmatmul.mubr.f32.gmra.mrb[178].mxu1 %v9492_v7  ;;  %v2520_v31 = vpop.f32.mrb[118].mxu0  ;;  %6343 = vmatmul.mubr.f32.gmra.mrb[180].mxu0 %v9494_v48 }
 0x54b   :  { %4225 = vmatprep.mubr.f32.mxu1 %v2985_v58  ;;  %v2987_v35 = vmax.f32 %v2901_v49, 0.0  ;;  %v6883_v52 = vadd.f32 %v9384_v11, %v2520_v31  ;;  %v2522_v46 = vpop.f32.mrb[119].mxu0 }
 0x54c   :  { %v9501_v53 = vld [vmem:[#allocation3 + $0x2e8] sm:$0xff] }
 0x54d   :  { %3282 = vst [vmem:[#allocation3 + $0x301] sm:$0xff] %v2987_v35  ;;  %v2906_v55 = vadd.f32 %v6883_v52, %v9328_v9  ;;  %v3058_v52 = vld [vmem:[#allocation9 + $0x208] sm:$0xff] }
 0x54e   :  { %4226 = vmatmul.mubr.f32.gmra.mrb[180].mxu1 %v9501_v53  ;;  %v2525_v63 = vpop.f32.mrb[120].mxu0 }
 0x54f   :  { %4230 = vmatprep.mubr.f32.mxu1 %v2986_v20  ;;  %v2988_v23 = vmax.f32 %v2906_v55, 0.0  ;;  %v6884_v6 = vadd.f32 %v9384_v11, %v2525_v63  ;;  %v2527_v62 = vpop.f32.mrb[121].mxu0 }
 0x550   :  { %v9506_v43 = vld [vmem:[#allocation3 + $0x2ea] sm:$0xff]  ;;  %v9510_v25 = vld [vmem:[#allocation3 + $0x2f2] sm:$0xff] }
 0x551   :  { %v9508_v61 = vld [vmem:[#allocation3 + $0x2f0] sm:$0xff]  ;;  %3283 = vst [vmem:[#allocation3 + $0x309] sm:$0xff] %v2988_v23  ;;  %v2911_v45 = vadd.f32 %v6884_v6, %v9336_v38  ;;  %6345 = vmatprep.mubr.f32.mxu0 %v9506_v43  ;;  %v3060_v62 = vld [vmem:[#allocation9 + $0x218] sm:$0xff] }
 0x552   :  { %4231 = vmatmul.mubr.f32.gmra.mrb[182].mxu1 %v9508_v61  ;;  %v2530_v9 = vpop.f32.mrb[122].mxu0  ;;  %6346 = vmatmul.mubr.f32.gmra.mrb[182].mxu0 %v9510_v25  ;;  %v3059_v6 = vld [vmem:[#allocation9 + $0x210] sm:$0xff] }
 0x553   :  { %4235 = vmatprep.mubr.f32.mxu1 %v2987_v35  ;;  %v2989_v19 = vmax.f32 %v2911_v45, 0.0  ;;  %v6885_v27 = vadd.f32 %v9384_v11, %v2530_v9  ;;  %v2532_v15 = vpop.f32.mrb[123].mxu0  ;;  %v3057_v35 = vld [vmem:[#allocation9 + $0x200] sm:$0xff] }
 0x554   :  { %v9517_v5 = vld [vmem:[#allocation3 + $0x300] sm:$0xff]  ;;  %v6681_v63 = vpack.c.bf16 %v3058_v52, %v3057_v35 }
 0x555   :  { %3284 = vst [vmem:[#allocation3 + $0x319] sm:$0xff] %v2989_v19  ;;  %v2916_v13 = vadd.f32 %v6885_v27, %v9334_v12  ;;  %v3481_v45 = vld [vmem:[#allocation3 + $0x20] sm:$0xff]  ;;  %v6684_v27 = vpack.c.bf16 %v3060_v62, %v3059_v6  ;;  %v3067_v62 = vld [vmem:[#allocation9 + $0x250] sm:$0xff] }
 0x556   :  { %4236 = vmatmul.mubr.f32.gmra.mrb[184].mxu1 %v9517_v5  ;;  %v2535_v38 = vpop.f32.mrb[124].mxu0  ;;  %v3065_v52 = vld [vmem:[#allocation9 + $0x240] sm:$0xff] }
 0x557   :  { %4240 = vmatprep.mubr.f32.mxu1 %v2988_v23  ;;  %v2990_v51 = vmax.f32 %v2916_v13, 0.0  ;;  %v6886_v47 = vadd.f32 %v9384_v11, %v2535_v38  ;;  %v2537_v58 = vpop.f32.mrb[125].mxu0  ;;  %v3061_v13 = vld [vmem:[#allocation9 + $0x220] sm:$0xff]  ;;  %v3062_v38 = vld [vmem:[#allocation9 + $0x228] sm:$0xff] }
 0x558   :  { %v9522_v21 = vld [vmem:[#allocation3 + $0x308] sm:$0xff]  ;;  %v6687_v58 = vpack.c.bf16 %v3062_v38, %v3061_v13  ;;  %v3485_v13 = vld [vmem:[#allocation3 + $0x50] sm:$0xff] }
 0x559   :  { %3285 = vst [vmem:[#allocation3 + $0x321] sm:$0xff] %v2990_v51  ;;  %v2921_v44 = vadd.f32 %v6886_v47, %v9343_v37 }
 0x55a   :  { %4241 = vmatmul.mubr.f32.gmra.mrb[186].mxu1 %v9522_v21  ;;  %v2540_v8 = vpop.f32.mrb[126].mxu0 }
 0x55b   :  { %4245 = vmatprep.mubr.f32.mxu1 %v2989_v19  ;;  %v2991_v3 = vmax.f32 %v2921_v44, 0.0  ;;  %v6887_v12 = vadd.f32 %v9384_v11, %v2540_v8  ;;  %v2542_v20 = vpop.f32.mrb[127].mxu0  ;;  %v3480_v11 = vld [vmem:[#allocation3 + $0x18] sm:$0xff]  ;;  %v3417_v19 = vld [vmem:[#allocation3 + $0xa] sm:$0xff] }
 0x55c   :  { %v9527_v57 = vld [vmem:[#allocation3 + $0x318] sm:$0xff]  ;;  %v3063_v8 = vld [vmem:[#allocation9 + $0x230] sm:$0xff] }
 0x55d   :  { %3286 = vst [vmem:[#allocation3 + $0x331] sm:$0xff] %v2991_v3  ;;  %v2926_v24 = vadd.f32 %v6887_v12, %v9340_v56  ;;  %v3416_v56 = vld [vmem:[#allocation3 + $0x2] sm:$0xff]  ;;  %v3064_v3 = vld [vmem:[#allocation9 + $0x238] sm:$0xff] }
 0x55e   :  { %4246 = vmatmul.mubr.f32.gmra.mrb[188].mxu1 %v9527_v57  ;;  %v9531_v49 = vpop.f32.mrb[128].mxu0  ;;  %v9552_v12 = vld [vmem:[#allocation3 + $0x1a] sm:$0xff] }
 0x55f   :  { %10425 = vst [vmem:[#allocation15_spill] sm:$0xff] %v9531_v49  ;;  %4250 = vmatprep.mubr.f32.mxu1 %v2990_v51  ;;  %v2992_v31 = vmax.f32 %v2926_v24, 0.0  ;;  %v9533_v37 = vpop.f32.mrb[129].mxu0  ;;  %v3482_v51 = vld [vmem:[#allocation3 + $0x30] sm:$0xff]  ;;  %v3483_v20 = vld [vmem:[#allocation3 + $0x38] sm:$0xff] }
 0x560   :  { %10426 = vst [vmem:[#allocation19_spill] sm:$0xff] %v9533_v37  ;;  %v9535_v46 = vld [vmem:[#allocation3 + $0x320] sm:$0xff]  ;;  %v3084_v49 = vld [vmem:[#allocation9 + $0x2d8] sm:$0xff] }
 0x561   :  { %3287 = vst [vmem:[#allocation3 + $0x339] sm:$0xff] %v2992_v31  ;;  %v6690_v31 = vpack.c.bf16 %v3064_v3, %v3063_v8  ;;  %v3070_v8 = vld [vmem:[#allocation9 + $0x268] sm:$0xff]  ;;  %v9572_v3 = vld [vmem:[#allocation3 + $0x3a] sm:$0xff] }
 0x562   :  { %4251 = vmatmul.mubr.f32.gmra.mrb[190].mxu1 %v9535_v46  ;;  %v9538_v55 = vpop.f32.mrb[130].mxu0  ;;  %v3502_v37 = vld [vmem:[#allocation3 + $0x120] sm:$0xff] }
 0x563   :  { %10427 = vst [vmem:[#allocation21_spill] sm:$0xff] %v9538_v55  ;;  %4320 = vmatprep.mubr.f32.mxu1 %v3480_v11  ;;  %v9540_v23 = vpop.f32.mrb[131].mxu0  ;;  %v3066_v11 = vld [vmem:[#allocation9 + $0x248] sm:$0xff]  ;;  %v3501_v55 = vld [vmem:[#allocation3 + $0x110] sm:$0xff] }
 0x564   :  { %10428 = vst [vmem:[#allocation16_spill] sm:$0xff] %v9540_v23  ;;  %v6693_v6 = vpack.c.bf16 %v3066_v11, %v3065_v52  ;;  %v3071_v52 = vld [vmem:[#allocation9 + $0x270] sm:$0xff]  ;;  %v3072_v11 = vld [vmem:[#allocation9 + $0x278] sm:$0xff] }
 0x565   :  { %v3083_v23 = vld [vmem:[#allocation9 + $0x2d0] sm:$0xff] }
 0x566   :  { %4321 = vmatmul.mubr.f32.vlgmr.msra.gmra.mrb[64].mxu1 %v3416_v56  ;;  %v9542_v9 = vpop.f32.mrb[132].mxu0  ;;  %v9560_v56 = vld [vmem:[#allocation3 + $0x22] sm:$0xff] }
 0x567   :  { %10429 = vst [vmem:[#allocation26_spill] sm:$0xff] %v9542_v9  ;;  %4325 = vmatprep.mubr.f32.mxu1 %v3481_v45  ;;  %6682 = vmatpush1.bf16.msra.mxu1 %v6681_v63  ;;  %v9544_v15 = vpop.f32.mrb[133].mxu0  ;;  %v3484_v63 = vld [vmem:[#allocation3 + $0x48] sm:$0xff]  ;;  %v3068_v45 = vld [vmem:[#allocation9 + $0x258] sm:$0xff] }
 0x568   :  { %10430 = vst [vmem:[#allocation27_spill] sm:$0xff] %v9544_v15  ;;  %6683 = vmatprep.subr.bf16.mxu1 %v10373_v2  ;;  %v3082_v9 = vld [vmem:[#allocation9 + $0x2c8] sm:$0xff]  ;;  %v3498_v15 = vld [vmem:[#allocation3 + $0xf0] sm:$0xff] }
 0x56a   :  { %4326 = vmatmul.mubr.f32.gmra.mrb[66].mxu1 %v3417_v19  ;;  %v9547_v47 = vpop.f32.mrb[134].mxu0  ;;  %v9564_v19 = vld [vmem:[#allocation3 + $0x32] sm:$0xff] }
 0x56b   :  { %10431 = vst [vmem:[#allocation28_spill] sm:$0xff] %v9547_v47  ;;  %4330 = vmatprep.mubr.f32.mxu1 %v3482_v51  ;;  %6685 = vmatpush1.bf16.msra.mxu1 %v6684_v27  ;;  %v9549_v44 = vpop.f32.mrb[135].mxu0  ;;  %v6696_v51 = vpack.c.bf16 %v3068_v45, %v3067_v62  ;;  %v3487_v62 = vld [vmem:[#allocation3 + $0x68] sm:$0xff]  ;;  %v3497_v47 = vld [vmem:[#allocation3 + $0xe0] sm:$0xff] }
 0x56c   :  { %10432 = vst [vmem:[#allocation29_spill] sm:$0xff] %v9549_v44  ;;  %6686 = vmatprep.subr.bf16.mxu1 %v10373_v2  ;;  %v3081_v44 = vld [vmem:[#allocation9 + $0x2c0] sm:$0xff] }
 0x56e   :  { %4331 = vmatmul.mubr.f32.gmra.mrb[68].mxu1 %v9552_v12  ;;  %v9555_v24 = vpop.f32.mrb[136].mxu0 }
 0x56f   :  { %10433 = vst [vmem:[#allocation30_spill] sm:$0xff] %v9555_v24  ;;  %4335 = vmatprep.mubr.f32.mxu1 %v3483_v20  ;;  %6688 = vmatpush1.bf16.msra.mxu1 %v6687_v58  ;;  %v9557_v35 = vpop.f32.mrb[137].mxu0  ;;  %v3069_v58 = vld [vmem:[#allocation9 + $0x260] sm:$0xff] }
 0x570   :  { %10434 = vst [vmem:[#allocation31_spill] sm:$0xff] %v9557_v35  ;;  %6689 = vmatprep.subr.bf16.mxu1 %v10373_v2  ;;  %v3486_v20 = vld [vmem:[#allocation3 + $0x60] sm:$0xff] }
 0x571   :  { %v9600_v24 = vld [vmem:[#allocation3 + $0x7a] sm:$0xff] }
 0x572   :  { %4336 = vmatmul.mubr.f32.gmra.mrb[70].mxu1 %v9560_v56  ;;  %v3494_v35 = vld [vmem:[#allocation3 + $0xc0] sm:$0xff] }
 0x573   :  { %4340 = vmatprep.mubr.f32.mxu1 %v3484_v63  ;;  %6691 = vmatpush1.bf16.msra.mxu1 %v6690_v31  ;;  %v6699_v31 = vpack.c.bf16 %v3070_v8, %v3069_v58  ;;  %v9576_v63 = vld [vmem:[#allocation3 + $0x4a] sm:$0xff]  ;;  %v9584_v8 = vld [vmem:[#allocation3 + $0x52] sm:$0xff] }
 0x574   :  { %6692 = vmatprep.subr.bf16.mxu1 %v10373_v2  ;;  %v3074_v58 = vld [vmem:[#allocation9 + $0x288] sm:$0xff] }
 0x575   :  { %v9566_v27 = vpop.f32.mrb[138].mxu0 }
 0x576   :  { %10435 = vst [vmem:[#allocation32_spill] sm:$0xff] %v9566_v27  ;;  %4341 = vmatmul.mubr.f32.gmra.mrb[72].mxu1 %v9564_v19  ;;  %v9569_v38 = vpop.f32.mrb[139].mxu0  ;;  %v3075_v27 = vld [vmem:[#allocation9 + $0x290] sm:$0xff] }
 0x577   :  { %10436 = vst [vmem:[#allocation33_spill] sm:$0xff] %v9569_v38  ;;  %4345 = vmatprep.mubr.f32.mxu1 %v3485_v13  ;;  %6694 = vmatpush1.bf16.msra.mxu1 %v6693_v6  ;;  %v6702_v13 = vpack.c.bf16 %v3072_v11, %v3071_v52  ;;  %v3076_v38 = vld [vmem:[#allocation9 + $0x298] sm:$0xff]  ;;  %v3489_v52 = vld [vmem:[#allocation3 + $0x80] sm:$0xff] }
 0x578   :  { %6695 = vmatprep.subr.bf16.mxu1 %v10373_v2 }
 0x57a   :  { %4346 = vmatmul.mubr.f32.gmra.mrb[74].mxu1 %v9572_v3 }
 0x57b   :  { %4350 = vmatprep.mubr.f32.mxu1 %v3486_v20  ;;  %6697 = vmatpush1.bf16.msra.mxu1 %v6696_v51  ;;  %v3073_v51 = vld [vmem:[#allocation9 + $0x280] sm:$0xff]  ;;  %v3488_v20 = vld [vmem:[#allocation3 + $0x78] sm:$0xff] }
 0x57c   :  { %6698 = vmatprep.subr.bf16.mxu1 %v10373_v2 }
 0x57d   :  { %v9578_v6 = vpop.f32.mrb[140].mxu0 }
 0x57e   :  { %10437 = vst [vmem:[#allocation34_spill] sm:$0xff] %v9578_v6  ;;  %4351 = vmatmul.mubr.f32.gmra.mrb[76].mxu1 %v9576_v63  ;;  %v9581_v45 = vpop.f32.mrb[141].mxu0  ;;  %v6705_v6 = vpack.c.bf16 %v3074_v58, %v3073_v51  ;;  %v3078_v51 = vld [vmem:[#allocation9 + $0x2a8] sm:$0xff] }
 0x57f   :  { %10438 = vst [vmem:[#allocation35_spill] sm:$0xff] %v9581_v45  ;;  %4355 = vmatprep.mubr.f32.mxu1 %v3487_v62  ;;  %6700 = vmatpush1.bf16.msra.mxu1 %v6699_v31  ;;  %v9588_v45 = vld [vmem:[#allocation3 + $0x62] sm:$0xff]  ;;  %v6708_v62 = vpack.c.bf16 %v3076_v38, %v3075_v27  ;;  %v9596_v58 = vld [vmem:[#allocation3 + $0x6a] sm:$0xff]  ;;  %v3491_v27 = vld [vmem:[#allocation3 + $0x98] sm:$0xff] }
 0x580   :  { %6701 = vmatprep.subr.bf16.mxu1 %v10373_v2 }
 0x582   :  { %4356 = vmatmul.mubr.f32.gmra.mrb[78].mxu1 %v9584_v8 }
 0x583   :  { %4360 = vmatprep.mubr.f32.mxu1 %v3488_v20  ;;  %6703 = vmatpush1.bf16.msra.mxu1 %v6702_v13  ;;  %v3077_v13 = vld [vmem:[#allocation9 + $0x2a0] sm:$0xff]  ;;  %v3490_v20 = vld [vmem:[#allocation3 + $0x90] sm:$0xff] }
 0x584   :  { %6704 = vmatprep.subr.bf16.mxu1 %v10373_v2 }
 0x585   :  { %v9590_v31 = vpop.f32.mrb[142].mxu0 }
 0x586   :  { %10439 = vst [vmem:[#allocation36_spill] sm:$0xff] %v9590_v31  ;;  %4361 = vmatmul.mubr.f32.gmra.mrb[80].mxu1 %v9588_v45  ;;  %v9593_v11 = vpop.f32.mrb[143].mxu0  ;;  %v6711_v31 = vpack.c.bf16 %v3078_v51, %v3077_v13  ;;  %v3493_v51 = vld [vmem:[#allocation3 + $0xb0] sm:$0xff] }
 0x587   :  { %10440 = vst [vmem:[#allocation37_spill] sm:$0xff] %v9593_v11  ;;  %4365 = vmatprep.mubr.f32.mxu1 %v3489_v52  ;;  %6706 = vmatpush1.bf16.msra.mxu1 %v6705_v6  ;;  %v9608_v6 = vld [vmem:[#allocation3 + $0x82] sm:$0xff] }
 0x588   :  { %6707 = vmatprep.subr.bf16.mxu1 %v10373_v2  ;;  %v3492_v52 = vld [vmem:[#allocation3 + $0xa8] sm:$0xff] }
 0x58a   :  { %4366 = vmatmul.mubr.f32.gmra.mrb[82].mxu1 %v9596_v58 }
 0x58b   :  { %4370 = vmatprep.mubr.f32.mxu1 %v3490_v20  ;;  %6709 = vmatpush1.bf16.msra.mxu1 %v6708_v62  ;;  %v9611_v62 = vld [vmem:[#allocation3 + $0x92] sm:$0xff] }
 0x58c   :  { %6710 = vmatprep.subr.bf16.mxu1 %v10373_v2 }
 0x58d   :  { %v9602_v11 = vpop.f32.mrb[144].mxu0 }
 0x58e   :  { %10441 = vst [vmem:[#allocation38_spill] sm:$0xff] %v9602_v11  ;;  %4371 = vmatmul.mubr.f32.gmra.mrb[84].mxu1 %v9600_v24  ;;  %v9605_v38 = vpop.f32.mrb[145].mxu0 }
 0x58f   :  { %10442 = vst [vmem:[#allocation39_spill] sm:$0xff] %v9605_v38  ;;  %4375 = vmatprep.mubr.f32.mxu1 %v3491_v27  ;;  %6712 = vmatpush1.bf16.msra.mxu1 %v6711_v31  ;;  %v3079_v27 = vld [vmem:[#allocation9 + $0x2b0] sm:$0xff]  ;;  %v3080_v31 = vld [vmem:[#allocation9 + $0x2b8] sm:$0xff] }
 0x590   :  { %6713 = vmatprep.subr.bf16.mxu1 %v10373_v2  ;;  %v6714_v11 = vpack.c.bf16 %v3080_v31, %v3079_v27  ;;  %v9618_v38 = vld [vmem:[#allocation3 + $0x9a] sm:$0xff]  ;;  %v9629_v27 = vld [vmem:[#allocation3 + $0xb2] sm:$0xff] }
 0x591   :  { %v3496_v31 = vld [vmem:[#allocation3 + $0xd8] sm:$0xff] }
 0x592   :  { %4376 = vmatmul.mubr.f32.gmra.mrb[86].mxu1 %v9608_v6 }
 0x593   :  { %4380 = vmatprep.mubr.f32.mxu1 %v3492_v52  ;;  %6715 = vmatpush1.bf16.msra.mxu1 %v6714_v11  ;;  %v9622_v52 = vld [vmem:[#allocation3 + $0xaa] sm:$0xff] }
 0x594   :  { %6716 = vmatprep.subr.bf16.mxu1 %v10373_v2 }
 0x595   :  { %v9613_v13 = vpop.f32.mrb[146].mxu0 }
 0x596   :  { %10443 = vst [vmem:[#allocation40_spill] sm:$0xff] %v9613_v13  ;;  %4381 = vmatmul.mubr.f32.gmra.mrb[88].mxu1 %v9611_v62  ;;  %v9616_v20 = vpop.f32.mrb[147].mxu0 }
 0x597   :  { %10444 = vst [vmem:[#allocation41_spill] sm:$0xff] %v9616_v20  ;;  %4385 = vmatprep.mubr.f32.mxu1 %v3493_v51  ;;  %v3495_v20 = vld [vmem:[#allocation3 + $0xc8] sm:$0xff] }
 0x59a   :  { %4386 = vmatmul.mubr.f32.gmra.mrb[90].mxu1 %v9618_v38 }
 0x59b   :  { %4390 = vmatprep.mubr.f32.mxu1 %v3494_v35  ;;  %v9632_v35 = vld [vmem:[#allocation3 + $0xc2] sm:$0xff] }
 0x59d   :  { %v9624_v13 = vpop.f32.mrb[148].mxu0 }
 0x59e   :  { %10445 = vst [vmem:[#allocation42_spill] sm:$0xff] %v9624_v13  ;;  %4391 = vmatmul.mubr.f32.gmra.mrb[92].mxu1 %v9622_v52  ;;  %v9627_v51 = vpop.f32.mrb[149].mxu0 }
 0x59f   :  { %10446 = vst [vmem:[#allocation43_spill] sm:$0xff] %v9627_v51  ;;  %4395 = vmatprep.mubr.f32.mxu1 %v3495_v20  ;;  %v6717_v51 = vpack.c.bf16 %v3082_v9, %v3081_v44  ;;  %v9639_v20 = vld [vmem:[#allocation3 + $0xca] sm:$0xff]  ;;  %v9650_v9 = vld [vmem:[#allocation3 + $0xe2] sm:$0xff] }
 0x5a0   :  { %v3500_v44 = vld [vmem:[#allocation3 + $0x108] sm:$0xff] }
 0x5a1   :  { %6718 = vmatpush1.bf16.msra.mxu1 %v6717_v51 }
 0x5a2   :  { %4396 = vmatmul.mubr.f32.gmra.mrb[94].mxu1 %v9629_v27  ;;  %6719 = vmatprep.subr.bf16.mxu1 %v10373_v2 }
 0x5a3   :  { %4400 = vmatprep.mubr.f32.mxu1 %v3496_v31  ;;  %v9643_v31 = vld [vmem:[#allocation3 + $0xda] sm:$0xff] }
 0x5a5   :  { %v9634_v11 = vpop.f32.mrb[150].mxu0 }
 0x5a6   :  { %10447 = vst [vmem:[#allocation44_spill] sm:$0xff] %v9634_v11  ;;  %4401 = vmatmul.mubr.f32.gmra.mrb[96].mxu1 %v9632_v35  ;;  %v9637_v13 = vpop.f32.mrb[151].mxu0 }
 0x5a7   :  { %10448 = vst [vmem:[#allocation45_spill] sm:$0xff] %v9637_v13  ;;  %4405 = vmatprep.mubr.f32.mxu1 %v3497_v47  ;;  %v3499_v13 = vld [vmem:[#allocation3 + $0xf8] sm:$0xff] }
 0x5aa   :  { %4406 = vmatmul.mubr.f32.gmra.mrb[98].mxu1 %v9639_v20 }
 0x5ab   :  { %4410 = vmatprep.mubr.f32.mxu1 %v3498_v15  ;;  %v9653_v15 = vld [vmem:[#allocation3 + $0xf2] sm:$0xff] }
 0x5ad   :  { %v9645_v11 = vpop.f32.mrb[152].mxu0 }
 0x5ae   :  { %10449 = vst [vmem:[#allocation46_spill] sm:$0xff] %v9645_v11  ;;  %4411 = vmatmul.mubr.f32.gmra.mrb[100].mxu1 %v9643_v31  ;;  %v9648_v47 = vpop.f32.mrb[153].mxu0 }
 0x5af   :  { %10450 = vst [vmem:[#allocation47_spill] sm:$0xff] %v9648_v47  ;;  %4415 = vmatprep.mubr.f32.mxu1 %v3499_v13  ;;  %v6720_v47 = vpack.c.bf16 %v3084_v49, %v3083_v23  ;;  %v9660_v13 = vld [vmem:[#allocation3 + $0xfa] sm:$0xff]  ;;  %v9671_v49 = vld [vmem:[#allocation3 + $0x112] sm:$0xff] }
 0x5b0   :  { %10455 = vst [vmem:[#allocation52_spill] sm:$0xff] %v9671_v49  ;;  %v3504_v23 = vld [vmem:[#allocation3 + $0x138] sm:$0xff] }
 0x5b1   :  { %6721 = vmatpush1.bf16.msra.mxu1 %v6720_v47  ;;  %v9678_v47 = vld [vmem:[#allocation3 + $0x122] sm:$0xff] }
 0x5b2   :  { %4416 = vmatmul.mubr.f32.gmra.mrb[102].mxu1 %v9650_v9  ;;  %6722 = vmatprep.subr.bf16.mxu1 %v10373_v2  ;;  %10458 = vst [vmem:[#allocation55_spill] sm:$0xff] %v9678_v47 }
 0x5b3   :  { %4420 = vmatprep.mubr.f32.mxu1 %v3500_v44  ;;  %v9664_v44 = vld [vmem:[#allocation3 + $0x10a] sm:$0xff] }
 0x5b5   :  { %v9655_v51 = vpop.f32.mrb[154].mxu0 }
 0x5b6   :  { %10451 = vst [vmem:[#allocation48_spill] sm:$0xff] %v9655_v51  ;;  %4421 = vmatmul.mubr.f32.gmra.mrb[104].mxu1 %v9653_v15  ;;  %v9658_v11 = vpop.f32.mrb[155].mxu0 }
 0x5b7   :  { %10452 = vst [vmem:[#allocation49_spill] sm:$0xff] %v9658_v11  ;;  %4425 = vmatprep.mubr.f32.mxu1 %v3501_v55  ;;  %v3503_v11 = vld [vmem:[#allocation3 + $0x128] sm:$0xff] }
 0x5ba   :  { %4426 = vmatmul.mubr.f32.gmra.mrb[106].mxu1 %v9660_v13 }
 0x5bb   :  { %4430 = vmatprep.mubr.f32.mxu1 %v3502_v37 }
 0x5bd   :  { %v9666_v51 = vpop.f32.mrb[156].mxu0 }
 0x5be   :  { %10453 = vst [vmem:[#allocation50_spill] sm:$0xff] %v9666_v51  ;;  %4431 = vmatmul.mubr.f32.gmra.mrb[108].mxu1 %v9664_v44  ;;  %v9669_v55 = vpop.f32.mrb[157].mxu0  ;;  %v3505_v51 = vld [vmem:[#allocation3 + $0x140] sm:$0xff] }
 0x5bf   :  { %10454 = vst [vmem:[#allocation51_spill] sm:$0xff] %v9669_v55  ;;  %4435 = vmatprep.mubr.f32.mxu1 %v3503_v11  ;;  %v6723_v55 = vpack.c.bf16 %v3086_v22, %v3085_v26  ;;  %v9681_v11 = vld [vmem:[#allocation3 + $0x12a] sm:$0xff]  ;;  %v9692_v22 = vld [vmem:[#allocation3 + $0x142] sm:$0xff] }
 0x5c0   :  { %10459 = vst [vmem:[#allocation56_spill] sm:$0xff] %v9681_v11  ;;  %10463 = vst [vmem:[#allocation60_spill] sm:$0xff] %v9692_v22  ;;  %v3508_v26 = vld [vmem:[#allocation3 + $0x168] sm:$0xff] }
 0x5c1   :  { %v9674_v32 = vpop.f32.mrb[158].mxu0  ;;  %6724 = vmatpush1.bf16.msra.mxu1 %v6723_v55 }
 0x5c2   :  { %4436 = vmatmul.mubr.f32.gmra.mrb[110].mxu1 %v9671_v49  ;;  %10456 = vst [vmem:[#allocation53_spill] sm:$0xff] %v9674_v32  ;;  %v9676_v37 = vpop.f32.mrb[159].mxu0  ;;  %v3506_v49 = vld [vmem:[#allocation3 + $0x150] sm:$0xff]  ;;  %6725 = vmatprep.subr.bf16.mxu1 %v10373_v2 }
 0x5c3   :  { %4440 = vmatprep.mubr.f32.mxu1 %v3504_v23  ;;  %10457 = vst [vmem:[#allocation54_spill] sm:$0xff] %v9676_v37  ;;  %v9685_v23 = vld [vmem:[#allocation3 + $0x13a] sm:$0xff] }
 0x5c4   :  { %10460 = vst [vmem:[#allocation57_spill] sm:$0xff] %v9685_v23  ;;  %v3507_v37 = vld [vmem:[#allocation3 + $0x158] sm:$0xff] }
 0x5c6   :  { %4441 = vmatmul.mubr.f32.gmra.mrb[112].mxu1 %v9678_v47  ;;  %v3088_v47 = vld [vmem:[#allocation9 + $0x2f8] sm:$0xff] }
 0x5c7   :  { %4445 = vmatprep.mubr.f32.mxu1 %v3505_v51 }
 0x5ca   :  { %4446 = vmatmul.mubr.f32.gmra.mrb[114].mxu1 %v9681_v11  ;;  %v3509_v11 = vld [vmem:[#allocation3 + $0x170] sm:$0xff] }
 0x5cb   :  { %4450 = vmatprep.mubr.f32.mxu1 %v3506_v49  ;;  %v9695_v49 = vld [vmem:[#allocation3 + $0x152] sm:$0xff] }
 0x5cc   :  { %10464 = vst [vmem:[#allocation61_spill] sm:$0xff] %v9695_v49 }
 0x5cd   :  { %v9687_v32 = vpop.f32.mrb[160].mxu0 }
 0x5ce   :  { %10461 = vst [vmem:[#allocation58_spill] sm:$0xff] %v9687_v32  ;;  %4451 = vmatmul.mubr.f32.gmra.mrb[116].mxu1 %v9685_v23  ;;  %v9690_v51 = vpop.f32.mrb[161].mxu0  ;;  %v3087_v23 = vld [vmem:[#allocation9 + $0x2f0] sm:$0xff] }
 0x5cf   :  { %10462 = vst [vmem:[#allocation59_spill] sm:$0xff] %v9690_v51  ;;  %4455 = vmatprep.mubr.f32.mxu1 %v3507_v37  ;;  %v6726_v51 = vpack.c.bf16 %v3088_v47, %v3087_v23  ;;  %v9702_v37 = vld [vmem:[#allocation3 + $0x15a] sm:$0xff]  ;;  %v9713_v47 = vld [vmem:[#allocation3 + $0x172] sm:$0xff]  ;;  %v3512_v23 = vld [vmem:[#allocation3 + $0x1c8] sm:$0xff] }
 0x5d0   :  { %10467 = vst [vmem:[#allocation64_spill] sm:$0xff] %v9702_v37  ;;  %10471 = vst [vmem:[#allocation68_spill] sm:$0xff] %v9713_v47 }
 0x5d1   :  { %6727 = vmatpush1.bf16.msra.mxu1 %v6726_v51 }
 0x5d2   :  { %4456 = vmatmul.mubr.f32.gmra.mrb[118].mxu1 %v9692_v22  ;;  %v3510_v22 = vld [vmem:[#allocation3 + $0x180] sm:$0xff]  ;;  %6728 = vmatprep.subr.bf16.mxu1 %v10373_v2 }
 0x5d3   :  { %4460 = vmatprep.mubr.f32.mxu1 %v3508_v26  ;;  %v9706_v26 = vld [vmem:[#allocation3 + $0x16a] sm:$0xff] }
 0x5d4   :  { %10468 = vst [vmem:[#allocation65_spill] sm:$0xff] %v9706_v26 }
 0x5d5   :  { %v9697_v55 = vpop.f32.mrb[162].mxu0 }
 0x5d6   :  { %10465 = vst [vmem:[#allocation62_spill] sm:$0xff] %v9697_v55  ;;  %4461 = vmatmul.mubr.f32.gmra.mrb[120].mxu1 %v9695_v49  ;;  %v9700_v32 = vpop.f32.mrb[163].mxu0 }
 0x5d7   :  { %10466 = vst [vmem:[#allocation63_spill] sm:$0xff] %v9700_v32  ;;  %4465 = vmatprep.mubr.f32.mxu1 %v3509_v11  ;;  %v3511_v32 = vld [vmem:[#allocation3 + $0x188] sm:$0xff] }
 0x5da   :  { %4466 = vmatmul.mubr.f32.gmra.mrb[122].mxu1 %v9702_v37  ;;  %v3513_v37 = vld [vmem:[#allocation3 + $0x1d0] sm:$0xff] }
 0x5db   :  { %4470 = vmatprep.mubr.f32.mxu1 %v3510_v22  ;;  %v3448_v22 = vld [vmem:[#allocation3 + $0x1b2] sm:$0xff] }
 0x5dd   :  { %v9708_v55 = vpop.f32.mrb[164].mxu0 }
 0x5de   :  { %10469 = vst [vmem:[#allocation66_spill] sm:$0xff] %v9708_v55  ;;  %4471 = vmatmul.mubr.f32.gmra.mrb[124].mxu1 %v9706_v26  ;;  %v9711_v11 = vpop.f32.mrb[165].mxu0  ;;  %v3449_v55 = vld [vmem:[#allocation3 + $0x1ba] sm:$0xff] }
 0x5df   :  { %10470 = vst [vmem:[#allocation67_spill] sm:$0xff] %v9711_v11  ;;  %4475 = vmatprep.mubr.f32.mxu1 %v3511_v32  ;;  %v3514_v26 = vld [vmem:[#allocation3 + $0x1e0] sm:$0xff]  ;;  %v9720_v11 = vld [vmem:[#allocation3 + $0x1ca] sm:$0xff] }
 0x5e2   :  { %4476 = vmatmul.mubr.f32.gmra.mrb[126].mxu1 %v9713_v47  ;;  %v3515_v47 = vld [vmem:[#allocation3 + $0x1e8] sm:$0xff] }
 0x5e3   :  { %4480 = vmatprep.mubr.f32.mxu1 %v3512_v23 }
 0x5e5   :  { %v9716_v51 = vpop.f32.mrb[166].mxu0 }
 0x5e6   :  { %10472 = vst [vmem:[#allocation69_spill] sm:$0xff] %v9716_v51  ;;  %4481 = vmatmul.mubr.f32.gmra.mrb[128].mxu1 %v3448_v22  ;;  %v9718_v49 = vpop.f32.mrb[167].mxu0  ;;  %v9727_v51 = vld [vmem:[#allocation3 + $0x1d2] sm:$0xff] }
 0x5e7   :  { %10473 = vst [vmem:[#allocation70_spill] sm:$0xff] %v9718_v49  ;;  %4485 = vmatprep.mubr.f32.mxu1 %v3513_v37  ;;  %10476 = vst [vmem:[#allocation73_spill] sm:$0xff] %v9727_v51  ;;  %v3516_v22 = vld [vmem:[#allocation3 + $0x1f8] sm:$0xff]  ;;  %v9730_v37 = vld [vmem:[#allocation3 + $0x1e2] sm:$0xff] }
 0x5e8   :  { %10477 = vst [vmem:[#allocation74_spill] sm:$0xff] %v9730_v37  ;;  %v9737_v49 = vld [vmem:[#allocation3 + $0x1ea] sm:$0xff] }
 0x5e9   :  { %10480 = vst [vmem:[#allocation77_spill] sm:$0xff] %v9737_v49 }
 0x5ea   :  { %4486 = vmatmul.mubr.f32.gmra.mrb[130].mxu1 %v3449_v55 }
 0x5eb   :  { %4490 = vmatprep.mubr.f32.mxu1 %v3514_v26  ;;  %v3517_v26 = vld [vmem:[#allocation3 + $0x200] sm:$0xff] }
 0x5ed   :  { %v9722_v32 = vpop.f32.mrb[168].mxu0 }
 0x5ee   :  { %10474 = vst [vmem:[#allocation71_spill] sm:$0xff] %v9722_v32  ;;  %4491 = vmatmul.mubr.f32.gmra.mrb[132].mxu1 %v9720_v11  ;;  %v9725_v23 = vpop.f32.mrb[169].mxu0 }
 0x5ef   :  { %10475 = vst [vmem:[#allocation72_spill] sm:$0xff] %v9725_v23  ;;  %4495 = vmatprep.mubr.f32.mxu1 %v3515_v47  ;;  %v3518_v47 = vld [vmem:[#allocation3 + $0x210] sm:$0xff]  ;;  %v9740_v23 = vld [vmem:[#allocation3 + $0x1fa] sm:$0xff] }
 0x5f0   :  { %10481 = vst [vmem:[#allocation78_spill] sm:$0xff] %v9740_v23 }
 0x5f2   :  { %4496 = vmatmul.mubr.f32.gmra.mrb[134].mxu1 %v9727_v51 }
 0x5f3   :  { %4500 = vmatprep.mubr.f32.mxu1 %v3516_v22  ;;  %v3519_v22 = vld [vmem:[#allocation3 + $0x218] sm:$0xff] }
 0x5f5   :  { %v9732_v55 = vpop.f32.mrb[170].mxu0 }
 0x5f6   :  { %10478 = vst [vmem:[#allocation75_spill] sm:$0xff] %v9732_v55  ;;  %4501 = vmatmul.mubr.f32.gmra.mrb[136].mxu1 %v9730_v37  ;;  %v9735_v32 = vpop.f32.mrb[171].mxu0  ;;  %v9747_v37 = vld [vmem:[#allocation3 + $0x202] sm:$0xff] }
 0x5f7   :  { %10479 = vst [vmem:[#allocation76_spill] sm:$0xff] %v9735_v32  ;;  %4505 = vmatprep.mubr.f32.mxu1 %v3517_v26  ;;  %10484 = vst [vmem:[#allocation81_spill] sm:$0xff] %v9747_v37  ;;  %v3520_v26 = vld [vmem:[#allocation3 + $0x228] sm:$0xff]  ;;  %v9750_v32 = vld [vmem:[#allocation3 + $0x212] sm:$0xff] }
 0x5fa   :  { %4506 = vmatmul.mubr.f32.gmra.mrb[138].mxu1 %v9737_v49 }
 0x5fb   :  { %4510 = vmatprep.mubr.f32.mxu1 %v3518_v47  ;;  %v3521_v47 = vld [vmem:[#allocation3 + $0x230] sm:$0xff] }
 0x5fd   :  { %v9742_v51 = vpop.f32.mrb[172].mxu0 }
 0x5fe   :  { %10482 = vst [vmem:[#allocation79_spill] sm:$0xff] %v9742_v51  ;;  %4511 = vmatmul.mubr.f32.gmra.mrb[140].mxu1 %v9740_v23  ;;  %v9745_v55 = vpop.f32.mrb[173].mxu0  ;;  %v9757_v23 = vld [vmem:[#allocation3 + $0x21a] sm:$0xff] }
 0x5ff   :  { %10483 = vst [vmem:[#allocation80_spill] sm:$0xff] %v9745_v55  ;;  %4515 = vmatprep.mubr.f32.mxu1 %v3519_v22  ;;  %v3522_v22 = vld [vmem:[#allocation3 + $0x240] sm:$0xff]  ;;  %v9760_v55 = vld [vmem:[#allocation3 + $0x22a] sm:$0xff] }
 0x602   :  { %4516 = vmatmul.mubr.f32.gmra.mrb[142].mxu1 %v9747_v37 }
 0x603   :  { %4520 = vmatprep.mubr.f32.mxu1 %v3520_v26 }
 0x605   :  { %v9752_v49 = vpop.f32.mrb[174].mxu0 }
 0x606   :  { %10485 = vst [vmem:[#allocation82_spill] sm:$0xff] %v9752_v49  ;;  %4521 = vmatmul.mubr.f32.gmra.mrb[144].mxu1 %v9750_v32  ;;  %v9755_v51 = vpop.f32.mrb[175].mxu0  ;;  %v9768_v49 = vld [vmem:[#allocation3 + $0x232] sm:$0xff] }
 0x607   :  { %10486 = vst [vmem:[#allocation83_spill] sm:$0xff] %v9755_v51  ;;  %4525 = vmatprep.mubr.f32.mxu1 %v3521_v47  ;;  %v9772_v47 = vld [vmem:[#allocation3 + $0x242] sm:$0xff] }
 0x60a   :  { %4526 = vmatmul.mubr.f32.gmra.mrb[146].mxu1 %v9757_v23 }
 0x60b   :  { %4530 = vmatprep.mubr.f32.mxu1 %v3522_v22 }
 0x60d   :  { %v9762_v37 = vpop.f32.mrb[176].mxu0 }
 0x60e   :  { %10487 = vst [vmem:[#allocation84_spill] sm:$0xff] %v9762_v37  ;;  %4531 = vmatmul.mubr.f32.gmra.mrb[148].mxu1 %v9760_v55  ;;  %v9765_v26 = vpop.f32.mrb[177].mxu0  ;;  %v9780_v37 = vld [vmem:[#allocation3 + $0x24a] sm:$0xff] }
 0x60f   :  { %10488 = vst [vmem:[#allocation85_spill] sm:$0xff] %v9765_v26  ;;  %4535 = vmatprep.mubr.f32.mxu1 %v9403_v33  ;;  %v9784_v33 = vld [vmem:[#allocation3 + $0x25a] sm:$0xff] }
 0x612   :  { %4536 = vmatmul.mubr.f32.gmra.mrb[150].mxu1 %v9768_v49 }
 0x613   :  { %4540 = vmatprep.mubr.f32.mxu1 %v9408_v40 }
 0x615   :  { %v9774_v51 = vpop.f32.mrb[178].mxu0 }
 0x616   :  { %10489 = vst [vmem:[#allocation86_spill] sm:$0xff] %v9774_v51  ;;  %4541 = vmatmul.mubr.f32.gmra.mrb[152].mxu1 %v9772_v47  ;;  %v9777_v22 = vpop.f32.mrb[179].mxu0 }
 0x617   :  { %10490 = vst [vmem:[#allocation87_spill] sm:$0xff] %v9777_v22  ;;  %4545 = vmatprep.mubr.f32.mxu1 %v9413_v59  ;;  %v10078_v22 = vld [vmem:[#allocation3 + $0x33a] sm:$0xff] }
 0x61a   :  { %4546 = vmatmul.mubr.f32.gmra.mrb[154].mxu1 %v9780_v37 }
 0x61b   :  { %4550 = vmatprep.mubr.f32.mxu1 %v9421_v29  ;;  %v9826_v29 = vld [vmem:[#allocation3 + $0x30a] sm:$0xff] }
 0x61d   :  { %v9786_v26 = vpop.f32.mrb[180].mxu0 }
 0x61e   :  { %10491 = vst [vmem:[#allocation88_spill] sm:$0xff] %v9786_v26  ;;  %4551 = vmatmul.mubr.f32.gmra.mrb[156].mxu1 %v9784_v33  ;;  %v9789_v40 = vpop.f32.mrb[181].mxu0  ;;  %v10050_v26 = vld [vmem:[#allocation3 + $0x2e9] sm:$0xff] }
 0x61f   :  { %10492 = vst [vmem:[#allocation89_spill] sm:$0xff] %v9789_v40  ;;  %4555 = vmatprep.mubr.f32.mxu1 %v9428_v14  ;;  %v9829_v14 = vld [vmem:[#allocation3 + $0x31a] sm:$0xff]  ;;  %v10053_v40 = vld [vmem:[#allocation3 + $0x2f1] sm:$0xff] }
 0x622   :  { %4556 = vmatmul.mubr.f32.gmra.mrb[158].mxu1 %v9415_v60  ;;  %v9822_v60 = vld [vmem:[#allocation3 + $0x302] sm:$0xff] }
 0x623   :  { %4560 = vmatprep.mubr.f32.mxu1 %v9437_v34  ;;  %v3089_v34 = vld [vmem:[#allocation9 + $0x300] sm:$0xff] }
 0x625   :  { %v9794_v59 = vpop.f32.mrb[182].mxu0 }
 0x626   :  { %10493 = vst [vmem:[#allocation90_spill] sm:$0xff] %v9794_v59  ;;  %4561 = vmatmul.mubr.f32.gmra.mrb[160].mxu1 %v9426_v1  ;;  %v9797_v51 = vpop.f32.mrb[183].mxu0  ;;  %v3542_v1 = vld [vmem:[#allocation3 + $0x330] sm:$0xff] }
 0x627   :  { %10494 = vst [vmem:[#allocation91_spill] sm:$0xff] %v9797_v51  ;;  %4565 = vmatprep.mubr.f32.mxu1 %v9444_v50  ;;  %v9832_v50 = vld [vmem:[#allocation3 + $0x322] sm:$0xff]  ;;  %v10044_v59 = vld [vmem:[#allocation3 + $0x2d1] sm:$0xff]  ;;  %v10047_v51 = vld [vmem:[#allocation3 + $0x2d9] sm:$0xff] }
 0x62a   :  { %4566 = vmatmul.mubr.f32.gmra.mrb[162].mxu1 %v9430_v42  ;;  %v3543_v42 = vld [vmem:[#allocation3 + $0x338] sm:$0xff] }
 0x62b   :  { %4570 = vmatprep.mubr.f32.mxu1 %v9453_v17  ;;  %v3091_v17 = vld [vmem:[#allocation9 + $0x310] sm:$0xff] }
 0x62e   :  { %4571 = vmatmul.mubr.f32.gmra.mrb[164].mxu1 %v9442_v4  ;;  %v3090_v4 = vld [vmem:[#allocation9 + $0x308] sm:$0xff] }
 0x62f   :  { %4575 = vmatprep.mubr.f32.mxu1 %v9460_v41  ;;  %v3544_v41 = vld [vmem:[#allocation3 + $0x19] sm:$0xff] }
 0x632   :  { %4576 = vmatmul.mubr.f32.gmra.mrb[166].mxu1 %v9446_v18  ;;  %v6729_v18 = vpack.c.bf16 %v3090_v4, %v3089_v34  ;;  %v3105_v34 = vld [vmem:[#allocation9 + $0x380] sm:$0xff]  ;;  %v3106_v4 = vld [vmem:[#allocation9 + $0x388] sm:$0xff] }
 0x633   :  { %4580 = vmatprep.mubr.f32.mxu1 %v9469_v30  ;;  %v3093_v30 = vld [vmem:[#allocation9 + $0x320] sm:$0xff] }
 0x636   :  { %4581 = vmatmul.mubr.f32.gmra.mrb[168].mxu1 %v9458_v16  ;;  %v3092_v16 = vld [vmem:[#allocation9 + $0x318] sm:$0xff] }
 0x637   :  { %4585 = vmatprep.mubr.f32.mxu1 %v9476_v39  ;;  %v3545_v39 = vld [vmem:[#allocation3 + $0x21] sm:$0xff] }
 0x63a   :  { %4586 = vmatmul.mubr.f32.gmra.mrb[170].mxu1 %v9462_v0  ;;  %v6732_v0 = vpack.c.bf16 %v3092_v16, %v3091_v17  ;;  %v3107_v17 = vld [vmem:[#allocation9 + $0x390] sm:$0xff]  ;;  %v3108_v16 = vld [vmem:[#allocation9 + $0x398] sm:$0xff] }
 0x63b   :  { %4590 = vmatprep.mubr.f32.mxu1 %v9485_v10  ;;  %v3095_v10 = vld [vmem:[#allocation9 + $0x330] sm:$0xff] }
 0x63e   :  { %4591 = vmatmul.mubr.f32.gmra.mrb[172].mxu1 %v9474_v54  ;;  %v3094_v54 = vld [vmem:[#allocation9 + $0x328] sm:$0xff] }
 0x63f   :  { %4595 = vmatprep.mubr.f32.mxu1 %v9492_v7  ;;  %v9840_v7 = vld [vmem:[#allocation3 + $0x31] sm:$0xff] }
 0x642   :  { %4596 = vmatmul.mubr.f32.gmra.mrb[174].mxu1 %v9478_v28  ;;  %v6735_v28 = vpack.c.bf16 %v3094_v54, %v3093_v30  ;;  %v3110_v30 = vld [vmem:[#allocation9 + $0x3a8] sm:$0xff] }
 0x643   :  { %4600 = vmatprep.mubr.f32.mxu1 %v9501_v53  ;;  %v3097_v53 = vld [vmem:[#allocation9 + $0x340] sm:$0xff] }
 0x644   :  { %v9875_v54 = vld [vmem:[#allocation3 + $0x81] sm:$0xff] }
 0x646   :  { %4601 = vmatmul.mubr.f32.gmra.mrb[176].mxu1 %v9490_v36  ;;  %v3096_v36 = vld [vmem:[#allocation9 + $0x338] sm:$0xff] }
 0x647   :  { %4605 = vmatprep.mubr.f32.mxu1 %v9508_v61  ;;  %v9845_v61 = vld [vmem:[#allocation3 + $0x39] sm:$0xff] }
 0x64a   :  { %4606 = vmatmul.mubr.f32.gmra.mrb[178].mxu1 %v9494_v48  ;;  %v6738_v48 = vpack.c.bf16 %v3096_v36, %v3095_v10  ;;  %v3112_v10 = vld [vmem:[#allocation9 + $0x3b8] sm:$0xff] }
 0x64b   :  { %4610 = vmatprep.mubr.f32.mxu1 %v9517_v5  ;;  %v3099_v5 = vld [vmem:[#allocation9 + $0x350] sm:$0xff] }
 0x64e   :  { %4611 = vmatmul.mubr.f32.gmra.mrb[180].mxu1 %v9506_v43  ;;  %v3098_v43 = vld [vmem:[#allocation9 + $0x348] sm:$0xff] }
 0x64f   :  { %4615 = vmatprep.mubr.f32.mxu1 %v9522_v21  ;;  %v3100_v21 = vld [vmem:[#allocation9 + $0x358] sm:$0xff] }
 0x652   :  { %4616 = vmatmul.mubr.f32.gmra.mrb[182].mxu1 %v9510_v25  ;;  %v6741_v25 = vpack.c.bf16 %v3098_v43, %v3097_v53  ;;  %v3114_v53 = vld [vmem:[#allocation9 + $0x3c8] sm:$0xff] }
 0x653   :  { %4620 = vmatprep.mubr.f32.mxu1 %v9527_v57  ;;  %v9850_v57 = vld [vmem:[#allocation3 + $0x49] sm:$0xff] }
 0x656   :  { %4621 = vmatmul.mubr.f32.gmra.mrb[184].mxu1 %v9822_v60 }
 0x657   :  { %4625 = vmatprep.mubr.f32.mxu1 %v9535_v46  ;;  %v6744_v46 = vpack.c.bf16 %v3100_v21, %v3099_v5  ;;  %v3115_v5 = vld [vmem:[#allocation9 + $0x3d0] sm:$0xff]  ;;  %v3116_v21 = vld [vmem:[#allocation9 + $0x3d8] sm:$0xff] }
 0x65a   :  { %4626 = vmatmul.mubr.f32.gmra.mrb[186].mxu1 %v9826_v29 }
 0x65b   :  { %4630 = vmatprep.mubr.f32.mxu1 %v3542_v1  ;;  %v3104_v1 = vld [vmem:[#allocation9 + $0x378] sm:$0xff] }
 0x65e   :  { %4631 = vmatmul.mubr.f32.gmra.mrb[188].mxu1 %v9829_v14 }
 0x65f   :  { %4635 = vmatprep.mubr.f32.mxu1 %v3543_v42  ;;  %v9860_v42 = vld [vmem:[#allocation3 + $0x61] sm:$0xff] }
 0x662   :  { %4636 = vmatmul.mubr.f32.gmra.mrb[190].mxu1 %v9832_v50 }
 0x663   :  { %4705 = vmatprep.mubr.f32.mxu1 %v9552_v12  ;;  %v3101_v12 = vld [vmem:[#allocation9 + $0x360] sm:$0xff] }
 0x666   :  { %4706 = vmatmul.mubr.f32.vlgmr.msra.gmra.mrb[64].mxu1 %v3544_v41  ;;  %v9870_v41 = vld [vmem:[#allocation3 + $0x79] sm:$0xff] }
 0x667   :  { %4710 = vmatprep.mubr.f32.mxu1 %v9560_v56  ;;  %6730 = vmatpush1.bf16.msra.mxu1 %v6729_v18  ;;  %v3102_v56 = vld [vmem:[#allocation9 + $0x368] sm:$0xff] }
 0x668   :  { %6731 = vmatprep.subr.bf16.mxu1 %v10373_v2  ;;  %v9865_v18 = vld [vmem:[#allocation3 + $0x69] sm:$0xff] }
 0x66a   :  { %4711 = vmatmul.mubr.f32.gmra.mrb[66].mxu1 %v3545_v39  ;;  %v9880_v39 = vld [vmem:[#allocation3 + $0x91] sm:$0xff] }
 0x66b   :  { %4715 = vmatprep.mubr.f32.mxu1 %v9564_v19  ;;  %6733 = vmatpush1.bf16.msra.mxu1 %v6732_v0  ;;  %v9855_v19 = vld [vmem:[#allocation3 + $0x51] sm:$0xff]  ;;  %v3109_v0 = vld [vmem:[#allocation9 + $0x3a0] sm:$0xff] }
 0x66c   :  { %6734 = vmatprep.subr.bf16.mxu1 %v10373_v2 }
 0x66e   :  { %4716 = vmatmul.mubr.f32.gmra.mrb[68].mxu1 %v9840_v7 }
 0x66f   :  { %4720 = vmatprep.mubr.f32.mxu1 %v9572_v3  ;;  %6736 = vmatpush1.bf16.msra.mxu1 %v6735_v28  ;;  %v6747_v3 = vpack.c.bf16 %v3102_v56, %v3101_v12  ;;  %v3111_v28 = vld [vmem:[#allocation9 + $0x3b0] sm:$0xff]  ;;  %v9932_v56 = vld [vmem:[#allocation3 + $0x121] sm:$0xff] }
 0x670   :  { %6737 = vmatprep.subr.bf16.mxu1 %v10373_v2  ;;  %v6762_v36 = vpack.c.bf16 %v3112_v10, %v3111_v28  ;;  %v9927_v12 = vld [vmem:[#allocation3 + $0x111] sm:$0xff]  ;;  %v9957_v28 = vld [vmem:[#allocation3 + $0x169] sm:$0xff] }
 0x671   :  { %v10503_v10 = vld [vmem:[#allocation68_spill] sm:$0xff] }
 0x672   :  { %4721 = vmatmul.mubr.f32.gmra.mrb[70].mxu1 %v9845_v61 }
 0x673   :  { %4725 = vmatprep.mubr.f32.mxu1 %v9576_v63  ;;  %6739 = vmatpush1.bf16.msra.mxu1 %v6738_v48  ;;  %v3103_v63 = vld [vmem:[#allocation9 + $0x370] sm:$0xff] }
 0x674   :  { %6740 = vmatprep.subr.bf16.mxu1 %v10373_v2  ;;  %v9893_v48 = vld [vmem:[#allocation3 + $0xb1] sm:$0xff] }
 0x676   :  { %4726 = vmatmul.mubr.f32.gmra.mrb[72].mxu1 %v9850_v57 }
 0x677   :  { %4730 = vmatprep.mubr.f32.mxu1 %v9584_v8  ;;  %6742 = vmatpush1.bf16.msra.mxu1 %v6741_v25  ;;  %v6750_v8 = vpack.c.bf16 %v3104_v1, %v3103_v63  ;;  %v9910_v25 = vld [vmem:[#allocation3 + $0xe1] sm:$0xff]  ;;  %v10498_v63 = vld [vmem:[#allocation57_spill] sm:$0xff] }
 0x678   :  { %6743 = vmatprep.subr.bf16.mxu1 %v10373_v2  ;;  %v9940_v1 = vld [vmem:[#allocation3 + $0x139] sm:$0xff]  ;;  %10513 = vst [vmem:[#allocation57_spill] sm:$0xff] %v10078_v22 }
 0x67a   :  { %4731 = vmatmul.mubr.f32.gmra.mrb[74].mxu1 %v9855_v19 }
 0x67b   :  { %4735 = vmatprep.mubr.f32.mxu1 %v9588_v45  ;;  %6745 = vmatpush1.bf16.msra.mxu1 %v6744_v46  ;;  %v6753_v45 = vpack.c.bf16 %v3106_v4, %v3105_v34  ;;  %v6768_v46 = vpack.c.bf16 %v3116_v21, %v3115_v5  ;;  %v3117_v34 = vld [vmem:[#allocation9 + $0x3e0] sm:$0xff]  ;;  %v3118_v4 = vld [vmem:[#allocation9 + $0x3e8] sm:$0xff] }
 0x67c   :  { %6746 = vmatprep.subr.bf16.mxu1 %v10373_v2  ;;  %v9965_v5 = vld [vmem:[#allocation3 + $0x181] sm:$0xff]  ;;  %v3639_v21 = vld [vmem:[#allocation3 + $0x18a] sm:$0xff] }
 0x67e   :  { %4736 = vmatmul.mubr.f32.gmra.mrb[76].mxu1 %v9860_v42 }
 0x67f   :  { %4740 = vmatprep.mubr.f32.mxu1 %v9596_v58  ;;  %6748 = vmatpush1.bf16.msra.mxu1 %v6747_v3  ;;  %v6756_v58 = vpack.c.bf16 %v3108_v16, %v3107_v17  ;;  %v9936_v3 = vld [vmem:[#allocation3 + $0x129] sm:$0xff]  ;;  %v9944_v17 = vld [vmem:[#allocation3 + $0x141] sm:$0xff]  ;;  %v10500_v16 = vld [vmem:[#allocation61_spill] sm:$0xff] }
 0x680   :  { %6749 = vmatprep.subr.bf16.mxu1 %v10373_v2 }
 0x682   :  { %4741 = vmatmul.mubr.f32.gmra.mrb[78].mxu1 %v9865_v18 }
 0x683   :  { %4745 = vmatprep.mubr.f32.mxu1 %v9600_v24  ;;  %6751 = vmatpush1.bf16.msra.mxu1 %v6750_v8  ;;  %v6759_v24 = vpack.c.bf16 %v3110_v30, %v3109_v0  ;;  %v10499_v8 = vld [vmem:[#allocation60_spill] sm:$0xff]  ;;  %v9953_v30 = vld [vmem:[#allocation3 + $0x159] sm:$0xff] }
 0x684   :  { %6752 = vmatprep.subr.bf16.mxu1 %v10373_v2  ;;  %v10501_v0 = vld [vmem:[#allocation64_spill] sm:$0xff] }
 0x686   :  { %4746 = vmatmul.mubr.f32.gmra.mrb[80].mxu1 %v9870_v41 }
 0x687   :  { %4750 = vmatprep.mubr.f32.mxu1 %v9608_v6  ;;  %6754 = vmatpush1.bf16.msra.mxu1 %v6753_v45  ;;  %v9885_v6 = vld [vmem:[#allocation3 + $0x99] sm:$0xff]  ;;  %v6771_v45 = vpack.c.bf16 %v3118_v4, %v3117_v34  ;;  %v9974_v34 = vld [vmem:[#allocation3 + $0x1e1] sm:$0xff] }
 0x688   :  { %6755 = vmatprep.subr.bf16.mxu1 %v10373_v2  ;;  %v10507_v4 = vld [vmem:[#allocation77_spill] sm:$0xff] }
 0x68a   :  { %4751 = vmatmul.mubr.f32.gmra.mrb[82].mxu1 %v9875_v54 }
 0x68b   :  { %4755 = vmatprep.mubr.f32.mxu1 %v9611_v62  ;;  %6757 = vmatpush1.bf16.msra.mxu1 %v6756_v58  ;;  %v9889_v62 = vld [vmem:[#allocation3 + $0xa9] sm:$0xff]  ;;  %v9949_v58 = vld [vmem:[#allocation3 + $0x151] sm:$0xff] }
 0x68c   :  { %6758 = vmatprep.subr.bf16.mxu1 %v10373_v2 }
 0x68e   :  { %4756 = vmatmul.mubr.f32.gmra.mrb[84].mxu1 %v9880_v39 }
 0x68f   :  { %4760 = vmatprep.mubr.f32.mxu1 %v9618_v38  ;;  %6760 = vmatpush1.bf16.msra.mxu1 %v6759_v24  ;;  %v9898_v38 = vld [vmem:[#allocation3 + $0xc1] sm:$0xff]  ;;  %v10502_v24 = vld [vmem:[#allocation65_spill] sm:$0xff] }
 0x690   :  { %6761 = vmatprep.subr.bf16.mxu1 %v10373_v2 }
 0x692   :  { %4761 = vmatmul.mubr.f32.gmra.mrb[86].mxu1 %v9885_v6 }
 0x693   :  { %4765 = vmatprep.mubr.f32.mxu1 %v9622_v52  ;;  %6763 = vmatpush1.bf16.msra.mxu1 %v6762_v36  ;;  %v9902_v52 = vld [vmem:[#allocation3 + $0xc9] sm:$0xff] }
 0x694   :  { %6764 = vmatprep.subr.bf16.mxu1 %v10373_v2  ;;  %v3119_v36 = vld [vmem:[#allocation9 + $0x3f0] sm:$0xff] }
 0x696   :  { %4766 = vmatmul.mubr.f32.gmra.mrb[88].mxu1 %v9889_v62 }
 0x697   :  { %4770 = vmatprep.mubr.f32.mxu1 %v9629_v27  ;;  %v9906_v27 = vld [vmem:[#allocation3 + $0xd9] sm:$0xff] }
 0x69a   :  { %4771 = vmatmul.mubr.f32.gmra.mrb[90].mxu1 %v9893_v48 }
 0x69b   :  { %4775 = vmatprep.mubr.f32.mxu1 %v9632_v35  ;;  %v3113_v35 = vld [vmem:[#allocation9 + $0x3c0] sm:$0xff] }
 0x69c   :  { %v6765_v43 = vpack.c.bf16 %v3114_v53, %v3113_v35  ;;  %v9961_v53 = vld [vmem:[#allocation3 + $0x171] sm:$0xff] }
 0x69e   :  { %4776 = vmatmul.mubr.f32.gmra.mrb[92].mxu1 %v9898_v38 }
 0x69f   :  { %4780 = vmatprep.mubr.f32.mxu1 %v9639_v20  ;;  %6766 = vmatpush1.bf16.msra.mxu1 %v6765_v43  ;;  %v9915_v20 = vld [vmem:[#allocation3 + $0xf1] sm:$0xff]  ;;  %v3638_v43 = vld [vmem:[#allocation3 + $0x182] sm:$0xff] }
 0x6a0   :  { %6767 = vmatprep.subr.bf16.mxu1 %v10373_v2 }
 0x6a2   :  { %4781 = vmatmul.mubr.f32.gmra.mrb[94].mxu1 %v9902_v52 }
 0x6a3   :  { %4785 = vmatprep.mubr.f32.mxu1 %v9643_v31  ;;  %v9919_v31 = vld [vmem:[#allocation3 + $0xf9] sm:$0xff]  ;;  %6769 = vmatpush1.bf16.msra.mxu1 %v6768_v46  ;;  %v9968_v46 = vld [vmem:[#allocation3 + $0x189] sm:$0xff] }
 0x6a4   :  { %6770 = vmatprep.subr.bf16.mxu1 %v10373_v2 }
 0x6a6   :  { %4786 = vmatmul.mubr.f32.gmra.mrb[96].mxu1 %v9906_v27 }
 0x6a7   :  { %4790 = vmatprep.mubr.f32.mxu1 %v9650_v9  ;;  %v9923_v9 = vld [vmem:[#allocation3 + $0x109] sm:$0xff]  ;;  %6772 = vmatpush1.bf16.msra.mxu1 %v6771_v45 }
 0x6a8   :  { %6773 = vmatprep.subr.bf16.mxu1 %v10373_v2  ;;  %v3120_v2 = vld [vmem:[#allocation9 + $0x3f8] sm:$0xff]  ;;  %v9978_v45 = vld [vmem:[#allocation3 + $0x1e9] sm:$0xff] }
 0x6a9   :  { %v6774_v35 = vpack.c.bf16 %v3120_v2, %v3119_v36  ;;  %v9994_v36 = vld [vmem:[#allocation3 + $0x219] sm:$0xff]  ;;  %v9998_v2 = vld [vmem:[#allocation3 + $0x229] sm:$0xff] }
 0x6aa   :  { %4791 = vmatmul.mubr.f32.gmra.mrb[98].mxu1 %v9910_v25 }
 0x6ab   :  { %4795 = vmatprep.mubr.f32.mxu1 %v9653_v15  ;;  %v10495_v15 = vld [vmem:[#allocation52_spill] sm:$0xff]  ;;  %6775 = vmatpush1.bf16.msra.mxu1 %v6774_v35 }
 0x6ac   :  { %v10002_v35 = vld [vmem:[#allocation3 + $0x231] sm:$0xff] }
 0x6ae   :  { %4796 = vmatmul.mubr.f32.gmra.mrb[100].mxu1 %v9915_v20 }
 0x6af   :  { %4800 = vmatprep.mubr.f32.mxu1 %v9660_v13  ;;  %v10496_v13 = vld [vmem:[#allocation55_spill] sm:$0xff] }
 0x6b2   :  { %4801 = vmatmul.mubr.f32.gmra.mrb[102].mxu1 %v9919_v31 }
 0x6b3   :  { %4805 = vmatprep.mubr.f32.mxu1 %v9664_v44  ;;  %v10497_v44 = vld [vmem:[#allocation56_spill] sm:$0xff] }
 0x6b6   :  { %4806 = vmatmul.mubr.f32.gmra.mrb[104].mxu1 %v9923_v9 }
 0x6b7   :  { %4810 = vmatprep.mubr.f32.mxu1 %v10495_v15  ;;  %v10504_v15 = vld [vmem:[#allocation17_spill] sm:$0xff] }
 0x6b8   :  { %6808 = vmatprep.subr.bf16.mxu1 %v10504_v15 }
 0x6ba   :  { %4811 = vmatmul.mubr.f32.gmra.mrb[106].mxu1 %v9927_v12 }
 0x6bb   :  { %4815 = vmatprep.mubr.f32.mxu1 %v10496_v13  ;;  %v3576_v13 = vld [vmem:[#allocation3 + $0x1c9] sm:$0xff] }
 0x6be   :  { %4816 = vmatmul.mubr.f32.gmra.mrb[108].mxu1 %v9932_v56 }
 0x6bf   :  { %4820 = vmatprep.mubr.f32.mxu1 %v10497_v44  ;;  %v10505_v44 = vld [vmem:[#allocation73_spill] sm:$0xff] }
 0x6c2   :  { %4821 = vmatmul.mubr.f32.gmra.mrb[110].mxu1 %v9936_v3 }
 0x6c3   :  { %4825 = vmatprep.mubr.f32.mxu1 %v10498_v63  ;;  %v3577_v63 = vld [vmem:[#allocation3 + $0x1d1] sm:$0xff] }
 0x6c6   :  { %4826 = vmatmul.mubr.f32.gmra.mrb[112].mxu1 %v9940_v1 }
 0x6c7   :  { %4830 = vmatprep.mubr.f32.mxu1 %v10499_v8  ;;  %v10506_v8 = vld [vmem:[#allocation74_spill] sm:$0xff] }
 0x6ca   :  { %4831 = vmatmul.mubr.f32.gmra.mrb[114].mxu1 %v9944_v17 }
 0x6cb   :  { %4835 = vmatprep.mubr.f32.mxu1 %v10500_v16  ;;  %v10508_v16 = vld [vmem:[#allocation78_spill] sm:$0xff] }
 0x6ce   :  { %4836 = vmatmul.mubr.f32.gmra.mrb[116].mxu1 %v9949_v58 }
 0x6cf   :  { %4840 = vmatprep.mubr.f32.mxu1 %v10501_v0  ;;  %v10509_v0 = vld [vmem:[#allocation81_spill] sm:$0xff] }
 0x6d2   :  { %4841 = vmatmul.mubr.f32.gmra.mrb[118].mxu1 %v9953_v30 }
 0x6d3   :  { %4845 = vmatprep.mubr.f32.mxu1 %v10502_v24  ;;  %v9986_v24 = vld [vmem:[#allocation3 + $0x201] sm:$0xff] }
 0x6d6   :  { %4846 = vmatmul.mubr.f32.gmra.mrb[120].mxu1 %v9957_v28 }
 0x6d7   :  { %4850 = vmatprep.mubr.f32.mxu1 %v10503_v10  ;;  %v9990_v10 = vld [vmem:[#allocation3 + $0x211] sm:$0xff] }
 0x6da   :  { %4851 = vmatmul.mubr.f32.gmra.mrb[122].mxu1 %v9961_v53 }
 0x6db   :  { %4855 = vmatprep.mubr.f32.mxu1 %v3638_v43  ;;  %v10017_v43 = vld [vmem:[#allocation3 + $0x261] sm:$0xff] }
 0x6de   :  { %4856 = vmatmul.mubr.f32.gmra.mrb[124].mxu1 %v9965_v5 }
 0x6df   :  { %4860 = vmatprep.mubr.f32.mxu1 %v3639_v21  ;;  %v10020_v21 = vld [vmem:[#allocation3 + $0x271] sm:$0xff] }
 0x6e2   :  { %4861 = vmatmul.mubr.f32.gmra.mrb[126].mxu1 %v9968_v46 }
 0x6e3   :  { %4865 = vmatprep.mubr.f32.mxu1 %v9720_v11  ;;  %v9982_v11 = vld [vmem:[#allocation3 + $0x1f9] sm:$0xff] }
 0x6e6   :  { %4866 = vmatmul.mubr.f32.gmra.mrb[128].mxu1 %v3576_v13  ;;  %v10023_v13 = vld [vmem:[#allocation3 + $0x279] sm:$0xff] }
 0x6e7   :  { %4870 = vmatprep.mubr.f32.mxu1 %v10505_v44  ;;  %v10026_v44 = vld [vmem:[#allocation3 + $0x289] sm:$0xff] }
 0x6ea   :  { %4871 = vmatmul.mubr.f32.gmra.mrb[130].mxu1 %v3577_v63  ;;  %v3657_v63 = vld [vmem:[#allocation3 + $0x292] sm:$0xff] }
 0x6eb   :  { %4875 = vmatprep.mubr.f32.mxu1 %v10506_v8  ;;  %v10029_v8 = vld [vmem:[#allocation3 + $0x291] sm:$0xff] }
 0x6ee   :  { %4876 = vmatmul.mubr.f32.gmra.mrb[132].mxu1 %v9974_v34 }
 0x6ef   :  { %4880 = vmatprep.mubr.f32.mxu1 %v10507_v4  ;;  %v3658_v4 = vld [vmem:[#allocation3 + $0x2a2] sm:$0xff] }
 0x6f2   :  { %4881 = vmatmul.mubr.f32.gmra.mrb[134].mxu1 %v9978_v45 }
 0x6f3   :  { %4885 = vmatprep.mubr.f32.mxu1 %v10508_v16  ;;  %v10032_v16 = vld [vmem:[#allocation3 + $0x2a1] sm:$0xff] }
 0x6f6   :  { %4886 = vmatmul.mubr.f32.gmra.mrb[136].mxu1 %v9982_v11 }
 0x6f7   :  { %4890 = vmatprep.mubr.f32.mxu1 %v10509_v0  ;;  %v3659_v0 = vld [vmem:[#allocation3 + $0x2aa] sm:$0xff] }
 0x6fa   :  { %4891 = vmatmul.mubr.f32.gmra.mrb[138].mxu1 %v9986_v24 }
 0x6fb   :  { %4895 = vmatprep.mubr.f32.mxu1 %v9750_v32  ;;  %v10006_v32 = vld [vmem:[#allocation3 + $0x241] sm:$0xff] }
 0x6fe   :  { %4896 = vmatmul.mubr.f32.gmra.mrb[140].mxu1 %v9990_v10 }
 0x6ff   :  { %4900 = vmatprep.mubr.f32.mxu1 %v9757_v23  ;;  %v10010_v23 = vld [vmem:[#allocation3 + $0x249] sm:$0xff] }
 0x702   :  { %4901 = vmatmul.mubr.f32.gmra.mrb[142].mxu1 %v9994_v36 }
 0x703   :  { %4905 = vmatprep.mubr.f32.mxu1 %v9760_v55  ;;  %v10014_v55 = vld [vmem:[#allocation3 + $0x259] sm:$0xff] }
 0x706   :  { %4906 = vmatmul.mubr.f32.gmra.mrb[144].mxu1 %v9998_v2 }
 0x707   :  { %4910 = vmatprep.mubr.f32.mxu1 %v9768_v49  ;;  %v3653_v49 = vld [vmem:[#allocation3 + $0x262] sm:$0xff] }
 0x70a   :  { %4911 = vmatmul.mubr.f32.gmra.mrb[146].mxu1 %v10002_v35 }
 0x70b   :  { %4915 = vmatprep.mubr.f32.mxu1 %v9772_v47  ;;  %v3654_v47 = vld [vmem:[#allocation3 + $0x272] sm:$0xff] }
 0x70e   :  { %4916 = vmatmul.mubr.f32.gmra.mrb[148].mxu1 %v10006_v32 }
 0x70f   :  { %4920 = vmatprep.mubr.f32.mxu1 %v9780_v37  ;;  %v3655_v37 = vld [vmem:[#allocation3 + $0x27a] sm:$0xff] }
 0x712   :  { %4921 = vmatmul.mubr.f32.gmra.mrb[150].mxu1 %v10010_v23 }
 0x713   :  { %4925 = vmatprep.mubr.f32.mxu1 %v9784_v33  ;;  %v3656_v33 = vld [vmem:[#allocation3 + $0x28a] sm:$0xff] }
 0x716   :  { %4926 = vmatmul.mubr.f32.gmra.mrb[152].mxu1 %v10014_v55 }
 0x717   :  { %4930 = vmatprep.mubr.f32.mxu1 %v3653_v49  ;;  %v10035_v49 = vld [vmem:[#allocation3 + $0x2a9] sm:$0xff] }
 0x71a   :  { %4931 = vmatmul.mubr.f32.gmra.mrb[154].mxu1 %v10017_v43 }
 0x71b   :  { %4935 = vmatprep.mubr.f32.mxu1 %v3654_v47  ;;  %v3660_v47 = vld [vmem:[#allocation3 + $0x2ba] sm:$0xff] }
 0x71e   :  { %4936 = vmatmul.mubr.f32.gmra.mrb[156].mxu1 %v10020_v21 }
 0x71f   :  { %4940 = vmatprep.mubr.f32.mxu1 %v3655_v37  ;;  %v10038_v37 = vld [vmem:[#allocation3 + $0x2b9] sm:$0xff] }
 0x722   :  { %4941 = vmatmul.mubr.f32.gmra.mrb[158].mxu1 %v10023_v13 }
 0x723   :  { %4945 = vmatprep.mubr.f32.mxu1 %v3656_v33  ;;  %v3661_v33 = vld [vmem:[#allocation3 + $0x2c2] sm:$0xff] }
 0x726   :  { %4946 = vmatmul.mubr.f32.gmra.mrb[160].mxu1 %v10026_v44 }
 0x727   :  { %4950 = vmatprep.mubr.f32.mxu1 %v3657_v63  ;;  %v10041_v63 = vld [vmem:[#allocation3 + $0x2c1] sm:$0xff] }
 0x72a   :  { %4951 = vmatmul.mubr.f32.gmra.mrb[162].mxu1 %v10029_v8 }
 0x72b   :  { %4955 = vmatprep.mubr.f32.mxu1 %v3658_v4  ;;  %v3662_v4 = vld [vmem:[#allocation3 + $0x2d2] sm:$0xff] }
 0x72e   :  { %4956 = vmatmul.mubr.f32.gmra.mrb[164].mxu1 %v10032_v16 }
 0x72f   :  { %4960 = vmatprep.mubr.f32.mxu1 %v3659_v0  ;;  %v3663_v0 = vld [vmem:[#allocation3 + $0x2da] sm:$0xff] }
 0x732   :  { %4961 = vmatmul.mubr.f32.gmra.mrb[166].mxu1 %v10035_v49 }
 0x733   :  { %4965 = vmatprep.mubr.f32.mxu1 %v3660_v47  ;;  %v3664_v47 = vld [vmem:[#allocation3 + $0x2ea] sm:$0xff] }
 0x736   :  { %4966 = vmatmul.mubr.f32.gmra.mrb[168].mxu1 %v10038_v37 }
 0x737   :  { %4970 = vmatprep.mubr.f32.mxu1 %v3661_v33  ;;  %v3665_v33 = vld [vmem:[#allocation3 + $0x2f2] sm:$0xff] }
 0x73a   :  { %4971 = vmatmul.mubr.f32.gmra.mrb[170].mxu1 %v10041_v63 }
 0x73b   :  { %4975 = vmatprep.mubr.f32.mxu1 %v3662_v4  ;;  %v10057_v4 = vld [vmem:[#allocation3 + $0x301] sm:$0xff] }
 0x73e   :  { %4976 = vmatmul.mubr.f32.gmra.mrb[172].mxu1 %v10044_v59 }
 0x73f   :  { %4980 = vmatprep.mubr.f32.mxu1 %v3663_v0  ;;  %v10061_v0 = vld [vmem:[#allocation3 + $0x309] sm:$0xff] }
 0x742   :  { %4981 = vmatmul.mubr.f32.gmra.mrb[174].mxu1 %v10047_v51 }
 0x743   :  { %4985 = vmatprep.mubr.f32.mxu1 %v3664_v47  ;;  %v10065_v47 = vld [vmem:[#allocation3 + $0x319] sm:$0xff] }
 0x746   :  { %4986 = vmatmul.mubr.f32.gmra.mrb[176].mxu1 %v10050_v26 }
 0x747   :  { %4990 = vmatprep.mubr.f32.mxu1 %v3665_v33  ;;  %v10069_v33 = vld [vmem:[#allocation3 + $0x321] sm:$0xff] }
 0x748   :  { %10510 = vst [vmem:[#allocation52_spill] sm:$0xff] %v10069_v33 }
 0x74a   :  { %4991 = vmatmul.mubr.f32.gmra.mrb[178].mxu1 %v10053_v40 }
 0x74b   :  { %4995 = vmatprep.mubr.f32.mxu1 %v9822_v60  ;;  %v10072_v60 = vld [vmem:[#allocation3 + $0x332] sm:$0xff] }
 0x74c   :  { %10511 = vst [vmem:[#allocation55_spill] sm:$0xff] %v10072_v60 }
 0x74e   :  { %4996 = vmatmul.mubr.f32.gmra.mrb[180].mxu1 %v10057_v4 }
 0x74f   :  { %5000 = vmatprep.mubr.f32.mxu1 %v9826_v29  ;;  %v10075_v29 = vld [vmem:[#allocation3 + $0x331] sm:$0xff] }
 0x750   :  { %10512 = vst [vmem:[#allocation56_spill] sm:$0xff] %v10075_v29 }
 0x752   :  { %5001 = vmatmul.mubr.f32.gmra.mrb[182].mxu1 %v10061_v0 }
 0x753   :  { %5005 = vmatprep.mubr.f32.mxu1 %v9829_v14  ;;  %v10081_v14 = vld [vmem:[#allocation3 + $0x339] sm:$0xff] }
 0x756   :  { %5006 = vmatmul.mubr.f32.gmra.mrb[184].mxu1 %v10065_v47 }
 0x757   :  { %5010 = vmatprep.mubr.f32.mxu1 %v9832_v50  ;;  %v3673_v50 = vld [vmem:[#allocation3 + $0x30] sm:$0xff] }
 0x75a   :  { %5011 = vmatmul.mubr.f32.gmra.mrb[186].mxu1 %v10069_v33  ;;  %v3674_v33 = vld [vmem:[#allocation3 + $0x38] sm:$0xff] }
 0x75b   :  { %5015 = vmatprep.mubr.f32.mxu1 %v10072_v60  ;;  %v10514_v60 = vld [vmem:[#allocation18_spill] sm:$0xff] }
 0x75e   :  { %5016 = vmatmul.mubr.f32.gmra.mrb[188].mxu1 %v10075_v29  ;;  %v3675_v29 = vld [vmem:[#allocation3 + $0x48] sm:$0xff] }
 0x75f   :  { %5020 = vmatprep.mubr.f32.mxu1 %v10078_v22  ;;  %v10515_v22 = vld [vmem:[#allocation20_spill] sm:$0xff] }
 0x762   :  { %5021 = vmatmul.mubr.f32.gmra.mrb[190].mxu1 %v10081_v14 }
 0x763   :  { %5090 = vmatprep.mubr.f32.mxu1 %v9840_v7  ;;  %v10516_v7 = vld [vmem:[#allocation22_spill] sm:$0xff] }
 0x766   :  { %5091 = vmatmul.mubr.f32.vlgmr.msra.gmra.mrb[64].mxu1 %v3673_v50  ;;  %v3683_v50 = vld [vmem:[#allocation3 + $0xa8] sm:$0xff] }
 0x767   :  { %5095 = vmatprep.mubr.f32.mxu1 %v9845_v61  ;;  %6816 = vmatpush3.bf16.msra.mxu1 %v10504_v15  ;;  %v3676_v61 = vld [vmem:[#allocation3 + $0x50] sm:$0xff]  ;;  %v10517_v15 = vld [vmem:[#allocation23_spill] sm:$0xff] }
 0x768   :  { %6809 = vmatprep.subr.bf16.mxu1 %v10514_v60 }
 0x76a   :  { %5096 = vmatmul.mubr.f32.gmra.mrb[66].mxu1 %v3674_v33  ;;  %v10518_v33 = vld [vmem:[#allocation24_spill] sm:$0xff] }
 0x76b   :  { %5100 = vmatprep.mubr.f32.mxu1 %v9850_v57  ;;  %6817 = vmatpush3.bf16.msra.mxu1 %v10514_v60  ;;  %v3677_v57 = vld [vmem:[#allocation3 + $0x60] sm:$0xff] }
 0x76c   :  { %6810 = vmatprep.subr.bf16.mxu1 %v10515_v22  ;;  %v10520_v60 = vld [vmem:[#allocation14_spill] sm:$0xff] }
 0x76e   :  { %5101 = vmatmul.mubr.f32.gmra.mrb[68].mxu1 %v3675_v29  ;;  %v3681_v29 = vld [vmem:[#allocation3 + $0x90] sm:$0xff] }
 0x76f   :  { %5105 = vmatprep.mubr.f32.mxu1 %v9855_v19  ;;  %6818 = vmatpush3.bf16.msra.mxu1 %v10515_v22  ;;  %v3678_v19 = vld [vmem:[#allocation3 + $0x68] sm:$0xff]  ;;  %v10519_v22 = vld [vmem:[#allocation25_spill] sm:$0xff] }
 0x770   :  { %6811 = vmatprep.subr.bf16.mxu1 %v10516_v7 }
 0x772   :  { %5106 = vmatmul.mubr.f32.gmra.mrb[70].mxu1 %v3676_v61  ;;  %v3702_v61 = vld [vmem:[#allocation3 + $0x188] sm:$0xff] }
 0x773   :  { %5110 = vmatprep.mubr.f32.mxu1 %v9860_v42  ;;  %6819 = vmatpush3.bf16.msra.mxu1 %v10516_v7  ;;  %v3679_v42 = vld [vmem:[#allocation3 + $0x78] sm:$0xff]  ;;  %v3685_v7 = vld [vmem:[#allocation3 + $0xc0] sm:$0xff] }
 0x774   :  { %6812 = vmatprep.subr.bf16.mxu1 %v10517_v15 }
 0x776   :  { %5111 = vmatmul.mubr.f32.gmra.mrb[72].mxu1 %v3677_v57  ;;  %v3708_v57 = vld [vmem:[#allocation3 + $0x200] sm:$0xff] }
 0x777   :  { %5115 = vmatprep.mubr.f32.mxu1 %v9865_v18  ;;  %6820 = vmatpush3.bf16.msra.mxu1 %v10517_v15  ;;  %v3680_v18 = vld [vmem:[#allocation3 + $0x80] sm:$0xff] }
 0x778   :  { %6813 = vmatprep.subr.bf16.mxu1 %v10518_v33  ;;  %v3768_v15 = vld [vmem:[#allocation3 + $0x1a1] sm:$0xff] }
 0x77a   :  { %5116 = vmatmul.mubr.f32.gmra.mrb[74].mxu1 %v3678_v19  ;;  %v3726_v19 = vld [vmem:[#allocation3 + $0x2d8] sm:$0xff] }
 0x77b   :  { %5120 = vmatprep.mubr.f32.mxu1 %v9870_v41  ;;  %6821 = vmatpush3.bf16.msra.mxu1 %v10518_v33  ;;  %v3682_v41 = vld [vmem:[#allocation3 + $0x98] sm:$0xff]  ;;  %v3709_v33 = vld [vmem:[#allocation3 + $0x210] sm:$0xff] }
 0x77c   :  { %6814 = vmatprep.subr.bf16.mxu1 %v10519_v22 }
 0x77e   :  { %5121 = vmatmul.mubr.f32.gmra.mrb[76].mxu1 %v3679_v42 }
 0x77f   :  { %5125 = vmatprep.mubr.f32.mxu1 %v9875_v54  ;;  %6822 = vmatpush3.bf16.msra.mxu1 %v10519_v22  ;;  %v3684_v54 = vld [vmem:[#allocation3 + $0xb0] sm:$0xff] }
 0x780   :  { %6815 = vmatprep.subr.bf16.mxu1 %v10520_v60 }
 0x782   :  { %5126 = vmatmul.mubr.f32.gmra.mrb[78].mxu1 %v3680_v18 }
 0x783   :  { %5130 = vmatprep.mubr.f32.mxu1 %v9880_v39  ;;  %6823 = vmatpush3.bf16.msra.mxu1 %v10520_v60  ;;  %v3686_v39 = vld [vmem:[#allocation3 + $0xc8] sm:$0xff] }
 0x784   :  { %v3727_v60 = vld [vmem:[#allocation3 + $0x2e8] sm:$0xff] }
 0x786   :  { %5131 = vmatmul.mubr.f32.gmra.mrb[80].mxu1 %v3681_v29 }
 0x787   :  { %5135 = vmatprep.mubr.f32.mxu1 %v9885_v6  ;;  %v3687_v6 = vld [vmem:[#allocation3 + $0xd8] sm:$0xff] }
 0x78a   :  { %5136 = vmatmul.mubr.f32.gmra.mrb[82].mxu1 %v3682_v41  ;;  %v10522_v41 = vld [vmem:[#allocation15_spill] sm:$0xff] }
 0x78b   :  { %5140 = vmatprep.mubr.f32.mxu1 %v9889_v62  ;;  %v3688_v62 = vld [vmem:[#allocation3 + $0xe0] sm:$0xff] }
 0x78e   :  { %5141 = vmatmul.mubr.f32.gmra.mrb[84].mxu1 %v3683_v50 }
 0x78f   :  { %5145 = vmatprep.mubr.f32.mxu1 %v9893_v48  ;;  %v3689_v48 = vld [vmem:[#allocation3 + $0xf0] sm:$0xff] }
 0x792   :  { %5146 = vmatmul.mubr.f32.gmra.mrb[86].mxu1 %v3684_v54 }
 0x793   :  { %5150 = vmatprep.mubr.f32.mxu1 %v9898_v38  ;;  %v3690_v38 = vld [vmem:[#allocation3 + $0xf8] sm:$0xff] }
 0x796   :  { %5151 = vmatmul.mubr.f32.gmra.mrb[88].mxu1 %v3685_v7  ;;  %v3728_v7 = vld [vmem:[#allocation3 + $0x2f0] sm:$0xff] }
 0x797   :  { %5155 = vmatprep.mubr.f32.mxu1 %v9902_v52  ;;  %v3691_v52 = vld [vmem:[#allocation3 + $0x108] sm:$0xff] }
 0x79a   :  { %5156 = vmatmul.mubr.f32.gmra.mrb[90].mxu1 %v3686_v39 }
 0x79b   :  { %5160 = vmatprep.mubr.f32.mxu1 %v9906_v27  ;;  %v3692_v27 = vld [vmem:[#allocation3 + $0x110] sm:$0xff] }
 0x79e   :  { %5161 = vmatmul.mubr.f32.gmra.mrb[92].mxu1 %v3687_v6 }
 0x79f   :  { %5165 = vmatprep.mubr.f32.mxu1 %v9910_v25  ;;  %v3693_v25 = vld [vmem:[#allocation3 + $0x120] sm:$0xff] }
 0x7a2   :  { %5166 = vmatmul.mubr.f32.gmra.mrb[94].mxu1 %v3688_v62  ;;  %v10523_v62 = vld [vmem:[#allocation16_spill] sm:$0xff] }
 0x7a3   :  { %5170 = vmatprep.mubr.f32.mxu1 %v9915_v20  ;;  %v3694_v20 = vld [vmem:[#allocation3 + $0x128] sm:$0xff] }
 0x7a6   :  { %5171 = vmatmul.mubr.f32.gmra.mrb[96].mxu1 %v3689_v48 }
 0x7a7   :  { %5175 = vmatprep.mubr.f32.mxu1 %v9919_v31  ;;  %v3695_v31 = vld [vmem:[#allocation3 + $0x138] sm:$0xff] }
 0x7aa   :  { %5176 = vmatmul.mubr.f32.gmra.mrb[98].mxu1 %v3690_v38 }
 0x7ab   :  { %5180 = vmatprep.mubr.f32.mxu1 %v9923_v9  ;;  %v3696_v9 = vld [vmem:[#allocation3 + $0x140] sm:$0xff] }
 0x7ae   :  { %5181 = vmatmul.mubr.f32.gmra.mrb[100].mxu1 %v3691_v52  ;;  %v3729_v52 = vld [vmem:[#allocation3 + $0x300] sm:$0xff] }
 0x7af   :  { %5185 = vmatprep.mubr.f32.mxu1 %v9927_v12  ;;  %v3697_v12 = vld [vmem:[#allocation3 + $0x150] sm:$0xff] }
 0x7b2   :  { %5186 = vmatmul.mubr.f32.gmra.mrb[102].mxu1 %v3692_v27 }
 0x7b3   :  { %5190 = vmatprep.mubr.f32.mxu1 %v9932_v56  ;;  %v3698_v56 = vld [vmem:[#allocation3 + $0x158] sm:$0xff] }
 0x7b6   :  { %5191 = vmatmul.mubr.f32.gmra.mrb[104].mxu1 %v3693_v25 }
 0x7b7   :  { %5195 = vmatprep.mubr.f32.mxu1 %v9936_v3  ;;  %v3699_v3 = vld [vmem:[#allocation3 + $0x168] sm:$0xff] }
 0x7ba   :  { %5196 = vmatmul.mubr.f32.gmra.mrb[106].mxu1 %v3694_v20  ;;  %v10524_v20 = vld [vmem:[#allocation21_spill] sm:$0xff] }
 0x7bb   :  { %5200 = vmatprep.mubr.f32.mxu1 %v9940_v1  ;;  %v3700_v1 = vld [vmem:[#allocation3 + $0x170] sm:$0xff] }
 0x7be   :  { %5201 = vmatmul.mubr.f32.gmra.mrb[108].mxu1 %v3695_v31 }
 0x7bf   :  { %5205 = vmatprep.mubr.f32.mxu1 %v9944_v17  ;;  %v3701_v17 = vld [vmem:[#allocation3 + $0x180] sm:$0xff] }
 0x7c2   :  { %5206 = vmatmul.mubr.f32.gmra.mrb[110].mxu1 %v3696_v9 }
 0x7c3   :  { %5210 = vmatprep.mubr.f32.mxu1 %v9949_v58  ;;  %v3767_v58 = vld [vmem:[#allocation3 + $0x199] sm:$0xff] }
 0x7c6   :  { %5211 = vmatmul.mubr.f32.gmra.mrb[112].mxu1 %v3697_v12  ;;  %v3730_v12 = vld [vmem:[#allocation3 + $0x308] sm:$0xff] }
 0x7c7   :  { %5215 = vmatprep.mubr.f32.mxu1 %v9953_v30  ;;  %v3703_v30 = vld [vmem:[#allocation3 + $0x198] sm:$0xff] }
 0x7ca   :  { %5216 = vmatmul.mubr.f32.gmra.mrb[114].mxu1 %v3698_v56 }
 0x7cb   :  { %5220 = vmatprep.mubr.f32.mxu1 %v9957_v28  ;;  %v10129_v28 = vld [vmem:[#allocation2 + $0x8] sm:$0xff] }
 0x7ce   :  { %5221 = vmatmul.mubr.f32.gmra.mrb[116].mxu1 %v3699_v3 }
 0x7cf   :  { %5225 = vmatprep.mubr.f32.mxu1 %v9961_v53  ;;  %v3705_v53 = vld [vmem:[#allocation3 + $0x1e0] sm:$0xff] }
 0x7d2   :  { %5226 = vmatmul.mubr.f32.gmra.mrb[118].mxu1 %v3700_v1  ;;  %v10525_v1 = vld [vmem:[#allocation27_spill] sm:$0xff] }
 0x7d3   :  { %5230 = vmatprep.mubr.f32.mxu1 %v9965_v5  ;;  %v3706_v5 = vld [vmem:[#allocation3 + $0x1e8] sm:$0xff] }
 0x7d6   :  { %5231 = vmatmul.mubr.f32.gmra.mrb[120].mxu1 %v3701_v17 }
 0x7d7   :  { %5235 = vmatprep.mubr.f32.mxu1 %v9968_v46  ;;  %v3707_v46 = vld [vmem:[#allocation3 + $0x1f8] sm:$0xff] }
 0x7da   :  { %5236 = vmatmul.mubr.f32.gmra.mrb[122].mxu1 %v3702_v61  ;;  %v3731_v61 = vld [vmem:[#allocation3 + $0x318] sm:$0xff] }
 0x7db   :  { %5240 = vmatprep.mubr.f32.mxu1 %v3767_v58 }
 0x7de   :  { %5241 = vmatmul.mubr.f32.gmra.mrb[124].mxu1 %v3703_v30 }
 0x7df   :  { %5245 = vmatprep.mubr.f32.mxu1 %v3768_v15 }
 0x7e2   :  { %5246 = vmatmul.mubr.f32.gmra.mrb[126].mxu1 %v10129_v28 }
 0x7e3   :  { %5250 = vmatprep.mubr.f32.mxu1 %v9974_v34  ;;  %v3710_v34 = vld [vmem:[#allocation3 + $0x218] sm:$0xff] }
 0x7e6   :  { %5251 = vmatmul.mubr.f32.gmra.mrb[128].mxu1 %v3705_v53  ;;  %v10526_v53 = vld [vmem:[#allocation52_spill] sm:$0xff] }
 0x7e7   :  { %5255 = vmatprep.mubr.f32.mxu1 %v9978_v45  ;;  %v3711_v45 = vld [vmem:[#allocation3 + $0x228] sm:$0xff] }
 0x7ea   :  { %5256 = vmatmul.mubr.f32.gmra.mrb[130].mxu1 %v3706_v5  ;;  %v10527_v5 = vld [vmem:[#allocation26_spill] sm:$0xff] }
 0x7eb   :  { %5260 = vmatprep.mubr.f32.mxu1 %v9982_v11  ;;  %v3712_v11 = vld [vmem:[#allocation3 + $0x230] sm:$0xff] }
 0x7ee   :  { %5261 = vmatmul.mubr.f32.gmra.mrb[132].mxu1 %v3707_v46 }
 0x7ef   :  { %5265 = vmatprep.mubr.f32.mxu1 %v9986_v24  ;;  %v3713_v24 = vld [vmem:[#allocation3 + $0x240] sm:$0xff] }
 0x7f2   :  { %5266 = vmatmul.mubr.f32.gmra.mrb[134].mxu1 %v3708_v57 }
 0x7f3   :  { %5270 = vmatprep.mubr.f32.mxu1 %v9990_v10  ;;  %v3714_v10 = vld [vmem:[#allocation3 + $0x248] sm:$0xff] }
 0x7f6   :  { %5271 = vmatmul.mubr.f32.gmra.mrb[136].mxu1 %v3709_v33  ;;  %v3732_v33 = vld [vmem:[#allocation3 + $0x320] sm:$0xff] }
 0x7f7   :  { %5275 = vmatprep.mubr.f32.mxu1 %v9994_v36  ;;  %v3715_v36 = vld [vmem:[#allocation3 + $0x258] sm:$0xff] }
 0x7fa   :  { %5276 = vmatmul.mubr.f32.gmra.mrb[138].mxu1 %v3710_v34 }
 0x7fb   :  { %5280 = vmatprep.mubr.f32.mxu1 %v9998_v2  ;;  %v3716_v2 = vld [vmem:[#allocation3 + $0x260] sm:$0xff] }
 0x7fe   :  { %5281 = vmatmul.mubr.f32.gmra.mrb[140].mxu1 %v3711_v45 }
 0x7ff   :  { %5285 = vmatprep.mubr.f32.mxu1 %v10002_v35  ;;  %v3717_v35 = vld [vmem:[#allocation3 + $0x270] sm:$0xff] }
 0x802   :  { %5286 = vmatmul.mubr.f32.gmra.mrb[142].mxu1 %v3712_v11  ;;  %v10528_v11 = vld [vmem:[#allocation56_spill] sm:$0xff] }
 0x803   :  { %5290 = vmatprep.mubr.f32.mxu1 %v10006_v32  ;;  %v3718_v32 = vld [vmem:[#allocation3 + $0x278] sm:$0xff] }
 0x806   :  { %5291 = vmatmul.mubr.f32.gmra.mrb[144].mxu1 %v3713_v24  ;;  %v10529_v24 = vld [vmem:[#allocation29_spill] sm:$0xff] }
 0x807   :  { %5295 = vmatprep.mubr.f32.mxu1 %v10010_v23  ;;  %v3719_v23 = vld [vmem:[#allocation3 + $0x288] sm:$0xff] }
 0x80a   :  { %5296 = vmatmul.mubr.f32.gmra.mrb[146].mxu1 %v3714_v10 }
 0x80b   :  { %5300 = vmatprep.mubr.f32.mxu1 %v10014_v55  ;;  %v3720_v55 = vld [vmem:[#allocation3 + $0x290] sm:$0xff] }
 0x80e   :  { %5301 = vmatmul.mubr.f32.gmra.mrb[148].mxu1 %v3715_v36 }
 0x80f   :  { %5305 = vmatprep.mubr.f32.mxu1 %v10017_v43  ;;  %v3721_v43 = vld [vmem:[#allocation3 + $0x2a0] sm:$0xff] }
 0x812   :  { %5306 = vmatmul.mubr.f32.gmra.mrb[150].mxu1 %v3716_v2  ;;  %v3733_v2 = vld [vmem:[#allocation3 + $0x330] sm:$0xff] }
 0x813   :  { %5310 = vmatprep.mubr.f32.mxu1 %v10020_v21  ;;  %v3722_v21 = vld [vmem:[#allocation3 + $0x2a8] sm:$0xff] }
 0x816   :  { %5311 = vmatmul.mubr.f32.gmra.mrb[152].mxu1 %v3717_v35 }
 0x817   :  { %5315 = vmatprep.mubr.f32.mxu1 %v10023_v13  ;;  %v3723_v13 = vld [vmem:[#allocation3 + $0x2b8] sm:$0xff] }
 0x81a   :  { %5316 = vmatmul.mubr.f32.gmra.mrb[154].mxu1 %v3718_v32 }
 0x81b   :  { %5320 = vmatprep.mubr.f32.mxu1 %v10026_v44  ;;  %v3724_v44 = vld [vmem:[#allocation3 + $0x2c0] sm:$0xff] }
 0x81e   :  { %5321 = vmatmul.mubr.f32.gmra.mrb[156].mxu1 %v3719_v23 }
 0x81f   :  { %5325 = vmatprep.mubr.f32.mxu1 %v10029_v8  ;;  %v3725_v8 = vld [vmem:[#allocation3 + $0x2d0] sm:$0xff] }
 0x822   :  { %5326 = vmatmul.mubr.f32.gmra.mrb[158].mxu1 %v3720_v55  ;;  %v10530_v55 = vld [vmem:[#allocation28_spill] sm:$0xff] }
 0x823   :  { %5330 = vmatprep.mubr.f32.mxu1 %v10032_v16  ;;  %v10157_v16 = vld [vmem:[%s10309_s4] ss:$0 sm:$0xff]  ;;  %s7834_s4 = smov [#allocation10]  }
 0x824   :  { %s5929_s10 = sshll.u32 %s7834_s4, 4  ;;  %s5930_s10 = int_to_ptr.vmem [resolvable:$true] %s5929_s10 }
 0x825   :  { %s7799_s11 = scalar_lea.vmem %s5930_s10, 8192  ;;  %p7804_p11 = scmp.lt.s32.totalorder %s5930_s10, %s5930_s10 }
 0x826   :  { %5331 = vmatmul.mubr.f32.gmra.mrb[160].mxu1 %v3721_v43  ;;  %p7800_p10 = scmp.ne.s32.totalorder %s5930_s10, %s7799_s11  ;;  %p7805_p12 = scmp.lt.s32.totalorder %s7799_s11, %s7799_s11 }
 0x827   :  { %5335 = vmatprep.mubr.f32.mxu1 %v10035_v49 }
 0x828   :  { %p7806_p13 = por %p7805_p12, %p7804_p11 }
 0x82a   :  { %5336 = vmatmul.mubr.f32.gmra.mrb[162].mxu1 %v3722_v21  ;;  %v3799_v21 = vld [vmem:[#allocation3 + $0x349] sm:$0xff]  ;;  %p7807_p0 = pnand %p7806_p13, %p7800_p10 }
 0x82b   :  { %5340 = vmatprep.mubr.f32.mxu1 %v10038_v37 }
 0x82e   :  { %5341 = vmatmul.mubr.f32.gmra.mrb[164].mxu1 %v3723_v13 }
 0x82f   :  { %5345 = vmatprep.mubr.f32.mxu1 %v10041_v63  ;;  %v10521_v63 = vld [vmem:[#allocation19_spill] sm:$0xff] }
 0x832   :  { %5346 = vmatmul.mubr.f32.gmra.mrb[166].mxu1 %v3724_v44  ;;  %v3734_v44 = vld [vmem:[#allocation3 + $0x338] sm:$0xff] }
 0x833   :  { %5350 = vmatprep.mubr.f32.mxu1 %v10044_v59 }
 0x836   :  { %5351 = vmatmul.mubr.f32.gmra.mrb[168].mxu1 %v3725_v8 }
 0x837   :  { %5355 = vmatprep.mubr.f32.mxu1 %v10047_v51 }
 0x839   :  { %v5092_v49 = vpop.f32.mrb[64].mxu1 }
 0x83a   :  { %v6888_v37 = vadd.f32 %v10157_v16, %v5092_v49  ;;  %v5094_v22 = vpop.f32.mrb[65].mxu1  ;;  %5356 = vmatmul.mubr.f32.gmra.mrb[170].mxu1 %v3726_v19 }
 0x83b   :  { %5360 = vmatprep.mubr.f32.mxu1 %v10050_v26  ;;  %v10531_v22 = vld [vmem:[#allocation31_spill] sm:$0xff] }
 0x83c   :  { %v5478_v42 = vadd.f32 %v6888_v37, %v10521_v63  ;;  %v3735_v37 = vld [vmem:[#allocation3 + $0x348] sm:$0xff] }
 0x83d   :  { %v5097_v59 = vpop.f32.mrb[66].mxu1 }
 0x83e   :  { %v5796_v18 = vmax.f32 %v5478_v42, 0.0  ;;  %v6889_v51 = vadd.f32 %v10157_v16, %v5097_v59  ;;  %v5099_v29 = vpop.f32.mrb[67].mxu1  ;;  %5361 = vmatmul.mubr.f32.gmra.mrb[172].mxu1 %v3727_v60  ;;  %v3800_v42 = vld [vmem:[#allocation3 + $0x351] sm:$0xff] }
 0x83f   :  { %5365 = vmatprep.mubr.f32.mxu1 %v10053_v40 }
 0x840   :  { %5860 = vst [vmem:[#allocation10] sm:$0xff] %v5796_v18  ;;  %v5483_v50 = vadd.f32 %v6889_v51, %v10522_v41  ;;  %v10532_v51 = vld [vmem:[#allocation30_spill] sm:$0xff] }
 0x841   :  { %v5102_v54 = vpop.f32.mrb[68].mxu1 }
 0x842   :  { %v5797_v39 = vmax.f32 %v5483_v50, 0.0  ;;  %v6890_v6 = vadd.f32 %v10157_v16, %v5102_v54  ;;  %v5104_v26 = vpop.f32.mrb[69].mxu1  ;;  %5366 = vmatmul.mubr.f32.gmra.mrb[174].mxu1 %v3728_v7 }
 0x843   :  { %5370 = vmatprep.mubr.f32.mxu1 %v10057_v4 }
 0x844   :  { %5861 = vst [vmem:[#allocation10 + $0x8] sm:$0xff] %v5797_v39  ;;  %v5488_v48 = vadd.f32 %v6890_v6, %v10523_v62  ;;  %v3857_v39 = vld [vmem:[#allocation3 + $0x302] sm:$0xff]  ;;  %v10533_v6 = vld [vmem:[#allocation33_spill] sm:$0xff] }
 0x845   :  { %v5107_v38 = vpop.f32.mrb[70].mxu1 }
 0x846   :  { %v5798_v27 = vmax.f32 %v5488_v48, 0.0  ;;  %v6891_v40 = vadd.f32 %v10157_v16, %v5107_v38  ;;  %v5109_v25 = vpop.f32.mrb[71].mxu1  ;;  %5371 = vmatmul.mubr.f32.gmra.mrb[176].mxu1 %v3729_v52  ;;  %v3858_v48 = vld [vmem:[#allocation3 + $0x30a] sm:$0xff] }
 0x847   :  { %5375 = vmatprep.mubr.f32.mxu1 %v10061_v0  ;;  %v10534_v25 = vld [vmem:[#allocation32_spill] sm:$0xff] }
 0x848   :  { %5862 = vst [vmem:[#allocation10 + $0x10] sm:$0xff] %v5798_v27  ;;  %v5493_v31 = vadd.f32 %v6891_v40, %v10524_v20  ;;  %v3859_v40 = vld [vmem:[#allocation3 + $0x31a] sm:$0xff] }
 0x849   :  { %v5112_v9 = vpop.f32.mrb[72].mxu1 }
 0x84a   :  { %v5799_v56 = vmax.f32 %v5493_v31, 0.0  ;;  %v6892_v4 = vadd.f32 %v10157_v16, %v5112_v9  ;;  %v5114_v3 = vpop.f32.mrb[73].mxu1  ;;  %5376 = vmatmul.mubr.f32.gmra.mrb[178].mxu1 %v3730_v12  ;;  %v3860_v9 = vld [vmem:[#allocation3 + $0x322] sm:$0xff] }
 0x84b   :  { %5380 = vmatprep.mubr.f32.mxu1 %v10065_v47  ;;  %v10536_v3 = vld [vmem:[#allocation35_spill] sm:$0xff] }
 0x84c   :  { %5863 = vst [vmem:[#allocation10 + $0x18] sm:$0xff] %v5799_v56  ;;  %v5498_v17 = vadd.f32 %v6892_v4, %v10525_v1  ;;  %v10535_v4 = vld [vmem:[#allocation55_spill] sm:$0xff] }
 0x84d   :  { %v5117_v58 = vpop.f32.mrb[74].mxu1 }
 0x84e   :  { %v5800_v30 = vmax.f32 %v5498_v17, 0.0  ;;  %v6893_v0 = vadd.f32 %v10157_v16, %v5117_v58  ;;  %v5119_v15 = vpop.f32.mrb[75].mxu1  ;;  %5381 = vmatmul.mubr.f32.gmra.mrb[180].mxu1 %v3731_v61  ;;  %v3863_v17 = vld [vmem:[#allocation3 + $0x34a] sm:$0xff] }
 0x84f   :  { %5385 = vmatprep.mubr.f32.mxu1 %v10526_v53  ;;  %v10537_v15 = vld [vmem:[#allocation57_spill] sm:$0xff] }
 0x850   :  { %5864 = vst [vmem:[#allocation10 + $0x20] sm:$0xff] %v5800_v30  ;;  %v5503_v46 = vadd.f32 %v6893_v0, %v10527_v5  ;;  %v3864_v53 = vld [vmem:[#allocation3 + $0x352] sm:$0xff]  ;;  %v10538_v5 = vld [vmem:[#allocation34_spill] sm:$0xff] }
 0x851   :  { %v5122_v57 = vpop.f32.mrb[76].mxu1 }
 0x852   :  { %v5801_v34 = vmax.f32 %v5503_v46, 0.0  ;;  %v6894_v47 = vadd.f32 %v10157_v16, %v5122_v57  ;;  %v5124_v45 = vpop.f32.mrb[77].mxu1  ;;  %5386 = vmatmul.mubr.f32.gmra.mrb[182].mxu1 %v3732_v33 }
 0x853   :  { %5390 = vmatprep.mubr.f32.mxu1 %v10528_v11  ;;  %v10539_v45 = vld [vmem:[#allocation37_spill] sm:$0xff] }
 0x854   :  { %5865 = vst [vmem:[#allocation10 + $0x28] sm:$0xff] %v5801_v34  ;;  %v5508_v10 = vadd.f32 %v6894_v47, %v10529_v24 }
 0x855   :  { %v5127_v36 = vpop.f32.mrb[78].mxu1 }
 0x856   :  { %v5802_v35 = vmax.f32 %v5508_v10, 0.0  ;;  %v6895_v32 = vadd.f32 %v10157_v16, %v5127_v36  ;;  %v5129_v23 = vpop.f32.mrb[79].mxu1  ;;  %5391 = vmatmul.mubr.f32.gmra.mrb[184].mxu1 %v3733_v2 }
 0x857   :  { %5395 = vmatprep.mubr.f32.mxu1 %v10081_v14 }
 0x858   :  { %5866 = vst [vmem:[#allocation10 + $0x30] sm:$0xff] %v5802_v35  ;;  %v5513_v43 = vadd.f32 %v6895_v32, %v10530_v55  ;;  %v10540_v35 = vld [vmem:[#allocation36_spill] sm:$0xff] }
 0x859   :  { %v5132_v13 = vpop.f32.mrb[80].mxu1 }
 0x85a   :  { %v5803_v8 = vmax.f32 %v5513_v43, 0.0  ;;  %v6896_v49 = vadd.f32 %v10157_v16, %v5132_v13  ;;  %v5134_v19 = vpop.f32.mrb[81].mxu1  ;;  %5396 = vmatmul.mubr.f32.gmra.mrb[186].mxu1 %v3734_v44  ;;  %v10541_v13 = vld [vmem:[#allocation39_spill] sm:$0xff] }
 0x85b   :  { %5400 = vmatprep.mubr.f32.mxu1 %v3799_v21 }
 0x85c   :  { %5867 = vst [vmem:[#allocation10 + $0x38] sm:$0xff] %v5803_v8  ;;  %v5518_v63 = vadd.f32 %v6896_v49, %v10531_v22  ;;  %v10542_v22 = vld [vmem:[#allocation38_spill] sm:$0xff] }
 0x85d   :  { %v5137_v59 = vpop.f32.mrb[82].mxu1 }
 0x85e   :  { %v5804_v60 = vmax.f32 %v5518_v63, 0.0  ;;  %v6897_v14 = vadd.f32 %v10157_v16, %v5137_v59  ;;  %v5139_v18 = vpop.f32.mrb[83].mxu1  ;;  %5401 = vmatmul.mubr.f32.gmra.mrb[188].mxu1 %v3735_v37 }
 0x85f   :  { %5405 = vmatprep.mubr.f32.mxu1 %v3800_v42  ;;  %v10543_v18 = vld [vmem:[#allocation41_spill] sm:$0xff] }
 0x860   :  { %5868 = vst [vmem:[#allocation10 + $0x40] sm:$0xff] %v5804_v60  ;;  %v5523_v29 = vadd.f32 %v6897_v14, %v10532_v51 }
 0x861   :  { %v5142_v41 = vpop.f32.mrb[84].mxu1 }
 0x862   :  { %v5805_v50 = vmax.f32 %v5523_v29, 0.0  ;;  %v6898_v54 = vadd.f32 %v10157_v16, %v5142_v41  ;;  %v5144_v7 = vpop.f32.mrb[85].mxu1  ;;  %5406 = vmatmul.mubr.f32.gmra.mrb[190].mxu1 %v10129_v28 }
 0x863   :  { %6348 = vmatprep.mubr.f32.mxu1 %v3857_v39  ;;  %v10544_v7 = vld [vmem:[#allocation40_spill] sm:$0xff] }
 0x864   :  { %5869 = vst [vmem:[#allocation10 + $0x48] sm:$0xff] %v5805_v50  ;;  %v5528_v26 = vadd.f32 %v6898_v54, %v10533_v6 }
 0x865   :  { %v5147_v62 = vpop.f32.mrb[86].mxu1 }
 0x866   :  { %v5806_v38 = vmax.f32 %v5528_v26, 0.0  ;;  %v6899_v52 = vadd.f32 %v10157_v16, %v5147_v62  ;;  %v5149_v27 = vpop.f32.mrb[87].mxu1  ;;  %6349 = vmatmul.mubr.f32.vlgmr.msra.gmra.mrb[192].mxu1 %v3858_v48 }
 0x867   :  { %6351 = vmatprep.mubr.f32.mxu1 %v3859_v40 }
 0x868   :  { %5870 = vst [vmem:[#allocation10 + $0x50] sm:$0xff] %v5806_v38  ;;  %v5533_v20 = vadd.f32 %v6899_v52, %v10534_v25  ;;  %v10545_v38 = vld [vmem:[#allocation43_spill] sm:$0xff] }
 0x869   :  { %v5152_v31 = vpop.f32.mrb[88].mxu1 }
 0x86a   :  { %v5807_v28 = vmax.f32 %v5533_v20, 0.0  ;;  %v6900_v12 = vadd.f32 %v10157_v16, %v5152_v31  ;;  %v5154_v56 = vpop.f32.mrb[89].mxu1  ;;  %6352 = vmatmul.mubr.f32.gmra.mrb[194].mxu1 %v3860_v9  ;;  %v10546_v31 = vld [vmem:[#allocation42_spill] sm:$0xff] }
 0x86b   :  { %6354 = vmatprep.mubr.f32.mxu1 %v10535_v4 }
 0x86c   :  { %5871 = vst [vmem:[#allocation10 + $0x58] sm:$0xff] %v5807_v28  ;;  %v5538_v1 = vadd.f32 %v6900_v12, %v10536_v3  ;;  %v10547_v3 = vld [vmem:[#allocation45_spill] sm:$0xff] }
 0x86d   :  { %v5157_v58 = vpop.f32.mrb[90].mxu1 }
 0x86e   :  { %v5808_v61 = vmax.f32 %v5538_v1, 0.0  ;;  %v6901_v30 = vadd.f32 %v10157_v16, %v5157_v58  ;;  %v5159_v0 = vpop.f32.mrb[91].mxu1  ;;  %6355 = vmatmul.mubr.f32.gmra.mrb[196].mxu1 %v10537_v15 }
 0x86f   :  { %6357 = vmatprep.mubr.f32.mxu1 %v3863_v17  ;;  %v10548_v0 = vld [vmem:[#allocation44_spill] sm:$0xff] }
 0x870   :  { %5872 = vst [vmem:[#allocation10 + $0x60] sm:$0xff] %v5808_v61  ;;  %v5543_v46 = vadd.f32 %v6901_v30, %v10538_v5 }
 0x871   :  { %v5162_v57 = vpop.f32.mrb[92].mxu1 }
 0x872   :  { %v5809_v33 = vmax.f32 %v5543_v46, 0.0  ;;  %v6902_v34 = vadd.f32 %v10157_v16, %v5162_v57  ;;  %v5164_v47 = vpop.f32.mrb[93].mxu1  ;;  %6358 = vmatmul.mubr.f32.gmra.mrb[198].mxu1 %v3864_v53 }
 0x874   :  { %5873 = vst [vmem:[#allocation10 + $0x68] sm:$0xff] %v5809_v33  ;;  %v5548_v11 = vadd.f32 %v6902_v34, %v10539_v45  ;;  %v10549_v33 = vld [vmem:[#allocation47_spill] sm:$0xff] }
 0x875   :  { %v5167_v24 = vpop.f32.mrb[94].mxu1 }
 0x876   :  { %v5810_v10 = vmax.f32 %v5548_v11, 0.0  ;;  %v6903_v36 = vadd.f32 %v10157_v16, %v5167_v24  ;;  %v5169_v2 = vpop.f32.mrb[95].mxu1 }
 0x878   :  { %5874 = vst [vmem:[#allocation10 + $0x70] sm:$0xff] %v5810_v10  ;;  %v5553_v32 = vadd.f32 %v6903_v36, %v10540_v35  ;;  %v10550_v10 = vld [vmem:[#allocation46_spill] sm:$0xff] }
 0x879   :  { %v5172_v23 = vpop.f32.mrb[96].mxu1 }
 0x87a   :  { %v5811_v55 = vmax.f32 %v5553_v32, 0.0  ;;  %v6904_v43 = vadd.f32 %v10157_v16, %v5172_v23  ;;  %v5174_v21 = vpop.f32.mrb[97].mxu1 }
 0x87c   :  { %5875 = vst [vmem:[#allocation10 + $0x78] sm:$0xff] %v5811_v55  ;;  %v5558_v44 = vadd.f32 %v6904_v43, %v10541_v13  ;;  %v10551_v55 = vld [vmem:[#allocation49_spill] sm:$0xff] }
 0x87d   :  { %v5177_v8 = vpop.f32.mrb[98].mxu1 }
 0x87e   :  { %v5812_v49 = vmax.f32 %v5558_v44, 0.0  ;;  %v6905_v19 = vadd.f32 %v10157_v16, %v5177_v8  ;;  %v5179_v37 = vpop.f32.mrb[99].mxu1 }
 0x880   :  { %5876 = vst [vmem:[#allocation10 + $0x80] sm:$0xff] %v5812_v49  ;;  %v5563_v63 = vadd.f32 %v6905_v19, %v10542_v22  ;;  %v10552_v49 = vld [vmem:[#allocation48_spill] sm:$0xff] }
 0x881   :  { %v5182_v42 = vpop.f32.mrb[100].mxu1 }
 0x882   :  { %v5813_v59 = vmax.f32 %v5563_v63, 0.0  ;;  %v6906_v60 = vadd.f32 %v10157_v16, %v5182_v42  ;;  %v5184_v14 = vpop.f32.mrb[101].mxu1 }
 0x884   :  { %5877 = vst [vmem:[#allocation10 + $0x88] sm:$0xff] %v5813_v59  ;;  %v5568_v51 = vadd.f32 %v6906_v60, %v10543_v18  ;;  %v10553_v59 = vld [vmem:[#allocation51_spill] sm:$0xff] }
 0x885   :  { %v5187_v29 = vpop.f32.mrb[102].mxu1 }
 0x886   :  { %v5814_v41 = vmax.f32 %v5568_v51, 0.0  ;;  %v6907_v50 = vadd.f32 %v10157_v16, %v5187_v29  ;;  %v5189_v54 = vpop.f32.mrb[103].mxu1 }
 0x888   :  { %5878 = vst [vmem:[#allocation10 + $0x90] sm:$0xff] %v5814_v41  ;;  %v5573_v39 = vadd.f32 %v6907_v50, %v10544_v7  ;;  %v10554_v41 = vld [vmem:[#allocation50_spill] sm:$0xff] }
 0x889   :  { %v5192_v6 = vpop.f32.mrb[104].mxu1 }
 0x88a   :  { %v5815_v26 = vmax.f32 %v5573_v39, 0.0  ;;  %v6908_v62 = vadd.f32 %v10157_v16, %v5192_v6  ;;  %v5194_v48 = vpop.f32.mrb[105].mxu1 }
 0x88c   :  { %5879 = vst [vmem:[#allocation10 + $0x98] sm:$0xff] %v5815_v26  ;;  %v5578_v52 = vadd.f32 %v6908_v62, %v10545_v38  ;;  %v10555_v26 = vld [vmem:[#allocation54_spill] sm:$0xff] }
 0x88d   :  { %v5197_v27 = vpop.f32.mrb[106].mxu1 }
 0x88e   :  { %v5816_v40 = vmax.f32 %v5578_v52, 0.0  ;;  %v6909_v25 = vadd.f32 %v10157_v16, %v5197_v27  ;;  %v5199_v20 = vpop.f32.mrb[107].mxu1 }
 0x890   :  { %5880 = vst [vmem:[#allocation10 + $0xa0] sm:$0xff] %v5816_v40  ;;  %v5583_v9 = vadd.f32 %v6909_v25, %v10546_v31  ;;  %v10556_v40 = vld [vmem:[#allocation53_spill] sm:$0xff] }
 0x891   :  { %v5202_v28 = vpop.f32.mrb[108].mxu1 }
 0x892   :  { %v5817_v12 = vmax.f32 %v5583_v9, 0.0  ;;  %v6910_v56 = vadd.f32 %v10157_v16, %v5202_v28  ;;  %v5204_v4 = vpop.f32.mrb[109].mxu1 }
 0x894   :  { %5881 = vst [vmem:[#allocation10 + $0xa8] sm:$0xff] %v5817_v12  ;;  %v5588_v1 = vadd.f32 %v6910_v56, %v10547_v3  ;;  %v10557_v12 = vld [vmem:[#allocation59_spill] sm:$0xff] }
 0x895   :  { %v5207_v17 = vpop.f32.mrb[110].mxu1 }
 0x896   :  { %v5818_v58 = vmax.f32 %v5588_v1, 0.0  ;;  %v6911_v61 = vadd.f32 %v10157_v16, %v5207_v17  ;;  %v5209_v30 = vpop.f32.mrb[111].mxu1 }
 0x898   :  { %5882 = vst [vmem:[#allocation10 + $0xb0] sm:$0xff] %v5818_v58  ;;  %v5593_v15 = vadd.f32 %v6911_v61, %v10548_v0  ;;  %v10558_v58 = vld [vmem:[#allocation58_spill] sm:$0xff] }
 0x899   :  { %v5212_v53 = vpop.f32.mrb[112].mxu1 }
 0x89a   :  { %v5819_v5 = vmax.f32 %v5593_v15, 0.0  ;;  %v6912_v46 = vadd.f32 %v10157_v16, %v5212_v53  ;;  %v5214_v57 = vpop.f32.mrb[113].mxu1 }
 0x89c   :  { %5883 = vst [vmem:[#allocation10 + $0xb8] sm:$0xff] %v5819_v5  ;;  %v5598_v34 = vadd.f32 %v6912_v46, %v10549_v33  ;;  %v10559_v5 = vld [vmem:[#allocation63_spill] sm:$0xff] }
 0x89d   :  { %v5217_v47 = vpop.f32.mrb[114].mxu1 }
 0x89e   :  { %v5820_v45 = vmax.f32 %v5598_v34, 0.0  ;;  %v6913_v11 = vadd.f32 %v10157_v16, %v5217_v47  ;;  %v5219_v24 = vpop.f32.mrb[115].mxu1 }
 0x8a0   :  { %5884 = vst [vmem:[#allocation10 + $0xc0] sm:$0xff] %v5820_v45  ;;  %v5603_v36 = vadd.f32 %v6913_v11, %v10550_v10  ;;  %v10560_v45 = vld [vmem:[#allocation62_spill] sm:$0xff] }
 0x8a1   :  { %v5222_v2 = vpop.f32.mrb[116].mxu1 }
 0x8a2   :  { %v5821_v35 = vmax.f32 %v5603_v36, 0.0  ;;  %v6914_v32 = vadd.f32 %v10157_v16, %v5222_v2  ;;  %v5224_v23 = vpop.f32.mrb[117].mxu1 }
 0x8a4   :  { %5885 = vst [vmem:[#allocation10 + $0xc8] sm:$0xff] %v5821_v35  ;;  %v5608_v43 = vadd.f32 %v6914_v32, %v10551_v55  ;;  %v10561_v35 = vld [vmem:[#allocation67_spill] sm:$0xff] }
 0x8a5   :  { %v5227_v21 = vpop.f32.mrb[118].mxu1 }
 0x8a6   :  { %v5822_v13 = vmax.f32 %v5608_v43, 0.0  ;;  %v6915_v44 = vadd.f32 %v10157_v16, %v5227_v21  ;;  %v5229_v8 = vpop.f32.mrb[119].mxu1 }
 0x8a8   :  { %5886 = vst [vmem:[#allocation10 + $0xd0] sm:$0xff] %v5822_v13  ;;  %v5613_v19 = vadd.f32 %v6915_v44, %v10552_v49  ;;  %v10562_v13 = vld [vmem:[#allocation66_spill] sm:$0xff] }
 0x8a9   :  { %v5232_v37 = vpop.f32.mrb[120].mxu1 }
 0x8aa   :  { %v5823_v22 = vmax.f32 %v5613_v19, 0.0  ;;  %v6916_v63 = vadd.f32 %v10157_v16, %v5232_v37  ;;  %v5234_v42 = vpop.f32.mrb[121].mxu1 }
 0x8ac   :  { %5887 = vst [vmem:[#allocation10 + $0xd8] sm:$0xff] %v5823_v22  ;;  %v5618_v60 = vadd.f32 %v6916_v63, %v10553_v59  ;;  %v10563_v22 = vld [vmem:[#allocation70_spill] sm:$0xff] }
 0x8ad   :  { %v5237_v14 = vpop.f32.mrb[122].mxu1 }
 0x8ae   :  { %v5824_v18 = vmax.f32 %v5618_v60, 0.0  ;;  %v6917_v51 = vadd.f32 %v10157_v16, %v5237_v14  ;;  %v5239_v29 = vpop.f32.mrb[123].mxu1 }
 0x8b0   :  { %5888 = vst [vmem:[#allocation10 + $0xe0] sm:$0xff] %v5824_v18  ;;  %v5623_v50 = vadd.f32 %v6917_v51, %v10554_v41  ;;  %v10564_v18 = vld [vmem:[#allocation69_spill] sm:$0xff] }
 0x8b1   :  { %v5242_v54 = vpop.f32.mrb[124].mxu1 }
 0x8b2   :  { %v5825_v7 = vmax.f32 %v5623_v50, 0.0  ;;  %v6918_v39 = vadd.f32 %v10157_v16, %v5242_v54  ;;  %v5244_v6 = vpop.f32.mrb[125].mxu1 }
 0x8b4   :  { %5889 = vst [vmem:[#allocation10 + $0xe8] sm:$0xff] %v5825_v7  ;;  %v5628_v62 = vadd.f32 %v6918_v39, %v10555_v26  ;;  %v10565_v7 = vld [vmem:[#allocation72_spill] sm:$0xff] }
 0x8b5   :  { %v5247_v48 = vpop.f32.mrb[126].mxu1 }
 0x8b6   :  { %v5826_v38 = vmax.f32 %v5628_v62, 0.0  ;;  %v6919_v52 = vadd.f32 %v10157_v16, %v5247_v48  ;;  %v5249_v27 = vpop.f32.mrb[127].mxu1 }
 0x8b8   :  { %5890 = vst [vmem:[#allocation10 + $0xf0] sm:$0xff] %v5826_v38  ;;  %v5633_v25 = vadd.f32 %v6919_v52, %v10556_v40  ;;  %v10566_v38 = vld [vmem:[#allocation71_spill] sm:$0xff] }
 0x8b9   :  { %v5252_v20 = vpop.f32.mrb[128].mxu1 }
 0x8ba   :  { %v5827_v31 = vmax.f32 %v5633_v25, 0.0  ;;  %v6920_v9 = vadd.f32 %v10157_v16, %v5252_v20  ;;  %v5254_v28 = vpop.f32.mrb[129].mxu1 }
 0x8bc   :  { %5891 = vst [vmem:[#allocation10 + $0xf8] sm:$0xff] %v5827_v31  ;;  %v5638_v56 = vadd.f32 %v6920_v9, %v10557_v12  ;;  %v10567_v31 = vld [vmem:[#allocation76_spill] sm:$0xff] }
 0x8bd   :  { %v5257_v4 = vpop.f32.mrb[130].mxu1 }
 0x8be   :  { %v5828_v3 = vmax.f32 %v5638_v56, 0.0  ;;  %v6921_v1 = vadd.f32 %v10157_v16, %v5257_v4  ;;  %v5259_v17 = vpop.f32.mrb[131].mxu1 }
 0x8c0   :  { %5892 = vst [vmem:[#allocation10 + $0x100] sm:$0xff] %v5828_v3  ;;  %v5643_v61 = vadd.f32 %v6921_v1, %v10558_v58  ;;  %v10568_v3 = vld [vmem:[#allocation75_spill] sm:$0xff] }
 0x8c1   :  { %v5262_v30 = vpop.f32.mrb[132].mxu1 }
 0x8c2   :  { %v5829_v0 = vmax.f32 %v5643_v61, 0.0  ;;  %v6922_v15 = vadd.f32 %v10157_v16, %v5262_v30  ;;  %v5264_v53 = vpop.f32.mrb[133].mxu1 }
 0x8c4   :  { %5893 = vst [vmem:[#allocation10 + $0x108] sm:$0xff] %v5829_v0  ;;  %v5648_v46 = vadd.f32 %v6922_v15, %v10559_v5  ;;  %v10569_v0 = vld [vmem:[#allocation80_spill] sm:$0xff] }
 0x8c5   :  { %v5267_v57 = vpop.f32.mrb[134].mxu1 }
 0x8c6   :  { %v5830_v33 = vmax.f32 %v5648_v46, 0.0  ;;  %v6923_v34 = vadd.f32 %v10157_v16, %v5267_v57  ;;  %v5269_v47 = vpop.f32.mrb[135].mxu1 }
 0x8c8   :  { %5894 = vst [vmem:[#allocation10 + $0x110] sm:$0xff] %v5830_v33  ;;  %v5653_v11 = vadd.f32 %v6923_v34, %v10560_v45  ;;  %v10570_v33 = vld [vmem:[#allocation79_spill] sm:$0xff] }
 0x8c9   :  { %v5272_v24 = vpop.f32.mrb[136].mxu1 }
 0x8ca   :  { %v5831_v10 = vmax.f32 %v5653_v11, 0.0  ;;  %v6924_v36 = vadd.f32 %v10157_v16, %v5272_v24  ;;  %v5274_v2 = vpop.f32.mrb[137].mxu1 }
 0x8cc   :  { %5895 = vst [vmem:[#allocation10 + $0x118] sm:$0xff] %v5831_v10  ;;  %v5658_v32 = vadd.f32 %v6924_v36, %v10561_v35  ;;  %v10571_v10 = vld [vmem:[#allocation83_spill] sm:$0xff] }
 0x8cd   :  { %v5277_v23 = vpop.f32.mrb[138].mxu1 }
 0x8ce   :  { %v5832_v55 = vmax.f32 %v5658_v32, 0.0  ;;  %v6925_v43 = vadd.f32 %v10157_v16, %v5277_v23  ;;  %v5279_v21 = vpop.f32.mrb[139].mxu1 }
 0x8d0   :  { %5896 = vst [vmem:[#allocation10 + $0x120] sm:$0xff] %v5832_v55  ;;  %v5663_v44 = vadd.f32 %v6925_v43, %v10562_v13  ;;  %v10572_v55 = vld [vmem:[#allocation82_spill] sm:$0xff] }
 0x8d1   :  { %v5282_v8 = vpop.f32.mrb[140].mxu1 }
 0x8d2   :  { %v5833_v49 = vmax.f32 %v5663_v44, 0.0  ;;  %v6926_v19 = vadd.f32 %v10157_v16, %v5282_v8  ;;  %v5284_v37 = vpop.f32.mrb[141].mxu1 }
 0x8d4   :  { %5897 = vst [vmem:[#allocation10 + $0x128] sm:$0xff] %v5833_v49  ;;  %v5668_v63 = vadd.f32 %v6926_v19, %v10563_v22  ;;  %v10573_v49 = vld [vmem:[#allocation85_spill] sm:$0xff] }
 0x8d5   :  { %v5287_v42 = vpop.f32.mrb[142].mxu1 }
 0x8d6   :  { %v5834_v59 = vmax.f32 %v5668_v63, 0.0  ;;  %v6927_v60 = vadd.f32 %v10157_v16, %v5287_v42  ;;  %v5289_v14 = vpop.f32.mrb[143].mxu1 }
 0x8d8   :  { %5898 = vst [vmem:[#allocation10 + $0x130] sm:$0xff] %v5834_v59  ;;  %v5673_v51 = vadd.f32 %v6927_v60, %v10564_v18  ;;  %v10574_v59 = vld [vmem:[#allocation84_spill] sm:$0xff] }
 0x8d9   :  { %v5292_v29 = vpop.f32.mrb[144].mxu1 }
 0x8da   :  { %v5835_v41 = vmax.f32 %v5673_v51, 0.0  ;;  %v6928_v50 = vadd.f32 %v10157_v16, %v5292_v29  ;;  %v5294_v54 = vpop.f32.mrb[145].mxu1 }
 0x8dc   :  { %5899 = vst [vmem:[#allocation10 + $0x138] sm:$0xff] %v5835_v41  ;;  %v5678_v39 = vadd.f32 %v6928_v50, %v10565_v7  ;;  %v10575_v41 = vld [vmem:[#allocation87_spill] sm:$0xff] }
 0x8dd   :  { %v5297_v6 = vpop.f32.mrb[146].mxu1 }
 0x8de   :  { %v5836_v26 = vmax.f32 %v5678_v39, 0.0  ;;  %v6929_v62 = vadd.f32 %v10157_v16, %v5297_v6  ;;  %v5299_v48 = vpop.f32.mrb[147].mxu1 }
 0x8e0   :  { %5900 = vst [vmem:[#allocation10 + $0x140] sm:$0xff] %v5836_v26  ;;  %v5683_v52 = vadd.f32 %v6929_v62, %v10566_v38  ;;  %v10576_v26 = vld [vmem:[#allocation86_spill] sm:$0xff] }
 0x8e1   :  { %v5302_v27 = vpop.f32.mrb[148].mxu1 }
 0x8e2   :  { %v5837_v40 = vmax.f32 %v5683_v52, 0.0  ;;  %v6930_v25 = vadd.f32 %v10157_v16, %v5302_v27  ;;  %v5304_v20 = vpop.f32.mrb[149].mxu1 }
 0x8e4   :  { %5901 = vst [vmem:[#allocation10 + $0x148] sm:$0xff] %v5837_v40  ;;  %v5688_v9 = vadd.f32 %v6930_v25, %v10567_v31  ;;  %v10577_v40 = vld [vmem:[#allocation89_spill] sm:$0xff] }
 0x8e5   :  { %v5307_v28 = vpop.f32.mrb[150].mxu1 }
 0x8e6   :  { %v5838_v12 = vmax.f32 %v5688_v9, 0.0  ;;  %v6931_v56 = vadd.f32 %v10157_v16, %v5307_v28  ;;  %v5309_v4 = vpop.f32.mrb[151].mxu1 }
 0x8e8   :  { %5902 = vst [vmem:[#allocation10 + $0x150] sm:$0xff] %v5838_v12  ;;  %v5693_v1 = vadd.f32 %v6931_v56, %v10568_v3  ;;  %v10578_v12 = vld [vmem:[#allocation88_spill] sm:$0xff] }
 0x8e9   :  { %v5312_v17 = vpop.f32.mrb[152].mxu1 }
 0x8ea   :  { %v5839_v58 = vmax.f32 %v5693_v1, 0.0  ;;  %v6932_v61 = vadd.f32 %v10157_v16, %v5312_v17  ;;  %v5314_v30 = vpop.f32.mrb[153].mxu1 }
 0x8ec   :  { %5903 = vst [vmem:[#allocation10 + $0x158] sm:$0xff] %v5839_v58  ;;  %v5698_v15 = vadd.f32 %v6932_v61, %v10569_v0  ;;  %v10579_v58 = vld [vmem:[#allocation91_spill] sm:$0xff] }
 0x8ed   :  { %v5317_v53 = vpop.f32.mrb[154].mxu1 }
 0x8ee   :  { %v5840_v5 = vmax.f32 %v5698_v15, 0.0  ;;  %v6933_v46 = vadd.f32 %v10157_v16, %v5317_v53  ;;  %v5319_v57 = vpop.f32.mrb[155].mxu1 }
 0x8f0   :  { %5904 = vst [vmem:[#allocation10 + $0x160] sm:$0xff] %v5840_v5  ;;  %v5703_v34 = vadd.f32 %v6933_v46, %v10570_v33  ;;  %v10580_v5 = vld [vmem:[#allocation90_spill] sm:$0xff] }
 0x8f1   :  { %v5322_v47 = vpop.f32.mrb[156].mxu1 }
 0x8f2   :  { %v5841_v45 = vmax.f32 %v5703_v34, 0.0  ;;  %v6934_v11 = vadd.f32 %v10157_v16, %v5322_v47  ;;  %v5324_v24 = vpop.f32.mrb[157].mxu1 }
 0x8f4   :  { %5905 = vst [vmem:[#allocation10 + $0x168] sm:$0xff] %v5841_v45  ;;  %v5708_v36 = vadd.f32 %v6934_v11, %v10571_v10 }
 0x8f5   :  { %v5327_v2 = vpop.f32.mrb[158].mxu1 }
 0x8f6   :  { %v5842_v35 = vmax.f32 %v5708_v36, 0.0  ;;  %v6935_v32 = vadd.f32 %v10157_v16, %v5327_v2  ;;  %v5329_v23 = vpop.f32.mrb[159].mxu1 }
 0x8f8   :  { %5906 = vst [vmem:[#allocation10 + $0x170] sm:$0xff] %v5842_v35  ;;  %v5713_v43 = vadd.f32 %v6935_v32, %v10572_v55 }
 0x8f9   :  { %v5332_v21 = vpop.f32.mrb[160].mxu1 }
 0x8fa   :  { %v5843_v13 = vmax.f32 %v5713_v43, 0.0  ;;  %v6936_v44 = vadd.f32 %v10157_v16, %v5332_v21  ;;  %v5334_v8 = vpop.f32.mrb[161].mxu1 }
 0x8fc   :  { %5907 = vst [vmem:[#allocation10 + $0x178] sm:$0xff] %v5843_v13  ;;  %v5718_v19 = vadd.f32 %v6936_v44, %v10573_v49 }
 0x8fd   :  { %v5337_v37 = vpop.f32.mrb[162].mxu1 }
 0x8fe   :  { %v5844_v22 = vmax.f32 %v5718_v19, 0.0  ;;  %v6937_v63 = vadd.f32 %v10157_v16, %v5337_v37  ;;  %v5339_v42 = vpop.f32.mrb[163].mxu1 }
 0x900   :  { %5908 = vst [vmem:[#allocation10 + $0x180] sm:$0xff] %v5844_v22  ;;  %v5723_v60 = vadd.f32 %v6937_v63, %v10574_v59 }
 0x901   :  { %v5342_v14 = vpop.f32.mrb[164].mxu1 }
 0x902   :  { %v5845_v18 = vmax.f32 %v5723_v60, 0.0  ;;  %v6938_v51 = vadd.f32 %v10157_v16, %v5342_v14  ;;  %v5344_v29 = vpop.f32.mrb[165].mxu1 }
 0x904   :  { %5909 = vst [vmem:[#allocation10 + $0x188] sm:$0xff] %v5845_v18  ;;  %v5728_v50 = vadd.f32 %v6938_v51, %v10575_v41 }
 0x905   :  { %v5347_v54 = vpop.f32.mrb[166].mxu1 }
 0x906   :  { %v5846_v7 = vmax.f32 %v5728_v50, 0.0  ;;  %v6939_v39 = vadd.f32 %v10157_v16, %v5347_v54  ;;  %v5349_v6 = vpop.f32.mrb[167].mxu1 }
 0x908   :  { %5910 = vst [vmem:[#allocation10 + $0x190] sm:$0xff] %v5846_v7  ;;  %v5733_v62 = vadd.f32 %v6939_v39, %v10576_v26 }
 0x909   :  { %v5352_v48 = vpop.f32.mrb[168].mxu1 }
 0x90a   :  { %v5847_v38 = vmax.f32 %v5733_v62, 0.0  ;;  %v6940_v52 = vadd.f32 %v10157_v16, %v5352_v48  ;;  %v5354_v27 = vpop.f32.mrb[169].mxu1 }
 0x90c   :  { %5911 = vst [vmem:[#allocation10 + $0x198] sm:$0xff] %v5847_v38  ;;  %v5738_v25 = vadd.f32 %v6940_v52, %v10577_v40 }
 0x90d   :  { %v5357_v20 = vpop.f32.mrb[170].mxu1 }
 0x90e   :  { %v5848_v31 = vmax.f32 %v5738_v25, 0.0  ;;  %v6941_v9 = vadd.f32 %v10157_v16, %v5357_v20  ;;  %v5359_v28 = vpop.f32.mrb[171].mxu1 }
 0x910   :  { %5912 = vst [vmem:[#allocation10 + $0x1a0] sm:$0xff] %v5848_v31  ;;  %v5743_v56 = vadd.f32 %v6941_v9, %v10578_v12 }
 0x911   :  { %v5362_v4 = vpop.f32.mrb[172].mxu1 }
 0x912   :  { %v5849_v3 = vmax.f32 %v5743_v56, 0.0  ;;  %v6942_v1 = vadd.f32 %v10157_v16, %v5362_v4  ;;  %v5364_v17 = vpop.f32.mrb[173].mxu1 }
 0x914   :  { %5913 = vst [vmem:[#allocation10 + $0x1a8] sm:$0xff] %v5849_v3  ;;  %v5748_v61 = vadd.f32 %v6942_v1, %v10579_v58 }
 0x915   :  { %v5367_v30 = vpop.f32.mrb[174].mxu1 }
 0x916   :  { %v5850_v0 = vmax.f32 %v5748_v61, 0.0  ;;  %v6943_v15 = vadd.f32 %v10157_v16, %v5367_v30  ;;  %v5369_v53 = vpop.f32.mrb[175].mxu1 }
 0x918   :  { %5914 = vst [vmem:[#allocation10 + $0x1b0] sm:$0xff] %v5850_v0  ;;  %v5753_v46 = vadd.f32 %v6943_v15, %v10580_v5 }
 0x919   :  { %v5372_v57 = vpop.f32.mrb[176].mxu1 }
 0x91a   :  { %v5851_v33 = vmax.f32 %v5753_v46, 0.0  ;;  %v5374_v34 = vpop.f32.mrb[177].mxu1  ;;  %v6944_v8 = vadd.f32 %v10157_v16, %v5372_v57 }
 0x91c   :  { %5915 = vst [vmem:[#allocation10 + $0x1b8] sm:$0xff] %v5851_v33 }
 0x91d   :  { %v5377_v47 = vpop.f32.mrb[178].mxu1 }
 0x91e   :  { %v5379_v45 = vpop.f32.mrb[179].mxu1  ;;  %v6945_v44 = vadd.f32 %v10157_v16, %v5377_v47 }
 0x921   :  { %v5382_v11 = vpop.f32.mrb[180].mxu1 }
 0x922   :  { %v5384_v24 = vpop.f32.mrb[181].mxu1  ;;  %v6946_v59 = vadd.f32 %v10157_v16, %v5382_v11 }
 0x925   :  { %v5387_v10 = vpop.f32.mrb[182].mxu1 }
 0x926   :  { %v5389_v36 = vpop.f32.mrb[183].mxu1  ;;  %v6947_v63 = vadd.f32 %v10157_v16, %v5387_v10 }
 0x929   :  { %v5392_v2 = vpop.f32.mrb[184].mxu1 }
 0x92a   :  { %v5394_v35 = vpop.f32.mrb[185].mxu1  ;;  %v6948_v54 = vadd.f32 %v10157_v16, %v5392_v2 }
 0x92d   :  { %v5397_v32 = vpop.f32.mrb[186].mxu1 }
 0x92e   :  { %v5399_v23 = vpop.f32.mrb[187].mxu1  ;;  %v6949_v41 = vadd.f32 %v10157_v16, %v5397_v32 }
 0x931   :  { %v5402_v55 = vpop.f32.mrb[188].mxu1 }
 0x932   :  { %v5404_v43 = vpop.f32.mrb[189].mxu1  ;;  %v6950_v52 = vadd.f32 %v10157_v16, %v5402_v55 }
 0x935   :  { %v5407_v21 = vpop.f32.mrb[190].mxu1 }
 0x936   :  { %v5409_v13 = vpop.f32.mrb[191].mxu1  ;;  %v6951_v48 = vadd.f32 %v10157_v16, %v5407_v21 }
 0x939   :  { %v6350_v49 = vpop.f32.mrb[192].mxu1 }
 0x93a   :  { %v5763_v19 = vadd.f32 %v6945_v44, %v6350_v49  ;;  %v5757_v37 = vpop.f32.mrb[193].mxu1 }
 0x93b   :  { %v5758_v22 = vadd.f32 %v6944_v8, %v5757_v37 }
 0x93c   :  { %v5853_v42 = vmax.f32 %v5763_v19, 0.0 }
 0x93d   :  { %v5852_v60 = vmax.f32 %v5758_v22, 0.0  ;;  %v6353_v14 = vpop.f32.mrb[194].mxu1 }
 0x93e   :  { %5917 = vst [vmem:[#allocation10 + $0x1c8] sm:$0xff] %v5853_v42  ;;  %v5773_v18 = vadd.f32 %v6947_v63, %v6353_v14  ;;  %v5767_v51 = vpop.f32.mrb[195].mxu1 }
 0x93f   :  { %5916 = vst [vmem:[#allocation10 + $0x1c0] sm:$0xff] %v5852_v60  ;;  %v5768_v29 = vadd.f32 %v6946_v59, %v5767_v51 }
 0x940   :  { %v5855_v50 = vmax.f32 %v5773_v18, 0.0 }
 0x941   :  { %v5854_v7 = vmax.f32 %v5768_v29, 0.0  ;;  %v6356_v39 = vpop.f32.mrb[196].mxu1 }
 0x942   :  { %5919 = vst [vmem:[#allocation10 + $0x1d8] sm:$0xff] %v5855_v50  ;;  %v5783_v6 = vadd.f32 %v6949_v41, %v6356_v39  ;;  %v5777_v26 = vpop.f32.mrb[197].mxu1 }
 0x943   :  { %5918 = vst [vmem:[#allocation10 + $0x1d0] sm:$0xff] %v5854_v7  ;;  %v5778_v62 = vadd.f32 %v6948_v54, %v5777_v26 }
 0x944   :  { %v5857_v38 = vmax.f32 %v5783_v6, 0.0 }
 0x945   :  { %v5856_v27 = vmax.f32 %v5778_v62, 0.0  ;;  %v6359_v40 = vpop.f32.mrb[198].mxu1 }
 0x946   :  { %5921 = vst [vmem:[#allocation10 + $0x1e8] sm:$0xff] %v5857_v38  ;;  %v5793_v25 = vadd.f32 %v6951_v48, %v6359_v40  ;;  %v5787_v20 = vpop.f32.mrb[199].mxu1 }
 0x947   :  { %5920 = vst [vmem:[#allocation10 + $0x1e0] sm:$0xff] %v5856_v27  ;;  %v5788_v31 = vadd.f32 %v6950_v52, %v5787_v20 }
 0x948   :  { %v5859_v9 = vmax.f32 %v5793_v25, 0.0 }
 0x949   :  { %v5858_v28 = vmax.f32 %v5788_v31, 0.0 }
 0x94a   :  { %5923 = vst [vmem:[#allocation10 + $0x1f8] sm:$0xff] %v5859_v9 }
 0x94b   :  { %5922 = vst [vmem:[#allocation10 + $0x1f0] sm:$0xff] %v5858_v28 }
 0x94c   :  { %7810 = shalt.err (!%p7807_p0)
}
 0x94d   :  { %s7811_s14 = scalar_lea.hbm %s10310_s5, 8192 }
 0x94e   :  { %p7812_p1 = scmp.ne.s32.totalorder %s10310_s5, %s7811_s14  ;;  %p7815_p2 = scmp.lt.u32.totalorder %s7811_s14, %s10310_s5 }
 0x950   :  { %p7817_p3 = pnand %p7815_p2, %p7812_p1 }
 0x952   :  { %7820 = shalt.err (!%p7817_p3)
}
 0x953   :  { %5935 = dma.vmem_to_hbm [thread:$0]  %s5930_s10, 8192, %s10310_s5, [#allocation6], %s7829_s30, %s7829_s30, %s7830_s6  }
 0x954   :  { %7825 = dma.done.wait [#allocation6], 8192  }
 0x955   :  { %7826 = vsyncadd [#allocation6], 4294959104 }
 0x956   :  { %5939 = vsyncpa [#allocation5], 1 }
 0x957   :  { %5940 = vsyncpa [#allocation8], 1 }
 0x958   :  { %5941 = vsyncpa [#allocation6], 1 }

</bundles_post_ra>
